<compile_context>
chip_gen: v7x
topology: tpu7x:2x2x1
jax: 0.10.0
libtpu: 0.0.40
codegen_flags: <defaults>
</compile_context>

<pallas_src>
import jax
import jax.numpy as jnp
import numpy as np
from jax.experimental import pallas as pl
from jax.experimental.pallas import tpu as pltpu

L_POS, L_DIR = 10, 4


def build_enc_tables(dim: int, L: int):
    """Frequency rows + phase row for the interleaved positional encoding.

    A[i, 2*(i*L+l)] = A[i, 2*(i*L+l)+1] = 2^l * pi ; phase = pi/2 on odd
    ("cos") lanes, so encode(x) == sin(sum_i x_i * A[i] + phase) reproduces the
    PyTorch sin/cos interleave with a single transcendental.
    """
    coef = (2.0 ** np.arange(L)) * np.pi
    A = np.zeros((dim, 2 * dim * L), dtype=np.float32)
    phase = np.zeros((1, 2 * dim * L), dtype=np.float32)
    for i in range(dim):
        for l in range(L):
            A[i, 2 * (i * L + l)] = coef[l]
            A[i, 2 * (i * L + l) + 1] = coef[l]
            phase[0, 2 * (i * L + l) + 1] = np.pi / 2.0
    return jnp.asarray(A), jnp.asarray(phase)


def nerf_kernel(pos_ref, dir_ref, a_pos_ref, ph_pos_ref, a_dir_ref, ph_dir_ref,
                w1s, b1, w2, b2, w3, b3, w4, b4, w5, b5,
                w6h, b6, w7, b7, w8, b8,
                w9_10, b9_10,
                w10d, w11p, b11p,
                out_ref):
    f32 = jnp.float32
    bf16 = jnp.bfloat16

    def enc(x, a_ref, ph_ref):
        # VPU encoding: rad[:, c] = x[:, dim(c)] * coef(c) + phase(c).
        # Angles reach ~2^9*pi -> keep them and the sin in f32; a single sin
        # with a +pi/2 phase covers both sin and cos lanes.
        rad = (x[:, 0:1] * a_ref[0:1, :]
               + x[:, 1:2] * a_ref[1:2, :]
               + x[:, 2:3] * a_ref[2:3, :]
               + ph_ref[...])
        return jnp.sin(rad)

    def lin(x, w_ref, b_ref):
        # bf16 operands, f32 accumulation, f32 bias add.
        return jnp.dot(x, w_ref[...], preferred_element_type=f32) + b_ref[...]

    def relu_bf16(x):
        return jnp.maximum(x, 0.0).astype(bf16)

    p = enc(pos_ref[...].astype(f32), a_pos_ref, ph_pos_ref).astype(bf16)  # (T, 60)
    d = enc(dir_ref[...].astype(f32), a_dir_ref, ph_dir_ref).astype(bf16)  # (T, 24)

    # ---- block_1 layer 1 merged with the block_2 p-skip: one K=60 matmul ----
    p_out = jnp.dot(p, w1s[...], preferred_element_type=f32)   # (T, 512) f32
    h = relu_bf16(p_out[:, :256] + b1[...])
    skip = p_out[:, 256:512]                                   # p @ w6[256:], f32

    h = relu_bf16(lin(h, w2, b2))
    h = relu_bf16(lin(h, w3, b3))
    h = relu_bf16(lin(h, w4, b4))
    h = relu_bf16(lin(h, w5, b5))

    # ---- block_2: concat([x1, p]) @ W6 == x1 @ W6[:256] + p @ W6[256:] ----
    h2 = relu_bf16(lin(h, w6h, b6) + skip)
    h2 = relu_bf16(lin(h2, w7, b7))
    h2 = lin(h2, w8, b8).astype(bf16)          # no ReLU (matches reference)

    # ---- folded head: lanes 0..127 = W9feat @ W10f (+ folded biases),
    #                   lane 128    = sigma column ----
    mid = lin(h2, w9_10, b9_10)                # (T, 256) f32
    sigma = mid[:, 128:129]                    # raw density logit, f32

    # ---- block_3: feat-part already folded; add the d @ W10[256:] term ----
    h3 = relu_bf16(mid[:, :128]
                   + jnp.dot(d, w10d[...], preferred_element_type=f32))
    rgb = jax.nn.sigmoid(lin(h3, w11p, b11p))  # (T, 128); RGB in lanes 0..2

    # Lane-dense store: RGB in lanes 0..2, relu(sigma) in lane 3, junk elsewhere.
    lane = jax.lax.broadcasted_iota(jnp.int32, rgb.shape, 1)
    out_ref[...] = jnp.where(lane == 3, jnp.maximum(sigma, 0.0),
                             rgb).astype(out_ref.dtype)


def init_params(key):
    def linear(k, fan_in, fan_out):
        kw, kb = jax.random.split(k)
        bound = 1.0 / np.sqrt(fan_in)
        w = jax.random.uniform(kw, (fan_in, fan_out), jnp.float32, -bound, bound)
        b = jax.random.uniform(kb, (1, fan_out), jnp.float32, -bound, bound)
        return w, b

    keys = jax.random.split(key, 11)
    block1 = [linear(keys[0], 60, 256)] + [linear(keys[i], 256, 256) for i in range(1, 5)]
    block2 = [linear(keys[5], 60 + 256, 256),
              linear(keys[6], 256, 256),
              linear(keys[7], 256, 256),
              linear(keys[8], 256, 1 + 256)]
    block3 = [linear(keys[9], 256 + 24, 128),
              linear(keys[10], 128, 3)]
    return {"block1": block1, "block2": block2, "block3": block3}


def _pick_tile(n):
    # Compute-bound kernel with tiny per-tile DMA: prefer big row tiles (1024,
    # 2048 for very large N) to amortize the ~0.35us/step overhead and the
    # per-layer MXU drain bubbles, but keep >=2 grid steps so both v7x TCs
    # get work.
    if n >= 8 * 2048:
        return 2048
    for t in (1024, 512, 256):
        if n >= 2 * t:
            return t
    return 128


def nerf_pallas(position, direction, params):
    N = position.shape[0]
    tile = _pick_tile(N)
    steps = -(-N // tile)
    # Keep the grid length even so the two v7x TensorCores split it evenly
    # (no effect on v5e/v6e which have a single TC).
    if steps > 1 and steps % 2 == 1:
        steps += 1
    Np = steps * tile
    pad = Np - N
    pos = jnp.pad(position.astype(jnp.float32), ((0, pad), (0, 0)))
    dirs = jnp.pad(direction.astype(jnp.float32), ((0, pad), (0, 0)))

    a_pos, ph_pos = build_enc_tables(3, L_POS)
    a_dir, ph_dir = build_enc_tables(3, L_DIR)

    (w1, b1), (w2, b2), (w3, b3), (w4, b4), (w5, b5) = params["block1"]
    (w6, b6), (w7, b7), (w8, b8), (w9, b9) = params["block2"]
    (w10, b10), (w11, b11) = params["block3"]

    # ---- weight prep (pure glue, done once outside the kernel) ----
    # Merge w1 with the p-skip half of w6: one (60, 512) weight.
    w1s = jnp.concatenate([w1, w6[256:]], axis=1)            # (60, 512)
    w6h = w6[:256]                                           # (256, 256)

    # Fold the feature head: feat @ W10[:256] == h2 @ (W9feat @ W10f) + b9feat @ W10f.
    w10f, w10d = w10[:256], w10[256:]
    wf = w9[:, 1:257] @ w10f                                 # (256, 128) in f32
    b10p = b10 + b9[:, 1:257] @ w10f                         # (1, 128)
    w9_10 = jnp.concatenate(
        [wf, w9[:, 0:1], jnp.zeros((256, 127), jnp.float32)], axis=1)  # (256, 256)
    b9_10 = jnp.concatenate(
        [b10p, b9[:, 0:1], jnp.zeros((1, 127), jnp.float32)], axis=1)  # (1, 256)

    # w11 padded to a full 128-lane output block (RGB in lanes 0..2).
    w11p = jnp.pad(w11, ((0, 0), (0, 128 - 3)))
    b11p = jnp.pad(b11, ((0, 0), (0, 128 - 3)))

    bf = lambda w: w.astype(jnp.bfloat16)   # weights bf16, biases stay f32
    weights = [bf(w1s), b1, bf(w2), b2, bf(w3), b3, bf(w4), b4, bf(w5), b5,
               bf(w6h), b6, bf(w7), b7, bf(w8), b8,
               bf(w9_10), b9_10,
               bf(w10d), bf(w11p), b11p]

    grid = (Np // tile,)
    in_specs = [pl.BlockSpec((tile, 3), lambda i: (i, 0)),
                pl.BlockSpec((tile, 3), lambda i: (i, 0)),
                pl.BlockSpec(a_pos.shape, lambda i: (0, 0)),
                pl.BlockSpec(ph_pos.shape, lambda i: (0, 0)),
                pl.BlockSpec(a_dir.shape, lambda i: (0, 0)),
                pl.BlockSpec(ph_dir.shape, lambda i: (0, 0))]
    in_specs += [pl.BlockSpec(w.shape, lambda i: (0, 0)) for w in weights]

    out_shape = jax.ShapeDtypeStruct((Np, 128), jnp.bfloat16)
    out_specs = pl.BlockSpec((tile, 128), lambda i: (i, 0))

    out = pl.pallas_call(
        nerf_kernel,
        out_shape=out_shape,
        grid_spec=pltpu.PrefetchScalarGridSpec(
            num_scalar_prefetch=0,
            grid=grid,
            in_specs=in_specs,
            out_specs=out_specs),
        compiler_params=pltpu.CompilerParams(
            dimension_semantics=("parallel",),
            vmem_limit_bytes=48 * 1024 * 1024),   # <= v7x's 64 MiB physical
    )(pos, dirs, a_pos, ph_pos, a_dir, ph_dir, *weights)

    dens = out[:N, 3].astype(jnp.float32)
    rad = out[:N, 0:3].astype(jnp.float32)
    return dens, rad


# ---------------- pure-JAX reference (mirrors the PyTorch forward) ----------------
def enc_ref(x, L):
    coef = (2.0 ** jnp.arange(L, dtype=jnp.float32)) * jnp.pi
    rad = x[:, :, None] * coef[None, None, :]          # (N, dim, L)
    s = jnp.sin(rad).reshape(x.shape[0], -1)
    c = jnp.cos(rad).reshape(x.shape[0], -1)
    return jnp.stack([s, c], axis=2).reshape(x.shape[0], -1)


def nerf_ref(position, direction, params):
    p = enc_ref(position, L_POS)
    d = enc_ref(direction, L_DIR)
    h = p
    for w, b in params["block1"]:
        h = jax.nn.relu(h @ w + b)
    (w6, b6), (w7, b7), (w8, b8), (w9, b9) = params["block2"]
    x = jnp.concatenate([h, p], axis=1)
    x = jax.nn.relu(x @ w6 + b6)
    x = jax.nn.relu(x @ w7 + b7)
    x = x @ w8 + b8
    x = x @ w9 + b9
    dens = jax.nn.relu(x[:, 0])
    (w10, b10), (w11, b11) = params["block3"]
    y = jnp.concatenate([x[:, 1:257], d], axis=1)
    y = jax.nn.relu(y @ w10 + b10)
    rad = jax.nn.sigmoid(y @ w11 + b11)
    return dens, rad


if __name__ == "__main__":
    key = jax.random.PRNGKey(0)
    k_pos, k_dir, k_params = jax.random.split(key, 3)

    N = 256
    position = jax.random.uniform(k_pos, (N, 3), jnp.float32, -1.0, 1.0)
    direction = jax.random.uniform(k_dir, (N, 3), jnp.float32, -1.0, 1.0)
    direction = direction / jnp.linalg.norm(direction, axis=1, keepdims=True)

    params = init_params(k_params)

    dens, rad = nerf_pallas(position, direction, params)
    jax.block_until_ready((dens, rad))

    dens_ref, rad_ref = nerf_ref(position, direction, params)
    assert dens.shape == (N,) and rad.shape == (N, 3)
    assert jnp.allclose(dens, dens_ref, atol=3e-2, rtol=3e-2), "density mismatch"
    assert jnp.allclose(rad, rad_ref, atol=3e-2, rtol=3e-2), "radiance mismatch"

    print("KERNEL_OK")
</pallas_src>

<mosaic_0001>
module attributes {stable_mosaic.version = 11 : i64} {
  func.func @nerf_kernel(%arg0: i32, %arg1: memref<128x3xf32, #tpu.memory_space<vmem>>, %arg2: memref<128x3xf32, #tpu.memory_space<vmem>>, %arg3: memref<3x60xf32, #tpu.memory_space<vmem>>, %arg4: memref<1x60xf32, #tpu.memory_space<vmem>>, %arg5: memref<3x24xf32, #tpu.memory_space<vmem>>, %arg6: memref<1x24xf32, #tpu.memory_space<vmem>>, %arg7: memref<60x512xbf16, #tpu.memory_space<vmem>>, %arg8: memref<1x256xf32, #tpu.memory_space<vmem>>, %arg9: memref<256x256xbf16, #tpu.memory_space<vmem>>, %arg10: memref<1x256xf32, #tpu.memory_space<vmem>>, %arg11: memref<256x256xbf16, #tpu.memory_space<vmem>>, %arg12: memref<1x256xf32, #tpu.memory_space<vmem>>, %arg13: memref<256x256xbf16, #tpu.memory_space<vmem>>, %arg14: memref<1x256xf32, #tpu.memory_space<vmem>>, %arg15: memref<256x256xbf16, #tpu.memory_space<vmem>>, %arg16: memref<1x256xf32, #tpu.memory_space<vmem>>, %arg17: memref<256x256xbf16, #tpu.memory_space<vmem>>, %arg18: memref<1x256xf32, #tpu.memory_space<vmem>>, %arg19: memref<256x256xbf16, #tpu.memory_space<vmem>>, %arg20: memref<1x256xf32, #tpu.memory_space<vmem>>, %arg21: memref<256x256xbf16, #tpu.memory_space<vmem>>, %arg22: memref<1x256xf32, #tpu.memory_space<vmem>>, %arg23: memref<256x256xbf16, #tpu.memory_space<vmem>>, %arg24: memref<1x256xf32, #tpu.memory_space<vmem>>, %arg25: memref<24x128xbf16, #tpu.memory_space<vmem>>, %arg26: memref<128x128xbf16, #tpu.memory_space<vmem>>, %arg27: memref<1x128xf32, #tpu.memory_space<vmem>>, %arg28: memref<128x128xbf16, #tpu.memory_space<vmem>>) attributes {dimension_semantics = [#tpu.dimension_semantics<parallel>], iteration_bounds = array<i64: 2>, scalar_prefetch = 0 : i64, scratch_operands = 0 : i64, tpu.core_type = #tpu.core_type<tc>, window_params = [{transform_indices = @transform_0, window_bounds = array<i64: 128, 3>}, {transform_indices = @transform_1, window_bounds = array<i64: 128, 3>}, {pipeline_mode = #tpu.pipeline_mode<synchronous>, transform_indices = @transform_2, window_bounds = array<i64: 3, 60>}, {pipeline_mode = #tpu.pipeline_mode<synchronous>, transform_indices = @transform_3, window_bounds = array<i64: 1, 60>}, {pipeline_mode = #tpu.pipeline_mode<synchronous>, transform_indices = @transform_4, window_bounds = array<i64: 3, 24>}, {pipeline_mode = #tpu.pipeline_mode<synchronous>, transform_indices = @transform_5, window_bounds = array<i64: 1, 24>}, {pipeline_mode = #tpu.pipeline_mode<synchronous>, transform_indices = @transform_6, window_bounds = array<i64: 60, 512>}, {pipeline_mode = #tpu.pipeline_mode<synchronous>, transform_indices = @transform_7, window_bounds = array<i64: 1, 256>}, {pipeline_mode = #tpu.pipeline_mode<synchronous>, transform_indices = @transform_8, window_bounds = array<i64: 256, 256>}, {pipeline_mode = #tpu.pipeline_mode<synchronous>, transform_indices = @transform_9, window_bounds = array<i64: 1, 256>}, {pipeline_mode = #tpu.pipeline_mode<synchronous>, transform_indices = @transform_10, window_bounds = array<i64: 256, 256>}, {pipeline_mode = #tpu.pipeline_mode<synchronous>, transform_indices = @transform_11, window_bounds = array<i64: 1, 256>}, {pipeline_mode = #tpu.pipeline_mode<synchronous>, transform_indices = @transform_12, window_bounds = array<i64: 256, 256>}, {pipeline_mode = #tpu.pipeline_mode<synchronous>, transform_indices = @transform_13, window_bounds = array<i64: 1, 256>}, {pipeline_mode = #tpu.pipeline_mode<synchronous>, transform_indices = @transform_14, window_bounds = array<i64: 256, 256>}, {pipeline_mode = #tpu.pipeline_mode<synchronous>, transform_indices = @transform_15, window_bounds = array<i64: 1, 256>}, {pipeline_mode = #tpu.pipeline_mode<synchronous>, transform_indices = @transform_16, window_bounds = array<i64: 256, 256>}, {pipeline_mode = #tpu.pipeline_mode<synchronous>, transform_indices = @transform_17, window_bounds = array<i64: 1, 256>}, {pipeline_mode = #tpu.pipeline_mode<synchronous>, transform_indices = @transform_18, window_bounds = array<i64: 256, 256>}, {pipeline_mode = #tpu.pipeline_mode<synchronous>, transform_indices = @transform_19, window_bounds = array<i64: 1, 256>}, {pipeline_mode = #tpu.pipeline_mode<synchronous>, transform_indices = @transform_20, window_bounds = array<i64: 256, 256>}, {pipeline_mode = #tpu.pipeline_mode<synchronous>, transform_indices = @transform_21, window_bounds = array<i64: 1, 256>}, {pipeline_mode = #tpu.pipeline_mode<synchronous>, transform_indices = @transform_22, window_bounds = array<i64: 256, 256>}, {pipeline_mode = #tpu.pipeline_mode<synchronous>, transform_indices = @transform_23, window_bounds = array<i64: 1, 256>}, {pipeline_mode = #tpu.pipeline_mode<synchronous>, transform_indices = @transform_24, window_bounds = array<i64: 24, 128>}, {pipeline_mode = #tpu.pipeline_mode<synchronous>, transform_indices = @transform_25, window_bounds = array<i64: 128, 128>}, {pipeline_mode = #tpu.pipeline_mode<synchronous>, transform_indices = @transform_26, window_bounds = array<i64: 1, 128>}, {transform_indices = @transform_27, window_bounds = array<i64: 128, 128>}]} {
    %c0 = arith.constant 0 : index
    %c0_0 = arith.constant 0 : index
    %0 = vector.load %arg1[%c0, %c0_0] : memref<128x3xf32, #tpu.memory_space<vmem>>, vector<128x3xf32>
    %1 = vector.extract_strided_slice %0 {offsets = [0, 0], sizes = [128, 1], strides = [1, 1]} : vector<128x3xf32> to vector<128x1xf32>
    %c0_1 = arith.constant 0 : index
    %c0_2 = arith.constant 0 : index
    %2 = vector.load %arg3[%c0_1, %c0_2] : memref<3x60xf32, #tpu.memory_space<vmem>>, vector<1x60xf32>
    %3 = vector.broadcast %1 : vector<128x1xf32> to vector<128x60xf32>
    %4 = vector.broadcast %2 : vector<1x60xf32> to vector<128x60xf32>
    %5 = arith.mulf %3, %4 : vector<128x60xf32>
    %6 = vector.extract_strided_slice %0 {offsets = [0, 1], sizes = [128, 1], strides = [1, 1]} : vector<128x3xf32> to vector<128x1xf32>
    %c1 = arith.constant 1 : index
    %c0_3 = arith.constant 0 : index
    %7 = vector.load %arg3[%c1, %c0_3] : memref<3x60xf32, #tpu.memory_space<vmem>>, vector<1x60xf32>
    %8 = vector.broadcast %6 : vector<128x1xf32> to vector<128x60xf32>
    %9 = vector.broadcast %7 : vector<1x60xf32> to vector<128x60xf32>
    %10 = arith.mulf %8, %9 : vector<128x60xf32>
    %11 = arith.addf %5, %10 : vector<128x60xf32>
    %12 = vector.extract_strided_slice %0 {offsets = [0, 2], sizes = [128, 1], strides = [1, 1]} : vector<128x3xf32> to vector<128x1xf32>
    %c2 = arith.constant 2 : index
    %c0_4 = arith.constant 0 : index
    %13 = vector.load %arg3[%c2, %c0_4] : memref<3x60xf32, #tpu.memory_space<vmem>>, vector<1x60xf32>
    %14 = vector.broadcast %12 : vector<128x1xf32> to vector<128x60xf32>
    %15 = vector.broadcast %13 : vector<1x60xf32> to vector<128x60xf32>
    %16 = arith.mulf %14, %15 : vector<128x60xf32>
    %17 = arith.addf %11, %16 : vector<128x60xf32>
    %c0_5 = arith.constant 0 : index
    %c0_6 = arith.constant 0 : index
    %18 = vector.load %arg4[%c0_5, %c0_6] : memref<1x60xf32, #tpu.memory_space<vmem>>, vector<1x60xf32>
    %19 = vector.broadcast %18 : vector<1x60xf32> to vector<128x60xf32>
    %20 = arith.addf %17, %19 : vector<128x60xf32>
    %21 = math.sin %20 : vector<128x60xf32>
    %22 = arith.truncf %21 : vector<128x60xf32> to vector<128x60xbf16>
    %c0_7 = arith.constant 0 : index
    %c0_8 = arith.constant 0 : index
    %23 = vector.load %arg2[%c0_7, %c0_8] : memref<128x3xf32, #tpu.memory_space<vmem>>, vector<128x3xf32>
    %24 = vector.extract_strided_slice %23 {offsets = [0, 0], sizes = [128, 1], strides = [1, 1]} : vector<128x3xf32> to vector<128x1xf32>
    %c0_9 = arith.constant 0 : index
    %c0_10 = arith.constant 0 : index
    %25 = vector.load %arg5[%c0_9, %c0_10] : memref<3x24xf32, #tpu.memory_space<vmem>>, vector<1x24xf32>
    %26 = vector.broadcast %24 : vector<128x1xf32> to vector<128x24xf32>
    %27 = vector.broadcast %25 : vector<1x24xf32> to vector<128x24xf32>
    %28 = arith.mulf %26, %27 : vector<128x24xf32>
    %29 = vector.extract_strided_slice %23 {offsets = [0, 1], sizes = [128, 1], strides = [1, 1]} : vector<128x3xf32> to vector<128x1xf32>
    %c1_11 = arith.constant 1 : index
    %c0_12 = arith.constant 0 : index
    %30 = vector.load %arg5[%c1_11, %c0_12] : memref<3x24xf32, #tpu.memory_space<vmem>>, vector<1x24xf32>
    %31 = vector.broadcast %29 : vector<128x1xf32> to vector<128x24xf32>
    %32 = vector.broadcast %30 : vector<1x24xf32> to vector<128x24xf32>
    %33 = arith.mulf %31, %32 : vector<128x24xf32>
    %34 = arith.addf %28, %33 : vector<128x24xf32>
    %35 = vector.extract_strided_slice %23 {offsets = [0, 2], sizes = [128, 1], strides = [1, 1]} : vector<128x3xf32> to vector<128x1xf32>
    %c2_13 = arith.constant 2 : index
    %c0_14 = arith.constant 0 : index
    %36 = vector.load %arg5[%c2_13, %c0_14] : memref<3x24xf32, #tpu.memory_space<vmem>>, vector<1x24xf32>
    %37 = vector.broadcast %35 : vector<128x1xf32> to vector<128x24xf32>
    %38 = vector.broadcast %36 : vector<1x24xf32> to vector<128x24xf32>
    %39 = arith.mulf %37, %38 : vector<128x24xf32>
    %40 = arith.addf %34, %39 : vector<128x24xf32>
    %c0_15 = arith.constant 0 : index
    %c0_16 = arith.constant 0 : index
    %41 = vector.load %arg6[%c0_15, %c0_16] : memref<1x24xf32, #tpu.memory_space<vmem>>, vector<1x24xf32>
    %42 = vector.broadcast %41 : vector<1x24xf32> to vector<128x24xf32>
    %43 = arith.addf %40, %42 : vector<128x24xf32>
    %44 = math.sin %43 : vector<128x24xf32>
    %45 = arith.truncf %44 : vector<128x24xf32> to vector<128x24xbf16>
    %c0_17 = arith.constant 0 : index
    %c0_18 = arith.constant 0 : index
    %46 = vector.load %arg7[%c0_17, %c0_18] : memref<60x512xbf16, #tpu.memory_space<vmem>>, vector<60x512xbf16>
    %cst = arith.constant dense<0.000000e+00> : vector<128x512xf32>
    %47 = tpu.matmul %22, %46, %cst {dimension_numbers = #tpu.dot_dimension_numbers<[1], [0], [0], [1], [0, 0, 1, 1], [], []>} : vector<128x60xbf16>, vector<60x512xbf16>, vector<128x512xf32> -> vector<128x512xf32>
    %48 = vector.extract_strided_slice %47 {offsets = [0, 0], sizes = [128, 256], strides = [1, 1]} : vector<128x512xf32> to vector<128x256xf32>
    %c0_19 = arith.constant 0 : index
    %c0_20 = arith.constant 0 : index
    %49 = vector.load %arg8[%c0_19, %c0_20] : memref<1x256xf32, #tpu.memory_space<vmem>>, vector<1x256xf32>
    %50 = vector.broadcast %49 : vector<1x256xf32> to vector<128x256xf32>
    %51 = arith.addf %48, %50 : vector<128x256xf32>
    %cst_21 = arith.constant 0.000000e+00 : f32
    %52 = vector.broadcast %cst_21 : f32 to vector<128x256xf32>
    %53 = arith.maximumf %51, %52 : vector<128x256xf32>
    %54 = arith.truncf %53 : vector<128x256xf32> to vector<128x256xbf16>
    %55 = vector.extract_strided_slice %47 {offsets = [0, 256], sizes = [128, 256], strides = [1, 1]} : vector<128x512xf32> to vector<128x256xf32>
    %c0_22 = arith.constant 0 : index
    %c0_23 = arith.constant 0 : index
    %56 = vector.load %arg9[%c0_22, %c0_23] : memref<256x256xbf16, #tpu.memory_space<vmem>>, vector<256x256xbf16>
    %cst_24 = arith.constant dense<0.000000e+00> : vector<128x256xf32>
    %57 = tpu.matmul %54, %56, %cst_24 {dimension_numbers = #tpu.dot_dimension_numbers<[1], [0], [0], [1], [0, 0, 1, 1], [], []>} : vector<128x256xbf16>, vector<256x256xbf16>, vector<128x256xf32> -> vector<128x256xf32>
    %c0_25 = arith.constant 0 : index
    %c0_26 = arith.constant 0 : index
    %58 = vector.load %arg10[%c0_25, %c0_26] : memref<1x256xf32, #tpu.memory_space<vmem>>, vector<1x256xf32>
    %59 = vector.broadcast %58 : vector<1x256xf32> to vector<128x256xf32>
    %60 = arith.addf %57, %59 : vector<128x256xf32>
    %cst_27 = arith.constant 0.000000e+00 : f32
    %61 = vector.broadcast %cst_27 : f32 to vector<128x256xf32>
    %62 = arith.maximumf %60, %61 : vector<128x256xf32>
    %63 = arith.truncf %62 : vector<128x256xf32> to vector<128x256xbf16>
    %c0_28 = arith.constant 0 : index
    %c0_29 = arith.constant 0 : index
    %64 = vector.load %arg11[%c0_28, %c0_29] : memref<256x256xbf16, #tpu.memory_space<vmem>>, vector<256x256xbf16>
    %cst_30 = arith.constant dense<0.000000e+00> : vector<128x256xf32>
    %65 = tpu.matmul %63, %64, %cst_30 {dimension_numbers = #tpu.dot_dimension_numbers<[1], [0], [0], [1], [0, 0, 1, 1], [], []>} : vector<128x256xbf16>, vector<256x256xbf16>, vector<128x256xf32> -> vector<128x256xf32>
    %c0_31 = arith.constant 0 : index
    %c0_32 = arith.constant 0 : index
    %66 = vector.load %arg12[%c0_31, %c0_32] : memref<1x256xf32, #tpu.memory_space<vmem>>, vector<1x256xf32>
    %67 = vector.broadcast %66 : vector<1x256xf32> to vector<128x256xf32>
    %68 = arith.addf %65, %67 : vector<128x256xf32>
    %cst_33 = arith.constant 0.000000e+00 : f32
    %69 = vector.broadcast %cst_33 : f32 to vector<128x256xf32>
    %70 = arith.maximumf %68, %69 : vector<128x256xf32>
    %71 = arith.truncf %70 : vector<128x256xf32> to vector<128x256xbf16>
    %c0_34 = arith.constant 0 : index
    %c0_35 = arith.constant 0 : index
    %72 = vector.load %arg13[%c0_34, %c0_35] : memref<256x256xbf16, #tpu.memory_space<vmem>>, vector<256x256xbf16>
    %cst_36 = arith.constant dense<0.000000e+00> : vector<128x256xf32>
    %73 = tpu.matmul %71, %72, %cst_36 {dimension_numbers = #tpu.dot_dimension_numbers<[1], [0], [0], [1], [0, 0, 1, 1], [], []>} : vector<128x256xbf16>, vector<256x256xbf16>, vector<128x256xf32> -> vector<128x256xf32>
    %c0_37 = arith.constant 0 : index
    %c0_38 = arith.constant 0 : index
    %74 = vector.load %arg14[%c0_37, %c0_38] : memref<1x256xf32, #tpu.memory_space<vmem>>, vector<1x256xf32>
    %75 = vector.broadcast %74 : vector<1x256xf32> to vector<128x256xf32>
    %76 = arith.addf %73, %75 : vector<128x256xf32>
    %cst_39 = arith.constant 0.000000e+00 : f32
    %77 = vector.broadcast %cst_39 : f32 to vector<128x256xf32>
    %78 = arith.maximumf %76, %77 : vector<128x256xf32>
    %79 = arith.truncf %78 : vector<128x256xf32> to vector<128x256xbf16>
    %c0_40 = arith.constant 0 : index
    %c0_41 = arith.constant 0 : index
    %80 = vector.load %arg15[%c0_40, %c0_41] : memref<256x256xbf16, #tpu.memory_space<vmem>>, vector<256x256xbf16>
    %cst_42 = arith.constant dense<0.000000e+00> : vector<128x256xf32>
    %81 = tpu.matmul %79, %80, %cst_42 {dimension_numbers = #tpu.dot_dimension_numbers<[1], [0], [0], [1], [0, 0, 1, 1], [], []>} : vector<128x256xbf16>, vector<256x256xbf16>, vector<128x256xf32> -> vector<128x256xf32>
    %c0_43 = arith.constant 0 : index
    %c0_44 = arith.constant 0 : index
    %82 = vector.load %arg16[%c0_43, %c0_44] : memref<1x256xf32, #tpu.memory_space<vmem>>, vector<1x256xf32>
    %83 = vector.broadcast %82 : vector<1x256xf32> to vector<128x256xf32>
    %84 = arith.addf %81, %83 : vector<128x256xf32>
    %cst_45 = arith.constant 0.000000e+00 : f32
    %85 = vector.broadcast %cst_45 : f32 to vector<128x256xf32>
    %86 = arith.maximumf %84, %85 : vector<128x256xf32>
    %87 = arith.truncf %86 : vector<128x256xf32> to vector<128x256xbf16>
    %c0_46 = arith.constant 0 : index
    %c0_47 = arith.constant 0 : index
    %88 = vector.load %arg17[%c0_46, %c0_47] : memref<256x256xbf16, #tpu.memory_space<vmem>>, vector<256x256xbf16>
    %cst_48 = arith.constant dense<0.000000e+00> : vector<128x256xf32>
    %89 = tpu.matmul %87, %88, %cst_48 {dimension_numbers = #tpu.dot_dimension_numbers<[1], [0], [0], [1], [0, 0, 1, 1], [], []>} : vector<128x256xbf16>, vector<256x256xbf16>, vector<128x256xf32> -> vector<128x256xf32>
    %c0_49 = arith.constant 0 : index
    %c0_50 = arith.constant 0 : index
    %90 = vector.load %arg18[%c0_49, %c0_50] : memref<1x256xf32, #tpu.memory_space<vmem>>, vector<1x256xf32>
    %91 = vector.broadcast %90 : vector<1x256xf32> to vector<128x256xf32>
    %92 = arith.addf %89, %91 : vector<128x256xf32>
    %93 = arith.addf %92, %55 : vector<128x256xf32>
    %cst_51 = arith.constant 0.000000e+00 : f32
    %94 = vector.broadcast %cst_51 : f32 to vector<128x256xf32>
    %95 = arith.maximumf %93, %94 : vector<128x256xf32>
    %96 = arith.truncf %95 : vector<128x256xf32> to vector<128x256xbf16>
    %c0_52 = arith.constant 0 : index
    %c0_53 = arith.constant 0 : index
    %97 = vector.load %arg19[%c0_52, %c0_53] : memref<256x256xbf16, #tpu.memory_space<vmem>>, vector<256x256xbf16>
    %cst_54 = arith.constant dense<0.000000e+00> : vector<128x256xf32>
    %98 = tpu.matmul %96, %97, %cst_54 {dimension_numbers = #tpu.dot_dimension_numbers<[1], [0], [0], [1], [0, 0, 1, 1], [], []>} : vector<128x256xbf16>, vector<256x256xbf16>, vector<128x256xf32> -> vector<128x256xf32>
    %c0_55 = arith.constant 0 : index
    %c0_56 = arith.constant 0 : index
    %99 = vector.load %arg20[%c0_55, %c0_56] : memref<1x256xf32, #tpu.memory_space<vmem>>, vector<1x256xf32>
    %100 = vector.broadcast %99 : vector<1x256xf32> to vector<128x256xf32>
    %101 = arith.addf %98, %100 : vector<128x256xf32>
    %cst_57 = arith.constant 0.000000e+00 : f32
    %102 = vector.broadcast %cst_57 : f32 to vector<128x256xf32>
    %103 = arith.maximumf %101, %102 : vector<128x256xf32>
    %104 = arith.truncf %103 : vector<128x256xf32> to vector<128x256xbf16>
    %c0_58 = arith.constant 0 : index
    %c0_59 = arith.constant 0 : index
    %105 = vector.load %arg21[%c0_58, %c0_59] : memref<256x256xbf16, #tpu.memory_space<vmem>>, vector<256x256xbf16>
    %cst_60 = arith.constant dense<0.000000e+00> : vector<128x256xf32>
    %106 = tpu.matmul %104, %105, %cst_60 {dimension_numbers = #tpu.dot_dimension_numbers<[1], [0], [0], [1], [0, 0, 1, 1], [], []>} : vector<128x256xbf16>, vector<256x256xbf16>, vector<128x256xf32> -> vector<128x256xf32>
    %c0_61 = arith.constant 0 : index
    %c0_62 = arith.constant 0 : index
    %107 = vector.load %arg22[%c0_61, %c0_62] : memref<1x256xf32, #tpu.memory_space<vmem>>, vector<1x256xf32>
    %108 = vector.broadcast %107 : vector<1x256xf32> to vector<128x256xf32>
    %109 = arith.addf %106, %108 : vector<128x256xf32>
    %110 = arith.truncf %109 : vector<128x256xf32> to vector<128x256xbf16>
    %c0_63 = arith.constant 0 : index
    %c0_64 = arith.constant 0 : index
    %111 = vector.load %arg23[%c0_63, %c0_64] : memref<256x256xbf16, #tpu.memory_space<vmem>>, vector<256x256xbf16>
    %cst_65 = arith.constant dense<0.000000e+00> : vector<128x256xf32>
    %112 = tpu.matmul %110, %111, %cst_65 {dimension_numbers = #tpu.dot_dimension_numbers<[1], [0], [0], [1], [0, 0, 1, 1], [], []>} : vector<128x256xbf16>, vector<256x256xbf16>, vector<128x256xf32> -> vector<128x256xf32>
    %c0_66 = arith.constant 0 : index
    %c0_67 = arith.constant 0 : index
    %113 = vector.load %arg24[%c0_66, %c0_67] : memref<1x256xf32, #tpu.memory_space<vmem>>, vector<1x256xf32>
    %114 = vector.broadcast %113 : vector<1x256xf32> to vector<128x256xf32>
    %115 = arith.addf %112, %114 : vector<128x256xf32>
    %116 = vector.extract_strided_slice %115 {offsets = [0, 128], sizes = [128, 1], strides = [1, 1]} : vector<128x256xf32> to vector<128x1xf32>
    %117 = vector.extract_strided_slice %115 {offsets = [0, 0], sizes = [128, 128], strides = [1, 1]} : vector<128x256xf32> to vector<128x128xf32>
    %c0_68 = arith.constant 0 : index
    %c0_69 = arith.constant 0 : index
    %118 = vector.load %arg25[%c0_68, %c0_69] : memref<24x128xbf16, #tpu.memory_space<vmem>>, vector<24x128xbf16>
    %cst_70 = arith.constant dense<0.000000e+00> : vector<128x128xf32>
    %119 = tpu.matmul %45, %118, %cst_70 {dimension_numbers = #tpu.dot_dimension_numbers<[1], [0], [0], [1], [0, 0, 1, 1], [], []>} : vector<128x24xbf16>, vector<24x128xbf16>, vector<128x128xf32> -> vector<128x128xf32>
    %120 = arith.addf %117, %119 : vector<128x128xf32>
    %cst_71 = arith.constant 0.000000e+00 : f32
    %121 = vector.broadcast %cst_71 : f32 to vector<128x128xf32>
    %122 = arith.maximumf %120, %121 : vector<128x128xf32>
    %123 = arith.truncf %122 : vector<128x128xf32> to vector<128x128xbf16>
    %c0_72 = arith.constant 0 : index
    %c0_73 = arith.constant 0 : index
    %124 = vector.load %arg26[%c0_72, %c0_73] : memref<128x128xbf16, #tpu.memory_space<vmem>>, vector<128x128xbf16>
    %cst_74 = arith.constant dense<0.000000e+00> : vector<128x128xf32>
    %125 = tpu.matmul %123, %124, %cst_74 {dimension_numbers = #tpu.dot_dimension_numbers<[1], [0], [0], [1], [0, 0, 1, 1], [], []>} : vector<128x128xbf16>, vector<128x128xbf16>, vector<128x128xf32> -> vector<128x128xf32>
    %c0_75 = arith.constant 0 : index
    %c0_76 = arith.constant 0 : index
    %126 = vector.load %arg27[%c0_75, %c0_76] : memref<1x128xf32, #tpu.memory_space<vmem>>, vector<1x128xf32>
    %127 = vector.broadcast %126 : vector<1x128xf32> to vector<128x128xf32>
    %128 = arith.addf %125, %127 : vector<128x128xf32>
    %129 = arith.negf %128 : vector<128x128xf32>
    %130 = math.exp %129 : vector<128x128xf32>
    %cst_77 = arith.constant 1.000000e+00 : f32
    %131 = vector.broadcast %cst_77 : f32 to vector<128x128xf32>
    %132 = arith.addf %131, %130 : vector<128x128xf32>
    %133 = arith.divf %131, %132 : vector<128x128xf32>
    %134 = tpu.iota {dimensions = array<i32: 1>} : vector<128x128xi32>
    %c3_i32 = arith.constant 3 : i32
    %135 = vector.broadcast %c3_i32 : i32 to vector<128x128xi32>
    %136 = arith.cmpi eq, %134, %135 : vector<128x128xi32>
    %cst_78 = arith.constant 0.000000e+00 : f32
    %137 = vector.broadcast %cst_78 : f32 to vector<128x1xf32>
    %138 = arith.maximumf %116, %137 : vector<128x1xf32>
    %139 = vector.shape_cast %138 : vector<128x1xf32> to vector<128x1xf32>
    %140 = vector.broadcast %139 : vector<128x1xf32> to vector<128x128xf32>
    %141 = arith.select %136, %140, %133 : vector<128x128xi1>, vector<128x128xf32>
    %142 = arith.truncf %141 : vector<128x128xf32> to vector<128x128xbf16>
    %c0_79 = arith.constant 0 : index
    %c0_80 = arith.constant 0 : index
    %143 = vector.load %arg28[%c0_79, %c0_80] : memref<128x128xbf16, #tpu.memory_space<vmem>>, vector<128x128xbf16>
    tpu.vector_store %arg28[%c0_79, %c0_80], %142 {strides = array<i32>} : memref<128x128xbf16, #tpu.memory_space<vmem>>, vector<128x128xbf16>,
    return
  }
  func.func @transform_0(%arg0: i32) -> (i32, i32) {
    %c0_i32 = arith.constant 0 : i32
    %c0_i32_0 = arith.constant 0 : i32
    return %arg0, %c0_i32 : i32, i32
  }
  func.func @transform_1(%arg0: i32) -> (i32, i32) {
    %c0_i32 = arith.constant 0 : i32
    %c0_i32_0 = arith.constant 0 : i32
    return %arg0, %c0_i32 : i32, i32
  }
  func.func @transform_2(%arg0: i32) -> (i32, i32) {
    %c0_i32 = arith.constant 0 : i32
    %c0_i32_0 = arith.constant 0 : i32
    %c0_i32_1 = arith.constant 0 : i32
    return %c0_i32, %c0_i32_0 : i32, i32
  }
  func.func @transform_3(%arg0: i32) -> (i32, i32) {
    %c0_i32 = arith.constant 0 : i32
    %c0_i32_0 = arith.constant 0 : i32
    %c0_i32_1 = arith.constant 0 : i32
    return %c0_i32, %c0_i32_0 : i32, i32
  }
  func.func @transform_4(%arg0: i32) -> (i32, i32) {
    %c0_i32 = arith.constant 0 : i32
    %c0_i32_0 = arith.constant 0 : i32
    %c0_i32_1 = arith.constant 0 : i32
    return %c0_i32, %c0_i32_0 : i32, i32
  }
  func.func @transform_5(%arg0: i32) -> (i32, i32) {
    %c0_i32 = arith.constant 0 : i32
    %c0_i32_0 = arith.constant 0 : i32
    %c0_i32_1 = arith.constant 0 : i32
    return %c0_i32, %c0_i32_0 : i32, i32
  }
  func.func @transform_6(%arg0: i32) -> (i32, i32) {
    %c0_i32 = arith.constant 0 : i32
    %c0_i32_0 = arith.constant 0 : i32
    %c0_i32_1 = arith.constant 0 : i32
    return %c0_i32, %c0_i32_0 : i32, i32
  }
  func.func @transform_7(%arg0: i32) -> (i32, i32) {
    %c0_i32 = arith.constant 0 : i32
    %c0_i32_0 = arith.constant 0 : i32
    %c0_i32_1 = arith.constant 0 : i32
    return %c0_i32, %c0_i32_0 : i32, i32
  }
  func.func @transform_8(%arg0: i32) -> (i32, i32) {
    %c0_i32 = arith.constant 0 : i32
    %c0_i32_0 = arith.constant 0 : i32
    %c0_i32_1 = arith.constant 0 : i32
    return %c0_i32, %c0_i32_0 : i32, i32
  }
  func.func @transform_9(%arg0: i32) -> (i32, i32) {
    %c0_i32 = arith.constant 0 : i32
    %c0_i32_0 = arith.constant 0 : i32
    %c0_i32_1 = arith.constant 0 : i32
    return %c0_i32, %c0_i32_0 : i32, i32
  }
  func.func @transform_10(%arg0: i32) -> (i32, i32) {
    %c0_i32 = arith.constant 0 : i32
    %c0_i32_0 = arith.constant 0 : i32
    %c0_i32_1 = arith.constant 0 : i32
    return %c0_i32, %c0_i32_0 : i32, i32
  }
  func.func @transform_11(%arg0: i32) -> (i32, i32) {
    %c0_i32 = arith.constant 0 : i32
    %c0_i32_0 = arith.constant 0 : i32
    %c0_i32_1 = arith.constant 0 : i32
    return %c0_i32, %c0_i32_0 : i32, i32
  }
  func.func @transform_12(%arg0: i32) -> (i32, i32) {
    %c0_i32 = arith.constant 0 : i32
    %c0_i32_0 = arith.constant 0 : i32
    %c0_i32_1 = arith.constant 0 : i32
    return %c0_i32, %c0_i32_0 : i32, i32
  }
  func.func @transform_13(%arg0: i32) -> (i32, i32) {
    %c0_i32 = arith.constant 0 : i32
    %c0_i32_0 = arith.constant 0 : i32
    %c0_i32_1 = arith.constant 0 : i32
    return %c0_i32, %c0_i32_0 : i32, i32
  }
  func.func @transform_14(%arg0: i32) -> (i32, i32) {
    %c0_i32 = arith.constant 0 : i32
    %c0_i32_0 = arith.constant 0 : i32
    %c0_i32_1 = arith.constant 0 : i32
    return %c0_i32, %c0_i32_0 : i32, i32
  }
  func.func @transform_15(%arg0: i32) -> (i32, i32) {
    %c0_i32 = arith.constant 0 : i32
    %c0_i32_0 = arith.constant 0 : i32
    %c0_i32_1 = arith.constant 0 : i32
    return %c0_i32, %c0_i32_0 : i32, i32
  }
  func.func @transform_16(%arg0: i32) -> (i32, i32) {
    %c0_i32 = arith.constant 0 : i32
    %c0_i32_0 = arith.constant 0 : i32
    %c0_i32_1 = arith.constant 0 : i32
    return %c0_i32, %c0_i32_0 : i32, i32
  }
  func.func @transform_17(%arg0: i32) -> (i32, i32) {
    %c0_i32 = arith.constant 0 : i32
    %c0_i32_0 = arith.constant 0 : i32
    %c0_i32_1 = arith.constant 0 : i32
    return %c0_i32, %c0_i32_0 : i32, i32
  }
  func.func @transform_18(%arg0: i32) -> (i32, i32) {
    %c0_i32 = arith.constant 0 : i32
    %c0_i32_0 = arith.constant 0 : i32
    %c0_i32_1 = arith.constant 0 : i32
    return %c0_i32, %c0_i32_0 : i32, i32
  }
  func.func @transform_19(%arg0: i32) -> (i32, i32) {
    %c0_i32 = arith.constant 0 : i32
    %c0_i32_0 = arith.constant 0 : i32
    %c0_i32_1 = arith.constant 0 : i32
    return %c0_i32, %c0_i32_0 : i32, i32
  }
  func.func @transform_20(%arg0: i32) -> (i32, i32) {
    %c0_i32 = arith.constant 0 : i32
    %c0_i32_0 = arith.constant 0 : i32
    %c0_i32_1 = arith.constant 0 : i32
    return %c0_i32, %c0_i32_0 : i32, i32
  }
  func.func @transform_21(%arg0: i32) -> (i32, i32) {
    %c0_i32 = arith.constant 0 : i32
    %c0_i32_0 = arith.constant 0 : i32
    %c0_i32_1 = arith.constant 0 : i32
    return %c0_i32, %c0_i32_0 : i32, i32
  }
  func.func @transform_22(%arg0: i32) -> (i32, i32) {
    %c0_i32 = arith.constant 0 : i32
    %c0_i32_0 = arith.constant 0 : i32
    %c0_i32_1 = arith.constant 0 : i32
    return %c0_i32, %c0_i32_0 : i32, i32
  }
  func.func @transform_23(%arg0: i32) -> (i32, i32) {
    %c0_i32 = arith.constant 0 : i32
    %c0_i32_0 = arith.constant 0 : i32
    %c0_i32_1 = arith.constant 0 : i32
    return %c0_i32, %c0_i32_0 : i32, i32
  }
  func.func @transform_24(%arg0: i32) -> (i32, i32) {
    %c0_i32 = arith.constant 0 : i32
    %c0_i32_0 = arith.constant 0 : i32
    %c0_i32_1 = arith.constant 0 : i32
    return %c0_i32, %c0_i32_0 : i32, i32
  }
  func.func @transform_25(%arg0: i32) -> (i32, i32) {
    %c0_i32 = arith.constant 0 : i32
    %c0_i32_0 = arith.constant 0 : i32
    %c0_i32_1 = arith.constant 0 : i32
    return %c0_i32, %c0_i32_0 : i32, i32
  }
  func.func @transform_26(%arg0: i32) -> (i32, i32) {
    %c0_i32 = arith.constant 0 : i32
    %c0_i32_0 = arith.constant 0 : i32
    %c0_i32_1 = arith.constant 0 : i32
    return %c0_i32, %c0_i32_0 : i32, i32
  }
  func.func @transform_27(%arg0: i32) -> (i32, i32) {
    %c0_i32 = arith.constant 0 : i32
    %c0_i32_0 = arith.constant 0 : i32
    return %arg0, %c0_i32 : i32, i32
  }
}

</mosaic_0001>

<bundles_post_ra>
// kernel: tpu_custom_call.1
= control target key start
LH: loop header
LB: loop body
LE: loop exit
PB: predicated region body
PF: predicated region fallthrough
CT: control target
= control target key end

     0   :  { %s17693_s0 = inlined_call_operand.vmem [shape: f32[256,3], index: 0, kind: input, shape index: {}]   ;;  %s17694_s1 = inlined_call_operand.vmem [shape: f32[256,3], index: 1, kind: input, shape index: {}]   ;;  %s17695_s2 = inlined_call_operand.hbm [shape: f32[3,60], index: 2, kind: input, shape index: {}]   ;;  %s17696_s3 = inlined_call_operand.hbm [shape: f32[1,60], index: 3, kind: input, shape index: {}]   ;;  %s17697_s4 = inlined_call_operand.hbm [shape: f32[3,24], index: 4, kind: input, shape index: {}]   ;;  %s17698_s5 = inlined_call_operand.hbm [shape: f32[1,24], index: 5, kind: input, shape index: {}]   ;;  %s17699_s6 = inlined_call_operand.hbm [shape: bf16[60,512], index: 6, kind: input, shape index: {}]   ;;  %s17700_s7 = inlined_call_operand.hbm [shape: f32[1,256], index: 7, kind: input, shape index: {}]   ;;  %s17701_s8 = inlined_call_operand.vmem [shape: bf16[256,256], index: 8, kind: input, shape index: {}]   ;;  %s17702_s9 = inlined_call_operand.hbm [shape: f32[1,256], index: 9, kind: input, shape index: {}]   ;;  %s17703_s10 = inlined_call_operand.vmem [shape: bf16[256,256], index: 10, kind: input, shape index: {}]   ;;  %s17704_s11 = inlined_call_operand.hbm [shape: f32[1,256], index: 11, kind: input, shape index: {}]   ;;  %s17705_s12 = inlined_call_operand.hbm [shape: bf16[256,256], index: 12, kind: input, shape index: {}]   ;;  %s17706_s13 = inlined_call_operand.hbm [shape: f32[1,256], index: 13, kind: input, shape index: {}]   ;;  %s17707_s14 = inlined_call_operand.hbm [shape: bf16[256,256], index: 14, kind: input, shape index: {}]   ;;  %s17708_s15 = inlined_call_operand.hbm [shape: f32[1,256], index: 15, kind: input, shape index: {}]   ;;  %s17709_s16 = inlined_call_operand.hbm [shape: bf16[256,256], index: 16, kind: input, shape index: {}]   ;;  %s17710_s17 = inlined_call_operand.hbm [shape: f32[1,256], index: 17, kind: input, shape index: {}]   ;;  %s17711_s18 = inlined_call_operand.hbm [shape: bf16[256,256], index: 18, kind: input, shape index: {}]   ;;  %s17712_s19 = inlined_call_operand.vmem [shape: f32[1,256], index: 19, kind: input, shape index: {}]   ;;  %s17713_s20 = inlined_call_operand.hbm [shape: bf16[256,256], index: 20, kind: input, shape index: {}]   ;;  %s17714_s21 = inlined_call_operand.vmem [shape: f32[1,256], index: 21, kind: input, shape index: {}]   ;;  %s17715_s22 = inlined_call_operand.hbm [shape: bf16[256,256], index: 22, kind: input, shape index: {}]   ;;  %s17716_s23 = inlined_call_operand.vmem [shape: f32[1,256], index: 23, kind: input, shape index: {}]   ;;  %s17717_s24 = inlined_call_operand.vmem [shape: bf16[24,128], index: 24, kind: input, shape index: {}]   ;;  %s17718_s25 = inlined_call_operand.vmem [shape: bf16[128,128], index: 25, kind: input, shape index: {}]   ;;  %s17719_s26 = inlined_call_operand.vmem [shape: f32[1,128], index: 26, kind: input, shape index: {}]   ;;  %s17720_s27 = inlined_call_operand.hbm [shape: bf16[256,128], index: 27, kind: output, shape index: {}]  }
   0x1   :  { %17904 = sst [smem:[#allocation81_spill]] %s17693_s0 }
   0x2   :  { %17905 = sst [smem:[#allocation82_spill]] %s17694_s1 }
   0x3   :  { %17906 = sst [smem:[#allocation83_spill]] %s17695_s2 }
   0x4   :  { %17907 = sst [smem:[#allocation84_spill]] %s17696_s3 }
   0x5   :  { %17908 = sst [smem:[#allocation85_spill]] %s17697_s4 }
   0x6   :  { %17909 = sst [smem:[#allocation86_spill]] %s17698_s5 }
   0x7   :  { %17910 = sst [smem:[#allocation87_spill]] %s17699_s6 }
   0x8   :  { %17911 = sst [smem:[#allocation88_spill]] %s17700_s7 }
   0x9   :  { %17912 = sst [smem:[#allocation89_spill]] %s17701_s8 }
   0xa   :  { %17913 = sst [smem:[#allocation90_spill]] %s17702_s9 }
   0xb   :  { %17914 = sst [smem:[#allocation91_spill]] %s17703_s10 }
   0xc   :  { %17915 = sst [smem:[#allocation92_spill]] %s17704_s11 }
   0xd   :  { %17916 = sst [smem:[#allocation93_spill]] %s17706_s13 }
   0xe   :  { %17917 = sst [smem:[#allocation94_spill]] %s17708_s15 }
   0xf   :  { %17918 = sst [smem:[#allocation95_spill]] %s17710_s17 }
  0x10   :  { %17919 = sst [smem:[#allocation96_spill]] %s17716_s23 }
  0x11   :  { %17920 = sst [smem:[#allocation97_spill]] %s17718_s25 }
  0x12   :  { %17921 = sst [smem:[#allocation98_spill]] %s17719_s26 }
  0x13   :  { %17922 = sst [smem:[#allocation99_spill]] %s17720_s27 }
  0x14   :  { %32 = vsyncpa [#allocation3], 0 }
  0x15   :  { %33 = vsyncpa [#allocation6], 0 }
  0x16   :  { %34 = vsyncpa [#allocation9], 0 }
  0x17   :  { %35 = vsyncpa [#allocation12], 0 }
  0x18   :  { %36 = vsyncpa [#allocation15], 0 }
  0x19   :  { %37 = vsyncpa [#allocation18], 0 }
  0x1a   :  { %38 = vsyncpa [#allocation21], 0 }
  0x1b   :  { %39 = vsyncpa [#allocation24], 0 }
  0x1c   :  { %40 = vsyncpa [#allocation27], 0 }
  0x1d   :  { %41 = vsyncpa [#allocation4], 0 }
  0x1e   :  { %43 = vsyncpa [#allocation4 + $0x1], 0  ;;  %s11864_s7 = smov 0   ;;  %s11866_s4 = smov 0  }
  0x1f   :  { %s11868_s8 = smov 0   ;;  %s11870_s30 = smov 0  }
  0x20   :  { %17923 = sst [smem:[#allocation40_spill]] %s11868_s8 }
  0x21 LB: > { %s17925_s8 = sld [smem:[#allocation40_spill]]  ;;  %17927 = sst [smem:[#allocation41_spill]] %s11681_s4  ;;  %s11689_s30 = sphi %s11870_s30, %s18296_s30   ;;  %s11681_s4 = sphi %s11866_s4, %s18298_s4   ;;  %s11677_s7 = sphi %s11864_s7, %s18297_s7  }
  0x22   : > { %17926 = sst [smem:[#allocation40_spill]] %s11677_s7  ;;  %s11885_s9 = sadd.s32 4294967295, %s11689_s30  }
  0x23   : > { %17929 = sst [smem:[#allocation43_spill]] %s11689_s30  ;;  %s9307_s5 = sadd.s32 4294967294, %s11689_s30  }
  0x24   : > { %s11889_s28 = sadd.s32 1, %s11689_s30   ;;  %p644_p2 = scmp.eq.s32.totalorder %s11885_s9, 1 }
  0x25   : > { %17930 = sst [smem:[#allocation44_spill]] %s11889_s28  ;;  %s630_s10 = ssub.s32 %s11689_s30, %s11889_s28 }
  0x26   : > { %p631_p1 = scmp.eq.s32.totalorder %s630_s10, 0  ;;  %p649_p3 = scmp.ne.s32.totalorder %s11681_s4, %s11677_s7 }
  0x27   : > { %17928 = sst [smem:[#allocation42_spill]] %s17925_s8  ;;  %s633_s0 = sadd.s32 1, %s17925_s8 }
  0x28   : > { %p643_p0 = scmp.ne.s32.totalorder %s17925_s8, %s11681_s4  ;;  %p650_p4 = scmp.eq.s32.totalorder %s9307_s5, 1 }
  0x29   : > { %s11900_s29 = scalar_select %p631_p1, %s17925_s8, %s633_s0  }
  0x2a   : > { %p11902_p5 = por %p644_p2, %p643_p0  ;;  %p11906_p6 = por %p650_p4, %p649_p3 }
  0x2b   : > { %17931 = sst [smem:[#allocation45_spill]] %s11900_s29  ;;  %p9308_p7 = scmp.ge.s32.totalorder %s11689_s30, 1 }
  0x2c   : > { %s17932_s1 = scalar_select %p11902_p5, 1, 0 }
  0x2d   : > { %s17934_s6 = scalar_select %p11906_p6, 1, 0 }
  0x2e   : > { %17933 = sst [smem:[#allocation46_spill]] %s17932_s1  ;;  %p657_p8 = scmp.lt.s32.totalorder %s11689_s30, 3 }
  0x2f   : > { %17935 = sst [smem:[#allocation47_spill]] %s17934_s6  ;;  %p17740_p9 = scmp.eq.s32.totalorder %s11885_s9, 0 }
  0x30   : > { %p11913_p10 = pnand %p9308_p7, %p657_p8  ;;  %s11691_s2 = smov [#allocation5]  }
  0x31   : > { %s681_s3 = sshll.u32 %s11691_s2, 4  ;;  %s11692_s5 = smov [#allocation8]   ;;  %s682_s3 = int_to_ptr.vmem [resolvable:$true] %s681_s3 }
  0x32   : > { %s17936_s11 = scalar_select %p11913_p10, 1, 0 }
  0x33   : > { %p10237_p11 = pneg %p11913_p10  ;;  %s703_s0 = sshll.u32 %s11692_s5, 4  ;;  %s11925_s0 = int_to_ptr.vmem [resolvable:$true] %s703_s0 }
  0x34   : > { %s11693_s29 = smov [#allocation11]   ;;  %s17938_s2 = sld [smem:[#allocation84_spill]] }
  0x35   : > { %p11921_p12 = pnand %p17740_p9, %p10237_p11  ;;  %s727_s8 = sshll.u32 %s11693_s29, 4  ;;  %s11927_s8 = int_to_ptr.vmem [resolvable:$true] %s727_s8 }
  0x37   : > { %p11937_p0 = pneg %p11921_p12 }
  0x3a   : > { %s11115_s7 = scalar_lea.hbm %s17938_s2, 16 }
  0x3b   : > { %p11116_p13 = scmp.ne.s32.totalorder %s17938_s2, %s11115_s7  ;;  %p11122_p3 = scmp.lt.u32.totalorder %s11115_s7, %s17938_s2 }
  0x3d   : > { %p11118_p1 = pnand %p11937_p0, %p11116_p13 }
  0x3f   : > { %p11119_p2 = pneg %p11118_p1 }
  0x41   : > { %p11124_p4 = pnand %p11122_p3, %p11119_p2 }
  0x43   : > { %11127 = shalt.err (!%p11124_p4)
}
  0x44   : > { %s11128_s28 = scalar_lea.vmem %s682_s3, 16  ;;  %s11135_s27 = scalar_lea.vmem %s682_s3, 32 }
  0x45   : > { %p11129_p7 = scmp.ne.s32.totalorder %s682_s3, %s11128_s28  ;;  %p11136_p9 = scmp.lt.s32.totalorder %s682_s3, %s682_s3 }
  0x46   : > { %p11137_p6 = scmp.lt.s32.totalorder %s11135_s27, %s11128_s28 }
  0x47   : > { %p11131_p8 = pnand %p11129_p7, %p11937_p0 }
  0x48   : > { %p11138_p5 = por %p11137_p6, %p11136_p9 }
  0x49   : > { %p11132_p11 = pneg %p11131_p8 }
  0x4b   : > { %p11139_p10 = pnand %p11138_p5, %p11132_p11 }
  0x4d   : > { %11142 = shalt.err (!%p11139_p10)
}
  0x4e   : > { %10243 = dma.hbm_to_vmem [thread:$0]  (!%p11921_p12), %s17938_s2, 16, %s682_s3, [#allocation6]  }
  0x4f   : > { %s17940_s29 = sld [smem:[#allocation86_spill]] }
  0x55   : > { %s11143_s4 = scalar_lea.hbm %s17940_s29, 16 }
  0x56   : > { %p11144_p13 = scmp.ne.s32.totalorder %s17940_s29, %s11143_s4  ;;  %p11150_p5 = scmp.lt.u32.totalorder %s11143_s4, %s17940_s29 }
  0x58   : > { %p11146_p1 = pnand %p11144_p13, %p11937_p0 }
  0x5a   : > { %p11147_p6 = pneg %p11146_p1 }
  0x5c   : > { %p11152_p9 = pnand %p11150_p5, %p11147_p6 }
  0x5e   : > { %11155 = shalt.err (!%p11152_p9)
}
  0x5f   : > { %s11156_s3 = scalar_lea.vmem %s11925_s0, 16  ;;  %s11163_s23 = scalar_lea.vmem %s11925_s0, 32 }
  0x60   : > { %p11157_p10 = scmp.ne.s32.totalorder %s11925_s0, %s11156_s3  ;;  %p11164_p4 = scmp.lt.s32.totalorder %s11925_s0, %s11925_s0 }
  0x61   : > { %p11165_p7 = scmp.lt.s32.totalorder %s11163_s23, %s11156_s3 }
  0x62   : > { %p11159_p2 = pnand %p11157_p10, %p11937_p0 }
  0x63   : > { %p11166_p8 = por %p11165_p7, %p11164_p4 }
  0x64   : > { %p11160_p3 = pneg %p11159_p2 }
  0x66   : > { %p11167_p11 = pnand %p11166_p8, %p11160_p3 }
  0x68   : > { %11170 = shalt.err (!%p11167_p11)
}
  0x69   : > { %10249 = dma.hbm_to_vmem [thread:$0]  (!%p11921_p12), %s17940_s29, 16, %s11925_s0, [#allocation9]  }
  0x6a   : > { %s17941_s7 = sld [smem:[#allocation88_spill]] }
  0x70   : > { %s17942_s1 = smov %s17941_s7  ;;  %s11171_s28 = scalar_lea.hbm %s17941_s7, 32 }
  0x71   : > { %p11172_p13 = scmp.ne.s32.totalorder %s17942_s1, %s11171_s28  ;;  %p11178_p5 = scmp.lt.u32.totalorder %s11171_s28, %s17942_s1 }
  0x73   : > { %p11174_p1 = pnand %p11172_p13, %p11937_p0 }
  0x75   : > { %p11175_p6 = pneg %p11174_p1 }
  0x77   : > { %p11180_p9 = pnand %p11178_p5, %p11175_p6 }
  0x79   : > { %11183 = shalt.err (!%p11180_p9)
}
  0x7a   : > { %s11184_s0 = scalar_lea.vmem %s11927_s8, 32  ;;  %p11192_p4 = scmp.lt.s32.totalorder %s11927_s8, %s11927_s8 }
  0x7b   : > { %p11185_p10 = scmp.ne.s32.totalorder %s11927_s8, %s11184_s0  ;;  %p11193_p7 = scmp.lt.s32.totalorder %s11184_s0, %s11184_s0 }
  0x7d   : > { %p11187_p2 = pnand %p11185_p10, %p11937_p0  ;;  %p11194_p8 = por %p11193_p7, %p11192_p4 }
  0x7f   : > { %p11188_p3 = pneg %p11187_p2 }
  0x81   : > { %p11195_p11 = pnand %p11194_p8, %p11188_p3 }
  0x83   : > { %11198 = shalt.err (!%p11195_p11)
}
  0x84   : > { %10255 = dma.hbm_to_vmem [thread:$0]  (!%p11921_p12), %s17942_s1, 32, %s11927_s8, [#allocation12]  }
  0x85   : > { %s11694_s4 = smov [#allocation14]   ;;  %s11695_s6 = smov [#allocation17]  }
  0x86   : > { %s755_s30 = sshll.u32 %s11694_s4, 4  ;;  %s779_s7 = sshll.u32 %s11695_s6, 4  ;;  %s756_s30 = int_to_ptr.vmem [resolvable:$true] %s755_s30  ;;  %s780_s7 = int_to_ptr.vmem [resolvable:$true] %s779_s7 }
  0x87   : > { %s17943_s3 = sld [smem:[#allocation92_spill]] }
  0x8d   : > { %s11199_s23 = scalar_lea.hbm %s17943_s3, 32 }
  0x8e   : > { %p11200_p13 = scmp.ne.s32.totalorder %s17943_s3, %s11199_s23  ;;  %p11206_p5 = scmp.lt.u32.totalorder %s11199_s23, %s17943_s3 }
  0x90   : > { %p11202_p1 = pnand %p11200_p13, %p11937_p0 }
  0x92   : > { %p11203_p6 = pneg %p11202_p1 }
  0x94   : > { %p11208_p9 = pnand %p11206_p5, %p11203_p6 }
  0x96   : > { %11211 = shalt.err (!%p11208_p9)
}
  0x97   : > { %s11212_s8 = scalar_lea.vmem %s756_s30, 32  ;;  %p11220_p4 = scmp.lt.s32.totalorder %s756_s30, %s756_s30 }
  0x98   : > { %p11213_p10 = scmp.ne.s32.totalorder %s756_s30, %s11212_s8  ;;  %p11221_p7 = scmp.lt.s32.totalorder %s11212_s8, %s11212_s8 }
  0x9a   : > { %p11215_p2 = pnand %p11213_p10, %p11937_p0  ;;  %p11222_p8 = por %p11221_p7, %p11220_p4 }
  0x9c   : > { %p11216_p3 = pneg %p11215_p2 }
  0x9e   : > { %p11223_p11 = pnand %p11222_p8, %p11216_p3 }
  0xa0   : > { %11226 = shalt.err (!%p11223_p11)
}
  0xa1   : > { %10261 = dma.hbm_to_vmem [thread:$0]  (!%p11921_p12), %s17943_s3, 32, %s756_s30, [#allocation15]  }
  0xa2   : > { %s17944_s13 = sld [smem:[#allocation93_spill]] }
  0xa8   : > { %s11227_s6 = scalar_lea.hbm %s17944_s13, 32 }
  0xa9   : > { %p11228_p13 = scmp.ne.s32.totalorder %s17944_s13, %s11227_s6  ;;  %p11234_p5 = scmp.lt.u32.totalorder %s11227_s6, %s17944_s13 }
  0xab   : > { %p11230_p1 = pnand %p11228_p13, %p11937_p0 }
  0xad   : > { %p11231_p6 = pneg %p11230_p1 }
  0xaf   : > { %p11236_p9 = pnand %p11234_p5, %p11231_p6 }
  0xb1   : > { %11239 = shalt.err (!%p11236_p9)
}
  0xb2   : > { %s11240_s2 = scalar_lea.vmem %s780_s7, 32  ;;  %p11248_p4 = scmp.lt.s32.totalorder %s780_s7, %s780_s7 }
  0xb3   : > { %p11241_p10 = scmp.ne.s32.totalorder %s780_s7, %s11240_s2  ;;  %p11249_p7 = scmp.lt.s32.totalorder %s11240_s2, %s11240_s2 }
  0xb5   : > { %p11243_p2 = pnand %p11241_p10, %p11937_p0  ;;  %p11250_p8 = por %p11249_p7, %p11248_p4 }
  0xb7   : > { %p11244_p3 = pneg %p11243_p2 }
  0xb9   : > { %p11251_p11 = pnand %p11250_p8, %p11244_p3 }
  0xbb   : > { %11254 = shalt.err (!%p11251_p11)
}
  0xbc   : > { %10267 = dma.hbm_to_vmem [thread:$0]  (!%p11921_p12), %s17944_s13, 32, %s780_s7, [#allocation18]  }
  0xbd   : > { %s11696_s29 = smov [#allocation20]   ;;  %s11697_s25 = smov [#allocation23]  }
  0xbe   : > { %s803_s26 = sshll.u32 %s11696_s29, 4  ;;  %s827_s4 = sshll.u32 %s11697_s25, 4  ;;  %s804_s26 = int_to_ptr.vmem [resolvable:$true] %s803_s26  ;;  %s828_s4 = int_to_ptr.vmem [resolvable:$true] %s827_s4 }
  0xbf   : > { %s17945_s15 = sld [smem:[#allocation94_spill]] }
  0xc5   : > { %s11255_s27 = scalar_lea.hbm %s17945_s15, 32 }
  0xc6   : > { %p11256_p13 = scmp.ne.s32.totalorder %s17945_s15, %s11255_s27  ;;  %p11262_p5 = scmp.lt.u32.totalorder %s11255_s27, %s17945_s15 }
  0xc8   : > { %p11258_p1 = pnand %p11256_p13, %p11937_p0 }
  0xca   : > { %p11259_p6 = pneg %p11258_p1 }
  0xcc   : > { %p11264_p9 = pnand %p11262_p5, %p11259_p6 }
  0xce   : > { %11267 = shalt.err (!%p11264_p9)
}
  0xcf   : > { %s11268_s7 = scalar_lea.vmem %s804_s26, 32  ;;  %p11276_p4 = scmp.lt.s32.totalorder %s804_s26, %s804_s26 }
  0xd0   : > { %p11269_p10 = scmp.ne.s32.totalorder %s804_s26, %s11268_s7  ;;  %p11277_p7 = scmp.lt.s32.totalorder %s11268_s7, %s11268_s7 }
  0xd2   : > { %p11271_p2 = pnand %p11269_p10, %p11937_p0  ;;  %p11278_p8 = por %p11277_p7, %p11276_p4 }
  0xd4   : > { %p11272_p3 = pneg %p11271_p2 }
  0xd6   : > { %p11279_p11 = pnand %p11278_p8, %p11272_p3 }
  0xd8   : > { %11282 = shalt.err (!%p11279_p11)
}
  0xd9   : > { %10273 = dma.hbm_to_vmem [thread:$0]  (!%p11921_p12), %s17945_s15, 32, %s804_s26, [#allocation21]  }
  0xda   : > { %s17946_s17 = sld [smem:[#allocation95_spill]] }
  0xe0   : > { %s11283_s28 = scalar_lea.hbm %s17946_s17, 32 }
  0xe1   : > { %p11284_p13 = scmp.ne.s32.totalorder %s17946_s17, %s11283_s28  ;;  %p11290_p5 = scmp.lt.u32.totalorder %s11283_s28, %s17946_s17 }
  0xe3   : > { %p11286_p1 = pnand %p11284_p13, %p11937_p0 }
  0xe5   : > { %p11287_p6 = pneg %p11286_p1 }
  0xe7   : > { %p11292_p9 = pnand %p11290_p5, %p11287_p6 }
  0xe9   : > { %11295 = shalt.err (!%p11292_p9)
}
  0xea   : > { %s11296_s30 = scalar_lea.vmem %s828_s4, 32  ;;  %p11304_p4 = scmp.lt.s32.totalorder %s828_s4, %s828_s4 }
  0xeb   : > { %p11297_p10 = scmp.ne.s32.totalorder %s828_s4, %s11296_s30  ;;  %p11305_p7 = scmp.lt.s32.totalorder %s11296_s30, %s11296_s30 }
  0xed   : > { %p11299_p2 = pnand %p11297_p10, %p11937_p0  ;;  %p11306_p8 = por %p11305_p7, %p11304_p4 }
  0xef   : > { %p11300_p3 = pneg %p11299_p2 }
  0xf1   : > { %p11307_p11 = pnand %p11306_p8, %p11300_p3 }
  0xf3   : > { %11310 = shalt.err (!%p11307_p11)
}
  0xf4   : > { %10279 = dma.hbm_to_vmem [thread:$0]  (!%p11921_p12), %s17946_s17, 32, %s828_s4, [#allocation24]  }
  0xf5   : > { %s11698_s8 = smov [#allocation26]   ;;  %s11699_s25 = smov [#allocation2]  }
  0xf6   : > { %s853_s29 = sshll.u32 %s11698_s8, 4  ;;  %s670_s6 = sshll.u32 %s11699_s25, 4  ;;  %s854_s29 = int_to_ptr.vmem [resolvable:$true] %s853_s29  ;;  %s671_s6 = int_to_ptr.vmem [resolvable:$true] %s670_s6 }
  0xf7   : > { %s11311_s23 = scalar_lea.hbm %s17713_s20, 4096 }
  0xf8   : > { %p11312_p13 = scmp.ne.s32.totalorder %s17713_s20, %s11311_s23  ;;  %p11318_p5 = scmp.lt.u32.totalorder %s11311_s23, %s17713_s20 }
  0xfa   : > { %p11314_p1 = pnand %p11312_p13, %p11937_p0 }
  0xfc   : > { %p11315_p6 = pneg %p11314_p1 }
  0xfe   : > { %p11320_p9 = pnand %p11318_p5, %p11315_p6 }
 0x100   : > { %11323 = shalt.err (!%p11320_p9)
}
 0x101   : > { %s11324_s4 = scalar_lea.vmem %s854_s29, 4096  ;;  %p11332_p4 = scmp.lt.s32.totalorder %s854_s29, %s854_s29 }
 0x102   : > { %p11325_p10 = scmp.ne.s32.totalorder %s854_s29, %s11324_s4  ;;  %p11333_p7 = scmp.lt.s32.totalorder %s11324_s4, %s11324_s4 }
 0x104   : > { %p11327_p2 = pnand %p11325_p10, %p11937_p0  ;;  %p11334_p8 = por %p11333_p7, %p11332_p4 }
 0x106   : > { %p11328_p3 = pneg %p11327_p2 }
 0x108   : > { %p11335_p11 = pnand %p11334_p8, %p11328_p3 }
 0x10a   : > { %11338 = shalt.err (!%p11335_p11)
}
 0x10b   : > { %s17751_s7 = smov 128   ;;  %s17749_s8 = smov 8  }
 0x10c   : > { %10285 = dma.hbm_to_vmem [thread:$0]  (!%p11921_p12), %s17713_s20, 4096, %s854_s29, [#allocation27], %s17751_s7, %s17751_s7, %s17749_s8  }
 0x10d   : > { %s17947_s0 = sld [smem:[#allocation83_spill]] }
 0x113   : > { %s11339_s2 = scalar_lea.hbm %s17947_s0, 64 }
 0x114   : > { %p11340_p13 = scmp.ne.s32.totalorder %s17947_s0, %s11339_s2  ;;  %p11346_p5 = scmp.lt.u32.totalorder %s11339_s2, %s17947_s0 }
 0x116   : > { %p11342_p1 = pnand %p11340_p13, %p11937_p0 }
 0x118   : > { %p11343_p6 = pneg %p11342_p1 }
 0x11a   : > { %p11348_p9 = pnand %p11346_p5, %p11343_p6 }
 0x11c   : > { %11351 = shalt.err (!%p11348_p9)
}
 0x11d   : > { %s11352_s25 = scalar_lea.vmem %s671_s6, 64  ;;  %p11360_p4 = scmp.lt.s32.totalorder %s671_s6, %s671_s6 }
 0x11e   : > { %p11353_p10 = scmp.ne.s32.totalorder %s671_s6, %s11352_s25  ;;  %p11361_p7 = scmp.lt.s32.totalorder %s11352_s25, %s11352_s25 }
 0x120   : > { %p11355_p2 = pnand %p11353_p10, %p11937_p0  ;;  %p11362_p8 = por %p11361_p7, %p11360_p4 }
 0x122   : > { %p11356_p3 = pneg %p11355_p2 }
 0x124   : > { %p11363_p11 = pnand %p11362_p8, %p11356_p3 }
 0x126   : > { %11366 = shalt.err (!%p11363_p11)
}
 0x127   : > { %10240 = dma.hbm_to_vmem [thread:$0]  (!%p11921_p12), %s17947_s0, 64, %s671_s6, [#allocation3]  }
 0x128   : > { %s11702_s1 = smov [#allocation7]   ;;  %s11703_s23 = smov [#allocation10]  }
 0x129   : > { %s692_s27 = sshll.u32 %s11702_s1, 4  ;;  %s713_s2 = sshll.u32 %s11703_s23, 4  ;;  %s693_s27 = int_to_ptr.vmem [resolvable:$true] %s692_s27  ;;  %s714_s2 = int_to_ptr.vmem [resolvable:$true] %s713_s2 }
 0x12a   : > { %s17948_s4 = sld [smem:[#allocation85_spill]] }
 0x130   : > { %s17949_s8 = smov %s17948_s4  ;;  %s11367_s7 = scalar_lea.hbm %s17948_s4, 64 }
 0x131   : > { %p11368_p13 = scmp.ne.s32.totalorder %s17949_s8, %s11367_s7  ;;  %p11374_p5 = scmp.lt.u32.totalorder %s11367_s7, %s17949_s8 }
 0x133   : > { %p11370_p1 = pnand %p11368_p13, %p11937_p0 }
 0x135   : > { %p11371_p6 = pneg %p11370_p1 }
 0x137   : > { %p11376_p9 = pnand %p11374_p5, %p11371_p6 }
 0x139   : > { %11379 = shalt.err (!%p11376_p9)
}
 0x13a   : > { %s11380_s6 = scalar_lea.vmem %s693_s27, 64  ;;  %p11388_p4 = scmp.lt.s32.totalorder %s693_s27, %s693_s27 }
 0x13b   : > { %p11381_p10 = scmp.ne.s32.totalorder %s693_s27, %s11380_s6  ;;  %p11389_p7 = scmp.lt.s32.totalorder %s11380_s6, %s11380_s6 }
 0x13d   : > { %p11383_p2 = pnand %p11381_p10, %p11937_p0  ;;  %p11390_p8 = por %p11389_p7, %p11388_p4 }
 0x13f   : > { %p11384_p3 = pneg %p11383_p2 }
 0x141   : > { %p11391_p11 = pnand %p11390_p8, %p11384_p3 }
 0x143   : > { %11394 = shalt.err (!%p11391_p11)
}
 0x144   : > { %10246 = dma.hbm_to_vmem [thread:$0]  (!%p11921_p12), %s17949_s8, 64, %s693_s27, [#allocation6]  }
 0x145   : > { %s17950_s1 = sld [smem:[#allocation87_spill]] }
 0x14b   : > { %s11395_s23 = scalar_lea.hbm %s17950_s1, 2048 }
 0x14c   : > { %p11396_p13 = scmp.ne.s32.totalorder %s17950_s1, %s11395_s23  ;;  %p11402_p5 = scmp.lt.u32.totalorder %s11395_s23, %s17950_s1 }
 0x14e   : > { %p11398_p1 = pnand %p11396_p13, %p11937_p0 }
 0x150   : > { %p11399_p6 = pneg %p11398_p1 }
 0x152   : > { %p11404_p9 = pnand %p11402_p5, %p11399_p6 }
 0x154   : > { %11407 = shalt.err (!%p11404_p9)
}
 0x155   : > { %s11408_s29 = scalar_lea.vmem %s714_s2, 2048  ;;  %p11416_p4 = scmp.lt.s32.totalorder %s714_s2, %s714_s2 }
 0x156   : > { %p11409_p10 = scmp.ne.s32.totalorder %s714_s2, %s11408_s29  ;;  %p11417_p7 = scmp.lt.s32.totalorder %s11408_s29, %s11408_s29 }
 0x158   : > { %p11411_p2 = pnand %p11409_p10, %p11937_p0  ;;  %p11418_p8 = por %p11417_p7, %p11416_p4 }
 0x15a   : > { %p11412_p3 = pneg %p11411_p2 }
 0x15c   : > { %p11419_p11 = pnand %p11418_p8, %p11412_p3 }
 0x15e   : > { %11422 = shalt.err (!%p11419_p11)
}
 0x15f   : > { %s11704_s27 = smov 256   ;;  %s11705_s6 = smov 16  }
 0x160   : > { %10252 = dma.hbm_to_vmem [thread:$0]  (!%p11921_p12), %s17950_s1, 2048, %s714_s2, [#allocation9], %s11704_s27, %s11704_s27, %s11705_s6  }
 0x161   : > { %s11706_s13 = smov [#allocation13]   ;;  %s11707_s23 = smov [#allocation16]  }
 0x162   : > { %s741_s7 = sshll.u32 %s11706_s13, 4  ;;  %s765_s30 = sshll.u32 %s11707_s23, 4  ;;  %s742_s7 = int_to_ptr.vmem [resolvable:$true] %s741_s7  ;;  %s766_s30 = int_to_ptr.vmem [resolvable:$true] %s765_s30 }
 0x163   : > { %s17951_s25 = sld [smem:[#allocation90_spill]] }
 0x169   : > { %s11423_s29 = scalar_lea.hbm %s17951_s25, 32 }
 0x16a   : > { %p11424_p13 = scmp.ne.s32.totalorder %s17951_s25, %s11423_s29  ;;  %p11430_p5 = scmp.lt.u32.totalorder %s11423_s29, %s17951_s25 }
 0x16c   : > { %p11426_p1 = pnand %p11424_p13, %p11937_p0 }
 0x16e   : > { %p11427_p6 = pneg %p11426_p1 }
 0x170   : > { %p11432_p9 = pnand %p11430_p5, %p11427_p6 }
 0x172   : > { %11435 = shalt.err (!%p11432_p9)
}
 0x173   : > { %s11436_s2 = scalar_lea.vmem %s742_s7, 32  ;;  %p11444_p4 = scmp.lt.s32.totalorder %s742_s7, %s742_s7 }
 0x174   : > { %p11437_p10 = scmp.ne.s32.totalorder %s742_s7, %s11436_s2  ;;  %p11445_p7 = scmp.lt.s32.totalorder %s11436_s2, %s11436_s2 }
 0x176   : > { %p11439_p2 = pnand %p11437_p10, %p11937_p0  ;;  %p11446_p8 = por %p11445_p7, %p11444_p4 }
 0x178   : > { %p11440_p3 = pneg %p11439_p2 }
 0x17a   : > { %p11447_p11 = pnand %p11446_p8, %p11440_p3 }
 0x17c   : > { %11450 = shalt.err (!%p11447_p11)
}
 0x17d   : > { %10258 = dma.hbm_to_vmem [thread:$0]  (!%p11921_p12), %s17951_s25, 32, %s742_s7, [#allocation12]  }
 0x17e   : > { %s11451_s27 = scalar_lea.hbm %s17705_s12, 4096 }
 0x17f   : > { %p11452_p13 = scmp.ne.s32.totalorder %s17705_s12, %s11451_s27  ;;  %p11458_p5 = scmp.lt.u32.totalorder %s11451_s27, %s17705_s12 }
 0x181   : > { %p11454_p1 = pnand %p11452_p13, %p11937_p0 }
 0x183   : > { %p11455_p6 = pneg %p11454_p1 }
 0x185   : > { %p11460_p9 = pnand %p11458_p5, %p11455_p6 }
 0x187   : > { %11463 = shalt.err (!%p11460_p9)
}
 0x188   : > { %s11464_s23 = scalar_lea.vmem %s766_s30, 4096  ;;  %p11472_p4 = scmp.lt.s32.totalorder %s766_s30, %s766_s30 }
 0x189   : > { %p11465_p10 = scmp.ne.s32.totalorder %s766_s30, %s11464_s23  ;;  %p11473_p7 = scmp.lt.s32.totalorder %s11464_s23, %s11464_s23 }
 0x18b   : > { %p11467_p2 = pnand %p11465_p10, %p11937_p0  ;;  %p11474_p8 = por %p11473_p7, %p11472_p4 }
 0x18d   : > { %p11468_p3 = pneg %p11467_p2 }
 0x18f   : > { %p11475_p11 = pnand %p11474_p8, %p11468_p3 }
 0x191   : > { %11478 = shalt.err (!%p11475_p11)
}
 0x192   : > { %s17952_s7 = smov 8   ;;  %s17953_s26 = smov 128  }
 0x193   : > { %10264 = dma.hbm_to_vmem [thread:$0]  (!%p11921_p12), %s17705_s12, 4096, %s766_s30, [#allocation15], %s17953_s26, %s17953_s26, %s17952_s7  }
 0x194   : > { %s11708_s2 = smov [#allocation19]   ;;  %s11709_s0 = smov [#allocation22]  }
 0x195   : > { %s789_s8 = sshll.u32 %s11708_s2, 4  ;;  %s813_s15 = sshll.u32 %s11709_s0, 4  ;;  %s790_s8 = int_to_ptr.vmem [resolvable:$true] %s789_s8  ;;  %s814_s15 = int_to_ptr.vmem [resolvable:$true] %s813_s15 }
 0x196   : > { %s11479_s6 = scalar_lea.hbm %s17707_s14, 4096 }
 0x197   : > { %p11480_p13 = scmp.ne.s32.totalorder %s17707_s14, %s11479_s6  ;;  %p11486_p5 = scmp.lt.u32.totalorder %s11479_s6, %s17707_s14 }
 0x199   : > { %p11482_p1 = pnand %p11480_p13, %p11937_p0 }
 0x19b   : > { %p11483_p6 = pneg %p11482_p1 }
 0x19d   : > { %p11488_p9 = pnand %p11486_p5, %p11483_p6 }
 0x19f   : > { %11491 = shalt.err (!%p11488_p9)
}
 0x1a0   : > { %s11492_s30 = scalar_lea.vmem %s790_s8, 4096  ;;  %p11500_p4 = scmp.lt.s32.totalorder %s790_s8, %s790_s8 }
 0x1a1   : > { %p11493_p10 = scmp.ne.s32.totalorder %s790_s8, %s11492_s30  ;;  %p11501_p7 = scmp.lt.s32.totalorder %s11492_s30, %s11492_s30 }
 0x1a3   : > { %p11495_p2 = pnand %p11493_p10, %p11937_p0  ;;  %p11502_p8 = por %p11501_p7, %p11500_p4 }
 0x1a5   : > { %p11496_p3 = pneg %p11495_p2 }
 0x1a7   : > { %p11503_p11 = pnand %p11502_p8, %p11496_p3 }
 0x1a9   : > { %11506 = shalt.err (!%p11503_p11)
}
 0x1aa   : > { %10270 = dma.hbm_to_vmem [thread:$0]  (!%p11921_p12), %s17707_s14, 4096, %s790_s8, [#allocation18], %s17953_s26, %s17953_s26, %s17952_s7  }
 0x1ab   : > { %s11507_s17 = scalar_lea.hbm %s17709_s16, 4096 }
 0x1ac   : > { %p11508_p13 = scmp.ne.s32.totalorder %s17709_s16, %s11507_s17  ;;  %p11514_p5 = scmp.lt.u32.totalorder %s11507_s17, %s17709_s16 }
 0x1ae   : > { %p11510_p1 = pnand %p11508_p13, %p11937_p0 }
 0x1b0   : > { %p11511_p6 = pneg %p11510_p1 }
 0x1b2   : > { %p11516_p9 = pnand %p11514_p5, %p11511_p6 }
 0x1b4   : > { %11519 = shalt.err (!%p11516_p9)
}
 0x1b5   : > { %s11520_s13 = scalar_lea.vmem %s814_s15, 4096  ;;  %p11528_p4 = scmp.lt.s32.totalorder %s814_s15, %s814_s15 }
 0x1b6   : > { %p11521_p10 = scmp.ne.s32.totalorder %s814_s15, %s11520_s13  ;;  %p11529_p7 = scmp.lt.s32.totalorder %s11520_s13, %s11520_s13 }
 0x1b8   : > { %p11523_p2 = pnand %p11521_p10, %p11937_p0  ;;  %p11530_p8 = por %p11529_p7, %p11528_p4 }
 0x1ba   : > { %p11524_p3 = pneg %p11523_p2 }
 0x1bc   : > { %p11531_p11 = pnand %p11530_p8, %p11524_p3 }
 0x1be   : > { %11534 = shalt.err (!%p11531_p11)
}
 0x1bf   : > { %10276 = dma.hbm_to_vmem [thread:$0]  (!%p11921_p12), %s17709_s16, 4096, %s814_s15, [#allocation21], %s17953_s26, %s17953_s26, %s17952_s7  }
 0x1c0   : > { %s11710_s30 = smov [#allocation25]   ;;  %s11711_s29 = smov [#allocation28]  }
 0x1c1   : > { %s837_s4 = sshll.u32 %s11710_s30, 4  ;;  %s869_s2 = sshll.u32 %s11711_s29, 4  ;;  %s838_s4 = int_to_ptr.vmem [resolvable:$true] %s837_s4  ;;  %s870_s2 = int_to_ptr.vmem [resolvable:$true] %s869_s2 }
 0x1c2   : > { %s11535_s27 = scalar_lea.hbm %s17711_s18, 4096 }
 0x1c3   : > { %p11536_p13 = scmp.ne.s32.totalorder %s17711_s18, %s11535_s27  ;;  %p11542_p5 = scmp.lt.u32.totalorder %s11535_s27, %s17711_s18 }
 0x1c5   : > { %p11538_p1 = pnand %p11536_p13, %p11937_p0 }
 0x1c7   : > { %p11539_p6 = pneg %p11538_p1 }
 0x1c9   : > { %p11544_p9 = pnand %p11542_p5, %p11539_p6 }
 0x1cb   : > { %11547 = shalt.err (!%p11544_p9)
}
 0x1cc   : > { %s11548_s15 = scalar_lea.vmem %s838_s4, 4096  ;;  %p11556_p4 = scmp.lt.s32.totalorder %s838_s4, %s838_s4 }
 0x1cd   : > { %p11549_p10 = scmp.ne.s32.totalorder %s838_s4, %s11548_s15  ;;  %p11557_p7 = scmp.lt.s32.totalorder %s11548_s15, %s11548_s15 }
 0x1cf   : > { %p11551_p2 = pnand %p11549_p10, %p11937_p0  ;;  %p11558_p8 = por %p11557_p7, %p11556_p4 }
 0x1d1   : > { %p11552_p3 = pneg %p11551_p2 }
 0x1d3   : > { %p11559_p11 = pnand %p11558_p8, %p11552_p3 }
 0x1d5   : > { %11562 = shalt.err (!%p11559_p11)
}
 0x1d6   : > { %10282 = dma.hbm_to_vmem [thread:$0]  (!%p11921_p12), %s17711_s18, 4096, %s838_s4, [#allocation24], %s17953_s26, %s17953_s26, %s17952_s7  }
 0x1d7   : > { %s11563_s0 = scalar_lea.hbm %s17715_s22, 4096 }
 0x1d8   : > { %p11564_p13 = scmp.ne.s32.totalorder %s17715_s22, %s11563_s0  ;;  %p11570_p5 = scmp.lt.u32.totalorder %s11563_s0, %s17715_s22 }
 0x1da   : > { %p11566_p1 = pnand %p11564_p13, %p11937_p0 }
 0x1dc   : > { %p11567_p6 = pneg %p11566_p1 }
 0x1de   : > { %p11572_p9 = pnand %p11570_p5, %p11567_p6 }
 0x1e0   : > { %11575 = shalt.err (!%p11572_p9)
}
 0x1e1   : > { %s11576_s28 = scalar_lea.vmem %s870_s2, 4096  ;;  %p11584_p4 = scmp.lt.s32.totalorder %s870_s2, %s870_s2 }
 0x1e2   : > { %p11577_p10 = scmp.ne.s32.totalorder %s870_s2, %s11576_s28  ;;  %p11585_p7 = scmp.lt.s32.totalorder %s11576_s28, %s11576_s28 }
 0x1e4   : > { %p11579_p2 = pnand %p11577_p10, %p11937_p0  ;;  %p11586_p8 = por %p11585_p7, %p11584_p4 }
 0x1e6   : > { %p11580_p3 = pneg %p11579_p2 }
 0x1e8   : > { %p11587_p11 = pnand %p11586_p8, %p11580_p3 }
 0x1ea   : > { %11590 = shalt.err (!%p11587_p11)
}
 0x1eb   : > { %10288 = dma.hbm_to_vmem [thread:$0]  (!%p11921_p12), %s17715_s22, 4096, %s870_s2, [#allocation27], %s17953_s26, %s17953_s26, %s17952_s7  }
 0x1ec   : > { %p17954_p13 = scmp.ne.s32.totalorder %s17936_s11, 0 }
 0x1ee   : > { %915 = sbr.rel (%p17954_p13) target bundleno = 3520 (0xdc0), region = 128 }
 0x1f5   : > { %p17955_p0 = scmp.eq.s32.totalorder %s11885_s9, 0 }
 0x1f7   : > { %11636 = dma.done.wait (%p17955_p0), [#allocation3], 64   ;;  %p17956_p1 = pmov %p17955_p0 }
 0x1f8   : > { %p17957_p6 = pmov %p17955_p0 }
 0x1f9   : > { %11638 = vsyncadd (%p17956_p1), [#allocation3], 4294967232 }
 0x1fa   : > { %11640 = dma.done.wait (%p17957_p6), [#allocation6], 80   ;;  %p17958_p5 = pmov %p17955_p0 }
 0x1fb   : > { %p17959_p9 = pmov %p17955_p0 }
 0x1fc   : > { %11642 = vsyncadd (%p17958_p5), [#allocation6], 4294967216 }
 0x1fd   : > { %11644 = dma.done.wait (%p17959_p9), [#allocation9], 2064   ;;  %p17960_p12 = pmov %p17955_p0 }
 0x1fe   : > { %p17961_p10 = pmov %p17955_p0 }
 0x1ff   : > { %11646 = vsyncadd (%p17960_p12), [#allocation9], 4294965232 }
 0x200   : > { %11648 = dma.done.wait (%p17961_p10), [#allocation12], 64   ;;  %p17962_p2 = pmov %p17955_p0 }
 0x201   : > { %p17963_p3 = pmov %p17955_p0 }
 0x202   : > { %11650 = vsyncadd (%p17962_p2), [#allocation12], 4294967232 }
 0x203   : > { %11652 = dma.done.wait (%p17963_p3), [#allocation15], 4128   ;;  %p17964_p4 = pmov %p17955_p0 }
 0x204   : > { %p17965_p7 = pmov %p17955_p0 }
 0x205   : > { %11654 = vsyncadd (%p17964_p4), [#allocation15], 4294963168 }
 0x206   : > { %11656 = dma.done.wait (%p17965_p7), [#allocation18], 4128   ;;  %p17966_p8 = pmov %p17955_p0 }
 0x207   : > { %p17967_p11 = pmov %p17955_p0 }
 0x208   : > { %11658 = vsyncadd (%p17966_p8), [#allocation18], 4294963168 }
 0x209   : > { %11660 = dma.done.wait (%p17967_p11), [#allocation21], 4128   ;;  %p17968_p13 = pmov %p17955_p0 }
 0x20b   : > { %11662 = vsyncadd (%p17968_p13), [#allocation21], 4294963168 }
 0x20c   : > { %11664 = dma.done.wait (%p17955_p0), [#allocation24], 4128   ;;  %p17969_p1 = pmov %p17955_p0 }
 0x20d   : > { %p17970_p6 = pmov %p17955_p0 }
 0x20e   : > { %11666 = vsyncadd (%p17969_p1), [#allocation24], 4294963168 }
 0x20f   : > { %11668 = dma.done.wait (%p17970_p6), [#allocation27], 8192   ;;  %p17971_p5 = pmov %p17955_p0 }
 0x210   : > { %s9346_s11 = sshll.u32 %s11885_s9, 4  ;;  %v17756_v0 = vmov 2   ;;  %v17758_v1 = vmov 1   ;;  %v17761_v2 = vmov 0   ;;  %s17972_s26 = sld [smem:[#allocation81_spill]]  ;;  %vm5215_vm13 = vcmask 1045504  }
 0x211   : > { %11670 = vsyncadd (%p17971_p5), [#allocation27], 4294959104  ;;  %10393 = vset.pattern.permute.xlu0 %v17756_v0  ;;  %10392 = vset.pattern.permute.xlu1 %v17758_v1  ;;  %p1057_p9 = scmp.lt.s32.totalorder %s9346_s11, 31  ;;  %s17973_s23 = sld [smem:[#allocation82_spill]]  ;;  %v10485_v32 = vld [vmem:[#allocation10 + $0x4] ss:$16 sps:$4 sm:$0xff]  }
 0x212   : > { %5260 = vmatprep.mubr.bf16.mxu0 %v17761_v2  ;;  %5373 = vmatprep.mubr.bf16.mxu1 %v17761_v2  ;;  %v10487_v33 = vld [vmem:[#allocation10 + $0xc] ss:$16 sps:$4 sm:$0xff]   ;;  %v10489_v34 = vld [vmem:[#allocation10] ss:$16 sps:$4 sm:$0xff]   ;;  %v10490_v35 = vld [vmem:[#allocation10 + $0x8] ss:$16 sps:$4 sm:$0xff]  }
 0x213   : > { %s18302_s11 = smov (!%p1057_p9, %s9346_s11), 31  ;;  %5228 = vmatprep.subr.bf16.mxu0 %v10485_v32  ;;  %5341 = vmatprep.subr.bf16.mxu1 %v10487_v33  ;;  %v10491_v37 = vld [vmem:[#allocation10 + $0x24] ss:$16 sps:$4 sm:$0xff]   ;;  %v10493_v38 = vld [vmem:[#allocation10 + $0x2c] ss:$16 sps:$4 sm:$0xff]   ;;  %s18082_s17 = sld [smem:[#allocation89_spill]] }
 0x214   : > { %s9347_s10 = sshll.u32 %s18302_s11, 3  ;;  %5229 = vmatpush1.bf16.msra.mxu0 %v10489_v34  ;;  %5342 = vmatpush1.bf16.msra.mxu1 %v10490_v35  ;;  %v10495_v39 = vld [vmem:[#allocation10 + $0x20] ss:$16 sps:$4 sm:$0xff]   ;;  %v10496_v40 = vld [vmem:[#allocation10 + $0x28] ss:$16 sps:$4 sm:$0xff]   ;;  %s18091_s8 = sld [smem:[#allocation91_spill]] }
 0x215   : > { %5230 = vmatprep.subr.bf16.mxu0 %v10491_v37  ;;  %5343 = vmatprep.subr.bf16.mxu1 %v10493_v38  ;;  %v12417_v41 = vld [vmem:[#allocation2] ss:$0 sm:$0xff]  ;;  %v12419_v43 = vld [vmem:[#allocation2 + $0x1] ss:$0 sm:$0xff]  ;;  %v12425_v47 = vld [vmem:[#allocation2 + $0x2] ss:$0 sm:$0xff] }
 0x216   : > { %s12321_s2 = scalar_lea.vmem %s17972_s26, %s9347_s10  ;;  %v10497_v50 = vld [vmem:[#allocation10 + $0x44] ss:$16 sps:$4 sm:$0xff]   ;;  %v10499_v51 = vld [vmem:[#allocation10 + $0x4c] ss:$16 sps:$4 sm:$0xff]   ;;  %v10501_v52 = vld [vmem:[#allocation10 + $0x40] ss:$16 sps:$4 sm:$0xff]  }
 0x217   : > { %v1070_v3 = vld [vmem:[%s12321_s2] sm:$0xff]  ;;  %v1072_v4 = vld [vmem:[%s12321_s2 + $0x10] sm:$0xff]  ;;  %v1071_v5 = vld [vmem:[%s12321_s2 + $0x8] sm:$0xff]  ;;  %s12356_s30 = scalar_lea.vmem %s17973_s23, %s9347_s10  ;;  %v17766_v34 = vmov 2131351028   ;;  %s18283_s4 = sld [smem:[#allocation97_spill]] }
 0x218   : > { %1290 = vperm.xlu0 %10393, %v1070_v3   ;;  %1189 = vperm.xlu1 %10392, %v1070_v3   ;;  %v1074_v6 = vld [vmem:[%s12321_s2 + $0x20] sm:$0xff]  ;;  %v1073_v7 = vld [vmem:[%s12321_s2 + $0x18] sm:$0xff]  ;;  %v1075_v8 = vld [vmem:[%s12321_s2 + $0x28] sm:$0xff]  ;;  %v17776_v37 = vmov 2102212464   ;;  %s18285_s11 = sld [smem:[#allocation96_spill]] }
 0x219   : > { %v1077_v9 = vld [vmem:[%s12321_s2 + $0x38] sm:$0xff]  ;;  %v1079_v10 = vld [vmem:[%s12321_s2 + $0x48] sm:$0xff]  ;;  %v1076_v12 = vld [vmem:[%s12321_s2 + $0x30] sm:$0xff]  ;;  %5231 = vmatpush1.bf16.msra.mxu0 %v10495_v39  ;;  %5344 = vmatpush1.bf16.msra.mxu1 %v10496_v40  ;;  %s18286_s7 = sld [smem:[#allocation98_spill]]  ;;  %s18287_s26 = sld [smem:[#allocation41_spill]] }
 0x21a   : > { %v1081_v11 = vld [vmem:[%s12321_s2 + $0x58] sm:$0xff]  ;;  %v1078_v13 = vld [vmem:[%s12321_s2 + $0x40] sm:$0xff]  ;;  %v1080_v14 = vld [vmem:[%s12321_s2 + $0x50] sm:$0xff]  ;;  %5232 = vmatprep.subr.bf16.mxu0 %v10497_v50  ;;  %5345 = vmatprep.subr.bf16.mxu1 %v10499_v51  ;;  %v17780_v51 = vmov 683565275   ;;  %s9848_s23 = sshll.u32 %s11885_s9, 10 }
 0x21b   : > { %v1082_v15 = vld [vmem:[%s12321_s2 + $0x60] sm:$0xff]  ;;  %v1083_v16 = vld [vmem:[%s12321_s2 + $0x68] sm:$0xff]  ;;  %v1085_v17 = vld [vmem:[%s12321_s2 + $0x78] sm:$0xff]  ;;  %s18289_s0 = sld [smem:[#allocation46_spill]]  ;;  %s18290_s6 = sld [smem:[#allocation99_spill]] }
 0x21c   : > { %1298 = vperm.xlu0 %10393, %v1072_v4   ;;  %1193 = vperm.xlu1 %10392, %v1071_v5   ;;  %v1084_v18 = vld [vmem:[%s12321_s2 + $0x70] sm:$0xff]  ;;  %v3085_v19 = vld [vmem:[%s12356_s30 + $0x8] sm:$0xff]  ;;  %v12363_v20 = vld [vmem:[%s12356_s30 + $0x20] sm:$0xff] }
 0x21d   : > { %v12367_v21 = vld [vmem:[%s12356_s30 + $0x38] sm:$0xff]  ;;  %v12371_v22 = vld [vmem:[%s12356_s30 + $0x48] sm:$0xff]  ;;  %v3086_v23 = vld [vmem:[%s12356_s30 + $0x10] sm:$0xff]  ;;  %5233 = vmatpush1.bf16.msra.mxu0 %v10501_v52  ;;  %s18284_s13 = smov %s18283_s4 }
 0x21e   : > { %v12385_v24 = vld [vmem:[%s12356_s30 + $0x50] sm:$0xff]  ;;  %v3096_v25 = vld [vmem:[%s12356_s30 + $0x60] sm:$0xff]  ;;  %v12395_v26 = vld [vmem:[%s12356_s30 + $0x28] sm:$0xff] }
 0x21f   : > { %v12400_v27 = vld [vmem:[%s12356_s30 + $0x30] sm:$0xff]  ;;  %v3084_v28 = vld [vmem:[%s12356_s30] sm:$0xff]  ;;  %v3087_v29 = vld [vmem:[%s12356_s30 + $0x18] sm:$0xff] }
 0x220   : > { %1306 = vperm.xlu0 %10393, %v1074_v6   ;;  %10394 = vset.pattern.permute.xlu1 %v17756_v0  ;;  %v10502_v53 = vld [vmem:[#allocation10 + $0x48] ss:$16 sps:$4 sm:$0xff]  }
 0x221   : > { %1294 = vperm.xlu1 %10394, %v1071_v5   ;;  %5346 = vmatpush1.bf16.msra.mxu1 %v10502_v53  ;;  %v12430_v55 = vld [vmem:[#allocation5] ss:$0 sm:$0xff]  ;;  %s17644_s3 = scalar_lea.hbm %s18290_s6, %s9848_s23  ;;  %p18291_p10 = scmp.ne.s32.totalorder %s18289_s0, 0 }
 0x224   : > { %10400 = vset.pattern.permute.xlu0 %v17761_v2 }
 0x225   : > { %1089 = vperm.xlu0 %10400, %v1070_v3   ;;  %10395 = vset.pattern.permute.xlu1 %v17761_v2 }
 0x226   : > { %1099 = vperm.xlu1 %10395, %v1072_v4  }
 0x229   : > { %1094 = vperm.xlu0 %10400, %v1071_v5  }
 0x22a   : > { %10396 = vset.pattern.permute.xlu1 %v17758_v1 }
 0x22b   : > { %1197 = vperm.xlu1 %10396, %v1072_v4  }
 0x22d   : > { %1104 = vperm.xlu0 %10400, %v1073_v7  }
 0x22f   : > { %1201 = vperm.xlu1 %10396, %v1073_v7  }
 0x231   : > { %1114 = vperm.xlu0 %10400, %v1075_v8  }
 0x233   : > { %10397 = vset.pattern.permute.xlu1 %v17756_v0 }
 0x234   : > { %1302 = vperm.xlu1 %10397, %v1073_v7   ;;  %v3092_v7 = vld [vmem:[%s12356_s30 + $0x40] sm:$0xff] }
 0x235   : > { %1124 = vperm.xlu0 %10400, %v1077_v9  }
 0x238   : > { %10398 = vset.pattern.permute.xlu1 %v17761_v2 }
 0x239   : > { %1109 = vperm.xlu1 %10398, %v1074_v6   ;;  %1134 = vperm.xlu0 %10400, %v1079_v10  }
 0x23d   : > { %10399 = vset.pattern.permute.xlu1 %v17758_v1  ;;  %1144 = vperm.xlu0 %10400, %v1081_v11  }
 0x23e   : > { %1205 = vperm.xlu1 %10399, %v1074_v6  }
 0x241   : > { %10409 = vset.pattern.permute.xlu0 %v17756_v0 }
 0x242   : > { %1209 = vperm.xlu1 %10399, %v1075_v8   ;;  %1314 = vperm.xlu0 %10409, %v1076_v12  }
 0x246   : > { %10401 = vset.pattern.permute.xlu1 %v17756_v0  ;;  %1322 = vperm.xlu0 %10409, %v1078_v13  }
 0x247   : > { %1310 = vperm.xlu1 %10401, %v1075_v8  }
 0x24a   : > { %1330 = vperm.xlu0 %10409, %v1080_v14  }
 0x24b   : > { %10402 = vset.pattern.permute.xlu1 %v17761_v2 }
 0x24c   : > { %1119 = vperm.xlu1 %10402, %v1076_v12  }
 0x24e   : > { %1338 = vperm.xlu0 %10409, %v1082_v15  }
 0x250   : > { %10403 = vset.pattern.permute.xlu1 %v17758_v1 }
 0x251   : > { %1213 = vperm.xlu1 %10403, %v1076_v12  }
 0x252   : > { %10414 = vset.pattern.permute.xlu0 %v17761_v2 }
 0x253   : > { %1154 = vperm.xlu0 %10414, %v1083_v16  }
 0x255   : > { %1217 = vperm.xlu1 %10403, %v1077_v9  }
 0x257   : > { %1164 = vperm.xlu0 %10414, %v1085_v17  }
 0x259   : > { %10404 = vset.pattern.permute.xlu1 %v17756_v0 }
 0x25a   : > { %1318 = vperm.xlu1 %10404, %v1077_v9  }
 0x25b   : > { %10418 = vset.pattern.permute.xlu0 %v17756_v0 }
 0x25c   : > { %1346 = vperm.xlu0 %10418, %v1084_v18  }
 0x25e   : > { %10405 = vset.pattern.permute.xlu1 %v17761_v2 }
 0x25f   : > { %1129 = vperm.xlu1 %10405, %v1078_v13  }
 0x260   : > { %3308 = vperm.xlu0 %10418, %v3085_v19  }
 0x263   : > { %10406 = vset.pattern.permute.xlu1 %v17758_v1 }
 0x264   : > { %1221 = vperm.xlu1 %10406, %v1078_v13   ;;  %3320 = vperm.xlu0 %10418, %v12363_v20  }
 0x268   : > { %1225 = vperm.xlu1 %10406, %v1079_v10   ;;  %3332 = vperm.xlu0 %10418, %v12367_v21  }
 0x26c   : > { %10407 = vset.pattern.permute.xlu1 %v17756_v0  ;;  %3340 = vperm.xlu0 %10418, %v12371_v22  }
 0x26d   : > { %1326 = vperm.xlu1 %10407, %v1079_v10  }
 0x270   : > { %10435 = vset.pattern.permute.xlu0 %v17761_v2 }
 0x271   : > { %10408 = vset.pattern.permute.xlu1 %v17761_v2  ;;  %3108 = vperm.xlu0 %10435, %v3085_v19  }
 0x272   : > { %1139 = vperm.xlu1 %10408, %v1080_v14  }
 0x275   : > { %3113 = vperm.xlu0 %10435, %v3086_v23  }
 0x276   : > { %10410 = vset.pattern.permute.xlu1 %v17758_v1 }
 0x277   : > { %1229 = vperm.xlu1 %10410, %v1080_v14  }
 0x279   : > { %3123 = vperm.xlu0 %10435, %v12363_v20  }
 0x27b   : > { %1233 = vperm.xlu1 %10410, %v1081_v11  }
 0x27d   : > { %3148 = vperm.xlu0 %10435, %v12371_v22  }
 0x27f   : > { %10411 = vset.pattern.permute.xlu1 %v17756_v0 }
 0x280   : > { %1334 = vperm.xlu1 %10411, %v1081_v11  }
 0x281   : > { %3153 = vperm.xlu0 %10435, %v12385_v24  }
 0x284   : > { %10412 = vset.pattern.permute.xlu1 %v17761_v2 }
 0x285   : > { %1149 = vperm.xlu1 %10412, %v1082_v15   ;;  %3163 = vperm.xlu0 %10435, %v3096_v25  }
 0x289   : > { %10413 = vset.pattern.permute.xlu1 %v17758_v1  ;;  %10436 = vset.pattern.permute.xlu0 %v17758_v1 }
 0x28a   : > { %1237 = vperm.xlu1 %10413, %v1082_v15   ;;  %3211 = vperm.xlu0 %10436, %v3086_v23  }
 0x28e   : > { %1241 = vperm.xlu1 %10413, %v1083_v16   ;;  %3223 = vperm.xlu0 %10436, %v12395_v26  }
 0x292   : > { %10415 = vset.pattern.permute.xlu1 %v17756_v0  ;;  %3227 = vperm.xlu0 %10436, %v12400_v27  }
 0x293   : > { %1342 = vperm.xlu1 %10415, %v1083_v16  }
 0x296   : > { %3243 = vperm.xlu0 %10436, %v12385_v24  }
 0x297   : > { %10416 = vset.pattern.permute.xlu1 %v17761_v2  ;;  %v1291_v30 = vpop.permute.xlu0 %1290  ;;  %v1190_v44 = vpop.permute.xlu1 %1189 }
 0x298   : > { %1159 = vperm.xlu1 %10416, %v1084_v18   ;;  %v1256_v46 = vmul.f32 %v12419_v43, %v1190_v44  ;;  %v1357_v48 = vmul.f32 %v12425_v47, %v1291_v30 }
 0x29b   : > { %v12411_v31 = vpop.permute.xlu0 %1298  ;;  %v1194_v56 = vpop.permute.xlu1 %1193 }
 0x29c   : > { %10417 = vset.pattern.permute.xlu1 %v17758_v1  ;;  %v1257_v61 = vmul.f32 %v12419_v43, %v1194_v56 }
 0x29d   : > { %1245 = vperm.xlu1 %10417, %v1084_v18  }
 0x29f   : > { %v12413_v36 = vpop.permute.xlu0 %1306 }
 0x2a0   : > { %v1295_v62 = vpop.permute.xlu1 %1294 }
 0x2a1   : > { %1249 = vperm.xlu1 %10417, %v1085_v17   ;;  %v1358_v4 = vmul.f32 %v12425_v47, %v1295_v62 }
 0x2a4   : > { %v1090_v42 = vpop.permute.xlu0 %1089 }
 0x2a5   : > { %10419 = vset.pattern.permute.xlu1 %v17756_v0  ;;  %v1171_v45 = vmul.f32 %v12417_v41, %v1090_v42  ;;  %v12450_v10 = vpop.permute.xlu1 %1099 }
 0x2a6   : > { %1350 = vperm.xlu1 %10419, %v1085_v17   ;;  %v3095_v17 = vld [vmem:[%s12356_s30 + $0x58] sm:$0xff] }
 0x2a7   : > { %v1272_v49 = vadd.f32 %v1256_v46, %v1171_v45  ;;  %v17792_v45 = vmov 2475754826  }
 0x2a8   : > { %v1095_v58 = vpop.permute.xlu0 %1094 }
 0x2a9   : > { %v1373_v54 = vadd.f32 %v1357_v48, %v1272_v49  ;;  %v1172_v59 = vmul.f32 %v12417_v41, %v1095_v58 }
 0x2aa   : > { %10420 = vset.pattern.permute.xlu1 %v17761_v2  ;;  %v12454_v14 = vpop.permute.xlu1 %1197 }
 0x2ab   : > { %3103 = vperm.xlu1 %10420, %v3084_v28   ;;  %v12434_v57 = vadd.f32 %v12430_v55, %v1373_v54  ;;  %v1273_v63 = vadd.f32 %v1257_v61, %v1172_v59 }
 0x2ad   : > { %v1415_v60 = vand.u32 2139095040, %v12434_v57  ;;  %v1374_v5 = vadd.f32 %v1358_v4, %v1273_v63 }
 0x2ae   : > { %v1202_v18 = vpop.permute.xlu1 %1201 }
 0x2af   : > { %10421 = vset.pattern.permute.xlu1 %v17758_v1  ;;  %v1416_v3 = vshrl.u32 %v1415_v60, 23  ;;  %v12447_v8 = vadd.f32 %v12430_v55, %v1374_v5  ;;  %v1259_v32 = vmul.f32 %v12419_v43, %v1202_v18 }
 0x2b0   : > { %3203 = vperm.xlu1 %10421, %v3084_v28  }
 0x2b1   : > { %v9354_v6 = vadd.s32 4294967169, %v1416_v3  ;;  %v1519_v11 = vand.u32 2139095040, %v12447_v8  ;;  %v17764_v18 = vand.u32 2147483647, %v12447_v8 }
 0x2b3   : > { %v1422_v9 = vadd.s32 1, %v9354_v6  ;;  %v1520_v13 = vshrl.u32 %v1519_v11, 23 }
 0x2b4   : > { %3207 = vperm.xlu1 %10421, %v3085_v19  }
 0x2b5   : > { %vm1423_vm0 = vcmp.gt.s32.totalorder %v1422_v9, 0  ;;  %v9358_v16 = vadd.s32 4294967169, %v1520_v13 }
 0x2b6   : > { %v1424_v12 = vsel %vm1423_vm0, %v1422_v9, 0 }
 0x2b7   : > { %v1426_v15 = vand.u32 31, %v1424_v12  ;;  %v12470_v33 = vshrl.u32 %v1424_v12, 5 }
 0x2b8   : > { %10422 = vset.pattern.permute.xlu1 %v17761_v2 }
 0x2b9   : > { %3118 = vperm.xlu1 %10422, %v3087_v29   ;;  %v12458_v19 = vsub.s32 32, %v1426_v15  ;;  %v1438_v39 = vshll.u32 %v17776_v37, %v1426_v15  ;;  %v1432_v48 = vshll.u32 %v17792_v45, %v1426_v15  ;;  %v1435_v49 = vshll.u32 %v17766_v34, %v1426_v15 }
 0x2ba   : > { %v1429_v52 = vshll.u32 %v17780_v51, %v1426_v15  ;;  %vm1447_vm2 = vcmp.lt.s32.totalorder %v12470_v33, 4  ;;  %vm1444_vm3 = vcmp.lt.s32.totalorder %v12470_v33, 1  ;;  %vm1446_vm4 = vcmp.lt.s32.totalorder %v12470_v33, 3 }
 0x2bb   : > { %v1433_v35 = vshrl.u32 %v17766_v34, %v12458_v19  ;;  %v1436_v38 = vshrl.u32 %v17776_v37, %v12458_v19  ;;  %v1430_v46 = vshrl.u32 %v17792_v45, %v12458_v19  ;;  %vm1445_vm5 = vcmp.lt.s32.totalorder %v12470_v33, 2 }
 0x2bd   : > { %10423 = vset.pattern.permute.xlu1 %v17758_v1  ;;  %v1434_v56 = vor.u32 %v1433_v35, %v1432_v48  ;;  %v1437_v58 = vor.u32 %v1436_v38, %v1435_v49  ;;  %v1431_v62 = vor.u32 %v1430_v46, %v1429_v52 }
 0x2be   : > { %3215 = vperm.xlu1 %10423, %v3087_v29  }
 0x2bf   : > { %v1456_v4 = vsel %vm1444_vm3, %v1434_v56, %v1437_v58  ;;  %v1452_v9 = vsel %vm1444_vm3, %v1431_v62, %v1434_v56 }
 0x2c2   : > { %10424 = vset.pattern.permute.xlu1 %v17756_v0 }
 0x2c3   : > { %3304 = vperm.xlu1 %10424, %v3084_v28  }
 0x2c7   : > { %3312 = vperm.xlu1 %10424, %v3086_v23   ;;  %v17768_v23 = vmov 1326507024  }
 0x2c8   : > { %v1442_v25 = vshrl.u32 %v17768_v23, %v12458_v19 }
 0x2cb   : > { %3316 = vperm.xlu1 %10424, %v3087_v29  }
 0x2cf   : > { %10425 = vset.pattern.permute.xlu1 %v17761_v2 }
 0x2d0   : > { %3128 = vperm.xlu1 %10425, %v12395_v26  }
 0x2d4   : > { %10426 = vset.pattern.permute.xlu1 %v17758_v1 }
 0x2d5   : > { %3219 = vperm.xlu1 %10426, %v12363_v20   ;;  %v1526_v20 = vadd.s32 1, %v9358_v16 }
 0x2d7   : > { %vm1527_vm1 = vcmp.gt.s32.totalorder %v1526_v20, 0 }
 0x2d8   : > { %v1528_v42 = vsel %vm1527_vm1, %v1526_v20, 0 }
 0x2d9   : > { %10427 = vset.pattern.permute.xlu1 %v17761_v2  ;;  %v1530_v59 = vand.u32 31, %v1528_v42 }
 0x2da   : > { %3133 = vperm.xlu1 %10427, %v12400_v27  }
 0x2db   : > { %v12498_v6 = vsub.s32 32, %v1530_v59  ;;  %v1539_v46 = vshll.u32 %v17766_v34, %v1530_v59 }
 0x2dd   : > { %v1546_v20 = vshrl.u32 %v17768_v23, %v12498_v6 }
 0x2de   : > { %3138 = vperm.xlu1 %10427, %v12367_v21  }
 0x2e2   : > { %10428 = vset.pattern.permute.xlu1 %v17758_v1 }
 0x2e3   : > { %3231 = vperm.xlu1 %10428, %v12367_v21   ;;  %v1105_v21 = vpop.permute.xlu0 %1104 }
 0x2e4   : > { %v1174_v30 = vmul.f32 %v12417_v41, %v1105_v21 }
 0x2e6   : > { %v1275_v54 = vadd.f32 %v1259_v32, %v1174_v30  ;;  %v1537_v30 = vshrl.u32 %v17766_v34, %v12498_v6  ;;  %v1540_v32 = vshrl.u32 %v17776_v37, %v12498_v6 }
 0x2e7   : > { %10429 = vset.pattern.permute.xlu1 %v17756_v0 }
 0x2e8   : > { %3324 = vperm.xlu1 %10429, %v12395_v26   ;;  %v17765_v26 = vand.u32 2147483647, %v12434_v57 }
 0x2ea   : > { %v1419_v50 = vand.u32 8388607, %v17765_v26 }
 0x2ec   : > { %3328 = vperm.xlu1 %10429, %v12400_v27   ;;  %v1303_v27 = vpop.permute.xlu1 %1302  ;;  %v1420_v3 = vor.u32 8388608, %v1419_v50  ;;  %v1523_v50 = vand.u32 8388607, %v17764_v18 }
 0x2ed   : > { %v1360_v44 = vmul.f32 %v12425_v47, %v1303_v27 }
 0x2ee   : > { %v1460_v13 = vshll.u32 %v1420_v3, 8 }
 0x2ef   : > { %v1376_v61 = vadd.f32 %v1360_v44, %v1275_v54  ;;  %v1536_v44 = vshll.u32 %v17792_v45, %v1530_v59 }
 0x2f0   : > { %10430 = vset.pattern.permute.xlu1 %v17761_v2  ;;  %v12513_v16 = vpop.permute.xlu1 %1109 }
 0x2f1   : > { %3143 = vperm.xlu1 %10430, %v3092_v7   ;;  %v1538_v54 = vor.u32 %v1537_v30, %v1536_v44 }
 0x2f4   : > { %v12544_v52 = vpop.permute.xlu1 %1205 }
 0x2f5   : > { %10431 = vset.pattern.permute.xlu1 %v17758_v1 }
 0x2f6   : > { %3235 = vperm.xlu1 %10431, %v3092_v7  }
 0x2fa   : > { %3239 = vperm.xlu1 %10431, %v12371_v22   ;;  %v17778_v22 = vmov 920167782  }
 0x2fb   : > { %v1439_v28 = vshrl.u32 %v17778_v22, %v12458_v19  ;;  %v1441_v29 = vshll.u32 %v17778_v22, %v1426_v15  ;;  %v1543_v15 = vshrl.u32 %v17778_v22, %v12498_v6  ;;  %v1545_v35 = vshll.u32 %v17778_v22, %v1530_v59 }
 0x2fd   : > { %v1443_v40 = vor.u32 %v1442_v25, %v1441_v29  ;;  %v1440_v53 = vor.u32 %v1439_v28, %v1438_v39  ;;  %v12524_v28 = vshrl.u32 %v1528_v42, 5  ;;  %v1542_v29 = vshll.u32 %v17776_v37, %v1530_v59 }
 0x2fe   : > { %10432 = vset.pattern.permute.xlu1 %v17761_v2  ;;  %v1547_v48 = vor.u32 %v1546_v20, %v1545_v35  ;;  %v1210_v20 = vpop.permute.xlu1 %1209 }
 0x2ff   : > { %3158 = vperm.xlu1 %10432, %v3095_v17   ;;  %v1457_v60 = vsel %vm1447_vm2, %v1443_v40, 1326507024  ;;  %v1453_v63 = vsel %vm1447_vm2, %v1440_v53, 920167782  ;;  %v1533_v40 = vshll.u32 %v17780_v51, %v1530_v59  ;;  %v1544_v42 = vor.u32 %v1543_v15, %v1542_v29 }
 0x300   : > { %v1458_v5 = vsel %vm1446_vm4, %v1440_v53, %v1457_v60  ;;  %v1454_v11 = vsel %vm1446_vm4, %v1437_v58, %v1453_v63  ;;  %v1541_v60 = vor.u32 %v1540_v32, %v1539_v46  ;;  %vm1551_vm6 = vcmp.lt.s32.totalorder %v12524_v28, 4 }
 0x301   : > { %v1459_v12 = vsel %vm1445_vm5, %v1456_v4, %v1458_v5  ;;  %v1557_v63 = vsel %vm1551_vm6, %v1544_v42, 920167782  ;;  %v1428_v59 = vshrl.u32 %v17780_v51, %v12458_v19  ;;  %v1561_v3 = vsel %vm1551_vm6, %v1547_v48, 1326507024 }
 0x302   : > { %v12521_v25 = vmul.u32.u64.low %v1460_v13, %v1459_v12  ;;  %v12522_v27 = vmul.u32.u64.high %v1460_v13, %v1459_v12, %v12521_v25  ;;  %v1524_v5 = vor.u32 8388608, %v1523_v50  ;;  %vm1548_vm7 = vcmp.lt.s32.totalorder %v12524_v28, 1  ;;  %v1311_v33 = vpop.permute.xlu1 %1310 }
 0x303   : > { %10433 = vset.pattern.permute.xlu1 %v17758_v1  ;;  %vm1550_vm8 = vcmp.lt.s32.totalorder %v12524_v28, 3  ;;  %v1560_v15 = vsel %vm1548_vm7, %v1538_v54, %v1541_v60  ;;  %vm1549_vm10 = vcmp.lt.s32.totalorder %v12524_v28, 2 }
 0x304   : > { %3247 = vperm.xlu1 %10433, %v3095_v17   ;;  %v1558_v19 = vsel %vm1550_vm8, %v1541_v60, %v1557_v63  ;;  %v1564_v29 = vshll.u32 %v1524_v5, 8  ;;  %v1532_v63 = vshrl.u32 %v17780_v51, %v12498_v6 }
 0x308   : > { %10434 = vset.pattern.permute.xlu1 %v17756_v0 }
 0x309   : > { %3336 = vperm.xlu1 %10434, %v3092_v7   ;;  %v12502_v7 = vadd.f32 %v12430_v55, %v1376_v61  ;;  %v1449_v61 = vsel %vm1447_vm2, %v1437_v58, 2102212464 }
 0x30a   : > { %v1450_v58 = vsel %vm1446_vm4, %v1434_v56, %v1449_v61  ;;  %v1553_v61 = vsel %vm1551_vm6, %v1541_v60, 2102212464  ;;  %v1173_v60 = vmul.f32 %v12417_v41, %v12450_v10 }
 0x30b   : > { %v1727_v21 = vand.u32 2139095040, %v12502_v7 }
 0x30d   : > { %3344 = vperm.xlu1 %10434, %v12385_v24   ;;  %v1455_v24 = vsel %vm1445_vm5, %v1452_v9, %v1454_v11  ;;  %v1728_v49 = vshrl.u32 %v1727_v21, 23  ;;  %v1448_v9 = vsel %vm1444_vm3, %v1428_v59, %v1431_v62 }
 0x30e   : > { %v12534_v38 = vmul.u32.u64.low %v1460_v13, %v1455_v24  ;;  %v12535_v39 = vmul.u32.u64.high %v1460_v13, %v1455_v24, %v12534_v38  ;;  %v1562_v24 = vsel %vm1550_vm8, %v1544_v42, %v1561_v3  ;;  %v1451_v62 = vsel %vm1445_vm5, %v1448_v9, %v1450_v58 }
 0x30f   : > { %v9366_v4 = vadd.s32 4294967169, %v1728_v49  ;;  %v1563_v25 = vsel %vm1549_vm10, %v1560_v15, %v1562_v24  ;;  %v1467_v32 = vmul.u32 %v1460_v13, %v1451_v62  ;;  %v1261_v49 = vmul.f32 %v12419_v43, %v1210_v20  ;;  %v1120_v20 = vpop.permute.xlu1 %1119  ;;  %v10505_v62 = vld [vmem:[#allocation10 + $0x6c] ss:$16 sps:$4 sm:$0x3f]  }
 0x310   : > { %v1470_v12 = vadd.s32 1, %v12535_v39  ;;  %vm1469_vm9 = vc.u32 %v12522_v27, %v12534_v38  ;;  %v12584_v42 = vmul.u32.u64.low %v1564_v29, %v1563_v25  ;;  %v12585_v44 = vmul.u32.u64.high %v1564_v29, %v1563_v25, %v12584_v42  ;;  %9511 = vmatprep.subr.msk.bf16.mxu1 %vm5215_vm13, %v10505_v62 }
 0x311   : > { %3348 = vperm.xlu1 %10434, %v3095_v17   ;;  %v1534_v17 = vshrl.u32 %v17792_v45, %v12498_v6  ;;  %v1734_v56 = vadd.s32 1, %v9366_v4  ;;  %v1362_v13 = vmul.f32 %v12425_v47, %v1311_v33  ;;  %v1258_v3 = vmul.f32 %v12419_v43, %v12454_v14 }
 0x312   : > { %v1471_v30 = vsel %vm1469_vm9, %v1470_v12, %v12535_v39  ;;  %v1554_v58 = vsel %vm1550_vm8, %v1538_v54, %v1553_v61  ;;  %v1359_v6 = vmul.f32 %v12425_v47, %v12411_v31 }
 0x313   : > { %v1535_v53 = vor.u32 %v1534_v17, %v1533_v40  ;;  %v1115_v17 = vpop.permute.xlu0 %1114  ;;  %vm1735_vm11 = vcmp.gt.s32.totalorder %v1734_v56, 0  ;;  %v1472_v46 = vadd.s32 %v1471_v30, %v1467_v32  ;;  %v1274_v12 = vadd.f32 %v1258_v3, %v1173_v60 }
 0x314   : > { %v1176_v48 = vmul.f32 %v12417_v41, %v1115_v17  ;;  %v1736_v50 = vsel %vm1735_vm11, %v1734_v56, 0  ;;  %v10503_v56 = vld [vmem:[#allocation10 + $0x64] ss:$16 sps:$4 sm:$0x3f]   ;;  %v17760_v30 = vand.u32 2147483647, %v12502_v7 }
 0x315   : > { %10437 = vset.pattern.permute.xlu1 %v17761_v2  ;;  %v1556_v11 = vsel %vm1548_vm7, %v1535_v53, %v1538_v54  ;;  %v1473_v59 = vadd.s32 536870912, %v1472_v46  ;;  %v1738_v4 = vand.u32 31, %v1736_v50  ;;  %v1552_v9 = vsel %vm1548_vm7, %v1532_v63, %v1535_v53  ;;  %9502 = vmatprep.subr.msk.bf16.mxu0 %vm5215_vm13, %v10503_v56 }
 0x316   : > { %v1559_v21 = vsel %vm1549_vm10, %v1556_v11, %v1558_v19  ;;  %v1277_v5 = vadd.f32 %v1261_v49, %v1176_v48  ;;  %v1555_v53 = vsel %vm1549_vm10, %v1552_v9, %v1554_v58  ;;  %v1375_v25 = vadd.f32 %v1359_v6, %v1274_v12 }
 0x317   : > { %v12580_v35 = vmul.u32.u64.low %v1564_v29, %v1559_v21  ;;  %v12581_v40 = vmul.u32.u64.high %v1564_v29, %v1559_v21, %v12580_v35  ;;  %v12591_v39 = vpop.permute.xlu0 %1124  ;;  %v12609_v14 = vshrl.u32 %v1473_v59, 30  ;;  %v12613_v15 = vsub.s32 32, %v1738_v4 }
 0x318   : > { %v1378_v19 = vadd.f32 %v1362_v13, %v1277_v5  ;;  %v1571_v31 = vmul.u32 %v1564_v29, %v1555_v53  ;;  %v1750_v42 = vshll.u32 %v17776_v37, %v1738_v4  ;;  %v12633_v48 = vshrl.u32 %v1736_v50, 5  ;;  %v1214_v5 = vpop.permute.xlu1 %1213 }
 0x319   : > { %v1574_v11 = vadd.s32 1, %v12581_v40  ;;  %vm1573_vm12 = vc.u32 %v12585_v44, %v12580_v35  ;;  %v1475_v21 = vshll.u32 %v12609_v14, 30  ;;  %v1751_v28 = vshrl.u32 %v17778_v22, %v12613_v15 }
 0x31a   : > { %v12619_v24 = vadd.f32 %v12430_v55, %v1378_v19  ;;  %v1754_v32 = vshrl.u32 %v17768_v23, %v12613_v15  ;;  %v1745_v49 = vshrl.u32 %v17766_v34, %v12613_v15  ;;  %v1748_v61 = vshrl.u32 %v17776_v37, %v12613_v15 }
 0x31b   : > { %v12615_v54 = vpop.permute.xlu0 %1134  ;;  %v1575_v10 = vsel %vm1573_vm12, %v1574_v11, %v12581_v40  ;;  %v1742_v40 = vshrl.u32 %v17792_v45, %v12613_v15  ;;  %v1753_v13 = vshll.u32 %v17778_v22, %v1738_v4  ;;  %v12642_v63 = vsub.s32 %v1472_v46, %v1475_v21 }
 0x31c   : > { %17974 = vst [vmem:[#allocation48_spill] sm:$0xff] %v12619_v24  ;;  %v1576_v17 = vadd.s32 %v1575_v10, %v1571_v31  ;;  %v1935_v29 = vand.u32 2139095040, %v12619_v24  ;;  %v12645_v59 = vadd.f32 %v12430_v55, %v1375_v25  ;;  %v1741_v50 = vshll.u32 %v17780_v51, %v1738_v4 }
 0x31d   : > { %v1752_v3 = vor.u32 %v1751_v28, %v1750_v42  ;;  %v1744_v58 = vshll.u32 %v17792_v45, %v1738_v4  ;;  %v1747_v60 = vshll.u32 %v17766_v34, %v1738_v4  ;;  %v1755_v11 = vor.u32 %v1754_v32, %v1753_v13 }
 0x31e   : > { %v1577_v9 = vadd.s32 536870912, %v1576_v17  ;;  %v1731_v19 = vand.u32 8388607, %v17760_v30  ;;  %v1743_v6 = vor.u32 %v1742_v40, %v1741_v50  ;;  %v1936_v53 = vshrl.u32 %v1935_v29, 23 }
 0x31f   : > { %v12631_v33 = vpop.permute.xlu0 %1144  ;;  %v1746_v46 = vor.u32 %v1745_v49, %v1744_v58  ;;  %v1749_v12 = vor.u32 %v1748_v61, %v1747_v60  ;;  %vm1759_vm14 = vcmp.lt.s32.totalorder %v12633_v48, 4  ;;  %v1262_v10 = vmul.f32 %v12419_v43, %v1214_v5 }
 0x320   : > { %v1623_v31 = vand.u32 2139095040, %v12645_v59  ;;  %v1765_v56 = vsel %vm1759_vm14, %v1752_v3, 920167782  ;;  %v1478_v4 = vsub.s32 0, %v12642_v63  ;;  %v12658_v21 = vshrl.u32 %v1577_v9, 30 }
 0x321   : > { %v1769_v25 = vsel %vm1759_vm14, %v1755_v11, 1326507024  ;;  %v1177_v28 = vmul.f32 %v12417_v41, %v1120_v20  ;;  %v1732_v32 = vor.u32 8388608, %v1731_v19  ;;  %vm1756_vm15 = vcmp.lt.s32.totalorder %v12633_v48, 1 }
 0x322   : > { %vm1758_vm0 = vcmp.lt.s32.totalorder %v12633_v48, 3  ;;  %v9374_v40 = vadd.s32 4294967169, %v1936_v53  ;;  %v1764_v42 = vsel %vm1756_vm15, %v1743_v6, %v1746_v46  ;;  %v1768_v13 = vsel %vm1756_vm15, %v1746_v46, %v1749_v12 }
 0x323   : > { %v1315_v62 = vpop.permute.xlu0 %1314  ;;  %v1766_v29 = vsel %vm1758_vm0, %v1749_v12, %v1765_v56  ;;  %v1278_v49 = vadd.f32 %v1262_v10, %v1177_v28  ;;  %v1770_v20 = vsel %vm1758_vm0, %v1752_v3, %v1769_v25  ;;  %v1579_v50 = vshll.u32 %v12658_v21, 30 }
 0x324   : > { %v1363_v61 = vmul.f32 %v12425_v47, %v1315_v62  ;;  %vm1757_vm1 = vcmp.lt.s32.totalorder %v12633_v48, 2  ;;  %v1624_v5 = vshrl.u32 %v1623_v31, 23  ;;  %v1942_v58 = vadd.s32 1, %v9374_v40 }
 0x325   : > { %v1767_v9 = vsel %vm1757_vm1, %v1764_v42, %v1766_v29  ;;  %v9355_v60 = vmin.u32 %v1478_v4, %v12642_v63  ;;  %v1771_v11 = vsel %vm1757_vm1, %v1768_v13, %v1770_v20  ;;  %v1772_v19 = vshll.u32 %v1732_v32, 8 }
 0x326   : > { %v1379_v53 = vadd.f32 %v1363_v61, %v1278_v49  ;;  %v12681_v10 = vsub.s32 %v1576_v17, %v1579_v50  ;;  %v9362_v62 = vadd.s32 4294967169, %v1624_v5  ;;  %vm1943_vm2 = vcmp.gt.s32.totalorder %v1942_v58, 0 }
 0x327   : > { %v12683_v56 = vmul.u32.u64.low %v1772_v19, %v1767_v9  ;;  %v12684_v3 = vmul.u32.u64.high %v1772_v19, %v1767_v9, %v12683_v56  ;;  %v12687_v25 = vmul.u32.u64.low %v1772_v19, %v1771_v11  ;;  %v12688_v31 = vmul.u32.u64.high %v1772_v19, %v1771_v11, %v12687_v25  ;;  %v1218_v11 = vpop.permute.xlu1 %1217 }
 0x328   : > { %v1480_v28 = vclz %v9355_v60  ;;  %v12691_v40 = vadd.f32 %v12430_v55, %v1379_v53  ;;  %v1582_v4 = vsub.s32 0, %v12681_v10  ;;  %v1761_v32 = vsel %vm1759_vm14, %v1749_v12, 2102212464 }
 0x329   : > { %v1944_v17 = vsel %vm1943_vm2, %v1942_v58, 0  ;;  %v1630_v42 = vadd.s32 1, %v9362_v62  ;;  %v1740_v29 = vshrl.u32 %v17780_v51, %v12613_v15  ;;  %v1762_v20 = vsel %vm1758_vm0, %v1746_v46, %v1761_v32 }
 0x32a   : > { %v9356_v49 = vadd.s32 4294967294, %v1480_v28  ;;  %v2039_v61 = vand.u32 2139095040, %v12691_v40  ;;  %v1946_v50 = vand.u32 31, %v1944_v17  ;;  %v9359_v5 = vmin.u32 %v1582_v4, %v12681_v10 }
 0x32b   : > { %v1760_v13 = vsel %vm1756_vm15, %v1740_v29, %v1743_v6  ;;  %v1782_v9 = vadd.s32 1, %v12684_v3  ;;  %v1260_v12 = vmul.f32 %v12419_v43, %v12544_v52  ;;  %vm1631_vm3 = vcmp.gt.s32.totalorder %v1630_v42, 0 }
 0x32c   : > { %vm1781_vm4 = vc.u32 %v12688_v31, %v12683_v56  ;;  %vm9357_vm5 = vcmp.lt.s32.totalorder %v9356_v49, 0  ;;  %v1763_v15 = vsel %vm1757_vm1, %v1760_v13, %v1762_v20  ;;  %v1175_v6 = vmul.f32 %v12417_v41, %v12513_v16 }
 0x32d   : > { %v2040_v46 = vshrl.u32 %v2039_v61, 23  ;;  %v1361_v58 = vmul.f32 %v12425_v47, %v12413_v36  ;;  %v12715_v60 = vsub.s32 32, %v1946_v50  ;;  %v1584_v53 = vclz %v9359_v5 }
 0x32e   : > { %v12717_v52 = vsel %vm1631_vm3, %v1630_v42, 0  ;;  %v1783_v62 = vsel %vm1781_vm4, %v1782_v9, %v12684_v3  ;;  %v1276_v25 = vadd.f32 %v1260_v12, %v1175_v6  ;;  %v12720_v28 = vsel %vm9357_vm5, 0, %v9356_v49 }
 0x32f   : > { %v1779_v48 = vmul.u32 %v1772_v19, %v1763_v15  ;;  %v9378_v4 = vadd.s32 4294967169, %v2040_v46  ;;  %v12723_v32 = vand.u32 31, %v12717_v52  ;;  %v1178_v36 = vmul.f32 %v12417_v41, %v12591_v39  ;;  %v1319_v39 = vpop.permute.xlu1 %1318 }
 0x330   : > { %v1959_v29 = vshrl.u32 %v17778_v22, %v12715_v60  ;;  %v1488_v42 = vsub.s32 4294967266, %v12720_v28  ;;  %v9360_v61 = vadd.s32 4294967294, %v1584_v53  ;;  %v1377_v3 = vadd.f32 %v1361_v58, %v1276_v25 }
 0x331   : > { %v12725_v16 = vadd.s32 %v1783_v62, %v1779_v48  ;;  %v1263_v49 = vmul.f32 %v12419_v43, %v1218_v11  ;;  %v17763_v19 = vand.u32 2147483647, %v12619_v24  ;;  %v1950_v13 = vshrl.u32 %v17792_v45, %v12715_v60 }
 0x332   : > { %v1958_v20 = vshll.u32 %v17776_v37, %v1946_v50  ;;  %v1962_v5 = vshrl.u32 %v17768_v23, %v12715_v60  ;;  %v12739_v9 = vshrl.u32 %v1944_v17, 5  ;;  %v1953_v12 = vshrl.u32 %v17766_v34, %v12715_v60 }
 0x333   : > { %v1956_v15 = vshrl.u32 %v17776_v37, %v12715_v60  ;;  %v2046_v6 = vadd.s32 1, %v9378_v4  ;;  %v1785_v46 = vadd.s32 536870912, %v12725_v16  ;;  %v1949_v58 = vshll.u32 %v17780_v51, %v1946_v50 }
 0x334   : > { %v1960_v11 = vor.u32 %v1959_v29, %v1958_v20  ;;  %v1961_v53 = vshll.u32 %v17778_v22, %v1946_v50  ;;  %vm9361_vm6 = vcmp.lt.s32.totalorder %v9360_v61, 0  ;;  %v1952_v62 = vshll.u32 %v17792_v45, %v1946_v50 }
 0x335   : > { %v1955_v17 = vshll.u32 %v17766_v34, %v1946_v50  ;;  %v1364_v25 = vmul.f32 %v12425_v47, %v1319_v39  ;;  %v1939_v48 = vand.u32 8388607, %v17763_v19  ;;  %v12753_v0 = vor.u32 %v1950_v13, %v1949_v58 }
 0x336   : > { %v1963_v4 = vor.u32 %v1962_v5, %v1961_v53  ;;  %v1279_v1 = vadd.f32 %v1263_v49, %v1178_v36  ;;  %v12755_v30 = vor.u32 %v1953_v12, %v1952_v62  ;;  %vm1967_vm7 = vcmp.lt.s32.totalorder %v12739_v9, 4  ;;  %v10507_v5 = vld [vmem:[#allocation10 + $0x60] ss:$16 sps:$4 sm:$0x3f]  }
 0x337   : > { %v1957_v2 = vor.u32 %v1956_v15, %v1955_v17  ;;  %vm2047_vm8 = vcmp.gt.s32.totalorder %v2046_v6, 0  ;;  %v1484_v29 = vsub.s32 32, %v12720_v28  ;;  %v12759_v20 = vsel %vm9361_vm6, 0, %v9360_v61  ;;  %v10508_v12 = vld [vmem:[#allocation10 + $0x68] ss:$16 sps:$4 sm:$0x3f]  }
 0x338   : > { %v12761_v50 = vshrl.u32 %v1785_v46, 30  ;;  %v1973_v39 = vsel %vm1967_vm7, %v1960_v11, 920167782  ;;  %v1468_v13 = vadd.s32 %v12534_v38, %v12522_v27  ;;  %v12768_v36 = vadd.f32 %v12430_v55, %v1377_v3 }
 0x339   : > { %v1380_v49 = vadd.f32 %v1364_v25, %v1279_v1  ;;  %vm1964_vm9 = vcmp.lt.s32.totalorder %v12739_v9, 1  ;;  %vm1966_vm10 = vcmp.lt.s32.totalorder %v12739_v9, 3  ;;  %v1977_v61 = vsel %vm1967_vm7, %v1963_v4, 1326507024 }
 0x33a   : > { %17975 = vst [vmem:[#allocation49_spill] sm:$0xff] %v12761_v50  ;;  %17976 = vst [vmem:[#allocation50_spill] sm:$0xff] %v12768_v36  ;;  %v2048_v15 = vsel %vm2047_vm8, %v2046_v6, 0  ;;  %v1489_v46 = vadd.s32 127, %v1488_v42  ;;  %v1940_v58 = vor.u32 8388608, %v1939_v48  ;;  %v1972_v27 = vsel %vm1964_vm9, %v12753_v0, %v12755_v30 }
 0x33b   : > { %v1974_v1 = vsel %vm1966_vm10, %v1957_v2, %v1973_v39  ;;  %v1592_v38 = vsub.s32 4294967266, %v12759_v20  ;;  %v1787_v3 = vshll.u32 %v12761_v50, 30  ;;  %vm1965_vm11 = vcmp.lt.s32.totalorder %v12739_v9, 2 }
 0x33c   : > { %v1976_v6 = vsel %vm1964_vm9, %v12755_v30, %v1957_v2  ;;  %v1978_v42 = vsel %vm1966_vm10, %v1960_v11, %v1977_v61  ;;  %v2050_v53 = vand.u32 31, %v2048_v15  ;;  %v5217_v62 = vsel %vm5215_vm13, %v10507_v5, 0 }
 0x33d   : > { %v5223_v17 = vsel %vm5215_vm13, %v10508_v12, 0  ;;  %v12791_v25 = vshrl.u32 %v12717_v52, 5  ;;  %v1831_v48 = vand.u32 2139095040, %v12768_v36  ;;  %v1975_v4 = vsel %vm1965_vm11, %v1972_v27, %v1974_v1  ;;  %5235 = vmatpush1.bf16.msra.mxu0 %v5217_v62 }
 0x33e   : > { %v12797_v39 = vadd.f32 %v12430_v55, %v1380_v49  ;;  %5348 = vmatpush1.bf16.msra.mxu1 %v5223_v17  ;;  %v1486_v19 = vshrl.u32 %v1468_v13, %v1484_v29  ;;  %v12800_v11 = vsub.s32 32, %v12723_v32  ;;  %v12804_v5 = vshll.u32 %v17776_v37, %v12723_v32 }
 0x33f   : > { %v12806_v52 = vshll.u32 %v1940_v58, 8  ;;  %v1490_v12 = vshll.u32 %v1489_v46, 23  ;;  %v1588_v61 = vsub.s32 32, %v12759_v20  ;;  %v1593_v18 = vadd.s32 127, %v1592_v38 }
 0x340   : > { %17977 = vst [vmem:[#allocation51_spill] sm:$0xff] %v12797_v39  ;;  %v1979_v49 = vsel %vm1965_vm11, %v1976_v6, %v1978_v42  ;;  %v12812_v27 = vsub.s32 %v12725_v16, %v1787_v3  ;;  %v12819_v1 = vsub.s32 32, %v2050_v53  ;;  %v1485_v58 = vshll.u32 %v12642_v63, %v12720_v28 }
 0x341   : > { %v12815_v29 = vmul.u32.u64.low %v12806_v52, %v1975_v4  ;;  %v12816_v13 = vmul.u32.u64.high %v12806_v52, %v1975_v4, %v12815_v29  ;;  %v1572_v46 = vadd.s32 %v12580_v35, %v12585_v44  ;;  %v1832_v38 = vshrl.u32 %v1831_v48, 23 }
 0x342   : > { %v2143_v62 = vand.u32 2139095040, %v12797_v39  ;;  %v12828_v16 = vshrl.u32 %v17778_v22, %v12800_v11  ;;  %v12832_v3 = vshrl.u32 %v17768_v23, %v12800_v11  ;;  %v12838_v17 = vor.u32 %v1486_v19, %v1485_v58 }
 0x343   : > { %v12835_v6 = vmul.u32.u64.low %v12806_v52, %v1979_v49  ;;  %v12836_v42 = vmul.u32.u64.high %v12806_v52, %v1979_v49, %v12835_v6  ;;  %v12840_v63 = vor.u32 4788187, %v1490_v12  ;;  %v1590_v35 = vshrl.u32 %v1572_v46, %v1588_v61 }
 0x344   : > { %v1969_v44 = vsel %vm1967_vm7, %v1957_v2, 2102212464  ;;  %v1594_v28 = vshll.u32 %v1593_v18, 23  ;;  %v1790_v48 = vsub.s32 0, %v12812_v27  ;;  %v1948_v4 = vshrl.u32 %v17780_v51, %v12715_v60 }
 0x345   : > { %v2063_v26 = vshrl.u32 %v17778_v22, %v12819_v1  ;;  %v9370_v34 = vadd.s32 4294967169, %v1832_v38  ;;  %v2066_v19 = vshrl.u32 %v17768_v23, %v12819_v1  ;;  %v2144_v12 = vshrl.u32 %v2143_v62, 23 }
 0x346   : > { %v1968_v2 = vsel %vm1964_vm9, %v1948_v4, %v12753_v0  ;;  %v1970_v18 = vsel %vm1966_vm10, %v12755_v30, %v1969_v44  ;;  %v12858_v61 = vshrl.u32 %v2048_v15, 5  ;;  %v2062_v60 = vshll.u32 %v17776_v37, %v2050_v53 }
 0x347   : > { %v2054_v58 = vshrl.u32 %v17792_v45, %v12819_v1  ;;  %v17978_v46 = vmov 2131351028   ;;  %v2060_v62 = vshrl.u32 %v17776_v37, %v12819_v1  ;;  %v2065_v6 = vshll.u32 %v17778_v22, %v2050_v53 }
 0x348   : > { %v2057_v38 = vshrl.u32 %v17978_v46, %v12819_v1  ;;  %v9367_v0 = vmin.u32 %v1790_v48, %v12812_v27  ;;  %v1990_v4 = vadd.s32 1, %v12816_v13  ;;  %v2053_v30 = vshll.u32 %v17780_v51, %v2050_v53 }
 0x349   : > { %v2064_v15 = vor.u32 %v2063_v26, %v2062_v60  ;;  %v2056_v44 = vshll.u32 %v17792_v45, %v2050_v53  ;;  %v2059_v23 = vshll.u32 %v17978_v46, %v2050_v53  ;;  %v2067_v49 = vor.u32 %v2066_v19, %v2065_v6 }
 0x34a   : > { %v9382_v24 = vadd.s32 4294967169, %v2144_v12  ;;  %v1595_v36 = vor.u32 4788187, %v1594_v28  ;;  %v1971_v50 = vsel %vm1965_vm11, %v1968_v2, %v1970_v18  ;;  %vm1989_vm12 = vc.u32 %v12836_v42, %v12815_v29 }
 0x34b   : > { %v17979_v48 = vand.u32 2147483647, %v12691_v40  ;;  %v12879_v22 = vor.u32 %v2054_v58, %v2053_v30  ;;  %v12881_v51 = vor.u32 %v2057_v38, %v2056_v44  ;;  %v2061_v26 = vor.u32 %v2060_v62, %v2059_v23 }
 0x34c   : > { %vm2071_vm13 = vcmp.lt.s32.totalorder %v12858_v61, 4  ;;  %v1492_v53 = vand.u32 2147483647, %v12840_v63  ;;  %v1589_v28 = vshll.u32 %v12681_v10, %v12759_v20  ;;  %v1838_v9 = vadd.s32 1, %v9370_v34  ;;  %v1130_v63 = vpop.permute.xlu1 %1129 }
 0x34d   : > { %v2043_v37 = vand.u32 8388607, %v17979_v48  ;;  %v2077_v19 = vsel %vm2071_vm13, %v2064_v15, 920167782  ;;  %v1792_v12 = vclz %v9367_v0  ;;  %v1991_v2 = vsel %vm1989_vm12, %v1990_v4, %v12816_v13 }
 0x34e   : > { %v2081_v18 = vsel %vm2071_vm13, %v2067_v49, 1326507024  ;;  %v2150_v60 = vadd.s32 1, %v9382_v24  ;;  %v1591_v58 = vor.u32 %v1590_v35, %v1589_v28  ;;  %v1987_v23 = vmul.u32 %v12806_v52, %v1971_v50 }
 0x34f   : > { %vm2068_vm14 = vcmp.lt.s32.totalorder %v12858_v61, 1  ;;  %vm2070_vm15 = vcmp.lt.s32.totalorder %v12858_v61, 3  ;;  %v1596_v10 = vand.u32 2147483647, %v1595_v36  ;;  %v2044_v34 = vor.u32 8388608, %v2043_v37 }
 0x350   : > { %v2076_v20 = vsel %vm2068_vm14, %v12879_v22, %v12881_v51  ;;  %v2078_v13 = vsel %vm2070_vm15, %v2061_v26, %v2077_v19  ;;  %vm1839_vm0 = vcmp.gt.s32.totalorder %v1838_v9, 0  ;;  %v12901_v24 = vadd.s32 %v1991_v2, %v1987_v23  ;;  %v1222_v44 = vpop.permute.xlu1 %1221  ;;  %v1323_v23 = vpop.permute.xlu0 %1322 }
 0x351   : > { %v2080_v50 = vsel %vm2068_vm14, %v12881_v51, %v2061_v26  ;;  %v2082_v52 = vsel %vm2070_vm15, %v2064_v15, %v2081_v18  ;;  %v1494_v37 = vcvt.s32.f32 %v12838_v17  ;;  %v9368_v36 = vadd.s32 4294967294, %v1792_v12 }
 0x352   : > { %vm2069_vm1 = vcmp.lt.s32.totalorder %v12858_v61, 2  ;;  %vm2151_vm2 = vcmp.gt.s32.totalorder %v2150_v60, 0  ;;  %v1598_v35 = vcvt.s32.f32 %v1591_v58  ;;  %v12912_v49 = vor.u32 %v12828_v16, %v12804_v5 }
 0x353   : > { %v17980_v38 = vmov 920167782   ;;  %v2079_v6 = vsel %vm2069_vm1, %v2076_v20, %v2078_v13  ;;  %vm1414_vm3 = vcmp.lt.s32.totalorder %v12434_v57, 0  ;;  %v1495_v0 = vmul.f32 %v1494_v37, %v1492_v53 }
 0x354   : > { %v1649_v62 = vshll.u32 %v17980_v38, %v12723_v32  ;;  %vm1518_vm4 = vcmp.lt.s32.totalorder %v12447_v8, 0  ;;  %v1840_v17 = vsel %vm1839_vm0, %v1838_v9, 0  ;;  %v2083_v4 = vsel %vm2069_vm1, %v2080_v50, %v2082_v52 }
 0x355   : > { %v12922_v30 = vshll.u32 %v2044_v34, 8  ;;  %v1599_v15 = vmul.f32 %v1598_v35, %v1596_v10  ;;  %vm1655_vm5 = vcmp.lt.s32.totalorder %v12791_v25, 4  ;;  %v1993_v5 = vadd.s32 536870912, %v12901_v24 }
 0x356   : > { %v2152_v16 = vsel %vm2151_vm2, %v2150_v60, 0  ;;  %v1651_v48 = vor.u32 %v12832_v3, %v1649_v62  ;;  %vm9369_vm6 = vcmp.lt.s32.totalorder %v9368_v36, 0  ;;  %v12935_v9 = vsel %vm1655_vm5, %v12912_v49, 920167782 }
 0x357   : > { %v12928_v53 = vmul.u32.u64.low %v12922_v30, %v2079_v6  ;;  %v12929_v28 = vmul.u32.u64.high %v12922_v30, %v2079_v6, %v12928_v53  ;;  %v12937_v19 = vand.u32 31, %v1840_v17  ;;  %v1496_v18 = vxor.u32 2147483648, %v1495_v0 }
 0x358   : > { %v12940_v12 = vmul.u32.u64.low %v12922_v30, %v2083_v4  ;;  %v12941_v2 = vmul.u32.u64.high %v12922_v30, %v2083_v4, %v12940_v12  ;;  %v2073_v3 = vsel %vm2071_vm13, %v2061_v26, 2102212464  ;;  %v2154_v60 = vand.u32 31, %v2152_v16 }
 0x359   : > { %17981 = vst [vmem:[#allocation52_spill] sm:$0xff] %v12937_v19  ;;  %v1264_v58 = vmul.f32 %v12419_v43, %v1222_v44  ;;  %v17982_v10 = vand.u32 2147483647, %v12434_v57  ;;  %v1600_v20 = vxor.u32 2147483648, %v1599_v15  ;;  %v12952_v13 = vsel %vm9369_vm6, 0, %v9368_v36 }
 0x35a   : > { %v12954_v50 = vshrl.u32 %v1993_v5, 30  ;;  %v17986_v52 = vmov 683565275   ;;  %v12960_v26 = vsel %vm1655_vm5, %v1651_v48, 1326507024  ;;  %v12964_v43 = vmul.f32 %v12417_v41, %v12615_v54 }
 0x35b   : > { %vm12948_vm7 = vcmp.le.f32.partialorder %v17982_v10, 0.7853982  ;;  %v2052_v37 = vshrl.u32 %v17986_v52, %v12819_v1  ;;  %v12968_v35 = vmul.f32 %v12417_v41, %v12631_v33  ;;  %v1179_v36 = vmul.f32 %v12417_v41, %v1130_v63 }
 0x35c   : > { %17985 = vst [vmem:[#allocation53_spill] sm:$0xff] %v12954_v50  ;;  %v12972_v62 = vsub.s32 32, %v12937_v19  ;;  %v2074_v6 = vsel %vm2070_vm15, %v12881_v51, %v2073_v3  ;;  %v1365_v54 = vmul.f32 %v12425_v47, %v1323_v23  ;;  %v1800_v4 = vsub.s32 4294967266, %v12952_v13 }
 0x35d   : > { %17987 = vst [vmem:[#allocation54_spill] sm:$0xff] %v12968_v35  ;;  %v2072_v1 = vsel %vm2068_vm14, %v2052_v37, %v12879_v22  ;;  %v17782_v33 = vand.u32 2147483647, %v12797_v39  ;;  %v12983_v5 = vsub.s32 32, %v2154_v60  ;;  %v1280_v41 = vadd.f32 %v1264_v58, %v1179_v36 }
 0x35e   : > { %17988 = vst [vmem:[#allocation55_spill] sm:$0xff] %v12972_v62  ;;  %v1497_v63 = vsel %vm1414_vm3, %v1496_v18, %v1495_v0  ;;  %v1601_v44 = vsel %vm1518_vm4, %v1600_v20, %v1599_v15  ;;  %v12991_v22 = vadd.s32 %v12683_v56, %v12688_v31  ;;  %v1995_v51 = vshll.u32 %v12954_v50, 30 }
 0x35f   : > { %v12994_v47 = vshrl.u32 %v1840_v17, 5  ;;  %v17990_v48 = vmov 2102212464   ;;  %v2075_v3 = vsel %vm2069_vm1, %v2072_v1, %v2074_v6  ;;  %v2094_v0 = vadd.s32 1, %v12929_v28 }
 0x360   : > { %v12998_v12 = vshll.u32 %v17990_v48, %v12937_v19  ;;  %v13005_v15 = vshrl.u32 %v17980_v38, %v12972_v62  ;;  %v13009_v56 = vshll.u32 %v17980_v38, %v12937_v19  ;;  %v17991_v31 = vmov 1326507024  }
 0x361   : > { %17989 = vst [vmem:[#allocation56_spill] sm:$0xff] %v12994_v47  ;;  %v13013_v17 = vshrl.u32 %v17991_v31, %v12972_v62  ;;  %vm2093_vm8 = vc.u32 %v12941_v2, %v12928_v53  ;;  %v1801_v18 = vadd.s32 127, %v1800_v4  ;;  %v2147_v61 = vand.u32 8388607, %v17782_v33 }
 0x362   : > { %v2167_v58 = vshrl.u32 %v17980_v38, %v12983_v5  ;;  %v1381_v23 = vadd.f32 %v1365_v54, %v1280_v41  ;;  %v13022_v10 = vsub.s32 %v12901_v24, %v1995_v51  ;;  %v2091_v20 = vmul.u32 %v12922_v30, %v2075_v3 }
 0x363   : > { %v2170_v37 = vshrl.u32 %v17991_v31, %v12983_v5  ;;  %v1500_v36 = vsel %vm12948_vm7, %v12434_v57, %v1497_v63  ;;  %v2095_v1 = vsel %vm2093_vm8, %v2094_v0, %v12929_v28  ;;  %v13031_v6 = vshrl.u32 %v2152_v16, 5 }
 0x364   : > { %v2158_v4 = vshrl.u32 %v17792_v45, %v12983_v5  ;;  %v2166_v54 = vshll.u32 %v17990_v48, %v2154_v60  ;;  %v2161_v24 = vshrl.u32 %v17978_v46, %v12983_v5  ;;  %v2164_v30 = vshrl.u32 %v17990_v48, %v12983_v5 }
 0x365   : > { %v2169_v41 = vshll.u32 %v17980_v38, %v2154_v60  ;;  %v1498_v51 = vsub.s32 4, %v12609_v14  ;;  %v2157_v63 = vshll.u32 %v17986_v52, %v2154_v60  ;;  %v13044_v16 = vadd.f32 %v12430_v55, %v1381_v23  ;;  %v1226_v55 = vpop.permute.xlu1 %1225 }
 0x366   : > { %v2168_v28 = vor.u32 %v2167_v58, %v2166_v54  ;;  %10903 = vcosq.f32 %v1500_v36  ;;  %v2160_v3 = vshll.u32 %v17792_v45, %v2154_v60  ;;  %v2163_v0 = vshll.u32 %v17978_v46, %v2154_v60 }
 0x367   : > { %17992 = vst [vmem:[#allocation57_spill] sm:$0xff] %v13044_v16  ;;  %v2171_v33 = vor.u32 %v2170_v37, %v2169_v41  ;;  %10905 = vsinq.f32 %v1500_v36  ;;  %v1998_v50 = vsub.s32 0, %v13022_v10  ;;  %v13049_v39 = vadd.s32 %v2095_v1, %v2091_v20  ;;  %v13102_v36 = vld [vmem:[#allocation2 + $0x1] ss:$0 sm:$0xff] }
 0x368   : > { %v2159_v19 = vor.u32 %v2158_v4, %v2157_v63  ;;  %v1602_v62 = vsub.s32 4, %v12658_v21  ;;  %v2162_v47 = vor.u32 %v2161_v24, %v2160_v3  ;;  %v2165_v35 = vor.u32 %v2164_v30, %v2163_v0 }
 0x369   : > { %vm2175_vm9 = vcmp.lt.s32.totalorder %v13031_v6, 4  ;;  %v1499_v58 = vsel %vm1414_vm3, %v1498_v51, %v12609_v14  ;;  %v1796_v60 = vsub.s32 32, %v12952_v13  ;;  %v2247_v20 = vand.u32 2139095040, %v13044_v16 }
 0x36a   : > { %v2181_v23 = vsel %vm2175_vm9, %v2168_v28, 920167782  ;;  %v17993_v37 = vand.u32 2147483647, %v12447_v8  ;;  %v1802_v1 = vshll.u32 %v1801_v18, 23  ;;  %v2148_v4 = vor.u32 8388608, %v2147_v61 }
 0x36b   : > { %v2185_v54 = vsel %vm2175_vm9, %v2171_v33, 1326507024  ;;  %vm2172_vm11 = vcmp.lt.s32.totalorder %v13031_v6, 1  ;;  %vm2174_vm12 = vcmp.lt.s32.totalorder %v13031_v6, 3  ;;  %v1501_v24 = vsel %vm12948_vm7, 0, %v1499_v58 }
 0x36c   : > { %vm13062_vm10 = vcmp.le.f32.partialorder %v17993_v37, 0.7853982  ;;  %v1603_v30 = vsel %vm1518_vm4, %v1602_v62, %v12658_v21  ;;  %v9375_v18 = vmin.u32 %v1998_v50, %v13022_v10  ;;  %v2097_v61 = vadd.s32 536870912, %v13049_v39  ;;  %v1327_v21 = vpop.permute.xlu1 %1326 }
 0x36d   : > { %v1604_v14 = vsel %vm13062_vm10, %v12447_v8, %v1601_v44  ;;  %v2180_v33 = vsel %vm2172_vm11, %v2159_v19, %v2162_v47  ;;  %v2182_v44 = vsel %vm2174_vm12, %v2165_v35, %v2181_v23  ;;  %v2184_v41 = vsel %vm2172_vm11, %v2162_v47, %v2165_v35 }
 0x36e   : > { %v2186_v34 = vsel %vm2174_vm12, %v2168_v28, %v2185_v54  ;;  %v2248_v51 = vshrl.u32 %v2247_v20, 23  ;;  %10907 = vcosq.f32 %v1604_v14  ;;  %vm2173_vm13 = vcmp.lt.s32.totalorder %v13031_v6, 2 }
 0x36f   : > { %v1505_v50 = vadd.s32 3, %v1501_v24  ;;  %v1605_v62 = vsel %vm13062_vm10, 0, %v1603_v30  ;;  %10909 = vsinq.f32 %v1604_v14  ;;  %v1798_v3 = vshrl.u32 %v12991_v22, %v1796_v60 }
 0x370   : > { %v10904_v63 = vpop.eup %10903  ;;  %v13092_v0 = vor.u32 4788187, %v1802_v1  ;;  %v2183_v58 = vsel %vm2173_vm13, %v2180_v33, %v2182_v44  ;;  %v13096_v23 = vshll.u32 %v2148_v4, 8  ;;  %v2000_v20 = vclz %v9375_v18  ;;  %v13107_v1 = vld [vmem:[#allocation2 + $0x2] ss:$0 sm:$0xff]  ;;  %v1140_v6 = vpop.permute.xlu1 %1139 }
 0x371   : > { %v10906_v28 = vpop.eup %10905  ;;  %v13098_v37 = vshrl.u32 %v2097_v61, 30  ;;  %v2187_v54 = vsel %vm2173_vm13, %v2184_v41, %v2186_v34  ;;  %v1265_v14 = vmul.f32 %v13102_v36, %v1226_v55  ;;  %v2156_v22 = vshrl.u32 %v17986_v52, %v12983_v5 }
 0x372   : > { %v9386_v60 = vadd.s32 4294967169, %v2248_v51  ;;  %v1366_v4 = vmul.f32 %v13107_v1, %v1327_v21  ;;  %v1609_v24 = vadd.s32 3, %v1605_v62  ;;  %v2177_v30 = vsel %vm2175_vm9, %v2165_v35, 2102212464 }
 0x373   : > { %17996 = vst [vmem:[#allocation58_spill] sm:$0xff] %v13098_v37  ;;  %v13113_v18 = vmul.u32.u64.low %v13096_v23, %v2183_v58  ;;  %v13114_v61 = vmul.u32.u64.high %v13096_v23, %v2183_v58, %v13113_v18  ;;  %v1506_v33 = vand.u32 3, %v1505_v50  ;;  %v1509_v5 = vxor.u32 2147483648, %v10906_v28 }
 0x374   : > { %v13118_v55 = vmul.u32.u64.low %v13096_v23, %v2187_v54  ;;  %v13119_v44 = vmul.u32.u64.high %v13096_v23, %v2187_v54, %v13118_v55  ;;  %v1512_v41 = vxor.u32 2147483648, %v10904_v63  ;;  %v1797_v34 = vshll.u32 %v12812_v27, %v12952_v13 }
 0x375   : > { %17997 = vst [vmem:[#allocation59_spill] sm:$0xff] %v13113_v18  ;;  %v9376_v51 = vadd.s32 4294967294, %v2000_v20  ;;  %v2099_v21 = vshll.u32 %v13098_v37, 30  ;;  %v1281_v35 = vadd.f32 %v1265_v14, %v12964_v43  ;;  %v2176_v62 = vsel %vm2172_vm11, %v2156_v22, %v2159_v19 }
 0x376   : > { %v2178_v50 = vsel %vm2174_vm12, %v2162_v47, %v2177_v30  ;;  %v2254_v58 = vadd.s32 1, %v9386_v60  ;;  %v1610_v45 = vand.u32 3, %v1609_v24  ;;  %v1799_v54 = vor.u32 %v1798_v3, %v1797_v34 }
 0x377   : > { %v13131_v55 = vor.u32 %v13005_v15, %v12998_v12  ;;  %vm1508_vm14 = vcmp.eq.s32.totalorder %v1506_v33, 0  ;;  %vm1511_vm15 = vcmp.eq.s32.totalorder %v1506_v33, 2  ;;  %v1804_v13 = vand.u32 2147483647, %v13092_v0 }
 0x378   : > { %v10908_v27 = vpop.eup %10907  ;;  %v1382_v20 = vadd.f32 %v1366_v4, %v1281_v35  ;;  %v1510_v43 = vsel %vm1508_vm14, %v10904_v63, %v1509_v5  ;;  %v1513_v14 = vsel %vm1511_vm15, %v1512_v41, %v10906_v28  ;;  %vm9377_vm0 = vcmp.lt.s32.totalorder %v9376_v51, 0  ;;  %v13142_v63 = vld [vmem:[#allocation5] ss:$0 sm:$0xff] }
 0x379   : > { %17998 = vst [vmem:[#allocation60_spill] sm:$0xff] %v13131_v55  ;;  %v10910_v37 = vpop.eup %10909  ;;  %v13135_v19 = vsub.s32 %v13049_v39, %v2099_v21  ;;  %v2179_v47 = vsel %vm2173_vm13, %v2176_v62, %v2178_v50  ;;  %v1616_v3 = vxor.u32 2147483648, %v10908_v27  ;;  %vm2255_vm1 = vcmp.gt.s32.totalorder %v2254_v58, 0 }
 0x37a   : > { %vm1507_vm2 = vcmp.lt.s32.totalorder %v1506_v33, 2  ;;  %v1613_v12 = vxor.u32 2147483648, %v10910_v37  ;;  %vm1615_vm3 = vcmp.eq.s32.totalorder %v1610_v45, 2  ;;  %v2198_v15 = vadd.s32 1, %v13114_v61 }
 0x37b   : > { %v1514_v22 = vsel %vm1507_vm2, %v1510_v43, %v1513_v14  ;;  %vm1612_vm4 = vcmp.eq.s32.totalorder %v1610_v45, 0  ;;  %v1617_v0 = vsel %vm1615_vm3, %v1616_v3, %v10910_v37  ;;  %vm2197_vm6 = vc.u32 %v13119_v44, %v13113_v18  ;;  %v1230_v43 = vpop.permute.xlu1 %1229  ;;  %v1331_v18 = vpop.permute.xlu0 %1330 }
 0x37c   : > { %v13145_v39 = vadd.f32 %v13142_v63, %v1382_v20  ;;  %vm1611_vm7 = vcmp.lt.s32.totalorder %v1610_v45, 2  ;;  %v1614_v28 = vsel %vm1612_vm4, %v10908_v27, %v1613_v12  ;;  %v2256_v60 = vsel %vm2255_vm1, %v2254_v58, 0 }
 0x37d   : > { %vm1504_vm8 = vweird.f32 %v12434_v57  ;;  %vm1608_vm9 = vweird.f32 %v12447_v8  ;;  %v1618_v4 = vsel %vm1611_vm7, %v1614_v28, %v1617_v0  ;;  %vm5190_vm10 = vcmask 490496   ;;  %v13191_v28 = vld [vmem:[#allocation2] ss:$0 sm:$0xff] }
 0x37e   : > { %17999 = vst [vmem:[#allocation61_spill] sm:$0xff] %v13145_v39  ;;  %v1515_v24 = vsel %vm1504_vm8, nan, %v1514_v22  ;;  %v1619_v30 = vsel %vm1608_vm9, nan, %v1618_v4  ;;  %v17796_v37 = vand.u32 2147483647, %v12645_v59  ;;  %v1641_v34 = vshrl.u32 %v17978_v46, %v12800_v11  ;;  %18002 = vst [vmem:[#allocation62_spill] sm:$0xff] %v13191_v28 }
 0x37f   : > { %v3076_v33 = vpack.c.bf16 %v1619_v30, %v1515_v24  ;;  %v18000_v5 = vmov 2475754826   ;;  %v1644_v45 = vshrl.u32 %v17990_v48, %v12800_v11  ;;  %v2102_v57 = vsub.s32 0, %v13135_v19 }
 0x380   : > { %v1638_v41 = vshrl.u32 %v18000_v5, %v12800_v11  ;;  %v2199_v8 = vsel %vm2197_vm6, %v2198_v15, %v13114_v61  ;;  %v2258_v21 = vand.u32 31, %v2256_v60  ;;  %v2351_v35 = vand.u32 2139095040, %v13145_v39 }
 0x381   : > { %v1806_v62 = vcvt.s32.f32 %v1799_v54  ;;  %9503 = vmatmul.mubr.msk.bf16.vlgmr.msra.gmra.mrb[0].mxu0 %vm5190_vm10, %v3076_v33  ;;  %9512 = vmatmul.mubr.msk.bf16.vlgmr.msra.gmra.mrb[0].mxu1 %vm5190_vm10, %v3076_v33  ;;  %v1637_v50 = vshll.u32 %v17986_v52, %v12723_v32  ;;  %v1640_v58 = vshll.u32 %v18000_v5, %v12723_v32  ;;  %v1643_v27 = vshll.u32 %v17978_v46, %v12723_v32 }
 0x382   : > { %v13172_v61 = vadd.s32 %v12815_v29, %v12836_v42  ;;  %v13175_v20 = vsel %vm9377_vm0, 0, %v9376_v51  ;;  %v2195_v54 = vmul.u32 %v13096_v23, %v2179_v47  ;;  %v18001_v14 = vmov 0  }
 0x383   : > { %5270 = vmatprep.mubr.bf16.mxu0 %v18001_v14  ;;  %5383 = vmatprep.mubr.bf16.mxu1 %v18001_v14  ;;  %v1627_v3 = vand.u32 8388607, %v17796_v37  ;;  %v13182_v12 = vmul.f32 %v1806_v62, %v1804_v13  ;;  %v1639_v32 = vor.u32 %v1638_v41, %v1637_v50  ;;  %v1642_v15 = vor.u32 %v1641_v34, %v1640_v58 }
 0x384   : > { %v1645_v22 = vor.u32 %v1644_v45, %v1643_v27  ;;  %v9379_v29 = vmin.u32 %v2102_v57, %v13135_v19  ;;  %v13185_v42 = vadd.s32 %v2199_v8, %v2195_v54  ;;  %v13187_v51 = vsub.s32 32, %v2258_v21 }
 0x385   : > { %v2352_v23 = vshrl.u32 %v2351_v35, 23  ;;  %v2004_v47 = vsub.s32 32, %v13175_v20  ;;  %v2008_v0 = vsub.s32 4294967266, %v13175_v20  ;;  %v1181_v4 = vmul.f32 %v13191_v28, %v1140_v6 }
 0x386   : > { %v1266_v13 = vmul.f32 %v13102_v36, %v1230_v43  ;;  %v1628_v30 = vor.u32 8388608, %v1627_v3  ;;  %vm1652_vm11 = vcmp.lt.s32.totalorder %v12791_v25, 1  ;;  %vm1654_vm12 = vcmp.lt.s32.totalorder %v12791_v25, 3 }
 0x387   : > { %v1660_v33 = vsel %vm1652_vm11, %v1639_v32, %v1642_v15  ;;  %v1662_v41 = vsel %vm1654_vm12, %v1645_v22, %v12935_v9  ;;  %v1664_v34 = vsel %vm1652_vm11, %v1642_v15, %v1645_v22  ;;  %v1666_v6 = vsel %vm1654_vm12, %v12912_v49, %v12960_v26 }
 0x388   : > { %v2104_v45 = vclz %v9379_v29  ;;  %v2201_v57 = vadd.s32 536870912, %v13185_v42  ;;  %v2271_v8 = vshrl.u32 %v17980_v38, %v13187_v51  ;;  %v9390_v35 = vadd.s32 4294967169, %v2352_v23 }
 0x389   : > { %v13212_v62 = vshrl.u32 %v2256_v60, 5  ;;  %v2261_v50 = vshll.u32 %v17986_v52, %v2258_v21  ;;  %v2264_v9 = vshll.u32 %v18000_v5, %v2258_v21  ;;  %vm1653_vm13 = vcmp.lt.s32.totalorder %v12791_v25, 2 }
 0x38a   : > { %v2270_v58 = vshll.u32 %v17990_v48, %v2258_v21  ;;  %v2274_v49 = vshrl.u32 %v17991_v31, %v13187_v51  ;;  %v1663_v26 = vsel %vm1653_vm13, %v1660_v33, %v1662_v41  ;;  %v1667_v27 = vsel %vm1653_vm13, %v1664_v34, %v1666_v6 }
 0x38b   : > { %v2262_v60 = vshrl.u32 %v18000_v5, %v13187_v51  ;;  %v2265_v54 = vshrl.u32 %v17978_v46, %v13187_v51  ;;  %v2273_v43 = vshll.u32 %v17980_v38, %v2258_v21  ;;  %v1668_v3 = vshll.u32 %v1628_v30, 8 }
 0x38c   : > { %v2268_v29 = vshrl.u32 %v17990_v48, %v13187_v51  ;;  %v2272_v23 = vor.u32 %v2271_v8, %v2270_v58  ;;  %v2358_v37 = vadd.s32 1, %v9390_v35  ;;  %v1657_v33 = vsel %vm1655_vm5, %v1645_v22, 2102212464 }
 0x38d   : > { %v13233_v41 = vmul.u32.u64.low %v1668_v3, %v1667_v27  ;;  %v13234_v24 = vmul.u32.u64.high %v1668_v3, %v1667_v27, %v13233_v41  ;;  %v13236_v34 = vmul.u32.u64.low %v1668_v3, %v1663_v26  ;;  %v13237_v6 = vmul.u32.u64.high %v1668_v3, %v1663_v26, %v13236_v34 }
 0x38e   : > { %v18003_v28 = vand.u32 2147483647, %v13044_v16  ;;  %v2267_v30 = vshll.u32 %v17978_v46, %v2258_v21  ;;  %v2275_v55 = vor.u32 %v2274_v49, %v2273_v43  ;;  %v1636_v8 = vshrl.u32 %v17986_v52, %v12800_v11 }
 0x38f   : > { %v9380_v35 = vadd.s32 4294967294, %v2104_v45  ;;  %v13245_v58 = vshrl.u32 %v2201_v57, 30  ;;  %v13247_v22 = vor.u32 %v2262_v60, %v2261_v50  ;;  %v13249_v27 = vor.u32 %v2265_v54, %v2264_v9 }
 0x390   : > { %v2251_v14 = vand.u32 8388607, %v18003_v28  ;;  %v2269_v26 = vor.u32 %v2268_v29, %v2267_v30  ;;  %vm2279_vm5 = vcmp.lt.s32.totalorder %v13212_v62, 4  ;;  %v1656_v28 = vsel %vm1652_vm11, %v1636_v8, %v1639_v32 }
 0x391   : > { %v1658_v21 = vsel %vm1654_vm12, %v1642_v15, %v1657_v33  ;;  %v2285_v49 = vsel %vm2279_vm5, %v2272_v23, 920167782  ;;  %vm2359_vm14 = vcmp.gt.s32.totalorder %v2358_v37, 0  ;;  %v1282_v11 = vadd.f32 %v1266_v13, %v1181_v4 }
 0x392   : > { %v1367_v45 = vmul.f32 %v13107_v1, %v1331_v18  ;;  %v2006_v57 = vshrl.u32 %v13172_v61, %v2004_v47  ;;  %v2009_v50 = vadd.s32 127, %v2008_v0  ;;  %v2252_v9 = vor.u32 8388608, %v2251_v14 }
 0x393   : > { %v2289_v60 = vsel %vm2279_vm5, %v2275_v55, 1326507024  ;;  %vm1726_vm15 = vcmp.lt.s32.totalorder %v12502_v7, 0  ;;  %vm9381_vm0 = vcmp.lt.s32.totalorder %v9380_v35, 0  ;;  %vm2276_vm1 = vcmp.lt.s32.totalorder %v13212_v62, 1 }
 0x394   : > { %vm2278_vm2 = vcmp.lt.s32.totalorder %v13212_v62, 3  ;;  %v1659_v32 = vsel %vm1653_vm13, %v1656_v28, %v1658_v21  ;;  %v2203_v15 = vshll.u32 %v13245_v58, 30  ;;  %v2284_v18 = vsel %vm2276_vm1, %v13247_v22, %v13249_v27 }
 0x395   : > { %v2286_v55 = vsel %vm2278_vm2, %v2269_v26, %v2285_v49  ;;  %v2360_v61 = vsel %vm2359_vm14, %v2358_v37, 0  ;;  %v2288_v14 = vsel %vm2276_vm1, %v13249_v27, %v2269_v26  ;;  %v2290_v25 = vsel %vm2278_vm2, %v2272_v23, %v2289_v60 }
 0x396   : > { %vm1677_vm3 = vc.u32 %v13234_v24, %v13236_v34  ;;  %v1678_v47 = vadd.s32 1, %v13237_v6  ;;  %v1808_v0 = vxor.u32 2147483648, %v13182_v12  ;;  %v13284_v4 = vsel %vm9381_vm0, 0, %v9380_v35 }
 0x397   : > { %vm2277_vm4 = vcmp.lt.s32.totalorder %v13212_v62, 2  ;;  %v1675_v13 = vmul.u32 %v1668_v3, %v1659_v32  ;;  %v2005_v37 = vshll.u32 %v13022_v10, %v13175_v20  ;;  %v2362_v43 = vand.u32 31, %v2360_v61 }
 0x398   : > { %v2287_v54 = vsel %vm2277_vm4, %v2284_v18, %v2286_v55  ;;  %v1679_v29 = vsel %vm1677_vm3, %v1678_v47, %v13237_v6  ;;  %v13293_v23 = vsub.s32 %v13185_v42, %v2203_v15  ;;  %v2291_v33 = vsel %vm2277_vm4, %v2288_v14, %v2290_v25 }
 0x399   : > { %v13297_v41 = vshll.u32 %v2252_v9, 8  ;;  %v1680_v30 = vadd.s32 %v1679_v29, %v1675_v13  ;;  %v13299_v8 = vor.u32 %v2006_v57, %v2005_v37  ;;  %v2010_v3 = vshll.u32 %v2009_v50, 23 }
 0x39a   : > { %v2108_v10 = vsub.s32 32, %v13284_v4  ;;  %v1383_v20 = vadd.f32 %v1367_v45, %v1282_v11  ;;  %v2112_v35 = vsub.s32 4294967266, %v13284_v4  ;;  %v17801_v9 = vand.u32 2147483647, %v13145_v39 }
 0x39b   : > { %v13304_v28 = vmul.u32.u64.low %v13297_v41, %v2287_v54  ;;  %v13305_v6 = vmul.u32.u64.high %v13297_v41, %v2287_v54, %v13304_v28  ;;  %v1681_v42 = vadd.s32 536870912, %v1680_v30  ;;  %v13313_v57 = vsub.s32 32, %v2362_v43 }
 0x39c   : > { %v13309_v21 = vmul.u32.u64.low %v13297_v41, %v2291_v33  ;;  %v13310_v49 = vmul.u32.u64.high %v13297_v41, %v2291_v33, %v13309_v21  ;;  %v13318_v11 = vsel %vm1726_vm15, %v1808_v0, %v13182_v12  ;;  %v2206_v50 = vsub.s32 0, %v13293_v23 }
 0x39d   : > { %v13323_v60 = vshrl.u32 %v1681_v42, 30  ;;  %v13325_v32 = vor.u32 4788187, %v2010_v3  ;;  %v2092_v18 = vadd.s32 %v12928_v53, %v12941_v2  ;;  %v13331_v55 = vadd.f32 %v13142_v63, %v1383_v20 }
 0x39e   : > { %v2109_v12 = vshll.u32 %v13135_v19, %v13284_v4  ;;  %v2260_v14 = vshrl.u32 %v17986_v52, %v13187_v51  ;;  %v2281_v25 = vsel %vm2279_vm5, %v2269_v26, 2102212464  ;;  %v2113_v13 = vadd.s32 127, %v2112_v35  ;;  %v1234_v26 = vpop.permute.xlu1 %1233 }
 0x39f   : > { %18004 = vst [vmem:[#allocation63_spill] sm:$0xff] %v13331_v55  ;;  %v1683_v47 = vshll.u32 %v13323_v60, 30  ;;  %v2110_v0 = vshrl.u32 %v2092_v18, %v2108_v10  ;;  %v13342_v37 = vand.u32 8388607, %v17801_v9  ;;  %v2375_v53 = vshrl.u32 %v17980_v38, %v13313_v57 }
 0x3a0   : > { %v9383_v2 = vmin.u32 %v2206_v50, %v13293_v23  ;;  %v2280_v19 = vsel %vm2276_vm1, %v2260_v14, %v13247_v22  ;;  %v2378_v51 = vshrl.u32 %v17991_v31, %v13313_v57  ;;  %v2282_v54 = vsel %vm2278_vm2, %v13249_v27, %v2281_v25 }
 0x3a1   : > { %v13352_v4 = vsub.s32 %v1680_v30, %v1683_v47  ;;  %v13357_v29 = vshrl.u32 %v2360_v61, 5  ;;  %v2366_v33 = vshrl.u32 %v18000_v5, %v13313_v57  ;;  %v2374_v3 = vshll.u32 %v17990_v48, %v2362_v43 }
 0x3a2   : > { %v2369_v22 = vshrl.u32 %v17978_v46, %v13313_v57  ;;  %v2372_v10 = vshrl.u32 %v17990_v48, %v13313_v57  ;;  %v2377_v30 = vshll.u32 %v17980_v38, %v2362_v43  ;;  %vm2301_vm6 = vc.u32 %v13310_v49, %v13304_v28 }
 0x3a3   : > { %v1686_v20 = vsub.s32 0, %v13352_v4  ;;  %v2302_v27 = vadd.s32 1, %v13305_v6  ;;  %v2365_v61 = vshll.u32 %v17986_v52, %v2362_v43  ;;  %v2376_v35 = vor.u32 %v2375_v53, %v2374_v3  ;;  %v1335_v53 = vpop.permute.xlu1 %1334 }
 0x3a4   : > { %v2368_v42 = vshll.u32 %v18000_v5, %v2362_v43  ;;  %v2371_v21 = vshll.u32 %v17978_v46, %v2362_v43  ;;  %v2379_v50 = vor.u32 %v2378_v51, %v2377_v30  ;;  %v2114_v14 = vshll.u32 %v2113_v13, 23 }
 0x3a5   : > { %v9363_v18 = vmin.u32 %v1686_v20, %v13352_v4  ;;  %v2208_v25 = vclz %v9383_v2  ;;  %v2283_v47 = vsel %vm2277_vm4, %v2280_v19, %v2282_v54  ;;  %v13377_v9 = vor.u32 %v2366_v33, %v2365_v61 }
 0x3a6   : > { %v13379_v45 = vor.u32 %v2369_v22, %v2368_v42  ;;  %v2373_v15 = vor.u32 %v2372_v10, %v2371_v21  ;;  %vm2383_vm7 = vcmp.lt.s32.totalorder %v13357_v29, 4  ;;  %v2111_v39 = vor.u32 %v2110_v0, %v2109_v12 }
 0x3a7   : > { %v1688_v3 = vclz %v9363_v18  ;;  %v2303_v43 = vsel %vm2301_vm6, %v2302_v27, %v13305_v6  ;;  %v2389_v13 = vsel %vm2383_vm7, %v2376_v35, 920167782  ;;  %v2455_v62 = vand.u32 2139095040, %v13331_v55  ;;  %v13409_v20 = vpop.permute.xlu1 %1149 }
 0x3a8   : > { %v2299_v2 = vmul.u32 %v13297_v41, %v2283_v47  ;;  %v2356_v19 = vor.u32 8388608, %v13342_v37  ;;  %v2393_v51 = vsel %vm2383_vm7, %v2379_v50, 1326507024  ;;  %v2115_v33 = vor.u32 4788187, %v2114_v14 }
 0x3a9   : > { %v9364_v54 = vadd.s32 4294967294, %v1688_v3  ;;  %v9384_v12 = vadd.s32 4294967294, %v2208_v25  ;;  %vm2380_vm8 = vcmp.lt.s32.totalorder %v13357_v29, 1  ;;  %vm2382_vm9 = vcmp.lt.s32.totalorder %v13357_v29, 3 }
 0x3aa   : > { %v13395_v6 = vadd.s32 %v2303_v43, %v2299_v2  ;;  %v2388_v0 = vsel %vm2380_vm8, %v13377_v9, %v13379_v45  ;;  %v2390_v41 = vsel %vm2382_vm9, %v2373_v15, %v2389_v13  ;;  %v2392_v37 = vsel %vm2380_vm8, %v13379_v45, %v2373_v15 }
 0x3ab   : > { %vm9365_vm11 = vcmp.lt.s32.totalorder %v9364_v54, 0  ;;  %v2394_v22 = vsel %vm2382_vm9, %v2376_v35, %v2393_v51  ;;  %v2456_v10 = vshrl.u32 %v2455_v62, 23  ;;  %vm2381_vm12 = vcmp.lt.s32.totalorder %v13357_v29, 2 }
 0x3ac   : > { %v1691_v30 = vsel %vm9365_vm11, 0, %v9364_v54  ;;  %v1676_v27 = vadd.s32 %v13236_v34, %v13234_v24  ;;  %v2118_v21 = vcvt.s32.f32 %v2111_v39  ;;  %vm9385_vm13 = vcmp.lt.s32.totalorder %v9384_v12, 0 }
 0x3ad   : > { %v1692_v61 = vsub.s32 32, %v1691_v30  ;;  %v1696_v42 = vsub.s32 4294967266, %v1691_v30  ;;  %v2391_v50 = vsel %vm2381_vm12, %v2388_v0, %v2390_v41  ;;  %v1267_v18 = vmul.f32 %v13102_v36, %v1234_v26  ;;  %v13447_v41 = vpop.permute.xlu1 %1237 }
 0x3ae   : > { %v2305_v35 = vadd.s32 536870912, %v13395_v6  ;;  %v2395_v14 = vsel %vm2381_vm12, %v2392_v37, %v2394_v22  ;;  %v13419_v25 = vshll.u32 %v2356_v19, 8  ;;  %v9394_v3 = vadd.s32 4294967169, %v2456_v10  ;;  %v18009_v37 = vld [vmem:[#allocation49_spill] sm:$0xff] }
 0x3af   : > { %v1694_v47 = vshrl.u32 %v1676_v27, %v1692_v61  ;;  %v1693_v24 = vshll.u32 %v13352_v4, %v1691_v30  ;;  %v1697_v34 = vadd.s32 127, %v1696_v42  ;;  %v18005_v39 = vand.u32 2147483647, %v12502_v7 }
 0x3b0   : > { %v2116_v13 = vand.u32 2147483647, %v2115_v33  ;;  %v13429_v36 = vmul.u32.u64.low %v13419_v25, %v2391_v50  ;;  %v13430_v26 = vmul.u32.u64.high %v13419_v25, %v2391_v50, %v13429_v36  ;;  %v13442_v54 = vsel %vm9385_vm13, 0, %v9384_v12 }
 0x3b1   : > { %vm13424_vm5 = vcmp.le.f32.partialorder %v18005_v39, 0.7853982  ;;  %v13438_v4 = vmul.u32.u64.low %v13419_v25, %v2395_v14  ;;  %v13439_v2 = vmul.u32.u64.high %v13419_v25, %v2395_v14, %v13438_v4  ;;  %v1695_v19 = vor.u32 %v1694_v47, %v1693_v24 }
 0x3b2   : > { %v1812_v62 = vsel %vm13424_vm5, %v12502_v7, %v13318_v11  ;;  %v1698_v51 = vshll.u32 %v1697_v34, 23  ;;  %v13444_v33 = vshrl.u32 %v2305_v35, 30  ;;  %v1368_v0 = vmul.f32 %v13107_v1, %v1335_v53  ;;  %v18010_v53 = vld [vmem:[#allocation54_spill] sm:$0xff] }
 0x3b3   : > { %v1810_v22 = vsub.s32 4, %v18009_v37  ;;  %v2385_v11 = vsel %vm2383_vm7, %v2373_v15, 2102212464  ;;  %v2462_v10 = vadd.s32 1, %v9394_v3  ;;  %10911 = vcosq.f32 %v1812_v62 }
 0x3b4   : > { %18008 = vst [vmem:[#allocation64_spill] sm:$0xff] %v13444_v33  ;;  %v1699_v30 = vor.u32 4788187, %v1698_v51  ;;  %v2012_v27 = vand.u32 2147483647, %v13325_v32  ;;  %vm2038_vm14 = vcmp.lt.s32.totalorder %v12691_v40, 0  ;;  %v2119_v12 = vmul.f32 %v2118_v21, %v2116_v13  ;;  %v13476_v13 = vpop.permute.xlu1 %1241 }
 0x3b5   : > { %v2364_v61 = vshrl.u32 %v17986_v52, %v13313_v57  ;;  %10913 = vsinq.f32 %v1812_v62  ;;  %v2216_v1 = vsub.s32 4294967266, %v13442_v54  ;;  %v1283_v42 = vadd.f32 %v1267_v18, %v18010_v53  ;;  %v18011_v21 = vld [vmem:[#allocation56_spill] sm:$0xff] }
 0x3b6   : > { %v1700_v50 = vand.u32 2147483647, %v1699_v30  ;;  %v1702_v35 = vcvt.s32.f32 %v1695_v19  ;;  %v2307_v15 = vshll.u32 %v13444_v33, 30  ;;  %v2386_v32 = vsel %vm2382_vm9, %v13379_v45, %v2385_v11 }
 0x3b7   : > { %v2384_v14 = vsel %vm2380_vm8, %v2364_v61, %v13377_v9  ;;  %v1811_v57 = vsel %vm1726_vm15, %v1810_v22, %v18009_v37  ;;  %vm1863_vm0 = vcmp.lt.s32.totalorder %v18011_v21, 4  ;;  %vm2463_vm1 = vcmp.gt.s32.totalorder %v2462_v10, 0  ;;  %v18019_v61 = vld [vmem:[#allocation59_spill] sm:$0xff] }
 0x3b8   : > { %v1384_v18 = vadd.f32 %v1368_v0, %v1283_v42  ;;  %v1703_v47 = vmul.f32 %v1702_v35, %v1700_v50  ;;  %v1706_v3 = vsub.s32 4, %v13323_v60  ;;  %v18012_v24 = vcvt.s32.f32 %v13299_v8 }
 0x3b9   : > { %v2120_v9 = vxor.u32 2147483648, %v2119_v12  ;;  %v2212_v39 = vsub.s32 32, %v13442_v54  ;;  %v2406_v45 = vadd.s32 1, %v13430_v26  ;;  %v18013_v62 = vand.u32 2147483647, %v12691_v40 }
 0x3ba   : > { %v13472_v34 = vmul.f32 %v18012_v24, %v2012_v27  ;;  %v2217_v19 = vadd.s32 127, %v2216_v1  ;;  %vm2405_vm2 = vc.u32 %v13439_v2, %v13429_v36  ;;  %v1704_v8 = vxor.u32 2147483648, %v1703_v47 }
 0x3bb   : > { %vm13480_vm15 = vcmp.le.f32.partialorder %v18013_v62, 0.7853982  ;;  %v1813_v51 = vsel %vm13424_vm5, 0, %v1811_v57  ;;  %v13489_v0 = vsub.s32 %v13395_v6, %v2307_v15  ;;  %v2387_v37 = vsel %vm2381_vm12, %v2384_v14, %v2386_v32 }
 0x3bc   : > { %v2464_v22 = vsel %vm2463_vm1, %v2462_v10, 0  ;;  %vm1622_vm3 = vcmp.lt.s32.totalorder %v12645_v59, 0  ;;  %v13496_v11 = vadd.f32 %v13142_v63, %v1384_v18  ;;  %v18016_v30 = vand.u32 2147483647, %v12645_v59 }
 0x3bd   : > { %v1705_v43 = vsel %vm1622_vm3, %v1704_v8, %v1703_v47  ;;  %v1707_v6 = vsel %vm1622_vm3, %v1706_v3, %v13323_v60  ;;  %v2196_v29 = vadd.s32 %v18019_v61, %v13119_v44  ;;  %v2407_v1 = vsel %vm2405_vm2, %v2406_v45, %v13430_v26  ;;  %v10912_v53 = vpop.eup %10911  ;;  %v13519_v26 = vpop.permute.xlu1 %1342  ;;  %v18027_v45 = vld [vmem:[#allocation52_spill] sm:$0xff] }
 0x3be   : > { %vm13500_vm4 = vcmp.le.f32.partialorder %v18016_v30, 0.7853982  ;;  %v1817_v63 = vadd.s32 3, %v1813_v51  ;;  %v2121_v42 = vsel %vm2038_vm14, %v2120_v9, %v2119_v12  ;;  %v2403_v50 = vmul.u32 %v13419_v25, %v2387_v37  ;;  %18020 = vst [vmem:[#allocation49_spill] sm:$0xff] %v13519_v26  ;;  %v18021_v12 = vld [vmem:[#allocation60_spill] sm:$0xff] }
 0x3bf   : > { %v1708_v10 = vsel %vm13500_vm4, %v12645_v59, %v1705_v43  ;;  %v17804_v35 = vand.u32 2147483647, %v13331_v55  ;;  %v10914_v60 = vpop.eup %10913  ;;  %v2214_v15 = vshrl.u32 %v2196_v29, %v2212_v39  ;;  %v13515_v14 = vand.u32 31, %v2464_v22 }
 0x3c0   : > { %10915 = vcosq.f32 %v1708_v10  ;;  %v1709_v44 = vsel %vm13500_vm4, 0, %v1707_v6  ;;  %v2218_v32 = vshll.u32 %v2217_v19, 23  ;;  %v2310_v57 = vsub.s32 0, %v13489_v0 }
 0x3c1   : > { %10917 = vsinq.f32 %v1708_v10  ;;  %v13522_v18 = vadd.s32 %v2407_v1, %v2403_v50  ;;  %v2559_v25 = vand.u32 2139095040, %v13496_v11  ;;  %v13528_v47 = vsel %vm1863_vm0, %v18021_v12, 920167782  ;;  %v13564_v61 = vpop.permute.xlu1 %1159 }
 0x3c2   : > { %v18022_v3 = vor.u32 %v13013_v17, %v13009_v56  ;;  %v2213_v9 = vshll.u32 %v13293_v23, %v13442_v54  ;;  %v1818_v39 = vand.u32 3, %v1817_v63  ;;  %v1713_v62 = vadd.s32 3, %v1709_v44  ;;  %18023 = vst [vmem:[#allocation54_spill] sm:$0xff] %v13564_v61  ;;  %v18024_v63 = vld [vmem:[#allocation50_spill] sm:$0xff] }
 0x3c3   : > { %v1821_v19 = vxor.u32 2147483648, %v10914_v60  ;;  %v1824_v8 = vxor.u32 2147483648, %v10912_v53  ;;  %v13543_v51 = vsel %vm13480_vm15, %v12691_v40, %v2121_v42  ;;  %v13549_v56 = vand.u32 8388607, %v17804_v35 }
 0x3c4   : > { %v13535_v24 = vsel %vm1863_vm0, %v18022_v3, 1326507024  ;;  %v13545_v37 = vor.u32 %v2214_v15, %v2213_v9  ;;  %v13552_v17 = vsub.s32 32, %v13515_v14  ;;  %v13554_v23 = vor.u32 4788187, %v2218_v32  ;;  %v18025_v9 = vld [vmem:[#allocation55_spill] sm:$0xff] }
 0x3c5   : > { %v13557_v54 = vmin.u32 %v2310_v57, %v13489_v0  ;;  %v2409_v30 = vadd.s32 536870912, %v13522_v18  ;;  %v2560_v27 = vshrl.u32 %v2559_v25, 23  ;;  %v13560_v43 = vshrl.u32 %v2464_v22, 5 }
 0x3c6   : > { %v2469_v6 = vshll.u32 %v17986_v52, %v13515_v14  ;;  %vm1820_vm6 = vcmp.eq.s32.totalorder %v1818_v39, 0  ;;  %vm1823_vm7 = vcmp.eq.s32.totalorder %v1818_v39, 2  ;;  %v1714_v29 = vand.u32 3, %v1713_v62 }
 0x3c7   : > { %v1822_v1 = vsel %vm1820_vm6, %v10912_v53, %v1821_v19  ;;  %v1825_v10 = vsel %vm1823_vm7, %v1824_v8, %v10914_v60  ;;  %v17807_v42 = vand.u32 2147483647, %v18024_v63  ;;  %v2470_v50 = vshrl.u32 %v18000_v5, %v13552_v17 }
 0x3c8   : > { %v2472_v15 = vshll.u32 %v18000_v5, %v13515_v14  ;;  %v2473_v22 = vshrl.u32 %v17978_v46, %v13552_v17  ;;  %v2475_v44 = vshll.u32 %v17978_v46, %v13515_v14  ;;  %v13575_v57 = vshrl.u32 %v2409_v30, 30 }
 0x3c9   : > { %v9398_v25 = vadd.s32 4294967169, %v2560_v27  ;;  %vm1816_vm8 = vweird.f32 %v12502_v7  ;;  %vm1819_vm9 = vcmp.lt.s32.totalorder %v1818_v39, 2  ;;  %v1846_v62 = vshrl.u32 %v18000_v5, %v18025_v9  ;;  %v13586_v39 = vpop.permute.xlu1 %1245 }
 0x3ca   : > { %v10916_v32 = vpop.eup %10915  ;;  %v1826_v3 = vsel %vm1819_vm9, %v1822_v1, %v1825_v10  ;;  %v1849_v19 = vshrl.u32 %v17978_v46, %v18025_v9  ;;  %vm1719_vm11 = vcmp.eq.s32.totalorder %v1714_v29, 2  ;;  %v1835_v35 = vand.u32 8388607, %v17807_v42  ;;  %18026 = vst [vmem:[#allocation56_spill] sm:$0xff] %v13586_v39 }
 0x3cb   : > { %v10918_v53 = vpop.eup %10917  ;;  %v1720_v60 = vxor.u32 2147483648, %v10916_v32  ;;  %v1852_v30 = vshrl.u32 %v17990_v48, %v18025_v9  ;;  %vm1716_vm12 = vcmp.eq.s32.totalorder %v1714_v29, 0  ;;  %v1845_v1 = vshll.u32 %v17986_v52, %v18027_v45 }
 0x3cc   : > { %v1717_v8 = vxor.u32 2147483648, %v10918_v53  ;;  %v1848_v10 = vshll.u32 %v18000_v5, %v18027_v45  ;;  %vm1715_vm13 = vcmp.lt.s32.totalorder %v1714_v29, 2  ;;  %v1827_v61 = vsel %vm1816_vm8, nan, %v1826_v3 }
 0x3cd   : > { %v1721_v27 = vsel %vm1719_vm11, %v1720_v60, %v10918_v53  ;;  %v1851_v42 = vshll.u32 %v17978_v46, %v18027_v45  ;;  %vm1712_vm5 = vweird.f32 %v12645_v59  ;;  %v1847_v53 = vor.u32 %v1846_v62, %v1845_v1 }
 0x3ce   : > { %v1718_v55 = vsel %vm1716_vm12, %v10916_v32, %v1717_v8  ;;  %v1850_v60 = vor.u32 %v1849_v19, %v1848_v10  ;;  %v2476_v39 = vshrl.u32 %v17990_v48, %v13552_v17  ;;  %v2479_v16 = vshrl.u32 %v17980_v38, %v13552_v17 }
 0x3cf   : > { %v1722_v33 = vsel %vm1715_vm13, %v1718_v55, %v1721_v27  ;;  %v1853_v29 = vor.u32 %v1852_v30, %v1851_v42  ;;  %v2478_v7 = vshll.u32 %v17990_v48, %v13515_v14  ;;  %v2482_v32 = vshrl.u32 %v17991_v31, %v13552_v17 }
 0x3d0   : > { %v1723_v26 = vsel %vm1712_vm5, nan, %v1722_v33  ;;  %v2566_v45 = vadd.s32 1, %v9398_v25  ;;  %v13605_v59 = vor.u32 %v2470_v50, %v2469_v6  ;;  %v2481_v55 = vshll.u32 %v17980_v38, %v13515_v14  ;;  %v13618_v6 = vpop.permute.xlu1 %1249 }
 0x3d1   : > { %v3077_v3 = vpack.c.bf16 %v1827_v61, %v1723_v26  ;;  %v1836_v62 = vor.u32 8388608, %v1835_v35  ;;  %vm1860_vm1 = vcmp.lt.s32.totalorder %v18011_v21, 1  ;;  %v2411_v19 = vshll.u32 %v13575_v57, 30  ;;  %18028 = vst [vmem:[#allocation59_spill] sm:$0xff] %v13618_v6 }
 0x3d2   : > { %v13611_v33 = vor.u32 %v2473_v22, %v2472_v15  ;;  %vm1862_vm2 = vcmp.lt.s32.totalorder %v18011_v21, 3  ;;  %v1868_v26 = vsel %vm1860_vm1, %v1847_v53, %v1850_v60  ;;  %v13620_v61 = vor.u32 %v2476_v39, %v2475_v44 }
 0x3d3   : > { %9504 = vmatmul.mubr.msk.bf16.gmra.mrb[4].mxu0 %vm5190_vm10, %v3077_v3  ;;  %9513 = vmatmul.mubr.msk.bf16.gmra.mrb[4].mxu1 %vm5190_vm10, %v3077_v3  ;;  %v2480_v35 = vor.u32 %v2479_v16, %v2478_v7  ;;  %v18029_v14 = vmov 0   ;;  %v1865_v42 = vsel %vm1863_vm0, %v1853_v29, 2102212464  ;;  %v1870_v50 = vsel %vm1862_vm2, %v1853_v29, %v13528_v47 }
 0x3d4   : > { %5280 = vmatprep.mubr.bf16.mxu0 %v18029_v14  ;;  %5393 = vmatprep.mubr.bf16.mxu1 %v18029_v14  ;;  %v2483_v15 = vor.u32 %v2482_v32, %v2481_v55  ;;  %vm2567_vm3 = vcmp.gt.s32.totalorder %v2566_v45, 0  ;;  %v1844_v22 = vshrl.u32 %v17986_v52, %v18025_v9  ;;  %vm1861_vm4 = vcmp.lt.s32.totalorder %v18011_v21, 2 }
 0x3d5   : > { %v1871_v16 = vsel %vm1861_vm4, %v1868_v26, %v1870_v50  ;;  %v1872_v44 = vsel %vm1860_vm1, %v1850_v60, %v1853_v29  ;;  %v1874_v25 = vsel %vm1862_vm2, %v18021_v12, %v13535_v24  ;;  %v1876_v8 = vshll.u32 %v1836_v62, 8 }
 0x3d6   : > { %vm2487_vm0 = vcmp.lt.s32.totalorder %v13560_v43, 4  ;;  %v1864_v47 = vsel %vm1860_vm1, %v1844_v22, %v1847_v53  ;;  %v1866_v9 = vsel %vm1862_vm2, %v1850_v60, %v1865_v42  ;;  %v1875_v30 = vsel %vm1861_vm4, %v1872_v44, %v1874_v25  ;;  %v13659_v60 = vpop.permute.xlu1 %1350 }
 0x3d7   : > { %v13647_v27 = vmul.u32.u64.low %v1876_v8, %v1875_v30  ;;  %v13648_v39 = vmul.u32.u64.high %v1876_v8, %v1875_v30, %v13647_v27  ;;  %v13650_v1 = vmul.u32.u64.low %v1876_v8, %v1871_v16  ;;  %v13651_v10 = vmul.u32.u64.high %v1876_v8, %v1871_v16, %v13650_v1  ;;  %18030 = vst [vmem:[#allocation60_spill] sm:$0xff] %v13659_v60 }
 0x3d8   : > { %v2220_v12 = vand.u32 2147483647, %v13554_v23  ;;  %v2222_v24 = vcvt.s32.f32 %v13545_v37  ;;  %v2493_v53 = vsel %vm2487_vm0, %v2480_v35, 920167782  ;;  %v2568_v29 = vsel %vm2567_vm3, %v2566_v45, 0 }
 0x3d9   : > { %v2312_v7 = vclz %v13557_v54  ;;  %vm2484_vm6 = vcmp.lt.s32.totalorder %v13560_v43, 1  ;;  %v2497_v32 = vsel %vm2487_vm0, %v2483_v15, 1326507024  ;;  %v1867_v3 = vsel %vm1861_vm4, %v1864_v47, %v1866_v9  ;;  %v18031_v15 = vld [vmem:[#allocation48_spill] sm:$0xff] }
 0x3da   : > { %v13668_v23 = vsub.s32 %v13522_v18, %v2411_v19  ;;  %v2460_v37 = vor.u32 8388608, %v13549_v56  ;;  %vm2486_vm7 = vcmp.lt.s32.totalorder %v13560_v43, 3  ;;  %v2492_v54 = vsel %vm2484_vm6, %v13605_v59, %v13611_v33  ;;  %v3104_v26 = vpop.permute.xlu1 %3103 }
 0x3db   : > { %v2494_v45 = vsel %vm2486_vm7, %v13620_v61, %v2493_v53  ;;  %v2570_v55 = vand.u32 31, %v2568_v29  ;;  %vm1885_vm8 = vc.u32 %v13648_v39, %v13650_v1  ;;  %v1886_v21 = vadd.s32 1, %v13651_v10 }
 0x3dc   : > { %v13682_v18 = vmul.f32 %v2222_v24, %v2220_v12  ;;  %v2496_v56 = vsel %vm2484_vm6, %v13611_v33, %v13620_v61  ;;  %v2498_v62 = vsel %vm2486_vm7, %v2480_v35, %v2497_v32  ;;  %v1883_v19 = vmul.u32 %v1876_v8, %v1867_v3  ;;  %v13728_v3 = vld [vmem:[#allocation7 + $0x1] ss:$0 sm:$0xff] }
 0x3dd   : > { %v9388_v42 = vadd.s32 4294967294, %v2312_v7  ;;  %vm2485_vm9 = vcmp.lt.s32.totalorder %v13560_v43, 2  ;;  %v1887_v50 = vsel %vm1885_vm8, %v1886_v21, %v13651_v10  ;;  %vm1934_vm11 = vcmp.lt.s32.totalorder %v18031_v15, 0 }
 0x3de   : > { %10919 = vcosq.f32 %v13543_v51  ;;  %v2495_v22 = vsel %vm2485_vm9, %v2492_v54, %v2494_v45  ;;  %v1888_v16 = vadd.s32 %v1887_v50, %v1883_v19  ;;  %v2414_v44 = vsub.s32 0, %v13668_v23 }
 0x3df   : > { %v2499_v35 = vsel %vm2485_vm9, %v2496_v56, %v2498_v62  ;;  %v13699_v25 = vshll.u32 %v2460_v37, 8  ;;  %v13701_v8 = vsub.s32 32, %v2570_v55  ;;  %v18032_v47 = vxor.u32 2147483648, %v13472_v34  ;;  %v3204_v37 = vpop.permute.xlu1 %3203 }
 0x3e0   : > { %10921 = vsinq.f32 %v13543_v51  ;;  %v1889_v27 = vadd.s32 536870912, %v1888_v16  ;;  %vm9389_vm12 = vcmp.lt.s32.totalorder %v9388_v42, 0  ;;  %v2468_v53 = vshrl.u32 %v17986_v52, %v13552_v17  ;;  %v13726_v51 = vld [vmem:[#allocation7] ss:$0 sm:$0xff] }
 0x3e1   : > { %v13708_v9 = vsel %vm1934_vm11, %v18032_v47, %v13472_v34  ;;  %v13713_v10 = vmul.u32.u64.low %v13699_v25, %v2495_v22  ;;  %v13714_v12 = vmul.u32.u64.high %v13699_v25, %v2495_v22, %v13713_v10  ;;  %v9391_v54 = vmin.u32 %v2414_v44, %v13668_v23 }
 0x3e2   : > { %v13721_v7 = vmul.u32.u64.low %v13699_v25, %v2499_v35  ;;  %v13722_v34 = vmul.u32.u64.high %v13699_v25, %v2499_v35, %v13721_v7  ;;  %v13724_v32 = vshrl.u32 %v1889_v27, 30  ;;  %v2583_v45 = vshrl.u32 %v17980_v38, %v13701_v8  ;;  %v18033_v35 = vld [vmem:[#allocation51_spill] sm:$0xff] }
 0x3e3   : > { %v3185_v21 = vmul.f32 %v13726_v51, %v3104_v26  ;;  %v3270_v17 = vmul.f32 %v13728_v3, %v3204_v37  ;;  %v13735_v56 = vsel %vm9389_vm12, 0, %v9388_v42  ;;  %v2488_v62 = vsel %vm2484_vm6, %v2468_v53, %v13605_v59 }
 0x3e4   : > { %v2489_v19 = vsel %vm2487_vm0, %v13620_v61, 2102212464  ;;  %v1891_v50 = vshll.u32 %v13724_v32, 30  ;;  %v2574_v22 = vshrl.u32 %v18000_v5, %v13701_v8  ;;  %v2582_v44 = vshll.u32 %v17990_v48, %v2570_v55 }
 0x3e5   : > { %v2586_v26 = vshrl.u32 %v17991_v31, %v13701_v8  ;;  %v13749_v42 = vadd.f32 %v3270_v17, %v3185_v21  ;;  %vm2142_vm13 = vcmp.lt.s32.totalorder %v18033_v35, 0  ;;  %v13752_v47 = vshrl.u32 %v2568_v29, 5 }
 0x3e6   : > { %v2577_v59 = vshrl.u32 %v17978_v46, %v13701_v8  ;;  %v2580_v61 = vshrl.u32 %v17990_v48, %v13701_v8  ;;  %v13758_v27 = vsub.s32 %v1888_v16, %v1891_v50  ;;  %v2416_v53 = vclz %v9391_v54 }
 0x3e7   : > { %v2573_v7 = vshll.u32 %v17986_v52, %v2570_v55  ;;  %v2584_v37 = vor.u32 %v2583_v45, %v2582_v44  ;;  %v2585_v30 = vshll.u32 %v17980_v38, %v2570_v55  ;;  %v2490_v29 = vsel %vm2486_vm7, %v13611_v33, %v2489_v19 }
 0x3e8   : > { %v13762_v21 = vpop.eup %10919  ;;  %v2576_v17 = vshll.u32 %v18000_v5, %v2570_v55  ;;  %v2579_v24 = vshll.u32 %v17978_v46, %v2570_v55  ;;  %v1894_v60 = vsub.s32 0, %v13758_v27  ;;  %v2510_v16 = vadd.s32 1, %v13714_v12 }
 0x3e9   : > { %v18034_v54 = vand.u32 2147483647, %v13496_v11  ;;  %v13773_v45 = vor.u32 %v2574_v22, %v2573_v7  ;;  %v2587_v44 = vor.u32 %v2586_v26, %v2585_v30  ;;  %vm2591_vm5 = vcmp.lt.s32.totalorder %v13752_v47, 4 }
 0x3ea   : > { %v13775_v6 = vpop.eup %10921  ;;  %v13777_v48 = vor.u32 %v2577_v59, %v2576_v17  ;;  %v2581_v31 = vor.u32 %v2580_v61, %v2579_v24  ;;  %v9371_v33 = vmin.u32 %v1894_v60, %v13758_v27  ;;  %v2320_v55 = vsub.s32 4294967266, %v13735_v56 }
 0x3eb   : > { %v2563_v50 = vand.u32 8388607, %v18034_v54  ;;  %v9392_v19 = vadd.s32 4294967294, %v2416_v53  ;;  %vm2509_vm1 = vc.u32 %v13722_v34, %v13713_v10  ;;  %v2597_v22 = vsel %vm2591_vm5, %v2584_v37, 920167782 }
 0x3ec   : > { %v2300_v30 = vadd.s32 %v13304_v28, %v13310_v49  ;;  %v2316_v26 = vsub.s32 32, %v13735_v56  ;;  %v2491_v24 = vsel %vm2485_vm9, %v2488_v62, %v2490_v29  ;;  %v1896_v59 = vclz %v9371_v33 }
 0x3ed   : > { %v2564_v61 = vor.u32 8388608, %v2563_v50  ;;  %vm2588_vm2 = vcmp.lt.s32.totalorder %v13752_v47, 1  ;;  %vm2590_vm3 = vcmp.lt.s32.totalorder %v13752_v47, 3  ;;  %v2601_v60 = vsel %vm2591_vm5, %v2587_v44, 1326507024 }
 0x3ee   : > { %v2511_v53 = vsel %vm2509_vm1, %v2510_v16, %v13714_v12  ;;  %v2596_v28 = vsel %vm2588_vm2, %v13773_v45, %v13777_v48  ;;  %v2598_v49 = vsel %vm2590_vm3, %v2581_v31, %v2597_v22  ;;  %v9372_v43 = vadd.s32 4294967294, %v1896_v59 }
 0x3ef   : > { %v18035_v62 = vxor.u32 2147483648, %v13682_v18  ;;  %v2321_v29 = vadd.s32 127, %v2320_v55  ;;  %vm9393_vm4 = vcmp.lt.s32.totalorder %v9392_v19, 0  ;;  %v2507_v12 = vmul.u32 %v13699_v25, %v2491_v24 }
 0x3f0   : > { %vm2589_vm0 = vcmp.lt.s32.totalorder %v13752_v47, 2  ;;  %v2600_v17 = vsel %vm2588_vm2, %v13777_v48, %v2581_v31  ;;  %v2602_v16 = vsel %vm2590_vm3, %v2584_v37, %v2601_v60  ;;  %vm9373_vm6 = vcmp.lt.s32.totalorder %v9372_v43, 0 }
 0x3f1   : > { %v13807_v7 = vsel %vm2142_vm13, %v18035_v62, %v13682_v18  ;;  %v2317_v54 = vshll.u32 %v13489_v0, %v13735_v56  ;;  %v13818_v50 = vadd.s32 %v2511_v53, %v2507_v12  ;;  %v2599_v18 = vsel %vm2589_vm0, %v2596_v28, %v2598_v49  ;;  %v13833_v53 = vld [vmem:[#allocation2 + $0x1] ss:$0 sm:$0xff]  ;;  %v18039_v62 = vld [vmem:[#allocation62_spill] sm:$0xff] }
 0x3f2   : > { %v1899_v44 = vsel %vm9373_vm6, 0, %v9372_v43  ;;  %v2318_v25 = vshrl.u32 %v2300_v30, %v2316_v26  ;;  %v13822_v33 = vshll.u32 %v2564_v61, 8  ;;  %v1884_v55 = vadd.s32 %v13650_v1, %v13648_v39 }
 0x3f3   : > { %v1900_v22 = vsub.s32 32, %v1899_v44  ;;  %v2322_v24 = vshll.u32 %v2321_v29, 23  ;;  %v2419_v59 = vsel %vm9393_vm4, 0, %v9392_v19  ;;  %v2603_v37 = vsel %vm2589_vm0, %v2600_v17, %v2602_v16  ;;  %v1339_v16 = vpop.permute.xlu0 %1338 }
 0x3f4   : > { %v1904_v60 = vsub.s32 4294967266, %v1899_v44  ;;  %v13829_v0 = vmul.u32.u64.low %v13822_v33, %v2599_v18  ;;  %v13830_v56 = vmul.u32.u64.high %v13822_v33, %v2599_v18, %v13829_v0  ;;  %v1268_v30 = vmul.f32 %v13833_v53, %v13447_v41 }
 0x3f5   : > { %v1902_v26 = vshrl.u32 %v1884_v55, %v1900_v22  ;;  %v2513_v39 = vadd.s32 536870912, %v13818_v50  ;;  %v1901_v1 = vshll.u32 %v13758_v27, %v1899_v44  ;;  %v18036_v61 = vand.u32 2147483647, %v18031_v15  ;;  %v13855_v27 = vpop.permute.xlu1 %3207 }
 0x3f6   : > { %v1905_v19 = vadd.s32 127, %v1904_v60  ;;  %v13846_v49 = vmul.u32.u64.low %v13822_v33, %v2603_v37  ;;  %v13847_v43 = vmul.u32.u64.high %v13822_v33, %v2603_v37, %v13846_v49  ;;  %v1183_v29 = vmul.f32 %v18039_v62, %v13409_v20  ;;  %18040 = vst [vmem:[#allocation50_spill] sm:$0xff] %v13855_v27  ;;  %v18041_v20 = vld [vmem:[#allocation53_spill] sm:$0xff] }
 0x3f7   : > { %vm13841_vm7 = vcmp.le.f32.partialorder %v18036_v61, 0.7853982  ;;  %v2404_v12 = vadd.s32 %v13429_v36, %v13439_v2  ;;  %v2420_v17 = vsub.s32 32, %v2419_v59  ;;  %v1903_v18 = vor.u32 %v1902_v26, %v1901_v1  ;;  %v13870_v26 = vld [vmem:[#allocation2 + $0x2] ss:$0 sm:$0xff] }
 0x3f8   : > { %v2020_v41 = vsel %vm13841_vm7, %v18031_v15, %v13708_v9  ;;  %v1906_v44 = vshll.u32 %v1905_v19, 23  ;;  %v13859_v55 = vor.u32 %v2318_v25, %v2317_v54  ;;  %v13861_v22 = vor.u32 4788187, %v2322_v24 }
 0x3f9   : > { %v1284_v37 = vadd.f32 %v1268_v30, %v1183_v29  ;;  %v2018_v60 = vsub.s32 4, %v18041_v20  ;;  %v2572_v61 = vshrl.u32 %v17986_v52, %v13701_v8  ;;  %v2593_v9 = vsel %vm2591_vm5, %v2581_v31, 2102212464  ;;  %v13873_v25 = vpop.permute.xlu1 %3118 }
 0x3fa   : > { %v1907_v49 = vor.u32 4788187, %v1906_v44  ;;  %10923 = vcosq.f32 %v2020_v41  ;;  %v2424_v36 = vsub.s32 4294967266, %v2419_v59  ;;  %v13868_v2 = vshrl.u32 %v2513_v39, 30 }
 0x3fb   : > { %v1369_v54 = vmul.f32 %v13870_v26, %v1339_v16  ;;  %10925 = vsinq.f32 %v2020_v41  ;;  %v2422_v24 = vshrl.u32 %v2404_v12, %v2420_v17  ;;  %v2592_v8 = vsel %vm2588_vm2, %v2572_v61, %v13773_v45 }
 0x3fc   : > { %v1908_v30 = vand.u32 2147483647, %v1907_v49  ;;  %v1910_v1 = vcvt.s32.f32 %v1903_v18  ;;  %v2594_v31 = vsel %vm2590_vm3, %v13777_v48, %v2593_v9  ;;  %v1914_v19 = vsub.s32 4, %v13724_v32  ;;  %v18042_v48 = vld [vmem:[#allocation58_spill] sm:$0xff] }
 0x3fd   : > { %v1385_v39 = vadd.f32 %v1369_v54, %v1284_v37  ;;  %v2019_v62 = vsel %vm1934_vm11, %v2018_v60, %v18041_v20  ;;  %v2326_v29 = vcvt.s32.f32 %v13859_v55  ;;  %v2421_v41 = vshll.u32 %v13668_v23, %v2419_v59  ;;  %v13900_v60 = vld [vmem:[#allocation5] ss:$0 sm:$0xff]  ;;  %v3216_v49 = vpop.permute.xlu1 %3215 }
 0x3fe   : > { %v2614_v12 = vadd.s32 1, %v13830_v56  ;;  %v1911_v45 = vmul.f32 %v1910_v1, %v1908_v30  ;;  %v2425_v17 = vadd.s32 127, %v2424_v36  ;;  %v2515_v16 = vshll.u32 %v13868_v2, 30  ;;  %v1155_v30 = vpop.permute.xlu0 %1154 }
 0x3ff   : > { %vm2613_vm8 = vc.u32 %v13847_v43, %v13829_v0  ;;  %v2122_v18 = vsub.s32 4, %v18042_v48  ;;  %v2595_v44 = vsel %vm2589_vm0, %v2592_v8, %v2594_v31  ;;  %vm1830_vm9 = vcmp.lt.s32.totalorder %v18024_v63, 0 }
 0x400   : > { %v1912_v37 = vxor.u32 2147483648, %v1911_v45  ;;  %v2021_v23 = vsel %vm13841_vm7, 0, %v2019_v62  ;;  %v2324_v59 = vand.u32 2147483647, %v13861_v22  ;;  %v13898_v20 = vor.u32 %v2422_v24, %v2421_v41 }
 0x401   : > { %v13903_v61 = vadd.f32 %v13900_v60, %v1385_v39  ;;  %v1915_v9 = vsel %vm1830_vm9, %v1914_v19, %v13724_v32  ;;  %v2615_v47 = vsel %vm2613_vm8, %v2614_v12, %v13830_v56  ;;  %v18043_v36 = vand.u32 2147483647, %v18024_v63 }
 0x402   : > { %v1913_v28 = vsel %vm1830_vm9, %v1912_v37, %v1911_v45  ;;  %v2226_v24 = vsub.s32 4, %v13245_v58  ;;  %v2611_v8 = vmul.u32 %v13822_v33, %v2595_v44  ;;  %v2025_v32 = vadd.s32 3, %v2021_v23 }
 0x403   : > { %vm13909_vm11 = vcmp.le.f32.partialorder %v18043_v36, 0.7853982  ;;  %v2123_v56 = vsel %vm2038_vm14, %v2122_v18, %v18042_v48  ;;  %v2426_v39 = vshll.u32 %v2425_v17, 23  ;;  %v13922_v19 = vsub.s32 %v13818_v50, %v2515_v16  ;;  %v13935_v17 = vld [vmem:[#allocation2] ss:$0 sm:$0xff] }
 0x404   : > { %v1916_v1 = vsel %vm13909_vm11, %v18024_v63, %v1913_v28  ;;  %v10924_v31 = vpop.eup %10923  ;;  %v1917_v62 = vsel %vm13909_vm11, 0, %v1915_v9  ;;  %v13926_v41 = vadd.s32 %v2615_v47, %v2611_v8  ;;  %v2663_v12 = vand.u32 2139095040, %v13903_v61  ;;  %v3305_v47 = vpop.permute.xlu1 %3304  ;;  %v13952_v28 = vld [vmem:[#allocation7 + $0x2] ss:$0 sm:$0xff] }
 0x405   : > { %10927 = vcosq.f32 %v1916_v1  ;;  %v10926_v33 = vpop.eup %10925  ;;  %v18046_v45 = vand.u32 2147483647, %v18033_v35  ;;  %v1184_v50 = vmul.f32 %v13935_v17, %v1155_v30  ;;  %v2125_v16 = vsel %vm13480_vm15, 0, %v2123_v56 }
 0x406   : > { %10929 = vsinq.f32 %v1916_v1  ;;  %v2227_v48 = vsel %vm2142_vm13, %v2226_v24, %v13245_v58  ;;  %v1269_v37 = vmul.f32 %v13833_v53, %v13476_v13  ;;  %v1921_v23 = vadd.s32 3, %v1917_v62  ;;  %v18049_v1 = vld [vmem:[#allocation49_spill] sm:$0xff] }
 0x407   : > { %vm13931_vm12 = vcmp.le.f32.partialorder %v18046_v45, 0.7853982  ;;  %v2026_v9 = vand.u32 3, %v2025_v32  ;;  %v2029_v36 = vxor.u32 2147483648, %v10926_v33  ;;  %v2032_v54 = vxor.u32 2147483648, %v10924_v31 }
 0x408   : > { %v2228_v18 = vsel %vm13931_vm12, %v18033_v35, %v13807_v7  ;;  %v2229_v4 = vsel %vm13931_vm12, 0, %v2227_v48  ;;  %v2617_v58 = vadd.s32 536870912, %v13926_v41  ;;  %v2129_v24 = vadd.s32 3, %v2125_v16 }
 0x409   : > { %10931 = vcosq.f32 %v2228_v18  ;;  %v3188_v7 = vmul.f32 %v13726_v51, %v13873_v25  ;;  %v3273_v13 = vmul.f32 %v13728_v3, %v3216_v49  ;;  %v13957_v8 = vor.u32 4788187, %v2426_v39 }
 0x40a   : > { %10933 = vsinq.f32 %v2228_v18  ;;  %v2664_v30 = vshrl.u32 %v2663_v12, 23  ;;  %v1370_v32 = vmul.f32 %v13870_v26, %v18049_v1  ;;  %v3371_v56 = vmul.f32 %v13952_v28, %v3305_v47 }
 0x40b   : > { %vm2028_vm14 = vcmp.eq.s32.totalorder %v2026_v9, 0  ;;  %vm2031_vm15 = vcmp.eq.s32.totalorder %v2026_v9, 2  ;;  %v2233_v62 = vadd.s32 3, %v2229_v4  ;;  %v13962_v45 = vadd.f32 %v3273_v13, %v3188_v7 }
 0x40c   : > { %v1285_v44 = vadd.f32 %v1269_v37, %v1184_v50  ;;  %v1922_v16 = vand.u32 3, %v1921_v23  ;;  %v2030_v48 = vsel %vm2028_vm14, %v10924_v31, %v2029_v36  ;;  %v2033_v18 = vsel %vm2031_vm15, %v2032_v54, %v10926_v33 }
 0x40d   : > { %v2518_v51 = vsub.s32 0, %v13922_v19  ;;  %v13965_v3 = vshrl.u32 %v2617_v58, 30  ;;  %v2130_v25 = vand.u32 3, %v2129_v24  ;;  %v13968_v49 = vadd.f32 %v3371_v56, %v13749_v42 }
 0x40e   : > { %v9402_v12 = vadd.s32 4294967169, %v2664_v30  ;;  %v1386_v47 = vadd.f32 %v1370_v32, %v1285_v44  ;;  %vm2027_vm13 = vcmp.lt.s32.totalorder %v2026_v9, 2  ;;  %v2133_v4 = vxor.u32 2147483648, %v13775_v6 }
 0x40f   : > { %18050 = vst [vmem:[#allocation55_spill] sm:$0xff] %v13968_v49  ;;  %v10928_v39 = vpop.eup %10927  ;;  %vm1920_vm5 = vweird.f32 %v18024_v63  ;;  %v2034_v31 = vsel %vm2027_vm13, %v2030_v48, %v2033_v18  ;;  %v2234_v33 = vand.u32 3, %v2233_v62  ;;  %vm1927_vm1 = vcmp.eq.s32.totalorder %v1922_v16, 2 }
 0x410   : > { %v10930_v7 = vpop.eup %10929  ;;  %v1928_v50 = vxor.u32 2147483648, %v10928_v39  ;;  %vm2024_vm2 = vweird.f32 %v18031_v15  ;;  %v2136_v23 = vxor.u32 2147483648, %v13762_v21  ;;  %vm1923_vm3 = vcmp.lt.s32.totalorder %v1922_v16, 2 }
 0x411   : > { %v1925_v37 = vxor.u32 2147483648, %v10930_v7  ;;  %vm1924_vm4 = vcmp.eq.s32.totalorder %v1922_v16, 0  ;;  %vm2132_vm0 = vcmp.eq.s32.totalorder %v2130_v25, 0  ;;  %v2035_v58 = vsel %vm2024_vm2, nan, %v2034_v31 }
 0x412   : > { %v1929_v36 = vsel %vm1927_vm1, %v1928_v50, %v10930_v7  ;;  %v2134_v24 = vsel %vm2132_vm0, %v13762_v21, %v2133_v4  ;;  %vm2135_vm6 = vcmp.eq.s32.totalorder %v2130_v25, 2  ;;  %vm2239_vm7 = vcmp.eq.s32.totalorder %v2234_v33, 2 }
 0x413   : > { %v10932_v42 = vpop.eup %10931  ;;  %v1926_v54 = vsel %vm1924_vm4, %v10928_v39, %v1925_v37  ;;  %v2137_v32 = vsel %vm2135_vm6, %v2136_v23, %v13775_v6  ;;  %vm2236_vm8 = vcmp.eq.s32.totalorder %v2234_v33, 0  ;;  %v2327_v62 = vmul.f32 %v2326_v29, %v2324_v59  ;;  %v18055_v23 = vld [vmem:[#allocation61_spill] sm:$0xff] }
 0x414   : > { %v10934_v9 = vpop.eup %10933  ;;  %v2240_v13 = vxor.u32 2147483648, %v10932_v42  ;;  %v1930_v30 = vsel %vm1923_vm3, %v1926_v54, %v1929_v36  ;;  %vm2235_vm9 = vcmp.lt.s32.totalorder %v2234_v33, 2  ;;  %v2428_v16 = vand.u32 2147483647, %v13957_v8 }
 0x415   : > { %v2237_v1 = vxor.u32 2147483648, %v10934_v9  ;;  %v1931_v15 = vsel %vm1920_vm5, nan, %v1930_v30  ;;  %v13984_v48 = vadd.f32 %v13900_v60, %v1386_v47  ;;  %vm2131_vm11 = vcmp.lt.s32.totalorder %v2130_v25, 2  ;;  %v18059_v30 = vld [vmem:[#allocation64_spill] sm:$0xff] }
 0x416   : > { %v2241_v56 = vsel %vm2239_vm7, %v2240_v13, %v10934_v9  ;;  %v3078_v44 = vpack.c.bf16 %v2035_v58, %v1931_v15  ;;  %v9395_v18 = vmin.u32 %v2518_v51, %v13922_v19  ;;  %v2619_v6 = vshll.u32 %v13965_v3, 30 }
 0x417   : > { %v2238_v21 = vsel %vm2236_vm8, %v10932_v42, %v2237_v1  ;;  %v2138_v55 = vsel %vm2131_vm11, %v2134_v24, %v2137_v32  ;;  %vm2232_vm12 = vweird.f32 %v18033_v35  ;;  %v2430_v22 = vcvt.s32.f32 %v13898_v20  ;;  %v18051_v20 = vld [vmem:[#allocation57_spill] sm:$0xff] }
 0x418   : > { %v2242_v63 = vsel %vm2235_vm9, %v2238_v21, %v2241_v56  ;;  %9505 = vmatmul.mubr.msk.bf16.gmra.mrb[8].mxu0 %vm5190_vm10, %v3078_v44  ;;  %9514 = vmatmul.mubr.msk.bf16.gmra.mrb[8].mxu1 %vm5190_vm10, %v3078_v44  ;;  %v2670_v29 = vadd.s32 1, %v9402_v12  ;;  %vm2128_vm14 = vweird.f32 %v12691_v40  ;;  %v2767_v51 = vand.u32 2139095040, %v13984_v48 }
 0x419   : > { %5290 = vmatprep.mubr.bf16.mxu0 %v18029_v14  ;;  %5403 = vmatprep.mubr.bf16.mxu1 %v18029_v14  ;;  %v2243_v59 = vsel %vm2232_vm12, nan, %v2242_v63  ;;  %v2431_v8 = vmul.f32 %v2430_v22, %v2428_v16  ;;  %v2139_v25 = vsel %vm2128_vm14, nan, %v2138_v55  ;;  %v2328_v39 = vxor.u32 2147483648, %v2327_v62 }
 0x41a   : > { %v2520_v47 = vclz %v9395_v18  ;;  %v13997_v4 = vsub.s32 %v13926_v41, %v2619_v6  ;;  %v3079_v35 = vpack.c.bf16 %v2243_v59, %v2139_v25  ;;  %vm2671_vm15 = vcmp.gt.s32.totalorder %v2670_v29, 0 }
 0x41b   : > { %vm2246_vm13 = vcmp.lt.s32.totalorder %v18051_v20, 0  ;;  %v2432_v12 = vxor.u32 2147483648, %v2431_v8  ;;  %v2768_v7 = vshrl.u32 %v2767_v51, 23  ;;  %v2672_v33 = vsel %vm2671_vm15, %v2670_v29, 0 }
 0x41c   : > { %v2329_v50 = vsel %vm2246_vm13, %v2328_v39, %v2327_v62  ;;  %v9396_v31 = vadd.s32 4294967294, %v2520_v47  ;;  %v2622_v40 = vsub.s32 0, %v13997_v4  ;;  %v18052_v41 = vand.u32 2147483647, %v18051_v20 }
 0x41d   : > { %vm2350_vm1 = vcmp.lt.s32.totalorder %v18055_v23, 0  ;;  %v2674_v9 = vand.u32 31, %v2672_v33  ;;  %v9406_v54 = vadd.s32 4294967169, %v2768_v7  ;;  %v18056_v24 = vand.u32 2147483647, %v18055_v23 }
 0x41e   : > { %vm14008_vm5 = vcmp.le.f32.partialorder %v18052_v41, 0.7853982  ;;  %v2433_v36 = vsel %vm2350_vm1, %v2432_v12, %v2431_v8  ;;  %vm9397_vm2 = vcmp.lt.s32.totalorder %v9396_v31, 0  ;;  %v9399_v58 = vmin.u32 %v2622_v40, %v13997_v4 }
 0x41f   : > { %v2332_v42 = vsel %vm14008_vm5, %v18051_v20, %v2329_v50  ;;  %vm14022_vm3 = vcmp.le.f32.partialorder %v18056_v24, 0.7853982  ;;  %v2330_v1 = vsub.s32 4, %v18059_v30  ;;  %v14030_v32 = vsel %vm9397_vm2, 0, %v9396_v31 }
 0x420   : > { %9506 = vmatmul.mubr.msk.bf16.gmra.mrb[12].mxu0 %vm5190_vm10, %v3079_v35  ;;  %9515 = vmatmul.mubr.msk.bf16.gmra.mrb[12].mxu1 %vm5190_vm10, %v3079_v35  ;;  %10935 = vcosq.f32 %v2332_v42  ;;  %v2436_v15 = vsel %vm14022_vm3, %v18055_v23, %v2433_v36  ;;  %v14032_v56 = vsub.s32 32, %v2674_v9  ;;  %v2774_v62 = vadd.s32 1, %v9406_v54 }
 0x421   : > { %5300 = vmatprep.mubr.bf16.mxu0 %v18029_v14  ;;  %5413 = vmatprep.mubr.bf16.mxu1 %v18029_v14  ;;  %10937 = vsinq.f32 %v2332_v42  ;;  %v2624_v44 = vclz %v9399_v58  ;;  %v17814_v21 = vand.u32 2147483647, %v13903_v61  ;;  %v2331_v16 = vsel %vm2246_vm13, %v2330_v1, %v18059_v30  ;;  %v14071_v30 = vpop.permute.xlu0 %1164 }
 0x422   : > { %10939 = vcosq.f32 %v2436_v15  ;;  %v2434_v63 = vsub.s32 4, %v13575_v57  ;;  %v2508_v18 = vadd.s32 %v13713_v10, %v13722_v34  ;;  %v2524_v6 = vsub.s32 32, %v14030_v32 }
 0x423   : > { %10941 = vsinq.f32 %v2436_v15  ;;  %v2528_v55 = vsub.s32 4294967266, %v14030_v32  ;;  %v2687_v22 = vshrl.u32 %v17980_v38, %v14032_v56  ;;  %v18060_v29 = vmov 1326507024  }
 0x424   : > { %v2690_v59 = vshrl.u32 %v18060_v29, %v14032_v56  ;;  %vm2775_vm4 = vcmp.gt.s32.totalorder %v2774_v62, 0  ;;  %v9400_v8 = vadd.s32 4294967294, %v2624_v44  ;;  %v14049_v51 = vand.u32 8388607, %v17814_v21 }
 0x425   : > { %v18061_v25 = vmov 2102212464   ;;  %v2333_v10 = vsel %vm14008_vm5, 0, %v2331_v16  ;;  %v2678_v34 = vshrl.u32 %v18000_v5, %v14032_v56  ;;  %v2681_v47 = vshrl.u32 %v17978_v46, %v14032_v56 }
 0x426   : > { %v2686_v39 = vshll.u32 %v18061_v25, %v2674_v9  ;;  %v2689_v35 = vshll.u32 %v17980_v38, %v2674_v9  ;;  %v2435_v12 = vsel %vm2350_vm1, %v2434_v63, %v13575_v57  ;;  %v14062_v7 = vshrl.u32 %v2672_v33, 5 }
 0x427   : > { %v2677_v50 = vshll.u32 %v17986_v52, %v2674_v9  ;;  %v2684_v31 = vshrl.u32 %v18061_v25, %v14032_v56  ;;  %v2776_v40 = vsel %vm2775_vm4, %v2774_v62, 0  ;;  %v2680_v41 = vshll.u32 %v18000_v5, %v2674_v9 }
 0x428   : > { %v2688_v37 = vor.u32 %v2687_v22, %v2686_v39  ;;  %v2691_v42 = vor.u32 %v2690_v59, %v2689_v35  ;;  %v2337_v36 = vadd.s32 3, %v2333_v10  ;;  %v14068_v58 = vshrl.u32 %v2508_v18, %v2524_v6  ;;  %v18062_v59 = vld [vmem:[#allocation56_spill] sm:$0xff] }
 0x429   : > { %v2683_v24 = vshll.u32 %v17978_v46, %v2674_v9  ;;  %v2437_v57 = vsel %vm14022_vm3, 0, %v2435_v12  ;;  %v14075_v1 = vadd.s32 127, %v2528_v55  ;;  %v14077_v15 = vor.u32 %v2678_v34, %v2677_v50 }
 0x42a   : > { %v10936_v54 = vpop.eup %10935  ;;  %v14079_v62 = vor.u32 %v2681_v47, %v2680_v41  ;;  %v14081_v44 = vand.u32 31, %v2776_v40  ;;  %vm9401_vm0 = vcmp.lt.s32.totalorder %v9400_v8, 0  ;;  %vm2695_vm6 = vcmp.lt.s32.totalorder %v14062_v7, 4  ;;  %v14094_v47 = vpop.permute.xlu1 %3312 }
 0x42b   : > { %v10938_v33 = vpop.eup %10937  ;;  %v14084_v63 = vor.u32 %v2684_v31, %v2683_v24  ;;  %v2701_v13 = vsel %vm2695_vm6, %v2688_v37, 920167782  ;;  %v2705_v18 = vsel %vm2695_vm6, %v2691_v42, 1326507024  ;;  %v2338_v6 = vand.u32 3, %v2337_v36  ;;  %18063 = vst [vmem:[#allocation52_spill] sm:$0xff] %v14094_v47  ;;  %v1347_v42 = vpop.permute.xlu0 %1346 }
 0x42c   : > { %v10940_v9 = vpop.eup %10939  ;;  %v2441_v55 = vadd.s32 3, %v2437_v57  ;;  %vm2692_vm7 = vcmp.lt.s32.totalorder %v14062_v7, 1  ;;  %v1270_v39 = vmul.f32 %v13833_v53, %v18062_v59  ;;  %v2341_v10 = vxor.u32 2147483648, %v10938_v33  ;;  %v18064_v36 = vld [vmem:[#allocation54_spill] sm:$0xff] }
 0x42d   : > { %v10942_v22 = vpop.eup %10941  ;;  %v2344_v34 = vxor.u32 2147483648, %v10936_v54  ;;  %v14096_v35 = vsel %vm9401_vm0, 0, %v9400_v8  ;;  %vm2694_vm8 = vcmp.lt.s32.totalorder %v14062_v7, 3  ;;  %v2700_v12 = vsel %vm2692_vm7, %v14077_v15, %v14079_v62 }
 0x42e   : > { %v14104_v50 = vsub.s32 32, %v14081_v44  ;;  %vm2693_vm9 = vcmp.lt.s32.totalorder %v14062_v7, 2  ;;  %v2702_v31 = vsel %vm2694_vm8, %v14084_v63, %v2701_v13  ;;  %v2704_v8 = vsel %vm2692_vm7, %v14079_v62, %v14084_v63 }
 0x42f   : > { %v2706_v41 = vsel %vm2694_vm8, %v2688_v37, %v2705_v18  ;;  %v1185_v24 = vmul.f32 %v13935_v17, %v18064_v36  ;;  %v1371_v57 = vmul.f32 %v13870_v26, %v1347_v42  ;;  %vm2340_vm11 = vcmp.eq.s32.totalorder %v2338_v6, 0 }
 0x430   : > { %vm2343_vm12 = vcmp.eq.s32.totalorder %v2338_v6, 2  ;;  %v2442_v59 = vand.u32 3, %v2441_v55  ;;  %v17817_v21 = vand.u32 2147483647, %v13984_v48  ;;  %v2342_v16 = vsel %vm2340_vm11, %v10936_v54, %v2341_v10 }
 0x431   : > { %v1286_v13 = vadd.f32 %v1270_v39, %v1185_v24  ;;  %v2345_v47 = vsel %vm2343_vm12, %v2344_v34, %v10938_v33  ;;  %v14120_v49 = vshrl.u32 %v2776_v40, 5  ;;  %v2782_v27 = vshrl.u32 %v18000_v5, %v14104_v50  ;;  %v3317_v39 = vpop.permute.xlu1 %3316 }
 0x432   : > { %v2785_v37 = vshrl.u32 %v17978_v46, %v14104_v50  ;;  %v2790_v18 = vshll.u32 %v18061_v25, %v14081_v44  ;;  %v2791_v42 = vshrl.u32 %v17980_v38, %v14104_v50  ;;  %vm2339_vm14 = vcmp.lt.s32.totalorder %v2338_v6, 2 }
 0x433   : > { %v2445_v55 = vxor.u32 2147483648, %v10942_v22  ;;  %v2448_v36 = vxor.u32 2147483648, %v10940_v9  ;;  %v2346_v54 = vsel %vm2339_vm14, %v2342_v16, %v2345_v47  ;;  %vm2444_vm15 = vcmp.eq.s32.totalorder %v2442_v59, 0 }
 0x434   : > { %vm2447_vm13 = vcmp.eq.s32.totalorder %v2442_v59, 2  ;;  %v3374_v40 = vmul.f32 %v13952_v28, %v3317_v39  ;;  %v2794_v33 = vshrl.u32 %v18060_v29, %v14104_v50  ;;  %vm2443_vm5 = vcmp.lt.s32.totalorder %v2442_v59, 2 }
 0x435   : > { %v2446_v10 = vsel %vm2444_vm15, %v10940_v9, %v2445_v55  ;;  %v2449_v34 = vsel %vm2447_vm13, %v2448_v36, %v10942_v22  ;;  %vm2336_vm1 = vweird.f32 %v18051_v20  ;;  %vm2440_vm2 = vweird.f32 %v18055_v23 }
 0x436   : > { %v2450_v24 = vsel %vm2443_vm5, %v2446_v10, %v2449_v34  ;;  %v14136_v6 = vadd.f32 %v3374_v40, %v13962_v45  ;;  %v2788_v16 = vshrl.u32 %v18061_v25, %v14104_v50  ;;  %v2793_v28 = vshll.u32 %v17980_v38, %v14081_v44 }
 0x437   : > { %v2347_v47 = vsel %vm2336_vm1, nan, %v2346_v54  ;;  %v2451_v39 = vsel %vm2440_vm2, nan, %v2450_v24  ;;  %v2703_v9 = vsel %vm2693_vm9, %v2700_v12, %v2702_v31  ;;  %v2792_v22 = vor.u32 %v2791_v42, %v2790_v18  ;;  %v18066_v24 = vld [vmem:[#allocation59_spill] sm:$0xff] }
 0x438   : > { %v1387_v59 = vadd.f32 %v1371_v57, %v1286_v13  ;;  %v3080_v20 = vpack.c.bf16 %v2451_v39, %v2347_v47  ;;  %v2781_v23 = vshll.u32 %v17986_v52, %v14081_v44  ;;  %v2784_v45 = vshll.u32 %v18000_v5, %v14081_v44 }
 0x439   : > { %v2787_v55 = vshll.u32 %v17978_v46, %v14081_v44  ;;  %v2795_v36 = vor.u32 %v2794_v33, %v2793_v28  ;;  %v2632_v40 = vsub.s32 4294967266, %v14096_v35  ;;  %v2707_v54 = vsel %vm2693_vm9, %v2704_v8, %v2706_v41 }
 0x43a   : > { %v18065_v12 = vor.u32 8388608, %v14049_v51  ;;  %v2771_v57 = vand.u32 8388607, %v17817_v21  ;;  %9507 = vmatmul.mubr.msk.bf16.gmra.mrb[16].mxu0 %vm5190_vm10, %v3080_v20  ;;  %9516 = vmatmul.mubr.msk.bf16.gmra.mrb[16].mxu1 %vm5190_vm10, %v3080_v20  ;;  %v14161_v13 = vor.u32 %v2782_v27, %v2781_v23  ;;  %v14163_v44 = vor.u32 %v2785_v37, %v2784_v45  ;;  %v18067_v20 = vld [vmem:[#allocation60_spill] sm:$0xff] }
 0x43b   : > { %v2789_v18 = vor.u32 %v2788_v16, %v2787_v55  ;;  %vm2799_vm3 = vcmp.lt.s32.totalorder %v14120_v49, 4  ;;  %5310 = vmatprep.mubr.bf16.mxu0 %v18029_v14  ;;  %5423 = vmatprep.mubr.bf16.mxu1 %v18029_v14  ;;  %v14176_v27 = vadd.f32 %v13900_v60, %v1387_v59  ;;  %v2530_v37 = vshll.u32 %v14075_v1, 23 }
 0x43c   : > { %v14155_v31 = vshll.u32 %v18065_v12, 8  ;;  %v2805_v41 = vsel %vm2799_vm3, %v2792_v22, 920167782  ;;  %v2809_v10 = vsel %vm2799_vm3, %v2795_v36, 1326507024  ;;  %v2633_v34 = vadd.s32 127, %v2632_v40 }
 0x43d   : > { %vm2796_vm4 = vcmp.lt.s32.totalorder %v14120_v49, 1  ;;  %vm2798_vm0 = vcmp.lt.s32.totalorder %v14120_v49, 3  ;;  %v1271_v16 = vmul.f32 %v13833_v53, %v18066_v24  ;;  %v1186_v28 = vmul.f32 %v13935_v17, %v14071_v30 }
 0x43e   : > { %v14169_v51 = vmul.u32.u64.low %v14155_v31, %v2703_v9  ;;  %v14170_v8 = vmul.u32.u64.high %v14155_v31, %v2703_v9, %v14169_v51  ;;  %v14180_v42 = vmul.u32.u64.low %v14155_v31, %v2707_v54  ;;  %v14181_v33 = vmul.u32.u64.high %v14155_v31, %v2707_v54, %v14180_v42 }
 0x43f   : > { %v2772_v47 = vor.u32 8388608, %v2771_v57  ;;  %v2804_v1 = vsel %vm2796_vm4, %v14161_v13, %v14163_v44  ;;  %v2806_v39 = vsel %vm2798_vm0, %v2789_v18, %v2805_v41  ;;  %v2808_v9 = vsel %vm2796_vm4, %v14163_v44, %v2789_v18 }
 0x440   : > { %v2810_v59 = vsel %vm2798_vm0, %v2792_v22, %v2809_v10  ;;  %v2871_v53 = vand.u32 2139095040, %v14176_v27  ;;  %v1372_v17 = vmul.f32 %v13870_v26, %v18067_v20  ;;  %v2628_v30 = vsub.s32 32, %v14096_v35 }
 0x441   : > { %vm2797_vm11 = vcmp.lt.s32.totalorder %v14120_v49, 2  ;;  %v2525_v23 = vshll.u32 %v13922_v19, %v14030_v32  ;;  %v2531_v45 = vor.u32 4788187, %v2530_v37  ;;  %v1287_v36 = vadd.f32 %v1271_v16, %v1186_v28 }
 0x442   : > { %v2807_v55 = vsel %vm2797_vm11, %v2804_v1, %v2806_v39  ;;  %v2612_v22 = vadd.s32 %v13829_v0, %v13847_v43  ;;  %v2634_v40 = vshll.u32 %v2633_v34, 23  ;;  %v2811_v54 = vsel %vm2797_vm11, %v2808_v9, %v2810_v59 }
 0x443   : > { %v2812_v26 = vshll.u32 %v2772_v47, 8  ;;  %v2527_v12 = vor.u32 %v14068_v58, %v2525_v23  ;;  %v2697_v57 = vsel %vm2695_vm6, %v14084_v63, 2102212464  ;;  %v2872_v19 = vshrl.u32 %v2871_v53, 23 }
 0x444   : > { %v1388_v32 = vadd.f32 %v1372_v17, %v1287_v36  ;;  %v2630_v41 = vshrl.u32 %v2612_v22, %v2628_v30  ;;  %v2676_v37 = vshrl.u32 %v17986_v52, %v14032_v56  ;;  %v2532_v0 = vand.u32 2147483647, %v2531_v45  ;;  %v18068_v36 = vld [vmem:[#allocation63_spill] sm:$0xff] }
 0x445   : > { %v14221_v42 = vmul.u32.u64.low %v2812_v26, %v2807_v55  ;;  %v14222_v10 = vmul.u32.u64.high %v2812_v26, %v2807_v55, %v14221_v42  ;;  %v2629_v43 = vshll.u32 %v13997_v4, %v14096_v35  ;;  %v2635_v24 = vor.u32 4788187, %v2634_v40 }
 0x446   : > { %v14227_v34 = vmul.u32.u64.low %v2812_v26, %v2811_v54  ;;  %v14228_v58 = vmul.u32.u64.high %v2812_v26, %v2811_v54, %v14227_v34  ;;  %v2696_v63 = vsel %vm2692_vm7, %v2676_v37, %v14077_v15  ;;  %v2698_v56 = vsel %vm2694_vm8, %v14079_v62, %v2697_v57 }
 0x447   : > { %v2718_v16 = vadd.s32 1, %v14170_v8  ;;  %vm2717_vm6 = vc.u32 %v14181_v33, %v14169_v51  ;;  %v9410_v28 = vadd.s32 4294967169, %v2872_v19  ;;  %v14240_v4 = vadd.f32 %v13900_v60, %v1388_v32 }
 0x448   : > { %v2534_v35 = vcvt.s32.f32 %v2527_v12  ;;  %v2631_v47 = vor.u32 %v2630_v41, %v2629_v43  ;;  %v2801_v1 = vsel %vm2799_vm3, %v2789_v18, 2102212464  ;;  %v2699_v15 = vsel %vm2693_vm9, %v2696_v63, %v2698_v56 }
 0x449   : > { %v2780_v62 = vshrl.u32 %v17986_v52, %v14104_v50  ;;  %v2636_v9 = vand.u32 2147483647, %v2635_v24  ;;  %v2719_v59 = vsel %vm2717_vm6, %v2718_v16, %v14170_v8  ;;  %v2802_v53 = vsel %vm2798_vm0, %v14163_v44, %v2801_v1 }
 0x44a   : > { %v2535_v39 = vmul.f32 %v2534_v35, %v2532_v0  ;;  %v2878_v20 = vadd.s32 1, %v9410_v28  ;;  %v2975_v18 = vand.u32 2139095040, %v14240_v4  ;;  %v2638_v7 = vcvt.s32.f32 %v2631_v47 }
 0x44b   : > { %v2800_v60 = vsel %vm2796_vm4, %v2780_v62, %v14161_v13  ;;  %v2715_v17 = vmul.u32 %v14155_v31, %v2699_v15  ;;  %v2822_v50 = vadd.s32 1, %v14222_v10  ;;  %vm2821_vm7 = vc.u32 %v14228_v58, %v14221_v42 }
 0x44c   : > { %v2639_v8 = vmul.f32 %v2638_v7, %v2636_v9  ;;  %v2803_v13 = vsel %vm2797_vm11, %v2800_v60, %v2802_v53  ;;  %v2536_v23 = vxor.u32 2147483648, %v2535_v39  ;;  %vm2879_vm8 = vcmp.gt.s32.totalorder %v2878_v20, 0 }
 0x44d   : > { %v2720_v30 = vadd.s32 %v2719_v59, %v2715_v17  ;;  %v2976_v45 = vshrl.u32 %v2975_v18, 23  ;;  %v2823_v44 = vsel %vm2821_vm7, %v2822_v50, %v14222_v10  ;;  %v2819_v55 = vmul.u32 %v2812_v26, %v2803_v13 }
 0x44e   : > { %vm2454_vm9 = vcmp.lt.s32.totalorder %v18068_v36, 0  ;;  %v2640_v22 = vxor.u32 2147483648, %v2639_v8  ;;  %v2880_v40 = vsel %vm2879_vm8, %v2878_v20, 0  ;;  %v18069_v19 = vand.u32 2147483647, %v18068_v36 }
 0x44f   : > { %v2721_v31 = vadd.s32 536870912, %v2720_v30  ;;  %v2537_v54 = vsel %vm2454_vm9, %v2536_v23, %v2535_v39  ;;  %v2824_v12 = vadd.s32 %v2823_v44, %v2819_v55  ;;  %v9414_v57 = vadd.s32 4294967169, %v2976_v45 }
 0x450   : > { %vm14268_vm12 = vcmp.le.f32.partialorder %v18069_v19, 0.7853982  ;;  %vm2558_vm14 = vcmp.lt.s32.totalorder %v13496_v11, 0  ;;  %v2882_v32 = vand.u32 31, %v2880_v40  ;;  %v18072_v43 = vand.u32 2147483647, %v13496_v11 }
 0x451   : > { %v2540_v26 = vsel %vm14268_vm12, %v18068_v36, %v2537_v54  ;;  %v2641_v41 = vsel %vm2558_vm14, %v2640_v22, %v2639_v8  ;;  %v14278_v37 = vshrl.u32 %v2721_v31, 30  ;;  %v2825_v10 = vadd.s32 536870912, %v2824_v12 }
 0x452   : > { %v2982_v0 = vadd.s32 1, %v9414_v57  ;;  %vm14282_vm15 = vcmp.le.f32.partialorder %v18072_v43, 0.7853982  ;;  %v2538_v24 = vsub.s32 4, %v13868_v2  ;;  %10943 = vcosq.f32 %v2540_v26 }
 0x453   : > { %v2644_v63 = vsel %vm14282_vm15, %v13496_v11, %v2641_v41  ;;  %v14290_v56 = vsub.s32 32, %v2882_v32  ;;  %10945 = vsinq.f32 %v2540_v26  ;;  %v2723_v16 = vshll.u32 %v14278_v37, 30 }
 0x454   : > { %v14293_v28 = vshrl.u32 %v2825_v10, 30  ;;  %vm2983_vm13 = vcmp.gt.s32.totalorder %v2982_v0, 0  ;;  %10947 = vcosq.f32 %v2644_v63  ;;  %v17816_v35 = vand.u32 2147483647, %v14176_v27 }
 0x455   : > { %v2539_v47 = vsel %vm2454_vm9, %v2538_v24, %v13868_v2  ;;  %10949 = vsinq.f32 %v2644_v63  ;;  %v2895_v1 = vshrl.u32 %v17980_v38, %v14290_v56  ;;  %v14301_v15 = vsub.s32 %v2720_v30, %v2723_v16 }
 0x456   : > { %v2886_v62 = vshrl.u32 %v18000_v5, %v14290_v56  ;;  %v2894_v39 = vshll.u32 %v18061_v25, %v2882_v32  ;;  %v2984_v9 = vsel %vm2983_vm13, %v2982_v0, 0  ;;  %v2827_v59 = vshll.u32 %v14293_v28, 30 }
 0x457   : > { %v2889_v60 = vshrl.u32 %v17978_v46, %v14290_v56  ;;  %v2541_v2 = vsel %vm14268_vm12, 0, %v2539_v47  ;;  %v2642_v53 = vsub.s32 4, %v13965_v3  ;;  %v14314_v20 = vand.u32 8388607, %v17816_v35 }
 0x458   : > { %v14316_v18 = vshrl.u32 %v2880_v40, 5  ;;  %v2892_v7 = vshrl.u32 %v18061_v25, %v14290_v56  ;;  %v2898_v17 = vshrl.u32 %v18060_v29, %v14290_v56  ;;  %v2885_v50 = vshll.u32 %v17986_v52, %v2882_v32 }
 0x459   : > { %v2888_v8 = vshll.u32 %v18000_v5, %v2882_v32  ;;  %v14324_v30 = vor.u32 %v2895_v1, %v2894_v39  ;;  %v2986_v13 = vand.u32 31, %v2984_v9  ;;  %v2891_v23 = vshll.u32 %v17978_v46, %v2882_v32 }
 0x45a   : > { %v2897_v45 = vshll.u32 %v17980_v38, %v2882_v32  ;;  %v2545_v44 = vadd.s32 3, %v2541_v2  ;;  %v14328_v22 = vsub.s32 %v2824_v12, %v2827_v59  ;;  %v14330_v31 = vor.u32 %v2886_v62, %v2885_v50 }
 0x45b   : > { %v14332_v40 = vor.u32 %v2889_v60, %v2888_v8  ;;  %v2643_v54 = vsel %vm2558_vm14, %v2642_v53, %v13965_v3  ;;  %v14337_v19 = vor.u32 %v2892_v7, %v2891_v23  ;;  %vm2903_vm5 = vcmp.lt.s32.totalorder %v14316_v18, 4 }
 0x45c   : > { %v10944_v55 = vpop.eup %10943  ;;  %v2899_v49 = vor.u32 %v2898_v17, %v2897_v45  ;;  %v17815_v32 = vand.u32 2147483647, %v14240_v4  ;;  %v2726_v26 = vsub.s32 0, %v14301_v15  ;;  %v2909_v41 = vsel %vm2903_vm5, %v14324_v30, 920167782 }
 0x45d   : > { %v10946_v57 = vpop.eup %10945  ;;  %v14346_v10 = vsub.s32 32, %v2986_v13  ;;  %vm2900_vm1 = vcmp.lt.s32.totalorder %v14316_v18, 1  ;;  %vm2902_vm2 = vcmp.lt.s32.totalorder %v14316_v18, 3  ;;  %v2546_v3 = vand.u32 3, %v2545_v44 }
 0x45e   : > { %v10948_v0 = vpop.eup %10947  ;;  %v2645_v43 = vsel %vm14282_vm15, 0, %v2643_v54  ;;  %v2830_v63 = vsub.s32 0, %v14328_v22  ;;  %v2908_v16 = vsel %vm2900_vm1, %v14330_v31, %v14332_v40  ;;  %v2549_v47 = vxor.u32 2147483648, %v10946_v57 }
 0x45f   : > { %v10950_v24 = vpop.eup %10949  ;;  %v2552_v1 = vxor.u32 2147483648, %v10944_v55  ;;  %v2910_v62 = vsel %vm2902_vm2, %v14337_v19, %v2909_v41  ;;  %v2913_v39 = vsel %vm2903_vm5, %v2899_v49, 1326507024  ;;  %v14364_v34 = vand.u32 8388607, %v17815_v32 }
 0x460   : > { %v2649_v59 = vadd.s32 3, %v2645_v43  ;;  %v14366_v60 = vshrl.u32 %v2984_v9, 5  ;;  %v2989_v2 = vshll.u32 %v17986_v52, %v2986_v13  ;;  %v2990_v53 = vshrl.u32 %v18000_v5, %v14346_v10 }
 0x461   : > { %v2999_v7 = vshrl.u32 %v17980_v38, %v14346_v10  ;;  %v3002_v17 = vshrl.u32 %v18060_v29, %v14346_v10  ;;  %vm2548_vm3 = vcmp.eq.s32.totalorder %v2546_v3, 0  ;;  %vm2551_vm4 = vcmp.eq.s32.totalorder %v2546_v3, 2 }
 0x462   : > { %v2650_v50 = vand.u32 3, %v2649_v59  ;;  %v2550_v8 = vsel %vm2548_vm3, %v10944_v55, %v2549_v47  ;;  %v2553_v23 = vsel %vm2551_vm4, %v2552_v1, %v10946_v57  ;;  %v2653_v45 = vxor.u32 2147483648, %v10950_v24 }
 0x463   : > { %v2656_v44 = vxor.u32 2147483648, %v10948_v0  ;;  %v2992_v9 = vshll.u32 %v18000_v5, %v2986_v13  ;;  %v2993_v54 = vshrl.u32 %v17978_v46, %v14346_v10  ;;  %v2995_v49 = vshll.u32 %v17978_v46, %v2986_v13 }
 0x464   : > { %v2998_v41 = vshll.u32 %v18061_v25, %v2986_v13  ;;  %v14380_v43 = vor.u32 %v2990_v53, %v2989_v2  ;;  %v2996_v32 = vshrl.u32 %v18061_v25, %v14346_v10  ;;  %v3001_v59 = vshll.u32 %v17980_v38, %v2986_v13 }
 0x465   : > { %vm2547_vm0 = vcmp.lt.s32.totalorder %v2546_v3, 2  ;;  %vm2652_vm11 = vcmp.eq.s32.totalorder %v2650_v50, 0  ;;  %vm2655_vm6 = vcmp.eq.s32.totalorder %v2650_v50, 2  ;;  %vm2651_vm7 = vcmp.lt.s32.totalorder %v2650_v50, 2 }
 0x466   : > { %v3000_v55 = vor.u32 %v2999_v7, %v2998_v41  ;;  %v2554_v57 = vsel %vm2547_vm0, %v2550_v8, %v2553_v23  ;;  %v3003_v47 = vor.u32 %v3002_v17, %v3001_v59  ;;  %v2654_v1 = vsel %vm2652_vm11, %v10948_v0, %v2653_v45 }
 0x467   : > { %v2657_v35 = vsel %vm2655_vm6, %v2656_v44, %v10950_v24  ;;  %v2994_v21 = vor.u32 %v2993_v54, %v2992_v9  ;;  %vm2544_vm8 = vweird.f32 %v18068_v36  ;;  %vm2648_vm9 = vweird.f32 %v13496_v11 }
 0x468   : > { %v2658_v2 = vsel %vm2651_vm7, %v2654_v1, %v2657_v35  ;;  %v2997_v53 = vor.u32 %v2996_v32, %v2995_v49  ;;  %vm3007_vm12 = vcmp.lt.s32.totalorder %v14366_v60, 4  ;;  %v2555_v12 = vsel %vm2544_vm8, nan, %v2554_v57 }
 0x469   : > { %v2659_v13 = vsel %vm2648_vm9, nan, %v2658_v2  ;;  %v2912_v3 = vsel %vm2900_vm1, %v14332_v40, %v14337_v19  ;;  %v2914_v0 = vsel %vm2902_vm2, %v14324_v30, %v2913_v39  ;;  %v3013_v36 = vsel %vm3007_vm12, %v3000_v55, 920167782 }
 0x46a   : > { %v3081_v24 = vpack.c.bf16 %v2659_v13, %v2555_v12  ;;  %v9403_v11 = vmin.u32 %v2726_v26, %v14301_v15  ;;  %v9407_v35 = vmin.u32 %v2830_v63, %v14328_v22  ;;  %vm2901_vm14 = vcmp.lt.s32.totalorder %v14316_v18, 2 }
 0x46b   : > { %v3017_v32 = vsel %vm3007_vm12, %v3003_v47, 1326507024  ;;  %v2911_v7 = vsel %vm2901_vm14, %v2908_v16, %v2910_v62  ;;  %v18075_v17 = vor.u32 8388608, %v14314_v20  ;;  %vm3004_vm15 = vcmp.lt.s32.totalorder %v14366_v60, 1 }
 0x46c   : > { %vm3006_vm13 = vcmp.lt.s32.totalorder %v14366_v60, 3  ;;  %9508 = vmatmul.mubr.msk.bf16.gmra.mrb[20].mxu0 %vm5190_vm10, %v3081_v24  ;;  %9517 = vmatmul.mubr.msk.bf16.gmra.mrb[20].mxu1 %vm5190_vm10, %v3081_v24  ;;  %v2915_v30 = vsel %vm2901_vm14, %v2912_v3, %v2914_v0  ;;  %v2980_v26 = vor.u32 8388608, %v14364_v34  ;;  %v3012_v12 = vsel %vm3004_vm15, %v14380_v43, %v2994_v21 }
 0x46d   : > { %v2916_v50 = vshll.u32 %v18075_v17, 8  ;;  %v3014_v20 = vsel %vm3006_vm13, %v2997_v53, %v3013_v36  ;;  %5320 = vmatprep.mubr.bf16.mxu0 %v18029_v14  ;;  %5433 = vmatprep.mubr.bf16.mxu1 %v18029_v14  ;;  %v3016_v63 = vsel %vm3004_vm15, %v2994_v21, %v2997_v53  ;;  %v3018_v16 = vsel %vm3006_vm13, %v3000_v55, %v3017_v32 }
 0x46e   : > { %v2832_v62 = vclz %v9407_v35  ;;  %vm3005_vm3 = vcmp.lt.s32.totalorder %v14366_v60, 2  ;;  %v2728_v8 = vclz %v9403_v11  ;;  %v3020_v54 = vshll.u32 %v2980_v26, 8 }
 0x46f   : > { %v14424_v39 = vmul.u32.u64.low %v2916_v50, %v2911_v7  ;;  %v14425_v34 = vmul.u32.u64.high %v2916_v50, %v2911_v7, %v14424_v39  ;;  %v14429_v23 = vmul.u32.u64.low %v2916_v50, %v2915_v30  ;;  %v14430_v45 = vmul.u32.u64.high %v2916_v50, %v2915_v30, %v14429_v23 }
 0x470   : > { %v3015_v44 = vsel %vm3005_vm3, %v3012_v12, %v3014_v20  ;;  %v3019_v9 = vsel %vm3005_vm3, %v3016_v63, %v3018_v16  ;;  %v9408_v49 = vadd.s32 4294967294, %v2832_v62  ;;  %v2905_v41 = vsel %vm2903_vm5, %v14337_v19, 2102212464 }
 0x471   : > { %v14439_v59 = vmul.u32.u64.low %v3020_v54, %v3015_v44  ;;  %v14440_v55 = vmul.u32.u64.high %v3020_v54, %v3015_v44, %v14439_v59  ;;  %v9404_v57 = vadd.s32 4294967294, %v2728_v8  ;;  %v2884_v47 = vshrl.u32 %v17986_v52, %v14290_v56 }
 0x472   : > { %v14445_v1 = vmul.u32.u64.low %v3020_v54, %v3019_v9  ;;  %v14446_v2 = vmul.u32.u64.high %v3020_v54, %v3019_v9, %v14445_v1  ;;  %v2906_v3 = vsel %vm2902_vm2, %v14332_v40, %v2905_v41  ;;  %vm9409_vm5 = vcmp.lt.s32.totalorder %v9408_v49, 0 }
 0x473   : > { %v2904_v13 = vsel %vm2900_vm1, %v2884_v47, %v14330_v31  ;;  %v2926_v19 = vadd.s32 1, %v14425_v34  ;;  %v3009_v0 = vsel %vm3007_vm12, %v2997_v53, 2102212464  ;;  %vm9405_vm4 = vcmp.lt.s32.totalorder %v9404_v57, 0 }
 0x474   : > { %vm2925_vm0 = vc.u32 %v14430_v45, %v14424_v39  ;;  %v2988_v56 = vshrl.u32 %v17986_v52, %v14346_v10  ;;  %v2907_v31 = vsel %vm2901_vm14, %v2904_v13, %v2906_v3  ;;  %v2835_v36 = vsel %vm9409_vm5, 0, %v9408_v49 }
 0x475   : > { %v3010_v24 = vsel %vm3006_vm13, %v2994_v21, %v3009_v0  ;;  %v2731_v11 = vsel %vm9405_vm4, 0, %v9404_v57  ;;  %v2927_v53 = vsel %vm2925_vm0, %v2926_v19, %v14425_v34  ;;  %v3030_v35 = vadd.s32 1, %v14440_v55 }
 0x476   : > { %v3008_v40 = vsel %vm3004_vm15, %v2988_v56, %v14380_v43  ;;  %v2923_v32 = vmul.u32 %v2916_v50, %v2907_v31  ;;  %vm3029_vm1 = vc.u32 %v14446_v2, %v14439_v59  ;;  %v2840_v10 = vsub.s32 4294967266, %v2835_v36 }
 0x477   : > { %v3011_v18 = vsel %vm3005_vm3, %v3008_v40, %v3010_v24  ;;  %v2736_v7 = vsub.s32 4294967266, %v2731_v11  ;;  %v3031_v43 = vsel %vm3029_vm1, %v3030_v35, %v14440_v55  ;;  %v2836_v63 = vsub.s32 32, %v2835_v36 }
 0x478   : > { %v2928_v17 = vadd.s32 %v2927_v53, %v2923_v32  ;;  %v3027_v30 = vmul.u32 %v3020_v54, %v3011_v18  ;;  %v2841_v26 = vadd.s32 127, %v2840_v10  ;;  %v2732_v16 = vsub.s32 32, %v2731_v11 }
 0x479   : > { %v2737_v21 = vadd.s32 127, %v2736_v7  ;;  %v2820_v50 = vadd.s32 %v14221_v42, %v14228_v58  ;;  %v2716_v34 = vadd.s32 %v14169_v51, %v14181_v33  ;;  %v2837_v54 = vshll.u32 %v14328_v22, %v2835_v36 }
 0x47a   : > { %v2929_v12 = vadd.s32 536870912, %v2928_v17  ;;  %v3032_v20 = vadd.s32 %v3031_v43, %v3027_v30  ;;  %v2842_v62 = vshll.u32 %v2841_v26, 23  ;;  %v2733_v41 = vshll.u32 %v14301_v15, %v2731_v11 }
 0x47b   : > { %v2738_v60 = vshll.u32 %v2737_v21, 23  ;;  %v2838_v44 = vshrl.u32 %v2820_v50, %v2836_v63  ;;  %v2734_v9 = vshrl.u32 %v2716_v34, %v2732_v16  ;;  %vm2766_vm2 = vcmp.lt.s32.totalorder %v13984_v48, 0 }
 0x47c   : > { %v14479_v8 = vshrl.u32 %v2929_v12, 30  ;;  %v3033_v23 = vadd.s32 536870912, %v3032_v20  ;;  %v2843_v49 = vor.u32 4788187, %v2842_v62  ;;  %vm2662_vm11 = vcmp.lt.s32.totalorder %v13903_v61, 0 }
 0x47d   : > { %v2739_v55 = vor.u32 4788187, %v2738_v60  ;;  %v2839_v42 = vor.u32 %v2838_v44, %v2837_v54  ;;  %v2735_v58 = vor.u32 %v2734_v9, %v2733_v41  ;;  %v18076_v10 = vand.u32 2147483647, %v13984_v48 }
 0x47e   : > { %v2931_v57 = vshll.u32 %v14479_v8, 30  ;;  %v14484_v47 = vshrl.u32 %v3033_v23, 30  ;;  %v2844_v1 = vand.u32 2147483647, %v2843_v49  ;;  %v2746_v12 = vsub.s32 4, %v14278_v37 }
 0x47f   : > { %v2740_v51 = vand.u32 2147483647, %v2739_v55  ;;  %v2846_v3 = vcvt.s32.f32 %v2839_v42  ;;  %v2742_v19 = vcvt.s32.f32 %v2735_v58  ;;  %vm14503_vm6 = vcmp.le.f32.partialorder %v18076_v10, 0.7853982 }
 0x480   : > { %v14486_v33 = vsub.s32 %v2928_v17, %v2931_v57  ;;  %v3035_v13 = vshll.u32 %v14484_v47, 30  ;;  %v18079_v17 = vand.u32 2147483647, %v13903_v61  ;;  %v2747_v63 = vsel %vm2662_vm11, %v2746_v12, %v14278_v37 }
 0x481   : > { %v2847_v0 = vmul.f32 %v2846_v3, %v2844_v1  ;;  %v2743_v22 = vmul.f32 %v2742_v19, %v2740_v51  ;;  %v2850_v60 = vsub.s32 4, %v14293_v28  ;;  %v10509_v1 = vld [vmem:[%s18082_s17] ss:$8 sps:$4 sm:$0xff]   ;;  %v10511_v51 = vld [vmem:[%s18082_s17 + $0x4] ss:$8 sps:$4 sm:$0xff]   ;;  %vm2856_vm4 = vweird.f32 %v13984_v48 }
 0x482   : > { %v2934_v56 = vsub.s32 0, %v14486_v33  ;;  %v14490_v15 = vsub.s32 %v3032_v20, %v3035_v13  ;;  %vm14512_vm7 = vcmp.le.f32.partialorder %v18079_v17, 0.7853982  ;;  %v14543_v13 = vpop.f32.mrb[0].mxu0  ;;  %5750 = vmatprep.subr.bf16.mxu0 %v10511_v51  ;;  %vm2752_vm0 = vweird.f32 %v13903_v61  ;;  %v10524_v51 = vld [vmem:[%s18082_s17 + $0x50] ss:$8 sps:$4 sm:$0xff]  }
 0x483   : > { %v2848_v31 = vxor.u32 2147483648, %v2847_v0  ;;  %v2744_v36 = vxor.u32 2147483648, %v2743_v22  ;;  %v2749_v50 = vsel %vm14512_vm7, 0, %v2747_v63  ;;  %v2851_v37 = vsel %vm2766_vm2, %v2850_v60, %v14293_v28  ;;  %5751 = vmatpush1.bf16.msra.mxu0 %v10509_v1  ;;  %v10520_v60 = vld [vmem:[%s18082_s17 + $0x34] ss:$8 sps:$4 sm:$0xff]  }
 0x484   : > { %v9411_v40 = vmin.u32 %v2934_v56, %v14486_v33  ;;  %v3038_v24 = vsub.s32 0, %v14490_v15  ;;  %v2753_v34 = vadd.s32 3, %v2749_v50  ;;  %v2853_v49 = vsel %vm14503_vm6, 0, %v2851_v37 }
 0x485   : > { %v2849_v11 = vsel %vm2766_vm2, %v2848_v31, %v2847_v0  ;;  %v2745_v53 = vsel %vm2662_vm11, %v2744_v36, %v2743_v22  ;;  %v2857_v42 = vadd.s32 3, %v2853_v49  ;;  %v10514_v0 = vld [vmem:[%s18082_s17 + $0x14] ss:$8 sps:$4 sm:$0xff]   ;;  %v2924_v22 = vadd.s32 %v14424_v39, %v14430_v45  ;;  %v10517_v39 = vld [vmem:[%s18082_s17 + $0x24] ss:$8 sps:$4 sm:$0xff]  }
 0x486   : > { %v2936_v35 = vclz %v9411_v40  ;;  %v9415_v32 = vmin.u32 %v3038_v24, %v14490_v15  ;;  %v2852_v7 = vsel %vm14503_vm6, %v13984_v48, %v2849_v11  ;;  %v2748_v30 = vsel %vm14512_vm7, %v13903_v61, %v2745_v53  ;;  %v10512_v24 = vld [vmem:[%s18082_s17 + $0x10] ss:$8 sps:$4 sm:$0xff]   ;;  %5752 = vmatprep.subr.bf16.mxu0 %v10514_v0  ;;  %v10515_v48 = vld [vmem:[%s18082_s17 + $0x20] ss:$8 sps:$4 sm:$0xff]  }
 0x487   : > { %10951 = vcosq.f32 %v2852_v7  ;;  %v2754_v57 = vand.u32 3, %v2753_v34  ;;  %v2858_v28 = vand.u32 3, %v2857_v42  ;;  %5753 = vmatpush1.bf16.msra.mxu0 %v10512_v24  ;;  %v10521_v42 = vld [vmem:[%s18082_s17 + $0x40] ss:$8 sps:$4 sm:$0xff]   ;;  %vm2870_vm1 = vcmp.lt.s32.totalorder %v14176_v27, 0 }
 0x488   : > { %v9412_v26 = vadd.s32 4294967294, %v2936_v35  ;;  %v3040_v21 = vclz %v9415_v32  ;;  %10953 = vcosq.f32 %v2748_v30  ;;  %v14557_v32 = vpop.f32.mrb[1].mxu0  ;;  %5754 = vmatprep.subr.bf16.mxu0 %v10517_v39  ;;  %v10527_v0 = vld [vmem:[%s18082_s17 + $0x60] ss:$8 sps:$4 sm:$0xff]   ;;  %vm2974_vm11 = vcmp.lt.s32.totalorder %v14240_v4, 0 }
 0x489   : > { %10955 = vsinq.f32 %v2852_v7  ;;  %vm2759_vm12 = vcmp.eq.s32.totalorder %v2754_v57, 2  ;;  %vm2860_vm14 = vcmp.eq.s32.totalorder %v2858_v28, 0  ;;  %vm2863_vm15 = vcmp.eq.s32.totalorder %v2858_v28, 2  ;;  %v14560_v7 = vpop.f32.mrb[2].mxu0  ;;  %v10535_v39 = vld [vmem:[%s18082_s17 + $0x84] ss:$8 sps:$4 sm:$0xff]  }
 0x48a   : > { %vm9413_vm8 = vcmp.lt.s32.totalorder %v9412_v26, 0  ;;  %v9416_v20 = vadd.s32 4294967294, %v3040_v21  ;;  %10957 = vsinq.f32 %v2748_v30  ;;  %vm2756_vm13 = vcmp.eq.s32.totalorder %v2754_v57, 0  ;;  %v14564_v12 = vpop.f32.mrb[3].mxu0 }
 0x48b   : > { %v14523_v16 = vsel %vm9413_vm8, 0, %v9412_v26  ;;  %vm2859_vm3 = vcmp.lt.s32.totalorder %v2858_v28, 2  ;;  %vm2755_vm5 = vcmp.lt.s32.totalorder %v2754_v57, 2  ;;  %5755 = vmatpush1.bf16.msra.mxu0 %v10515_v48  ;;  %v10541_v48 = vld [vmem:[%s18082_s17 + $0xa4] ss:$8 sps:$4 sm:$0xff]  }
 0x48c   : > { %vm9417_vm9 = vcmp.lt.s32.totalorder %v9416_v20, 0  ;;  %v2944_v62 = vsub.s32 4294967266, %v14523_v16  ;;  %v2940_v31 = vsub.s32 32, %v14523_v16  ;;  %v2941_v61 = vshll.u32 %v14486_v33, %v14523_v16  ;;  %5756 = vmatprep.subr.bf16.mxu0 %v10520_v60 }
 0x48d   : > { %v14529_v44 = vsel %vm9417_vm9, 0, %v9416_v20 }
 0x48e   : > { %v2945_v41 = vadd.s32 127, %v2944_v62  ;;  %v3048_v55 = vsub.s32 4294967266, %v14529_v44  ;;  %v2942_v30 = vshrl.u32 %v2924_v22, %v2940_v31  ;;  %v3044_v26 = vsub.s32 32, %v14529_v44  ;;  %v10532_v31 = vld [vmem:[%s18082_s17 + $0x74] ss:$8 sps:$4 sm:$0xff]  }
 0x48f   : > { %v3028_v62 = vadd.s32 %v14439_v59, %v14446_v2  ;;  %v10518_v59 = vld [vmem:[%s18082_s17 + $0x30] ss:$8 sps:$4 sm:$0xff]  }
 0x490   : > { %v2946_v36 = vshll.u32 %v2945_v41, 23  ;;  %v3049_v40 = vadd.s32 127, %v3048_v55  ;;  %v10523_v41 = vld [vmem:[%s18082_s17 + $0x44] ss:$8 sps:$4 sm:$0xff]   ;;  %5757 = vmatpush1.bf16.msra.mxu0 %v10518_v59 }
 0x491   : > { %v10952_v23 = vpop.eup %10951  ;;  %v3046_v37 = vshrl.u32 %v3028_v62, %v3044_v26  ;;  %5758 = vmatprep.subr.bf16.mxu0 %v10523_v41  ;;  %v3058_v26 = vsub.s32 4, %v14484_v47 }
 0x492   : > { %v10954_v9 = vpop.eup %10953  ;;  %v2864_v19 = vxor.u32 2147483648, %v10952_v23  ;;  %v2947_v50 = vor.u32 4788187, %v2946_v36  ;;  %v3050_v34 = vshll.u32 %v3049_v40, 23  ;;  %v18083_v36 = vand.u32 2147483647, %v14176_v27 }
 0x493   : > { %v10956_v54 = vpop.eup %10955  ;;  %v2760_v58 = vxor.u32 2147483648, %v10954_v9  ;;  %v17818_v40 = vlaneseq }
 0x494   : > { %v2861_v3 = vxor.u32 2147483648, %v10956_v54  ;;  %v10958_v56 = vpop.eup %10957  ;;  %v2865_v35 = vsel %vm2863_vm15, %v2864_v19, %v10956_v54  ;;  %v2948_v16 = vand.u32 2147483647, %v2947_v50  ;;  %v3045_v54 = vshll.u32 %v14490_v15, %v14529_v44  ;;  %v10526_v15 = vld [vmem:[%s18082_s17 + $0x54] ss:$8 sps:$4 sm:$0xff]   ;;  %5759 = vmatpush1.bf16.msra.mxu0 %v10521_v42 }
 0x495   : > { %v2757_v11 = vxor.u32 2147483648, %v10958_v56  ;;  %v2761_v53 = vsel %vm2759_vm12, %v2760_v58, %v10958_v56  ;;  %v3051_v49 = vor.u32 4788187, %v3050_v34  ;;  %5760 = vmatprep.subr.bf16.mxu0 %v10526_v15  ;;  %v10529_v19 = vld [vmem:[%s18082_s17 + $0x64] ss:$8 sps:$4 sm:$0xff]  }
 0x496   : > { %v2862_v45 = vsel %vm2860_vm14, %v10952_v23, %v2861_v3  ;;  %v3047_v57 = vor.u32 %v3046_v37, %v3045_v54  ;;  %vm14619_vm2 = vcmp.le.f32.partialorder %v18083_v36, 0.7853982  ;;  %v10539_v50 = vld [vmem:[%s18082_s17 + $0xa0] ss:$8 sps:$4 sm:$0xff]   ;;  %v10544_v34 = vld [vmem:[%s18082_s17 + $0xb4] ss:$8 sps:$4 sm:$0xff]  }
 0x497   : > { %v2758_v10 = vsel %vm2756_vm13, %v10954_v9, %v2757_v11  ;;  %v2866_v18 = vsel %vm2859_vm3, %v2862_v45, %v2865_v35  ;;  %v2943_v9 = vor.u32 %v2942_v30, %v2941_v61  ;;  %v3052_v1 = vand.u32 2147483647, %v3051_v49  ;;  %v10530_v11 = vld [vmem:[%s18082_s17 + $0x70] ss:$8 sps:$4 sm:$0xff]   ;;  %v10547_v49 = vld [vmem:[%s18082_s17 + $0xc4] ss:$8 sps:$4 sm:$0xff]  }
 0x498   : > { %v2762_v17 = vsel %vm2755_vm5, %v2758_v10, %v2761_v53  ;;  %v2867_v43 = vsel %vm2856_vm4, nan, %v2866_v18  ;;  %v3054_v44 = vcvt.s32.f32 %v3047_v57  ;;  %5761 = vmatpush1.bf16.msra.mxu0 %v10524_v51  ;;  %v2954_v45 = vsub.s32 4, %v14479_v8 }
 0x499   : > { %v2763_v21 = vsel %vm2752_vm0, nan, %v2762_v17  ;;  %v2950_v55 = vcvt.s32.f32 %v2943_v9  ;;  %5762 = vmatprep.subr.bf16.mxu0 %v10529_v19  ;;  %v18086_v35 = vand.u32 2147483647, %v14240_v4  ;;  %v10533_v17 = vld [vmem:[%s18082_s17 + $0x80] ss:$8 sps:$4 sm:$0xff]   ;;  %vm2960_vm13 = vweird.f32 %v14176_v27 }
 0x49a   : > { %v3082_v20 = vpack.c.bf16 %v2867_v43, %v2763_v21  ;;  %v3055_v3 = vmul.f32 %v3054_v44, %v3052_v1  ;;  %v10538_v43 = vld [vmem:[%s18082_s17 + $0x94] ss:$8 sps:$4 sm:$0xff]   ;;  %v2955_v30 = vsel %vm2870_vm1, %v2954_v45, %v14479_v8  ;;  %v10536_v21 = vld [vmem:[%s18082_s17 + $0x90] ss:$8 sps:$4 sm:$0xff]   ;;  %v3059_v8 = vsel %vm2974_vm11, %v3058_v26, %v14484_v47  ;;  %v10545_v1 = vld [vmem:[%s18082_s17 + $0xc0] ss:$8 sps:$4 sm:$0xff]  }
 0x49b   : > { %v2951_v58 = vmul.f32 %v2950_v55, %v2948_v16  ;;  %vm14638_vm6 = vcmp.le.f32.partialorder %v18086_v35, 0.7853982  ;;  %v10542_v47 = vld [vmem:[%s18082_s17 + $0xb0] ss:$8 sps:$4 sm:$0xff]   ;;  %v10550_v19 = vld [vmem:[%s18082_s17 + $0xd4] ss:$8 sps:$4 sm:$0xff]   ;;  %vm3064_vm3 = vweird.f32 %v14240_v4 }
 0x49c   : > { %9509 = vmatmul.mubr.msk.bf16.gmra.mrb[24].mxu0 %vm5190_vm10, %v3082_v20  ;;  %9518 = vmatmul.mubr.msk.bf16.gmra.mrb[24].mxu1 %vm5190_vm10, %v3082_v20  ;;  %v3056_v56 = vxor.u32 2147483648, %v3055_v3  ;;  %v2957_v20 = vsel %vm14619_vm2, 0, %v2955_v30  ;;  %v3061_v9 = vsel %vm14638_vm6, 0, %v3059_v8 }
 0x49d   : > { %5330 = vmatprep.mubr.bf16.mxu0 %v18029_v14  ;;  %5443 = vmatprep.mubr.bf16.mxu1 %v18029_v14  ;;  %v2952_v28 = vxor.u32 2147483648, %v2951_v58  ;;  %v2961_v61 = vadd.s32 3, %v2957_v20  ;;  %v3065_v57 = vadd.s32 3, %v3061_v9  ;;  %v10554_v20 = vld [vmem:[%s18082_s17 + $0xf0] ss:$8 sps:$4 sm:$0xff]  }
 0x49e   : > { %5763 = vmatpush1.bf16.msra.mxu0 %v10527_v0  ;;  %v3057_v53 = vsel %vm2974_vm11, %v3056_v56, %v3055_v3 }
 0x49f   : > { %v2953_v22 = vsel %vm2870_vm1, %v2952_v28, %v2951_v58  ;;  %5764 = vmatprep.subr.bf16.mxu0 %v10532_v31  ;;  %v3060_v18 = vsel %vm14638_vm6, %v14240_v4, %v3057_v53  ;;  %v2962_v37 = vand.u32 3, %v2961_v61  ;;  %v3066_v28 = vand.u32 3, %v3065_v57  ;;  %v10548_v31 = vld [vmem:[%s18082_s17 + $0xd0] ss:$8 sps:$4 sm:$0xff]   ;;  %v5454_v4 = vld [vmem:[#allocation11] sm:$0x3] }
 0x4a0   : > { %v2956_v24 = vsel %vm14619_vm2, %v14176_v27, %v2953_v22  ;;  %v10556_v27 = vld [vmem:[%s18082_s17 + $0xf4] ss:$8 sps:$4 sm:$0xff]  }
 0x4a1   : > { %10959 = vcosq.f32 %v2956_v24  ;;  %vm2964_vm7 = vcmp.eq.s32.totalorder %v2962_v37, 0  ;;  %vm2967_vm8 = vcmp.eq.s32.totalorder %v2962_v37, 2  ;;  %vm2963_vm9 = vcmp.lt.s32.totalorder %v2962_v37, 2 }
 0x4a2   : > { %10961 = vsinq.f32 %v2956_v24  ;;  %5765 = vmatpush1.bf16.msra.mxu0 %v10530_v11  ;;  %vm3068_vm12 = vcmp.eq.s32.totalorder %v3066_v28, 0  ;;  %vm3071_vm14 = vcmp.eq.s32.totalorder %v3066_v28, 2  ;;  %vm3067_vm15 = vcmp.lt.s32.totalorder %v3066_v28, 2  ;;  %v10553_v24 = vld [vmem:[%s18082_s17 + $0xe4] ss:$8 sps:$4 sm:$0xff]  }
 0x4a3   : > { %5766 = vmatprep.subr.bf16.mxu0 %v10535_v39  ;;  %10963 = vsinq.f32 %v3060_v18 }
 0x4a4   : > { %10965 = vcosq.f32 %v3060_v18 }
 0x4a6   : > { %v14569_v63 = vpop.f32.mrb[4].mxu0  ;;  %5767 = vmatpush1.bf16.msra.mxu0 %v10533_v17  ;;  %v5457_v17 = vshrl.u32 %v17818_v40, 7 }
 0x4a7   : > { %v14578_v23 = vpop.f32.mrb[5].mxu0  ;;  %5768 = vmatprep.subr.bf16.mxu0 %v10538_v43  ;;  %v10551_v43 = vld [vmem:[%s18082_s17 + $0xe0] ss:$8 sps:$4 sm:$0xff]  }
 0x4a8   : > { %v14584_v33 = vpop.f32.mrb[6].mxu0  ;;  %v14709_v26 = vsub.s32 0, %v5457_v17 }
 0x4a9   : > { %v14589_v2 = vpop.f32.mrb[7].mxu0 }
 0x4aa   : > { %5769 = vmatpush1.bf16.msra.mxu0 %v10536_v21  ;;  %18089 = vst [vmem:[#allocation48_spill] sm:$0xff] %v14709_v26  ;;  %v14711_v21 = vsub.s32 1, %v5457_v17 }
 0x4ab   : > { %v10960_v62 = vpop.eup %10959  ;;  %5770 = vmatprep.subr.bf16.mxu0 %v10541_v48  ;;  %v14717_v48 = vrot.slane %v5454_v4, %v14709_v26 }
 0x4ac   : > { %v10962_v60 = vpop.eup %10961  ;;  %v2968_v54 = vxor.u32 2147483648, %v10960_v62  ;;  %18090 = vst [vmem:[#allocation51_spill] sm:$0xff] %v14711_v21  ;;  %v14720_v61 = vrot.slane %v5454_v4, %v14711_v21 }
 0x4ad   : > { %v10964_v59 = vpop.eup %10963  ;;  %v2965_v16 = vxor.u32 2147483648, %v10962_v60  ;;  %v5466_v8 = vadd.f32 %v14717_v48, %v14543_v13  ;;  %v5470_v13 = vadd.f32 %v14717_v48, %v14569_v63 }
 0x4ae   : > { %5771 = vmatpush1.bf16.msra.mxu0 %v10539_v50  ;;  %v10966_v55 = vpop.eup %10965  ;;  %v3069_v58 = vxor.u32 2147483648, %v10964_v59  ;;  %v2969_v51 = vsel %vm2967_vm8, %v2968_v54, %v10962_v60  ;;  %v5468_v50 = vadd.f32 %v14717_v48, %v14560_v7  ;;  %v5469_v9 = vadd.f32 %v14720_v61, %v14564_v12 }
 0x4af   : > { %5772 = vmatprep.subr.bf16.mxu0 %v10544_v34  ;;  %v2966_v44 = vsel %vm2964_vm7, %v10960_v62, %v2965_v16  ;;  %v3072_v3 = vxor.u32 2147483648, %v10966_v55  ;;  %v5467_v62 = vadd.f32 %v14720_v61, %v14557_v32  ;;  %v5498_v34 = vmax.f32 %v5466_v8, 0.0 }
 0x4b0   : > { %v2970_v22 = vsel %vm2963_vm9, %v2966_v44, %v2969_v51  ;;  %v3070_v56 = vsel %vm3068_vm12, %v10966_v55, %v3069_v58  ;;  %v5500_v60 = vmax.f32 %v5468_v50, 0.0  ;;  %v5472_v7 = vadd.f32 %v14717_v48, %v14584_v33 }
 0x4b1   : > { %v3073_v36 = vsel %vm3071_vm14, %v3072_v3, %v10964_v59  ;;  %v2971_v45 = vsel %vm2960_vm13, nan, %v2970_v22  ;;  %v5501_v59 = vmax.f32 %v5469_v9, 0.0  ;;  %v5502_v54 = vmax.f32 %v5470_v13, 0.0 }
 0x4b2   : > { %5773 = vmatpush1.bf16.msra.mxu0 %v10542_v47  ;;  %v3074_v53 = vsel %vm3067_vm15, %v3070_v56, %v3073_v36  ;;  %v5530_v37 = vpack.c.bf16 %v5500_v60, %v5498_v34  ;;  %v5499_v47 = vmax.f32 %v5467_v62, 0.0  ;;  %v5471_v32 = vadd.f32 %v14720_v61, %v14578_v23 }
 0x4b3   : > { %5774 = vmatprep.subr.bf16.mxu0 %v10547_v49  ;;  %v3075_v35 = vsel %vm3064_vm3, nan, %v3074_v53  ;;  %v5504_v49 = vmax.f32 %v5472_v7, 0.0  ;;  %v5473_v12 = vadd.f32 %v14720_v61, %v14589_v2 }
 0x4b4   : > { %v3083_v18 = vpack.c.bf16 %v3075_v35, %v2971_v45  ;;  %v5531_v16 = vpack.c.bf16 %v5501_v59, %v5499_v47  ;;  %v5503_v44 = vmax.f32 %v5471_v32, 0.0 }
 0x4b5   : > { %v5532_v55 = vpack.c.bf16 %v5504_v49, %v5502_v54  ;;  %v5505_v51 = vmax.f32 %v5473_v12, 0.0  ;;  %v10557_v12 = vld [vmem:[%s18091_s8] ss:$8 sps:$4 sm:$0xff]  }
 0x4b6   : > { %5775 = vmatpush1.bf16.msra.mxu0 %v10545_v1  ;;  %9519 = vmatmul.mubr.msk.bf16.gmra.mrb[28].mxu1 %vm5190_vm10, %v3083_v18 }
 0x4b7   : > { %5776 = vmatprep.subr.bf16.mxu0 %v10550_v19  ;;  %9510 = vmatmul.mubr.msk.bf16.gmra.mrb[28].mxu0 %vm5190_vm10, %v3083_v18  ;;  %v5533_v22 = vpack.c.bf16 %v5505_v51, %v5503_v44  ;;  %v10563_v44 = vld [vmem:[%s18091_s8 + $0x20] ss:$8 sps:$4 sm:$0xff]   ;;  %v10568_v51 = vld [vmem:[%s18091_s8 + $0x34] ss:$8 sps:$4 sm:$0xff]  }
 0x4b8   : > { %5782 = vmatprep.mubr.bf16.mxu0 %v5531_v16 }
 0x4ba   : > { %5777 = vmatpush1.bf16.msra.mxu0 %v10548_v31 }
 0x4bb   : > { %5778 = vmatprep.subr.bf16.mxu0 %v10553_v24 }
 0x4be   : > { %5779 = vmatpush1.bf16.msra.mxu0 %v10551_v43 }
 0x4bf   : > { %5780 = vmatprep.subr.bf16.mxu0 %v10556_v27 }
 0x4c2   : > { %5781 = vmatpush1.bf16.msra.mxu0 %v10554_v20 }
 0x4c5   : > { %5783 = vmatmul.mubr.bf16.vlgmr.msra.gmra.mrb[32].mxu0 %v5530_v37 }
 0x4c6   : > { %5792 = vmatprep.mubr.bf16.mxu0 %v5533_v22  ;;  %v10577_v22 = vld [vmem:[%s18091_s8 + $0x64] ss:$8 sps:$4 sm:$0xff]  }
 0x4cd   : > { %5793 = vmatmul.mubr.bf16.gmra.mrb[36].mxu0 %v5532_v55 }
 0x4eb   : > { %v14680_v41 = vpop.f32.mrb[8].mxu0 }
 0x4ec   : > { %v14682_v42 = vpop.f32.mrb[9].mxu0  ;;  %v5474_v57 = vadd.f32 %v14717_v48, %v14680_v41 }
 0x4ed   : > { %v14687_v15 = vpop.f32.mrb[10].mxu0  ;;  %v5475_v58 = vadd.f32 %v14720_v61, %v14682_v42 }
 0x4ee   : > { %v5288_v0 = vpop.f32.mrb[11].mxu0  ;;  %v5476_v63 = vadd.f32 %v14717_v48, %v14687_v15  ;;  %v5506_v28 = vmax.f32 %v5474_v57, 0.0  ;;  %v10559_v57 = vld [vmem:[%s18091_s8 + $0x4] ss:$8 sps:$4 sm:$0xff]  }
 0x4ef   : > { %v5477_v33 = vadd.f32 %v14720_v61, %v5288_v0  ;;  %v5507_v56 = vmax.f32 %v5475_v58, 0.0  ;;  %6115 = vmatprep.subr.bf16.mxu1 %v10559_v57 }
 0x4f0   : > { %v5508_v3 = vmax.f32 %v5476_v63, 0.0  ;;  %v10562_v63 = vld [vmem:[%s18091_s8 + $0x14] ss:$8 sps:$4 sm:$0xff]   ;;  %6116 = vmatpush1.bf16.msra.mxu1 %v10557_v12 }
 0x4f1   : > { %v5509_v41 = vmax.f32 %v5477_v33, 0.0  ;;  %v10560_v33 = vld [vmem:[%s18091_s8 + $0x10] ss:$8 sps:$4 sm:$0xff]   ;;  %6117 = vmatprep.subr.bf16.mxu1 %v10562_v63 }
 0x4f2   : > { %v5534_v36 = vpack.c.bf16 %v5508_v3, %v5506_v28  ;;  %v10571_v28 = vld [vmem:[%s18091_s8 + $0x44] ss:$8 sps:$4 sm:$0xff]   ;;  %v10569_v3 = vld [vmem:[%s18091_s8 + $0x40] ss:$8 sps:$4 sm:$0xff]  }
 0x4f3   : > { %v5292_v11 = vpop.f32.mrb[12].mxu0  ;;  %v5535_v15 = vpack.c.bf16 %v5509_v41, %v5507_v56  ;;  %v10575_v56 = vld [vmem:[%s18091_s8 + $0x60] ss:$8 sps:$4 sm:$0xff]   ;;  %v10580_v41 = vld [vmem:[%s18091_s8 + $0x74] ss:$8 sps:$4 sm:$0xff]  }
 0x4f4   : > { %v5294_v39 = vpop.f32.mrb[13].mxu0  ;;  %v5478_v19 = vadd.f32 %v14717_v48, %v5292_v11  ;;  %6118 = vmatpush1.bf16.msra.mxu1 %v10560_v33 }
 0x4f5   : > { %v5296_v10 = vpop.f32.mrb[14].mxu0  ;;  %v5479_v42 = vadd.f32 %v14720_v61, %v5294_v39  ;;  %5802 = vmatprep.mubr.bf16.mxu0 %v5535_v15  ;;  %v10586_v15 = vld [vmem:[%s18091_s8 + $0x94] ss:$8 sps:$4 sm:$0xff]  }
 0x4f6   : > { %v5298_v30 = vpop.f32.mrb[15].mxu0  ;;  %v5480_v0 = vadd.f32 %v14717_v48, %v5296_v10  ;;  %v5510_v45 = vmax.f32 %v5478_v19, 0.0  ;;  %5803 = vmatmul.mubr.bf16.gmra.mrb[40].mxu0 %v5534_v36  ;;  %v10574_v19 = vld [vmem:[%s18091_s8 + $0x54] ss:$8 sps:$4 sm:$0xff]   ;;  %v10583_v36 = vld [vmem:[%s18091_s8 + $0x84] ss:$8 sps:$4 sm:$0xff]  }
 0x4f7   : > { %v5481_v24 = vadd.f32 %v14720_v61, %v5298_v30  ;;  %v5511_v35 = vmax.f32 %v5479_v42, 0.0  ;;  %v10581_v42 = vld [vmem:[%s18091_s8 + $0x80] ss:$8 sps:$4 sm:$0xff]  }
 0x4f8   : > { %v5512_v18 = vmax.f32 %v5480_v0, 0.0  ;;  %v10584_v0 = vld [vmem:[%s18091_s8 + $0x90] ss:$8 sps:$4 sm:$0xff]  }
 0x4f9   : > { %v5513_v17 = vmax.f32 %v5481_v24, 0.0  ;;  %v10589_v24 = vld [vmem:[%s18091_s8 + $0xa4] ss:$8 sps:$4 sm:$0xff]  }
 0x4fa   : > { %v5536_v27 = vpack.c.bf16 %v5512_v18, %v5510_v45  ;;  %v10592_v45 = vld [vmem:[%s18091_s8 + $0xb4] ss:$8 sps:$4 sm:$0xff]   ;;  %v10593_v18 = vld [vmem:[%s18091_s8 + $0xc0] ss:$8 sps:$4 sm:$0xff]  }
 0x4fb   : > { %v5537_v4 = vpack.c.bf16 %v5513_v17, %v5511_v35  ;;  %v10595_v35 = vld [vmem:[%s18091_s8 + $0xc4] ss:$8 sps:$4 sm:$0xff]   ;;  %v10598_v17 = vld [vmem:[%s18091_s8 + $0xd4] ss:$8 sps:$4 sm:$0xff]  }
 0x4fd   : > { %5812 = vmatprep.mubr.bf16.mxu0 %v5537_v4  ;;  %v10604_v4 = vld [vmem:[%s18091_s8 + $0xf4] ss:$8 sps:$4 sm:$0xff]  }
 0x4fe   : > { %5813 = vmatmul.mubr.bf16.gmra.mrb[44].mxu0 %v5536_v27  ;;  %v10599_v27 = vld [vmem:[%s18091_s8 + $0xe0] ss:$8 sps:$4 sm:$0xff]  }
 0x50d   : > { %v5302_v1 = vpop.f32.mrb[16].mxu0 }
 0x50e   : > { %v5304_v23 = vpop.f32.mrb[17].mxu0  ;;  %v5482_v53 = vadd.f32 %v14717_v48, %v5302_v1  ;;  %v10565_v1 = vld [vmem:[%s18091_s8 + $0x24] ss:$8 sps:$4 sm:$0xff]  }
 0x50f   : > { %v5306_v2 = vpop.f32.mrb[18].mxu0  ;;  %v5483_v11 = vadd.f32 %v14720_v61, %v5304_v23  ;;  %6119 = vmatprep.subr.bf16.mxu1 %v10565_v1  ;;  %v10566_v23 = vld [vmem:[%s18091_s8 + $0x30] ss:$8 sps:$4 sm:$0xff]  }
 0x510   : > { %v5308_v31 = vpop.f32.mrb[19].mxu0  ;;  %v5484_v43 = vadd.f32 %v14717_v48, %v5306_v2  ;;  %v5514_v20 = vmax.f32 %v5482_v53, 0.0  ;;  %6120 = vmatpush1.bf16.msra.mxu1 %v10563_v44  ;;  %v10572_v2 = vld [vmem:[%s18091_s8 + $0x50] ss:$8 sps:$4 sm:$0xff]   ;;  %v10587_v53 = vld [vmem:[%s18091_s8 + $0xa0] ss:$8 sps:$4 sm:$0xff]  }
 0x511   : > { %v5485_v39 = vadd.f32 %v14720_v61, %v5308_v31  ;;  %v5515_v8 = vmax.f32 %v5483_v11, 0.0  ;;  %6121 = vmatprep.subr.bf16.mxu1 %v10568_v51  ;;  %v10578_v31 = vld [vmem:[%s18091_s8 + $0x70] ss:$8 sps:$4 sm:$0xff]  }
 0x512   : > { %v5516_v10 = vmax.f32 %v5484_v43, 0.0  ;;  %v10590_v11 = vld [vmem:[%s18091_s8 + $0xb0] ss:$8 sps:$4 sm:$0xff]  }
 0x513   : > { %v5517_v30 = vmax.f32 %v5485_v39, 0.0  ;;  %v10596_v43 = vld [vmem:[%s18091_s8 + $0xd0] ss:$8 sps:$4 sm:$0xff]   ;;  %v10601_v39 = vld [vmem:[%s18091_s8 + $0xe4] ss:$8 sps:$4 sm:$0xff]  }
 0x514   : > { %v5538_v50 = vpack.c.bf16 %v5516_v10, %v5514_v20  ;;  %6122 = vmatpush1.bf16.msra.mxu1 %v10566_v23  ;;  %v10602_v20 = vld [vmem:[%s18091_s8 + $0xf0] ss:$8 sps:$4 sm:$0xff]  }
 0x515   : > { %v5539_v62 = vpack.c.bf16 %v5517_v30, %v5515_v8  ;;  %6123 = vmatprep.subr.bf16.mxu1 %v10571_v28 }
 0x517   : > { %5822 = vmatprep.mubr.bf16.mxu0 %v5539_v62 }
 0x518   : > { %5823 = vmatmul.mubr.bf16.gmra.mrb[48].mxu0 %v5538_v50  ;;  %6124 = vmatpush1.bf16.msra.mxu1 %v10569_v3  ;;  %v5578_v3 = vld [vmem:[#allocation13] sm:$0x3] }
 0x519   : > { %6125 = vmatprep.subr.bf16.mxu1 %v10574_v19  ;;  %v14862_v19 = vrot.slane %v5578_v3, %v14709_v26 }
 0x51c   : > { %6126 = vmatpush1.bf16.msra.mxu1 %v10572_v2  ;;  %v14865_v2 = vrot.slane %v5578_v3, %v14711_v21 }
 0x51d   : > { %6127 = vmatprep.subr.bf16.mxu1 %v10577_v22 }
 0x520   : > { %6128 = vmatpush1.bf16.msra.mxu1 %v10575_v56 }
 0x521   : > { %6129 = vmatprep.subr.bf16.mxu1 %v10580_v41 }
 0x524   : > { %6130 = vmatpush1.bf16.msra.mxu1 %v10578_v31 }
 0x525   : > { %6131 = vmatprep.subr.bf16.mxu1 %v10583_v36 }
 0x528   : > { %6132 = vmatpush1.bf16.msra.mxu1 %v10581_v42 }
 0x529   : > { %6133 = vmatprep.subr.bf16.mxu1 %v10586_v15 }
 0x52c   : > { %6134 = vmatpush1.bf16.msra.mxu1 %v10584_v0 }
 0x52d   : > { %6135 = vmatprep.subr.bf16.mxu1 %v10589_v24 }
 0x530   : > { %6136 = vmatpush1.bf16.msra.mxu1 %v10587_v53 }
 0x531   : > { %6137 = vmatprep.subr.bf16.mxu1 %v10592_v45 }
 0x534   : > { %6138 = vmatpush1.bf16.msra.mxu1 %v10590_v11 }
 0x535   : > { %6139 = vmatprep.subr.bf16.mxu1 %v10595_v35 }
 0x538   : > { %6140 = vmatpush1.bf16.msra.mxu1 %v10593_v18 }
 0x539   : > { %6141 = vmatprep.subr.bf16.mxu1 %v10598_v17 }
 0x53c   : > { %6142 = vmatpush1.bf16.msra.mxu1 %v10596_v43 }
 0x53d   : > { %6143 = vmatprep.subr.bf16.mxu1 %v10601_v39 }
 0x53f   : > { %v5312_v34 = vpop.f32.mrb[20].mxu0 }
 0x540   : > { %v5486_v60 = vadd.f32 %v14717_v48, %v5312_v34  ;;  %v5314_v9 = vpop.f32.mrb[21].mxu0  ;;  %6144 = vmatpush1.bf16.msra.mxu1 %v10599_v27 }
 0x541   : > { %v5487_v37 = vadd.f32 %v14720_v61, %v5314_v9  ;;  %v5316_v47 = vpop.f32.mrb[22].mxu0  ;;  %6145 = vmatprep.subr.bf16.mxu1 %v10604_v4 }
 0x542   : > { %v5488_v59 = vadd.f32 %v14717_v48, %v5316_v47  ;;  %v5318_v16 = vpop.f32.mrb[23].mxu0  ;;  %v5518_v7 = vmax.f32 %v5486_v60, 0.0 }
 0x543   : > { %v5489_v13 = vadd.f32 %v14720_v61, %v5318_v16  ;;  %v5519_v32 = vmax.f32 %v5487_v37, 0.0 }
 0x544   : > { %v5520_v54 = vmax.f32 %v5488_v59, 0.0  ;;  %6146 = vmatpush1.bf16.msra.mxu1 %v10602_v20 }
 0x545   : > { %v5521_v49 = vmax.f32 %v5489_v13, 0.0 }
 0x546   : > { %v5540_v55 = vpack.c.bf16 %v5520_v54, %v5518_v7 }
 0x547   : > { %v5541_v58 = vpack.c.bf16 %v5521_v49, %v5519_v32 }
 0x549   : > { %5832 = vmatprep.mubr.bf16.mxu0 %v5541_v58 }
 0x54a   : > { %5833 = vmatmul.mubr.bf16.gmra.mrb[52].mxu0 %v5540_v55 }
 0x56f   : > { %v5322_v10 = vpop.f32.mrb[24].mxu0 }
 0x570   : > { %v5490_v8 = vadd.f32 %v14717_v48, %v5322_v10  ;;  %v5324_v30 = vpop.f32.mrb[25].mxu0 }
 0x571   : > { %v5491_v50 = vadd.f32 %v14720_v61, %v5324_v30  ;;  %v5326_v62 = vpop.f32.mrb[26].mxu0 }
 0x572   : > { %v5492_v34 = vadd.f32 %v14717_v48, %v5326_v62  ;;  %v5328_v60 = vpop.f32.mrb[27].mxu0  ;;  %v5522_v37 = vmax.f32 %v5490_v8, 0.0 }
 0x573   : > { %v5493_v9 = vadd.f32 %v14720_v61, %v5328_v60  ;;  %v5523_v59 = vmax.f32 %v5491_v50, 0.0 }
 0x574   : > { %v5524_v47 = vmax.f32 %v5492_v34, 0.0 }
 0x575   : > { %v5525_v16 = vmax.f32 %v5493_v9, 0.0 }
 0x576   : > { %v5542_v13 = vpack.c.bf16 %v5524_v47, %v5522_v37 }
 0x577   : > { %v5543_v7 = vpack.c.bf16 %v5525_v16, %v5523_v59 }
 0x579   : > { %5842 = vmatprep.mubr.bf16.mxu0 %v5543_v7 }
 0x57a   : > { %5843 = vmatmul.mubr.bf16.gmra.mrb[56].mxu0 %v5542_v13 }
 0x58a   : > { %v5332_v54 = vpop.f32.mrb[28].mxu0 }
 0x58b   : > { %v5494_v32 = vadd.f32 %v14717_v48, %v5332_v54  ;;  %v5334_v49 = vpop.f32.mrb[29].mxu0 }
 0x58c   : > { %v5495_v55 = vadd.f32 %v14720_v61, %v5334_v49  ;;  %v5336_v12 = vpop.f32.mrb[30].mxu0 }
 0x58d   : > { %v5496_v57 = vadd.f32 %v14717_v48, %v5336_v12  ;;  %v5338_v58 = vpop.f32.mrb[31].mxu0  ;;  %v5526_v33 = vmax.f32 %v5494_v32, 0.0 }
 0x58e   : > { %v5497_v63 = vadd.f32 %v14720_v61, %v5338_v58  ;;  %v5527_v44 = vmax.f32 %v5495_v55, 0.0 }
 0x58f   : > { %v5528_v1 = vmax.f32 %v5496_v57, 0.0 }
 0x590   : > { %v5529_v51 = vmax.f32 %v5497_v63, 0.0 }
 0x591   : > { %v5544_v23 = vpack.c.bf16 %v5528_v1, %v5526_v33 }
 0x592   : > { %v5545_v28 = vpack.c.bf16 %v5529_v51, %v5527_v44 }
 0x594   : > { %5852 = vmatprep.mubr.bf16.mxu0 %v5545_v28 }
 0x595   : > { %5853 = vmatmul.mubr.bf16.gmra.mrb[60].mxu0 %v5544_v23 }
 0x598   : > { %v5784_v22 = vpop.f32.mrb[32].mxu0 }
 0x599   : > { %v5785_v48 = vadd.f32 %v5784_v22, %v14862_v19  ;;  %v5786_v56 = vpop.f32.mrb[33].mxu0 }
 0x59a   : > { %v5787_v61 = vadd.f32 %v5786_v56, %v14865_v2  ;;  %v5788_v41 = vpop.f32.mrb[34].mxu0 }
 0x59b   : > { %v5789_v31 = vadd.f32 %v5788_v41, %v14862_v19  ;;  %v5790_v36 = vpop.f32.mrb[35].mxu0  ;;  %v5863_v15 = vmax.f32 %v5785_v48, 0.0 }
 0x59c   : > { %v5791_v42 = vadd.f32 %v5790_v36, %v14865_v2  ;;  %v5864_v24 = vmax.f32 %v5787_v61, 0.0 }
 0x59d   : > { %v5865_v0 = vmax.f32 %v5789_v31, 0.0 }
 0x59e   : > { %v5866_v53 = vmax.f32 %v5791_v42, 0.0 }
 0x59f   : > { %v5895_v45 = vpack.c.bf16 %v5865_v0, %v5863_v15 }
 0x5a0   : > { %v5896_v11 = vpack.c.bf16 %v5866_v53, %v5864_v24  ;;  %v5794_v35 = vpop.f32.mrb[36].mxu0 }
 0x5a1   : > { %v5795_v18 = vadd.f32 %v5794_v35, %v14862_v19  ;;  %v5796_v17 = vpop.f32.mrb[37].mxu0 }
 0x5a2   : > { %6147 = vmatprep.mubr.bf16.mxu1 %v5896_v11  ;;  %v5797_v43 = vadd.f32 %v5796_v17, %v14865_v2  ;;  %v5798_v39 = vpop.f32.mrb[38].mxu0 }
 0x5a3   : > { %6148 = vmatmul.mubr.bf16.vlgmr.msra.gmra.mrb[32].mxu1 %v5895_v45  ;;  %v5799_v27 = vadd.f32 %v5798_v39, %v14862_v19  ;;  %v5800_v4 = vpop.f32.mrb[39].mxu0  ;;  %v5867_v10 = vmax.f32 %v5795_v18, 0.0 }
 0x5a4   : > { %v5801_v20 = vadd.f32 %v5800_v4, %v14865_v2  ;;  %v5868_v30 = vmax.f32 %v5797_v43, 0.0 }
 0x5a5   : > { %v5869_v8 = vmax.f32 %v5799_v27, 0.0 }
 0x5a6   : > { %v5870_v50 = vmax.f32 %v5801_v20, 0.0 }
 0x5a7   : > { %v5897_v62 = vpack.c.bf16 %v5869_v8, %v5867_v10 }
 0x5a8   : > { %v5898_v34 = vpack.c.bf16 %v5870_v50, %v5868_v30 }
 0x5aa   : > { %6157 = vmatprep.mubr.bf16.mxu1 %v5898_v34 }
 0x5ab   : > { %6158 = vmatmul.mubr.bf16.gmra.mrb[36].mxu1 %v5897_v62 }
 0x5c9   : > { %v5804_v60 = vpop.f32.mrb[40].mxu0 }
 0x5ca   : > { %v5805_v9 = vadd.f32 %v5804_v60, %v14862_v19  ;;  %v5806_v37 = vpop.f32.mrb[41].mxu0 }
 0x5cb   : > { %v5807_v47 = vadd.f32 %v5806_v37, %v14865_v2  ;;  %v5808_v59 = vpop.f32.mrb[42].mxu0 }
 0x5cc   : > { %v5809_v16 = vadd.f32 %v5808_v59, %v14862_v19  ;;  %v5810_v13 = vpop.f32.mrb[43].mxu0  ;;  %v5871_v54 = vmax.f32 %v5805_v9, 0.0  ;;  %v10605_v59 = vld [vmem:[#allocation16] ss:$8 sps:$4 sm:$0xff]  }
 0x5cd   : > { %v5811_v7 = vadd.f32 %v5810_v13, %v14865_v2  ;;  %v5872_v49 = vmax.f32 %v5807_v47, 0.0 }
 0x5ce   : > { %v5873_v32 = vmax.f32 %v5809_v16, 0.0  ;;  %v10607_v16 = vld [vmem:[#allocation16 + $0x4] ss:$8 sps:$4 sm:$0xff]  }
 0x5cf   : > { %v5874_v55 = vmax.f32 %v5811_v7, 0.0  ;;  %v10610_v7 = vld [vmem:[#allocation16 + $0x14] ss:$8 sps:$4 sm:$0xff]   ;;  %6480 = vmatprep.subr.bf16.mxu0 %v10607_v16 }
 0x5d0   : > { %v5899_v12 = vpack.c.bf16 %v5873_v32, %v5871_v54  ;;  %6481 = vmatpush1.bf16.msra.mxu0 %v10605_v59  ;;  %v10608_v54 = vld [vmem:[#allocation16 + $0x10] ss:$8 sps:$4 sm:$0xff]   ;;  %v10613_v32 = vld [vmem:[#allocation16 + $0x24] ss:$8 sps:$4 sm:$0xff]  }
 0x5d1   : > { %v5900_v57 = vpack.c.bf16 %v5874_v55, %v5872_v49  ;;  %v5814_v58 = vpop.f32.mrb[44].mxu0  ;;  %6482 = vmatprep.subr.bf16.mxu0 %v10610_v7  ;;  %v10611_v49 = vld [vmem:[#allocation16 + $0x20] ss:$8 sps:$4 sm:$0xff]   ;;  %v10616_v55 = vld [vmem:[#allocation16 + $0x34] ss:$8 sps:$4 sm:$0xff]  }
 0x5d2   : > { %v5815_v63 = vadd.f32 %v5814_v58, %v14862_v19  ;;  %v5816_v33 = vpop.f32.mrb[45].mxu0  ;;  %v10617_v58 = vld [vmem:[#allocation16 + $0x40] ss:$8 sps:$4 sm:$0xff]  }
 0x5d3   : > { %6167 = vmatprep.mubr.bf16.mxu1 %v5900_v57  ;;  %v5817_v1 = vadd.f32 %v5816_v33, %v14865_v2  ;;  %v5818_v44 = vpop.f32.mrb[46].mxu0  ;;  %v10619_v57 = vld [vmem:[#allocation16 + $0x44] ss:$8 sps:$4 sm:$0xff]   ;;  %v10620_v33 = vld [vmem:[#allocation16 + $0x50] ss:$8 sps:$4 sm:$0xff]  }
 0x5d4   : > { %6168 = vmatmul.mubr.bf16.gmra.mrb[40].mxu1 %v5899_v12  ;;  %v5819_v51 = vadd.f32 %v5818_v44, %v14862_v19  ;;  %v5820_v23 = vpop.f32.mrb[47].mxu0  ;;  %v5875_v3 = vmax.f32 %v5815_v63, 0.0  ;;  %6483 = vmatpush1.bf16.msra.mxu0 %v10608_v54  ;;  %v10614_v12 = vld [vmem:[#allocation16 + $0x30] ss:$8 sps:$4 sm:$0xff]   ;;  %v10622_v63 = vld [vmem:[#allocation16 + $0x54] ss:$8 sps:$4 sm:$0xff]  }
 0x5d5   : > { %v5821_v28 = vadd.f32 %v5820_v23, %v14865_v2  ;;  %v5876_v48 = vmax.f32 %v5817_v1, 0.0  ;;  %6484 = vmatprep.subr.bf16.mxu0 %v10613_v32  ;;  %v10625_v1 = vld [vmem:[#allocation16 + $0x64] ss:$8 sps:$4 sm:$0xff]   ;;  %v10623_v44 = vld [vmem:[#allocation16 + $0x60] ss:$8 sps:$4 sm:$0xff]  }
 0x5d6   : > { %v5877_v22 = vmax.f32 %v5819_v51, 0.0  ;;  %v10628_v51 = vld [vmem:[#allocation16 + $0x74] ss:$8 sps:$4 sm:$0xff]   ;;  %v10626_v23 = vld [vmem:[#allocation16 + $0x70] ss:$8 sps:$4 sm:$0xff]  }
 0x5d7   : > { %v5878_v56 = vmax.f32 %v5821_v28, 0.0  ;;  %v10631_v28 = vld [vmem:[#allocation16 + $0x84] ss:$8 sps:$4 sm:$0xff]  }
 0x5d8   : > { %v5901_v61 = vpack.c.bf16 %v5877_v22, %v5875_v3  ;;  %6485 = vmatpush1.bf16.msra.mxu0 %v10611_v49  ;;  %v10629_v3 = vld [vmem:[#allocation16 + $0x80] ss:$8 sps:$4 sm:$0xff]   ;;  %v10634_v22 = vld [vmem:[#allocation16 + $0x94] ss:$8 sps:$4 sm:$0xff]  }
 0x5d9   : > { %v5902_v41 = vpack.c.bf16 %v5878_v56, %v5876_v48  ;;  %6486 = vmatprep.subr.bf16.mxu0 %v10616_v55  ;;  %v10632_v48 = vld [vmem:[#allocation16 + $0x90] ss:$8 sps:$4 sm:$0xff]   ;;  %v10637_v56 = vld [vmem:[#allocation16 + $0xa4] ss:$8 sps:$4 sm:$0xff]  }
 0x5db   : > { %6177 = vmatprep.mubr.bf16.mxu1 %v5902_v41  ;;  %v10640_v41 = vld [vmem:[#allocation16 + $0xb4] ss:$8 sps:$4 sm:$0xff]  }
 0x5dc   : > { %6178 = vmatmul.mubr.bf16.gmra.mrb[44].mxu1 %v5901_v61  ;;  %6487 = vmatpush1.bf16.msra.mxu0 %v10614_v12  ;;  %v10635_v61 = vld [vmem:[#allocation16 + $0xa0] ss:$8 sps:$4 sm:$0xff]  }
 0x5dd   : > { %6488 = vmatprep.subr.bf16.mxu0 %v10619_v57 }
 0x5e0   : > { %6489 = vmatpush1.bf16.msra.mxu0 %v10617_v58  ;;  %v5943_v58 = vld [vmem:[#allocation14] sm:$0x3] }
 0x5e1   : > { %6490 = vmatprep.subr.bf16.mxu0 %v10622_v63  ;;  %v14900_v63 = vrot.slane %v5943_v58, %v14709_v26 }
 0x5e4   : > { %6491 = vmatpush1.bf16.msra.mxu0 %v10620_v33  ;;  %v14903_v33 = vrot.slane %v5943_v58, %v14711_v21 }
 0x5e5   : > { %6492 = vmatprep.subr.bf16.mxu0 %v10625_v1 }
 0x5e8   : > { %6493 = vmatpush1.bf16.msra.mxu0 %v10623_v44 }
 0x5e9   : > { %6494 = vmatprep.subr.bf16.mxu0 %v10628_v51 }
 0x5eb   : > { %v5824_v31 = vpop.f32.mrb[48].mxu0 }
 0x5ec   : > { %v5825_v36 = vadd.f32 %v5824_v31, %v14862_v19  ;;  %v5826_v42 = vpop.f32.mrb[49].mxu0  ;;  %6495 = vmatpush1.bf16.msra.mxu0 %v10626_v23  ;;  %v10638_v31 = vld [vmem:[#allocation16 + $0xb0] ss:$8 sps:$4 sm:$0xff]  }
 0x5ed   : > { %v5827_v15 = vadd.f32 %v5826_v42, %v14865_v2  ;;  %v5828_v0 = vpop.f32.mrb[50].mxu0  ;;  %6496 = vmatprep.subr.bf16.mxu0 %v10631_v28  ;;  %v10641_v42 = vld [vmem:[#allocation16 + $0xc0] ss:$8 sps:$4 sm:$0xff]  }
 0x5ee   : > { %v5829_v24 = vadd.f32 %v5828_v0, %v14862_v19  ;;  %v5830_v53 = vpop.f32.mrb[51].mxu0  ;;  %v5879_v11 = vmax.f32 %v5825_v36, 0.0  ;;  %v10643_v36 = vld [vmem:[#allocation16 + $0xc4] ss:$8 sps:$4 sm:$0xff]   ;;  %v10644_v0 = vld [vmem:[#allocation16 + $0xd0] ss:$8 sps:$4 sm:$0xff]  }
 0x5ef   : > { %v5831_v45 = vadd.f32 %v5830_v53, %v14865_v2  ;;  %v5880_v18 = vmax.f32 %v5827_v15, 0.0  ;;  %v10646_v15 = vld [vmem:[#allocation16 + $0xd4] ss:$8 sps:$4 sm:$0xff]   ;;  %v10647_v53 = vld [vmem:[#allocation16 + $0xe0] ss:$8 sps:$4 sm:$0xff]  }
 0x5f0   : > { %v5881_v35 = vmax.f32 %v5829_v24, 0.0  ;;  %6497 = vmatpush1.bf16.msra.mxu0 %v10629_v3  ;;  %v10649_v24 = vld [vmem:[#allocation16 + $0xe4] ss:$8 sps:$4 sm:$0xff]  }
 0x5f1   : > { %v5882_v17 = vmax.f32 %v5831_v45, 0.0  ;;  %6498 = vmatprep.subr.bf16.mxu0 %v10634_v22  ;;  %v10652_v45 = vld [vmem:[#allocation16 + $0xf4] ss:$8 sps:$4 sm:$0xff]  }
 0x5f2   : > { %v5903_v43 = vpack.c.bf16 %v5881_v35, %v5879_v11  ;;  %v10650_v11 = vld [vmem:[#allocation16 + $0xf0] ss:$8 sps:$4 sm:$0xff]  }
 0x5f3   : > { %v5904_v39 = vpack.c.bf16 %v5882_v17, %v5880_v18 }
 0x5f4   : > { %6499 = vmatpush1.bf16.msra.mxu0 %v10632_v48 }
 0x5f5   : > { %6187 = vmatprep.mubr.bf16.mxu1 %v5904_v39  ;;  %6500 = vmatprep.subr.bf16.mxu0 %v10637_v56 }
 0x5f6   : > { %6188 = vmatmul.mubr.bf16.gmra.mrb[48].mxu1 %v5903_v43 }
 0x5f8   : > { %6501 = vmatpush1.bf16.msra.mxu0 %v10635_v61 }
 0x5f9   : > { %6502 = vmatprep.subr.bf16.mxu0 %v10640_v41 }
 0x5fc   : > { %6503 = vmatpush1.bf16.msra.mxu0 %v10638_v31 }
 0x5fd   : > { %6504 = vmatprep.subr.bf16.mxu0 %v10643_v36 }
 0x600   : > { %6505 = vmatpush1.bf16.msra.mxu0 %v10641_v42 }
 0x601   : > { %6506 = vmatprep.subr.bf16.mxu0 %v10646_v15 }
 0x604   : > { %6507 = vmatpush1.bf16.msra.mxu0 %v10644_v0 }
 0x605   : > { %6508 = vmatprep.subr.bf16.mxu0 %v10649_v24 }
 0x608   : > { %6509 = vmatpush1.bf16.msra.mxu0 %v10647_v53 }
 0x609   : > { %6510 = vmatprep.subr.bf16.mxu0 %v10652_v45 }
 0x60c   : > { %6511 = vmatpush1.bf16.msra.mxu0 %v10650_v11 }
 0x61d   : > { %v5834_v27 = vpop.f32.mrb[52].mxu0 }
 0x61e   : > { %v5835_v4 = vadd.f32 %v5834_v27, %v14862_v19  ;;  %v5836_v20 = vpop.f32.mrb[53].mxu0 }
 0x61f   : > { %v5837_v10 = vadd.f32 %v5836_v20, %v14865_v2  ;;  %v5838_v8 = vpop.f32.mrb[54].mxu0 }
 0x620   : > { %v5839_v30 = vadd.f32 %v5838_v8, %v14862_v19  ;;  %v5840_v50 = vpop.f32.mrb[55].mxu0  ;;  %v5883_v34 = vmax.f32 %v5835_v4, 0.0 }
 0x621   : > { %v5841_v62 = vadd.f32 %v5840_v50, %v14865_v2  ;;  %v5884_v9 = vmax.f32 %v5837_v10, 0.0 }
 0x622   : > { %v5885_v60 = vmax.f32 %v5839_v30, 0.0 }
 0x623   : > { %v5886_v37 = vmax.f32 %v5841_v62, 0.0 }
 0x624   : > { %v5905_v47 = vpack.c.bf16 %v5885_v60, %v5883_v34 }
 0x625   : > { %v5906_v13 = vpack.c.bf16 %v5886_v37, %v5884_v9 }
 0x627   : > { %6197 = vmatprep.mubr.bf16.mxu1 %v5906_v13 }
 0x628   : > { %6198 = vmatmul.mubr.bf16.gmra.mrb[52].mxu1 %v5905_v47 }
 0x64d   : > { %v5844_v35 = vpop.f32.mrb[56].mxu0 }
 0x64e   : > { %v5845_v18 = vadd.f32 %v5844_v35, %v14862_v19  ;;  %v5846_v17 = vpop.f32.mrb[57].mxu0 }
 0x64f   : > { %v5847_v43 = vadd.f32 %v5846_v17, %v14865_v2  ;;  %v5848_v39 = vpop.f32.mrb[58].mxu0 }
 0x650   : > { %v5849_v27 = vadd.f32 %v5848_v39, %v14862_v19  ;;  %v5850_v4 = vpop.f32.mrb[59].mxu0  ;;  %v5887_v10 = vmax.f32 %v5845_v18, 0.0 }
 0x651   : > { %v5851_v20 = vadd.f32 %v5850_v4, %v14865_v2  ;;  %v5888_v30 = vmax.f32 %v5847_v43, 0.0 }
 0x652   : > { %v5889_v8 = vmax.f32 %v5849_v27, 0.0 }
 0x653   : > { %v5890_v50 = vmax.f32 %v5851_v20, 0.0 }
 0x654   : > { %v5907_v62 = vpack.c.bf16 %v5889_v8, %v5887_v10 }
 0x655   : > { %v5908_v34 = vpack.c.bf16 %v5890_v50, %v5888_v30 }
 0x657   : > { %6207 = vmatprep.mubr.bf16.mxu1 %v5908_v34 }
 0x658   : > { %6208 = vmatmul.mubr.bf16.gmra.mrb[56].mxu1 %v5907_v62 }
 0x668   : > { %v5854_v60 = vpop.f32.mrb[60].mxu0 }
 0x669   : > { %v5855_v9 = vadd.f32 %v5854_v60, %v14862_v19  ;;  %v5856_v37 = vpop.f32.mrb[61].mxu0 }
 0x66a   : > { %v5857_v47 = vadd.f32 %v5856_v37, %v14865_v2  ;;  %v5858_v59 = vpop.f32.mrb[62].mxu0 }
 0x66b   : > { %v5859_v16 = vadd.f32 %v5858_v59, %v14862_v19  ;;  %v5860_v13 = vpop.f32.mrb[63].mxu0  ;;  %v5891_v54 = vmax.f32 %v5855_v9, 0.0 }
 0x66c   : > { %v5861_v7 = vadd.f32 %v5860_v13, %v14865_v2  ;;  %v5892_v49 = vmax.f32 %v5857_v47, 0.0 }
 0x66d   : > { %v5893_v32 = vmax.f32 %v5859_v16, 0.0 }
 0x66e   : > { %v5894_v55 = vmax.f32 %v5861_v7, 0.0 }
 0x66f   : > { %v5909_v12 = vpack.c.bf16 %v5893_v32, %v5891_v54 }
 0x670   : > { %v5910_v57 = vpack.c.bf16 %v5894_v55, %v5892_v49 }
 0x672   : > { %6217 = vmatprep.mubr.bf16.mxu1 %v5910_v57 }
 0x673   : > { %6218 = vmatmul.mubr.bf16.gmra.mrb[60].mxu1 %v5909_v12 }
 0x676   : > { %v6149_v1 = vpop.f32.mrb[32].mxu1 }
 0x677   : > { %v6150_v19 = vadd.f32 %v6149_v1, %v14900_v63  ;;  %v6151_v44 = vpop.f32.mrb[33].mxu1 }
 0x678   : > { %v6152_v2 = vadd.f32 %v6151_v44, %v14903_v33  ;;  %v6153_v51 = vpop.f32.mrb[34].mxu1 }
 0x679   : > { %v6154_v23 = vadd.f32 %v6153_v51, %v14900_v63  ;;  %v6155_v28 = vpop.f32.mrb[35].mxu1  ;;  %v6228_v22 = vmax.f32 %v6150_v19, 0.0 }
 0x67a   : > { %v6156_v3 = vadd.f32 %v6155_v28, %v14903_v33  ;;  %v6229_v56 = vmax.f32 %v6152_v2, 0.0 }
 0x67b   : > { %v6230_v48 = vmax.f32 %v6154_v23, 0.0 }
 0x67c   : > { %v6231_v61 = vmax.f32 %v6156_v3, 0.0 }
 0x67d   : > { %v6260_v41 = vpack.c.bf16 %v6230_v48, %v6228_v22 }
 0x67e   : > { %v6261_v31 = vpack.c.bf16 %v6231_v61, %v6229_v56  ;;  %v6159_v36 = vpop.f32.mrb[36].mxu1 }
 0x67f   : > { %v6160_v42 = vadd.f32 %v6159_v36, %v14900_v63  ;;  %v6161_v15 = vpop.f32.mrb[37].mxu1 }
 0x680   : > { %6512 = vmatprep.mubr.bf16.mxu0 %v6261_v31  ;;  %v6162_v0 = vadd.f32 %v6161_v15, %v14903_v33  ;;  %v6163_v24 = vpop.f32.mrb[38].mxu1 }
 0x681   : > { %6513 = vmatmul.mubr.bf16.vlgmr.msra.gmra.mrb[64].mxu0 %v6260_v41  ;;  %v6164_v53 = vadd.f32 %v6163_v24, %v14900_v63  ;;  %v6165_v45 = vpop.f32.mrb[39].mxu1  ;;  %v6232_v35 = vmax.f32 %v6160_v42, 0.0 }
 0x682   : > { %v6166_v11 = vadd.f32 %v6165_v45, %v14903_v33  ;;  %v6233_v17 = vmax.f32 %v6162_v0, 0.0 }
 0x683   : > { %v6234_v18 = vmax.f32 %v6164_v53, 0.0 }
 0x684   : > { %v6235_v43 = vmax.f32 %v6166_v11, 0.0 }
 0x685   : > { %v6262_v39 = vpack.c.bf16 %v6234_v18, %v6232_v35 }
 0x686   : > { %v6263_v27 = vpack.c.bf16 %v6235_v43, %v6233_v17 }
 0x688   : > { %6522 = vmatprep.mubr.bf16.mxu0 %v6263_v27 }
 0x689   : > { %6523 = vmatmul.mubr.bf16.gmra.mrb[68].mxu0 %v6262_v39 }
 0x6a7   : > { %v6169_v4 = vpop.f32.mrb[40].mxu1 }
 0x6a8   : > { %v6170_v20 = vadd.f32 %v6169_v4, %v14900_v63  ;;  %v6171_v10 = vpop.f32.mrb[41].mxu1 }
 0x6a9   : > { %v6172_v8 = vadd.f32 %v6171_v10, %v14903_v33  ;;  %v6173_v30 = vpop.f32.mrb[42].mxu1 }
 0x6aa   : > { %v6174_v50 = vadd.f32 %v6173_v30, %v14900_v63  ;;  %v6175_v62 = vpop.f32.mrb[43].mxu1  ;;  %v6236_v60 = vmax.f32 %v6170_v20, 0.0  ;;  %v10653_v30 = vld [vmem:[#allocation19] ss:$8 sps:$4 sm:$0xff]  }
 0x6ab   : > { %v6176_v34 = vadd.f32 %v6175_v62, %v14903_v33  ;;  %v6237_v37 = vmax.f32 %v6172_v8, 0.0 }
 0x6ac   : > { %v6238_v9 = vmax.f32 %v6174_v50, 0.0  ;;  %v10655_v50 = vld [vmem:[#allocation19 + $0x4] ss:$8 sps:$4 sm:$0xff]  }
 0x6ad   : > { %v6239_v47 = vmax.f32 %v6176_v34, 0.0  ;;  %v10658_v34 = vld [vmem:[#allocation19 + $0x14] ss:$8 sps:$4 sm:$0xff]   ;;  %6845 = vmatprep.subr.bf16.mxu1 %v10655_v50 }
 0x6ae   : > { %v6264_v59 = vpack.c.bf16 %v6238_v9, %v6236_v60  ;;  %6846 = vmatpush1.bf16.msra.mxu1 %v10653_v30  ;;  %v10656_v60 = vld [vmem:[#allocation19 + $0x10] ss:$8 sps:$4 sm:$0xff]   ;;  %v10661_v9 = vld [vmem:[#allocation19 + $0x24] ss:$8 sps:$4 sm:$0xff]  }
 0x6af   : > { %v6265_v16 = vpack.c.bf16 %v6239_v47, %v6237_v37  ;;  %v6179_v13 = vpop.f32.mrb[44].mxu1  ;;  %6847 = vmatprep.subr.bf16.mxu1 %v10658_v34  ;;  %v10659_v37 = vld [vmem:[#allocation19 + $0x20] ss:$8 sps:$4 sm:$0xff]   ;;  %v10664_v47 = vld [vmem:[#allocation19 + $0x34] ss:$8 sps:$4 sm:$0xff]  }
 0x6b0   : > { %v6180_v7 = vadd.f32 %v6179_v13, %v14900_v63  ;;  %v6181_v54 = vpop.f32.mrb[45].mxu1  ;;  %v10665_v13 = vld [vmem:[#allocation19 + $0x40] ss:$8 sps:$4 sm:$0xff]  }
 0x6b1   : > { %6532 = vmatprep.mubr.bf16.mxu0 %v6265_v16  ;;  %v6182_v32 = vadd.f32 %v6181_v54, %v14903_v33  ;;  %v6183_v49 = vpop.f32.mrb[46].mxu1  ;;  %v10667_v16 = vld [vmem:[#allocation19 + $0x44] ss:$8 sps:$4 sm:$0xff]   ;;  %v10668_v54 = vld [vmem:[#allocation19 + $0x50] ss:$8 sps:$4 sm:$0xff]  }
 0x6b2   : > { %6533 = vmatmul.mubr.bf16.gmra.mrb[72].mxu0 %v6264_v59  ;;  %v6184_v55 = vadd.f32 %v6183_v49, %v14900_v63  ;;  %v6185_v12 = vpop.f32.mrb[47].mxu1  ;;  %v6240_v58 = vmax.f32 %v6180_v7, 0.0  ;;  %6848 = vmatpush1.bf16.msra.mxu1 %v10656_v60  ;;  %v10662_v59 = vld [vmem:[#allocation19 + $0x30] ss:$8 sps:$4 sm:$0xff]   ;;  %v10670_v7 = vld [vmem:[#allocation19 + $0x54] ss:$8 sps:$4 sm:$0xff]  }
 0x6b3   : > { %v6186_v57 = vadd.f32 %v6185_v12, %v14903_v33  ;;  %v6241_v19 = vmax.f32 %v6182_v32, 0.0  ;;  %6849 = vmatprep.subr.bf16.mxu1 %v10661_v9  ;;  %v10673_v32 = vld [vmem:[#allocation19 + $0x64] ss:$8 sps:$4 sm:$0xff]   ;;  %v10671_v49 = vld [vmem:[#allocation19 + $0x60] ss:$8 sps:$4 sm:$0xff]  }
 0x6b4   : > { %v6242_v1 = vmax.f32 %v6184_v55, 0.0  ;;  %v10676_v55 = vld [vmem:[#allocation19 + $0x74] ss:$8 sps:$4 sm:$0xff]   ;;  %v10674_v12 = vld [vmem:[#allocation19 + $0x70] ss:$8 sps:$4 sm:$0xff]  }
 0x6b5   : > { %v6243_v44 = vmax.f32 %v6186_v57, 0.0  ;;  %v10679_v57 = vld [vmem:[#allocation19 + $0x84] ss:$8 sps:$4 sm:$0xff]  }
 0x6b6   : > { %v6266_v2 = vpack.c.bf16 %v6242_v1, %v6240_v58  ;;  %6850 = vmatpush1.bf16.msra.mxu1 %v10659_v37  ;;  %v10677_v58 = vld [vmem:[#allocation19 + $0x80] ss:$8 sps:$4 sm:$0xff]   ;;  %v10682_v1 = vld [vmem:[#allocation19 + $0x94] ss:$8 sps:$4 sm:$0xff]  }
 0x6b7   : > { %v6267_v51 = vpack.c.bf16 %v6243_v44, %v6241_v19  ;;  %6851 = vmatprep.subr.bf16.mxu1 %v10664_v47  ;;  %v10680_v19 = vld [vmem:[#allocation19 + $0x90] ss:$8 sps:$4 sm:$0xff]   ;;  %v10685_v44 = vld [vmem:[#allocation19 + $0xa4] ss:$8 sps:$4 sm:$0xff]  }
 0x6b9   : > { %6542 = vmatprep.mubr.bf16.mxu0 %v6267_v51  ;;  %v10688_v51 = vld [vmem:[#allocation19 + $0xb4] ss:$8 sps:$4 sm:$0xff]  }
 0x6ba   : > { %6543 = vmatmul.mubr.bf16.gmra.mrb[76].mxu0 %v6266_v2  ;;  %6852 = vmatpush1.bf16.msra.mxu1 %v10662_v59  ;;  %v10683_v2 = vld [vmem:[#allocation19 + $0xa0] ss:$8 sps:$4 sm:$0xff]  }
 0x6bb   : > { %6853 = vmatprep.subr.bf16.mxu1 %v10667_v16 }
 0x6be   : > { %6854 = vmatpush1.bf16.msra.mxu1 %v10665_v13  ;;  %v6308_v13 = vld [vmem:[#allocation17] sm:$0x3] }
 0x6bf   : > { %6855 = vmatprep.subr.bf16.mxu1 %v10670_v7  ;;  %v14938_v7 = vrot.slane %v6308_v13, %v14709_v26 }
 0x6c2   : > { %6856 = vmatpush1.bf16.msra.mxu1 %v10668_v54  ;;  %v14941_v54 = vrot.slane %v6308_v13, %v14711_v21 }
 0x6c3   : > { %6857 = vmatprep.subr.bf16.mxu1 %v10673_v32 }
 0x6c6   : > { %6858 = vmatpush1.bf16.msra.mxu1 %v10671_v49 }
 0x6c7   : > { %6859 = vmatprep.subr.bf16.mxu1 %v10676_v55 }
 0x6c9   : > { %v6189_v23 = vpop.f32.mrb[48].mxu1 }
 0x6ca   : > { %v6190_v28 = vadd.f32 %v6189_v23, %v14900_v63  ;;  %v6191_v3 = vpop.f32.mrb[49].mxu1  ;;  %6860 = vmatpush1.bf16.msra.mxu1 %v10674_v12  ;;  %v10686_v23 = vld [vmem:[#allocation19 + $0xb0] ss:$8 sps:$4 sm:$0xff]  }
 0x6cb   : > { %v6192_v22 = vadd.f32 %v6191_v3, %v14903_v33  ;;  %v6193_v48 = vpop.f32.mrb[50].mxu1  ;;  %6861 = vmatprep.subr.bf16.mxu1 %v10679_v57  ;;  %v10689_v3 = vld [vmem:[#allocation19 + $0xc0] ss:$8 sps:$4 sm:$0xff]  }
 0x6cc   : > { %v6194_v56 = vadd.f32 %v6193_v48, %v14900_v63  ;;  %v6195_v61 = vpop.f32.mrb[51].mxu1  ;;  %v6244_v31 = vmax.f32 %v6190_v28, 0.0  ;;  %v10691_v28 = vld [vmem:[#allocation19 + $0xc4] ss:$8 sps:$4 sm:$0xff]   ;;  %v10692_v48 = vld [vmem:[#allocation19 + $0xd0] ss:$8 sps:$4 sm:$0xff]  }
 0x6cd   : > { %v6196_v41 = vadd.f32 %v6195_v61, %v14903_v33  ;;  %v6245_v42 = vmax.f32 %v6192_v22, 0.0  ;;  %v10694_v22 = vld [vmem:[#allocation19 + $0xd4] ss:$8 sps:$4 sm:$0xff]   ;;  %v10695_v61 = vld [vmem:[#allocation19 + $0xe0] ss:$8 sps:$4 sm:$0xff]  }
 0x6ce   : > { %v6246_v36 = vmax.f32 %v6194_v56, 0.0  ;;  %6862 = vmatpush1.bf16.msra.mxu1 %v10677_v58  ;;  %v10697_v56 = vld [vmem:[#allocation19 + $0xe4] ss:$8 sps:$4 sm:$0xff]  }
 0x6cf   : > { %v6247_v15 = vmax.f32 %v6196_v41, 0.0  ;;  %6863 = vmatprep.subr.bf16.mxu1 %v10682_v1  ;;  %v10700_v41 = vld [vmem:[#allocation19 + $0xf4] ss:$8 sps:$4 sm:$0xff]  }
 0x6d0   : > { %v6268_v0 = vpack.c.bf16 %v6246_v36, %v6244_v31  ;;  %v10698_v31 = vld [vmem:[#allocation19 + $0xf0] ss:$8 sps:$4 sm:$0xff]  }
 0x6d1   : > { %v6269_v24 = vpack.c.bf16 %v6247_v15, %v6245_v42 }
 0x6d2   : > { %6864 = vmatpush1.bf16.msra.mxu1 %v10680_v19 }
 0x6d3   : > { %6552 = vmatprep.mubr.bf16.mxu0 %v6269_v24  ;;  %6865 = vmatprep.subr.bf16.mxu1 %v10685_v44 }
 0x6d4   : > { %6553 = vmatmul.mubr.bf16.gmra.mrb[80].mxu0 %v6268_v0 }
 0x6d6   : > { %6866 = vmatpush1.bf16.msra.mxu1 %v10683_v2 }
 0x6d7   : > { %6867 = vmatprep.subr.bf16.mxu1 %v10688_v51 }
 0x6da   : > { %6868 = vmatpush1.bf16.msra.mxu1 %v10686_v23 }
 0x6db   : > { %6869 = vmatprep.subr.bf16.mxu1 %v10691_v28 }
 0x6de   : > { %6870 = vmatpush1.bf16.msra.mxu1 %v10689_v3 }
 0x6df   : > { %6871 = vmatprep.subr.bf16.mxu1 %v10694_v22 }
 0x6e2   : > { %6872 = vmatpush1.bf16.msra.mxu1 %v10692_v48 }
 0x6e3   : > { %6873 = vmatprep.subr.bf16.mxu1 %v10697_v56 }
 0x6e6   : > { %6874 = vmatpush1.bf16.msra.mxu1 %v10695_v61 }
 0x6e7   : > { %6875 = vmatprep.subr.bf16.mxu1 %v10700_v41 }
 0x6ea   : > { %6876 = vmatpush1.bf16.msra.mxu1 %v10698_v31 }
 0x6fb   : > { %v6199_v53 = vpop.f32.mrb[52].mxu1 }
 0x6fc   : > { %v6200_v45 = vadd.f32 %v6199_v53, %v14900_v63  ;;  %v6201_v11 = vpop.f32.mrb[53].mxu1 }
 0x6fd   : > { %v6202_v35 = vadd.f32 %v6201_v11, %v14903_v33  ;;  %v6203_v18 = vpop.f32.mrb[54].mxu1 }
 0x6fe   : > { %v6204_v17 = vadd.f32 %v6203_v18, %v14900_v63  ;;  %v6205_v43 = vpop.f32.mrb[55].mxu1  ;;  %v6248_v27 = vmax.f32 %v6200_v45, 0.0 }
 0x6ff   : > { %v6206_v39 = vadd.f32 %v6205_v43, %v14903_v33  ;;  %v6249_v20 = vmax.f32 %v6202_v35, 0.0 }
 0x700   : > { %v6250_v4 = vmax.f32 %v6204_v17, 0.0 }
 0x701   : > { %v6251_v10 = vmax.f32 %v6206_v39, 0.0 }
 0x702   : > { %v6270_v8 = vpack.c.bf16 %v6250_v4, %v6248_v27 }
 0x703   : > { %v6271_v62 = vpack.c.bf16 %v6251_v10, %v6249_v20 }
 0x705   : > { %6562 = vmatprep.mubr.bf16.mxu0 %v6271_v62 }
 0x706   : > { %6563 = vmatmul.mubr.bf16.gmra.mrb[84].mxu0 %v6270_v8 }
 0x72b   : > { %v6209_v36 = vpop.f32.mrb[56].mxu1 }
 0x72c   : > { %v6210_v42 = vadd.f32 %v6209_v36, %v14900_v63  ;;  %v6211_v15 = vpop.f32.mrb[57].mxu1 }
 0x72d   : > { %v6212_v0 = vadd.f32 %v6211_v15, %v14903_v33  ;;  %v6213_v24 = vpop.f32.mrb[58].mxu1 }
 0x72e   : > { %v6214_v53 = vadd.f32 %v6213_v24, %v14900_v63  ;;  %v6215_v45 = vpop.f32.mrb[59].mxu1  ;;  %v6252_v35 = vmax.f32 %v6210_v42, 0.0 }
 0x72f   : > { %v6216_v11 = vadd.f32 %v6215_v45, %v14903_v33  ;;  %v6253_v17 = vmax.f32 %v6212_v0, 0.0 }
 0x730   : > { %v6254_v18 = vmax.f32 %v6214_v53, 0.0 }
 0x731   : > { %v6255_v43 = vmax.f32 %v6216_v11, 0.0 }
 0x732   : > { %v6272_v39 = vpack.c.bf16 %v6254_v18, %v6252_v35 }
 0x733   : > { %v6273_v27 = vpack.c.bf16 %v6255_v43, %v6253_v17 }
 0x735   : > { %6572 = vmatprep.mubr.bf16.mxu0 %v6273_v27 }
 0x736   : > { %6573 = vmatmul.mubr.bf16.gmra.mrb[88].mxu0 %v6272_v39 }
 0x746   : > { %v6219_v4 = vpop.f32.mrb[60].mxu1 }
 0x747   : > { %v6220_v20 = vadd.f32 %v6219_v4, %v14900_v63  ;;  %v6221_v10 = vpop.f32.mrb[61].mxu1 }
 0x748   : > { %v6222_v8 = vadd.f32 %v6221_v10, %v14903_v33  ;;  %v6223_v30 = vpop.f32.mrb[62].mxu1 }
 0x749   : > { %v6224_v50 = vadd.f32 %v6223_v30, %v14900_v63  ;;  %v6225_v62 = vpop.f32.mrb[63].mxu1  ;;  %v6256_v60 = vmax.f32 %v6220_v20, 0.0 }
 0x74a   : > { %v6226_v34 = vadd.f32 %v6225_v62, %v14903_v33  ;;  %v6257_v37 = vmax.f32 %v6222_v8, 0.0 }
 0x74b   : > { %v6258_v9 = vmax.f32 %v6224_v50, 0.0 }
 0x74c   : > { %v6259_v47 = vmax.f32 %v6226_v34, 0.0 }
 0x74d   : > { %v6274_v59 = vpack.c.bf16 %v6258_v9, %v6256_v60 }
 0x74e   : > { %v6275_v16 = vpack.c.bf16 %v6259_v47, %v6257_v37 }
 0x750   : > { %6582 = vmatprep.mubr.bf16.mxu0 %v6275_v16 }
 0x751   : > { %6583 = vmatmul.mubr.bf16.gmra.mrb[92].mxu0 %v6274_v59 }
 0x754   : > { %v6514_v32 = vpop.f32.mrb[64].mxu0 }
 0x755   : > { %v6515_v63 = vadd.f32 %v6514_v32, %v14938_v7  ;;  %v6516_v49 = vpop.f32.mrb[65].mxu0 }
 0x756   : > { %v6517_v33 = vadd.f32 %v6516_v49, %v14941_v54  ;;  %v6518_v55 = vpop.f32.mrb[66].mxu0 }
 0x757   : > { %v6519_v12 = vadd.f32 %v6518_v55, %v14938_v7  ;;  %v6520_v57 = vpop.f32.mrb[67].mxu0  ;;  %v6593_v1 = vmax.f32 %v6515_v63, 0.0 }
 0x758   : > { %v6521_v58 = vadd.f32 %v6520_v57, %v14941_v54  ;;  %v6594_v44 = vmax.f32 %v6517_v33, 0.0 }
 0x759   : > { %v6595_v19 = vmax.f32 %v6519_v12, 0.0 }
 0x75a   : > { %v6596_v2 = vmax.f32 %v6521_v58, 0.0 }
 0x75b   : > { %v6625_v51 = vpack.c.bf16 %v6595_v19, %v6593_v1 }
 0x75c   : > { %v6626_v23 = vpack.c.bf16 %v6596_v2, %v6594_v44  ;;  %v6524_v28 = vpop.f32.mrb[68].mxu0 }
 0x75d   : > { %v6525_v3 = vadd.f32 %v6524_v28, %v14938_v7  ;;  %v6526_v22 = vpop.f32.mrb[69].mxu0 }
 0x75e   : > { %6877 = vmatprep.mubr.bf16.mxu1 %v6626_v23  ;;  %v6527_v48 = vadd.f32 %v6526_v22, %v14941_v54  ;;  %v6528_v56 = vpop.f32.mrb[70].mxu0 }
 0x75f   : > { %6878 = vmatmul.mubr.bf16.vlgmr.msra.gmra.mrb[64].mxu1 %v6625_v51  ;;  %v6529_v61 = vadd.f32 %v6528_v56, %v14938_v7  ;;  %v6530_v41 = vpop.f32.mrb[71].mxu0  ;;  %v6597_v36 = vmax.f32 %v6525_v3, 0.0 }
 0x760   : > { %v6531_v31 = vadd.f32 %v6530_v41, %v14941_v54  ;;  %v6598_v15 = vmax.f32 %v6527_v48, 0.0 }
 0x761   : > { %v6599_v42 = vmax.f32 %v6529_v61, 0.0 }
 0x762   : > { %v6600_v0 = vmax.f32 %v6531_v31, 0.0 }
 0x763   : > { %v6627_v24 = vpack.c.bf16 %v6599_v42, %v6597_v36 }
 0x764   : > { %v6628_v53 = vpack.c.bf16 %v6600_v0, %v6598_v15 }
 0x766   : > { %6887 = vmatprep.mubr.bf16.mxu1 %v6628_v53 }
 0x767   : > { %6888 = vmatmul.mubr.bf16.gmra.mrb[68].mxu1 %v6627_v24 }
 0x785   : > { %v6534_v45 = vpop.f32.mrb[72].mxu0 }
 0x786   : > { %v6535_v11 = vadd.f32 %v6534_v45, %v14938_v7  ;;  %v6536_v35 = vpop.f32.mrb[73].mxu0 }
 0x787   : > { %v6537_v18 = vadd.f32 %v6536_v35, %v14941_v54  ;;  %v6538_v17 = vpop.f32.mrb[74].mxu0 }
 0x788   : > { %v6539_v43 = vadd.f32 %v6538_v17, %v14938_v7  ;;  %v6540_v39 = vpop.f32.mrb[75].mxu0  ;;  %v6601_v4 = vmax.f32 %v6535_v11, 0.0  ;;  %v10701_v17 = vld [vmem:[#allocation22] ss:$8 sps:$4 sm:$0xff]  }
 0x789   : > { %v6541_v27 = vadd.f32 %v6540_v39, %v14941_v54  ;;  %v6602_v10 = vmax.f32 %v6537_v18, 0.0 }
 0x78a   : > { %v6603_v20 = vmax.f32 %v6539_v43, 0.0  ;;  %v10703_v43 = vld [vmem:[#allocation22 + $0x4] ss:$8 sps:$4 sm:$0xff]  }
 0x78b   : > { %v6604_v8 = vmax.f32 %v6541_v27, 0.0  ;;  %v10706_v27 = vld [vmem:[#allocation22 + $0x14] ss:$8 sps:$4 sm:$0xff]   ;;  %7210 = vmatprep.subr.bf16.mxu1 %v10703_v43 }
 0x78c   : > { %v6629_v30 = vpack.c.bf16 %v6603_v20, %v6601_v4  ;;  %7211 = vmatpush1.bf16.msra.mxu1 %v10701_v17  ;;  %v10704_v4 = vld [vmem:[#allocation22 + $0x10] ss:$8 sps:$4 sm:$0xff]   ;;  %v10709_v20 = vld [vmem:[#allocation22 + $0x24] ss:$8 sps:$4 sm:$0xff]  }
 0x78d   : > { %v6630_v50 = vpack.c.bf16 %v6604_v8, %v6602_v10  ;;  %v6544_v62 = vpop.f32.mrb[76].mxu0  ;;  %7212 = vmatprep.subr.bf16.mxu1 %v10706_v27  ;;  %v10707_v10 = vld [vmem:[#allocation22 + $0x20] ss:$8 sps:$4 sm:$0xff]   ;;  %v10712_v8 = vld [vmem:[#allocation22 + $0x34] ss:$8 sps:$4 sm:$0xff]  }
 0x78e   : > { %v6545_v34 = vadd.f32 %v6544_v62, %v14938_v7  ;;  %v6546_v60 = vpop.f32.mrb[77].mxu0  ;;  %v10713_v62 = vld [vmem:[#allocation22 + $0x40] ss:$8 sps:$4 sm:$0xff]  }
 0x78f   : > { %6897 = vmatprep.mubr.bf16.mxu1 %v6630_v50  ;;  %v6547_v9 = vadd.f32 %v6546_v60, %v14941_v54  ;;  %v6548_v37 = vpop.f32.mrb[78].mxu0  ;;  %v10715_v50 = vld [vmem:[#allocation22 + $0x44] ss:$8 sps:$4 sm:$0xff]   ;;  %v10716_v60 = vld [vmem:[#allocation22 + $0x50] ss:$8 sps:$4 sm:$0xff]  }
 0x790   : > { %6898 = vmatmul.mubr.bf16.gmra.mrb[72].mxu1 %v6629_v30  ;;  %v6549_v47 = vadd.f32 %v6548_v37, %v14938_v7  ;;  %v6550_v59 = vpop.f32.mrb[79].mxu0  ;;  %v6605_v13 = vmax.f32 %v6545_v34, 0.0  ;;  %v10710_v30 = vld [vmem:[#allocation22 + $0x30] ss:$8 sps:$4 sm:$0xff]   ;;  %v10718_v34 = vld [vmem:[#allocation22 + $0x54] ss:$8 sps:$4 sm:$0xff]  }
 0x791   : > { %v6551_v16 = vadd.f32 %v6550_v59, %v14941_v54  ;;  %v6606_v63 = vmax.f32 %v6547_v9, 0.0  ;;  %7213 = vmatpush1.bf16.msra.mxu1 %v10704_v4  ;;  %v10721_v9 = vld [vmem:[#allocation22 + $0x64] ss:$8 sps:$4 sm:$0xff]   ;;  %v10719_v37 = vld [vmem:[#allocation22 + $0x60] ss:$8 sps:$4 sm:$0xff]  }
 0x792   : > { %v6607_v32 = vmax.f32 %v6549_v47, 0.0  ;;  %7214 = vmatprep.subr.bf16.mxu1 %v10709_v20  ;;  %v10724_v47 = vld [vmem:[#allocation22 + $0x74] ss:$8 sps:$4 sm:$0xff]   ;;  %v10722_v59 = vld [vmem:[#allocation22 + $0x70] ss:$8 sps:$4 sm:$0xff]  }
 0x793   : > { %v6608_v49 = vmax.f32 %v6551_v16, 0.0  ;;  %v10727_v16 = vld [vmem:[#allocation22 + $0x84] ss:$8 sps:$4 sm:$0xff]  }
 0x794   : > { %v6631_v33 = vpack.c.bf16 %v6607_v32, %v6605_v13  ;;  %v10725_v13 = vld [vmem:[#allocation22 + $0x80] ss:$8 sps:$4 sm:$0xff]   ;;  %v10730_v32 = vld [vmem:[#allocation22 + $0x94] ss:$8 sps:$4 sm:$0xff]  }
 0x795   : > { %v6632_v55 = vpack.c.bf16 %v6608_v49, %v6606_v63  ;;  %7215 = vmatpush1.bf16.msra.mxu1 %v10707_v10  ;;  %v10728_v63 = vld [vmem:[#allocation22 + $0x90] ss:$8 sps:$4 sm:$0xff]   ;;  %v10733_v49 = vld [vmem:[#allocation22 + $0xa4] ss:$8 sps:$4 sm:$0xff]  }
 0x796   : > { %7216 = vmatprep.subr.bf16.mxu1 %v10712_v8 }
 0x797   : > { %6907 = vmatprep.mubr.bf16.mxu1 %v6632_v55  ;;  %v10736_v55 = vld [vmem:[#allocation22 + $0xb4] ss:$8 sps:$4 sm:$0xff]  }
 0x798   : > { %6908 = vmatmul.mubr.bf16.gmra.mrb[76].mxu1 %v6631_v33  ;;  %v10731_v33 = vld [vmem:[#allocation22 + $0xa0] ss:$8 sps:$4 sm:$0xff]  }
 0x799   : > { %7217 = vmatpush1.bf16.msra.mxu1 %v10710_v30 }
 0x79a   : > { %7218 = vmatprep.subr.bf16.mxu1 %v10715_v50 }
 0x79d   : > { %7219 = vmatpush1.bf16.msra.mxu1 %v10713_v62  ;;  %v6673_v62 = vld [vmem:[#allocation20] sm:$0x3] }
 0x79e   : > { %7220 = vmatprep.subr.bf16.mxu1 %v10718_v34  ;;  %v14976_v34 = vrot.slane %v6673_v62, %v14709_v26 }
 0x7a1   : > { %7221 = vmatpush1.bf16.msra.mxu1 %v10716_v60  ;;  %v14979_v60 = vrot.slane %v6673_v62, %v14711_v21 }
 0x7a2   : > { %7222 = vmatprep.subr.bf16.mxu1 %v10721_v9 }
 0x7a5   : > { %7223 = vmatpush1.bf16.msra.mxu1 %v10719_v37 }
 0x7a6   : > { %7224 = vmatprep.subr.bf16.mxu1 %v10724_v47 }
 0x7a7   : > { %v6554_v12 = vpop.f32.mrb[80].mxu0 }
 0x7a8   : > { %v6555_v57 = vadd.f32 %v6554_v12, %v14938_v7  ;;  %v6556_v58 = vpop.f32.mrb[81].mxu0  ;;  %v10734_v12 = vld [vmem:[#allocation22 + $0xb0] ss:$8 sps:$4 sm:$0xff]  }
 0x7a9   : > { %v6557_v1 = vadd.f32 %v6556_v58, %v14941_v54  ;;  %v6558_v19 = vpop.f32.mrb[82].mxu0  ;;  %7225 = vmatpush1.bf16.msra.mxu1 %v10722_v59  ;;  %v10737_v58 = vld [vmem:[#allocation22 + $0xc0] ss:$8 sps:$4 sm:$0xff]  }
 0x7aa   : > { %v6559_v44 = vadd.f32 %v6558_v19, %v14938_v7  ;;  %v6560_v2 = vpop.f32.mrb[83].mxu0  ;;  %v6609_v23 = vmax.f32 %v6555_v57, 0.0  ;;  %7226 = vmatprep.subr.bf16.mxu1 %v10727_v16  ;;  %v10739_v57 = vld [vmem:[#allocation22 + $0xc4] ss:$8 sps:$4 sm:$0xff]   ;;  %v10740_v19 = vld [vmem:[#allocation22 + $0xd0] ss:$8 sps:$4 sm:$0xff]  }
 0x7ab   : > { %v6561_v51 = vadd.f32 %v6560_v2, %v14941_v54  ;;  %v6610_v3 = vmax.f32 %v6557_v1, 0.0  ;;  %v10742_v1 = vld [vmem:[#allocation22 + $0xd4] ss:$8 sps:$4 sm:$0xff]   ;;  %v10743_v2 = vld [vmem:[#allocation22 + $0xe0] ss:$8 sps:$4 sm:$0xff]  }
 0x7ac   : > { %v6611_v28 = vmax.f32 %v6559_v44, 0.0  ;;  %v10745_v44 = vld [vmem:[#allocation22 + $0xe4] ss:$8 sps:$4 sm:$0xff]  }
 0x7ad   : > { %v6612_v22 = vmax.f32 %v6561_v51, 0.0  ;;  %7227 = vmatpush1.bf16.msra.mxu1 %v10725_v13  ;;  %v10748_v51 = vld [vmem:[#allocation22 + $0xf4] ss:$8 sps:$4 sm:$0xff]  }
 0x7ae   : > { %v6633_v48 = vpack.c.bf16 %v6611_v28, %v6609_v23  ;;  %7228 = vmatprep.subr.bf16.mxu1 %v10730_v32  ;;  %v10746_v23 = vld [vmem:[#allocation22 + $0xf0] ss:$8 sps:$4 sm:$0xff]  }
 0x7af   : > { %v6634_v56 = vpack.c.bf16 %v6612_v22, %v6610_v3 }
 0x7b1   : > { %6917 = vmatprep.mubr.bf16.mxu1 %v6634_v56  ;;  %7229 = vmatpush1.bf16.msra.mxu1 %v10728_v63 }
 0x7b2   : > { %6918 = vmatmul.mubr.bf16.gmra.mrb[80].mxu1 %v6633_v48  ;;  %7230 = vmatprep.subr.bf16.mxu1 %v10733_v49 }
 0x7b5   : > { %7231 = vmatpush1.bf16.msra.mxu1 %v10731_v33 }
 0x7b6   : > { %7232 = vmatprep.subr.bf16.mxu1 %v10736_v55 }
 0x7b9   : > { %7233 = vmatpush1.bf16.msra.mxu1 %v10734_v12 }
 0x7ba   : > { %7234 = vmatprep.subr.bf16.mxu1 %v10739_v57 }
 0x7bd   : > { %7235 = vmatpush1.bf16.msra.mxu1 %v10737_v58 }
 0x7be   : > { %7236 = vmatprep.subr.bf16.mxu1 %v10742_v1 }
 0x7c1   : > { %7237 = vmatpush1.bf16.msra.mxu1 %v10740_v19 }
 0x7c2   : > { %7238 = vmatprep.subr.bf16.mxu1 %v10745_v44 }
 0x7c5   : > { %7239 = vmatpush1.bf16.msra.mxu1 %v10743_v2 }
 0x7c6   : > { %7240 = vmatprep.subr.bf16.mxu1 %v10748_v51 }
 0x7c9   : > { %7241 = vmatpush1.bf16.msra.mxu1 %v10746_v23 }
 0x7d9   : > { %v6564_v61 = vpop.f32.mrb[84].mxu0 }
 0x7da   : > { %v6565_v41 = vadd.f32 %v6564_v61, %v14938_v7  ;;  %v6566_v31 = vpop.f32.mrb[85].mxu0 }
 0x7db   : > { %v6567_v36 = vadd.f32 %v6566_v31, %v14941_v54  ;;  %v6568_v42 = vpop.f32.mrb[86].mxu0 }
 0x7dc   : > { %v6569_v15 = vadd.f32 %v6568_v42, %v14938_v7  ;;  %v6570_v0 = vpop.f32.mrb[87].mxu0  ;;  %v6613_v53 = vmax.f32 %v6565_v41, 0.0 }
 0x7dd   : > { %v6571_v24 = vadd.f32 %v6570_v0, %v14941_v54  ;;  %v6614_v11 = vmax.f32 %v6567_v36, 0.0 }
 0x7de   : > { %v6615_v45 = vmax.f32 %v6569_v15, 0.0 }
 0x7df   : > { %v6616_v35 = vmax.f32 %v6571_v24, 0.0 }
 0x7e0   : > { %v6635_v18 = vpack.c.bf16 %v6615_v45, %v6613_v53 }
 0x7e1   : > { %v6636_v39 = vpack.c.bf16 %v6616_v35, %v6614_v11 }
 0x7e3   : > { %6927 = vmatprep.mubr.bf16.mxu1 %v6636_v39 }
 0x7e4   : > { %6928 = vmatmul.mubr.bf16.gmra.mrb[84].mxu1 %v6635_v18 }
 0x809   : > { %v6574_v28 = vpop.f32.mrb[88].mxu0 }
 0x80a   : > { %v6575_v3 = vadd.f32 %v6574_v28, %v14938_v7  ;;  %v6576_v22 = vpop.f32.mrb[89].mxu0 }
 0x80b   : > { %v6577_v48 = vadd.f32 %v6576_v22, %v14941_v54  ;;  %v6578_v56 = vpop.f32.mrb[90].mxu0 }
 0x80c   : > { %v6579_v61 = vadd.f32 %v6578_v56, %v14938_v7  ;;  %v6580_v41 = vpop.f32.mrb[91].mxu0  ;;  %v6617_v36 = vmax.f32 %v6575_v3, 0.0 }
 0x80d   : > { %v6581_v31 = vadd.f32 %v6580_v41, %v14941_v54  ;;  %v6618_v15 = vmax.f32 %v6577_v48, 0.0 }
 0x80e   : > { %v6619_v42 = vmax.f32 %v6579_v61, 0.0 }
 0x80f   : > { %v6620_v0 = vmax.f32 %v6581_v31, 0.0 }
 0x810   : > { %v6637_v24 = vpack.c.bf16 %v6619_v42, %v6617_v36 }
 0x811   : > { %v6638_v53 = vpack.c.bf16 %v6620_v0, %v6618_v15 }
 0x813   : > { %6937 = vmatprep.mubr.bf16.mxu1 %v6638_v53 }
 0x814   : > { %6938 = vmatmul.mubr.bf16.gmra.mrb[88].mxu1 %v6637_v24 }
 0x824   : > { %v6584_v45 = vpop.f32.mrb[92].mxu0 }
 0x825   : > { %v6585_v11 = vadd.f32 %v6584_v45, %v14938_v7  ;;  %v6586_v35 = vpop.f32.mrb[93].mxu0 }
 0x826   : > { %v6587_v18 = vadd.f32 %v6586_v35, %v14941_v54  ;;  %v6588_v17 = vpop.f32.mrb[94].mxu0 }
 0x827   : > { %v6589_v43 = vadd.f32 %v6588_v17, %v14938_v7  ;;  %v6590_v39 = vpop.f32.mrb[95].mxu0  ;;  %v6621_v4 = vmax.f32 %v6585_v11, 0.0 }
 0x828   : > { %v6591_v27 = vadd.f32 %v6590_v39, %v14941_v54  ;;  %v6622_v10 = vmax.f32 %v6587_v18, 0.0 }
 0x829   : > { %v6623_v20 = vmax.f32 %v6589_v43, 0.0 }
 0x82a   : > { %v6624_v8 = vmax.f32 %v6591_v27, 0.0 }
 0x82b   : > { %v6639_v30 = vpack.c.bf16 %v6623_v20, %v6621_v4 }
 0x82c   : > { %v6640_v50 = vpack.c.bf16 %v6624_v8, %v6622_v10 }
 0x82e   : > { %6947 = vmatprep.mubr.bf16.mxu1 %v6640_v50 }
 0x82f   : > { %6948 = vmatmul.mubr.bf16.gmra.mrb[92].mxu1 %v6639_v30 }
 0x832   : > { %v6879_v9 = vpop.f32.mrb[64].mxu1 }
 0x833   : > { %v6880_v7 = vadd.f32 %v6879_v9, %v14976_v34  ;;  %v6881_v37 = vpop.f32.mrb[65].mxu1 }
 0x834   : > { %v6882_v54 = vadd.f32 %v6881_v37, %v14979_v60  ;;  %v6883_v47 = vpop.f32.mrb[66].mxu1 }
 0x835   : > { %v6884_v59 = vadd.f32 %v6883_v47, %v14976_v34  ;;  %v6885_v16 = vpop.f32.mrb[67].mxu1  ;;  %v6958_v32 = vmax.f32 %v6880_v7, 0.0 }
 0x836   : > { %v6886_v13 = vadd.f32 %v6885_v16, %v14979_v60  ;;  %v6959_v49 = vmax.f32 %v6882_v54, 0.0 }
 0x837   : > { %v6960_v63 = vmax.f32 %v6884_v59, 0.0 }
 0x838   : > { %v6961_v33 = vmax.f32 %v6886_v13, 0.0 }
 0x839   : > { %v6990_v55 = vpack.c.bf16 %v6960_v63, %v6958_v32 }
 0x83a   : > { %v6991_v12 = vpack.c.bf16 %v6961_v33, %v6959_v49  ;;  %v6889_v57 = vpop.f32.mrb[68].mxu1 }
 0x83b   : > { %v6890_v58 = vadd.f32 %v6889_v57, %v14976_v34  ;;  %v6891_v1 = vpop.f32.mrb[69].mxu1 }
 0x83c   : > { %7242 = vmatprep.mubr.bf16.mxu1 %v6991_v12  ;;  %v6892_v19 = vadd.f32 %v6891_v1, %v14979_v60  ;;  %v6893_v44 = vpop.f32.mrb[70].mxu1 }
 0x83d   : > { %7243 = vmatmul.mubr.bf16.vlgmr.msra.gmra.mrb[0].mxu1 %v6990_v55  ;;  %v6894_v2 = vadd.f32 %v6893_v44, %v14976_v34  ;;  %v6895_v51 = vpop.f32.mrb[71].mxu1  ;;  %v6962_v28 = vmax.f32 %v6890_v58, 0.0 }
 0x83e   : > { %v6896_v23 = vadd.f32 %v6895_v51, %v14979_v60  ;;  %v6963_v22 = vmax.f32 %v6892_v19, 0.0 }
 0x83f   : > { %v6964_v3 = vmax.f32 %v6894_v2, 0.0 }
 0x840   : > { %v6965_v48 = vmax.f32 %v6896_v23, 0.0 }
 0x841   : > { %v6992_v56 = vpack.c.bf16 %v6964_v3, %v6962_v28 }
 0x842   : > { %v6993_v61 = vpack.c.bf16 %v6965_v48, %v6963_v22 }
 0x844   : > { %7252 = vmatprep.mubr.bf16.mxu1 %v6993_v61 }
 0x845   : > { %7253 = vmatmul.mubr.bf16.gmra.mrb[4].mxu1 %v6992_v56 }
 0x863   : > { %v6899_v41 = vpop.f32.mrb[72].mxu1 }
 0x864   : > { %v6900_v31 = vadd.f32 %v6899_v41, %v14976_v34  ;;  %v6901_v36 = vpop.f32.mrb[73].mxu1 }
 0x865   : > { %v6902_v42 = vadd.f32 %v6901_v36, %v14979_v60  ;;  %v6903_v15 = vpop.f32.mrb[74].mxu1 }
 0x866   : > { %v6904_v0 = vadd.f32 %v6903_v15, %v14976_v34  ;;  %v6905_v24 = vpop.f32.mrb[75].mxu1  ;;  %v6966_v45 = vmax.f32 %v6900_v31, 0.0  ;;  %v10749_v15 = vld [vmem:[#allocation25] ss:$8 sps:$4 sm:$0xff]  }
 0x867   : > { %v6906_v53 = vadd.f32 %v6905_v24, %v14979_v60  ;;  %v6967_v35 = vmax.f32 %v6902_v42, 0.0 }
 0x868   : > { %v6968_v11 = vmax.f32 %v6904_v0, 0.0  ;;  %v10751_v0 = vld [vmem:[#allocation25 + $0x4] ss:$8 sps:$4 sm:$0xff]  }
 0x869   : > { %v6969_v18 = vmax.f32 %v6906_v53, 0.0  ;;  %v10754_v53 = vld [vmem:[#allocation25 + $0x14] ss:$8 sps:$4 sm:$0xff]   ;;  %7607 = vmatprep.subr.bf16.mxu0 %v10751_v0  ;;  %v15015_v0 = vld [vmem:[#allocation7] ss:$0 sm:$0xff] }
 0x86a   : > { %v6994_v17 = vpack.c.bf16 %v6968_v11, %v6966_v45  ;;  %7608 = vmatpush1.bf16.msra.mxu0 %v10749_v15  ;;  %v10752_v45 = vld [vmem:[#allocation25 + $0x10] ss:$8 sps:$4 sm:$0xff]   ;;  %v10757_v11 = vld [vmem:[#allocation25 + $0x24] ss:$8 sps:$4 sm:$0xff]  }
 0x86b   : > { %v6995_v43 = vpack.c.bf16 %v6969_v18, %v6967_v35  ;;  %v6909_v39 = vpop.f32.mrb[76].mxu1  ;;  %7609 = vmatprep.subr.bf16.mxu0 %v10754_v53  ;;  %v10755_v35 = vld [vmem:[#allocation25 + $0x20] ss:$8 sps:$4 sm:$0xff]   ;;  %v10760_v18 = vld [vmem:[#allocation25 + $0x34] ss:$8 sps:$4 sm:$0xff]  }
 0x86c   : > { %v6910_v27 = vadd.f32 %v6909_v39, %v14976_v34  ;;  %v6911_v4 = vpop.f32.mrb[77].mxu1  ;;  %v10761_v39 = vld [vmem:[#allocation25 + $0x40] ss:$8 sps:$4 sm:$0xff]   ;;  %v15018_v53 = vld [vmem:[#allocation7 + $0x1] ss:$0 sm:$0xff] }
 0x86d   : > { %7262 = vmatprep.mubr.bf16.mxu1 %v6995_v43  ;;  %v6912_v20 = vadd.f32 %v6911_v4, %v14979_v60  ;;  %v6913_v10 = vpop.f32.mrb[78].mxu1  ;;  %v10763_v43 = vld [vmem:[#allocation25 + $0x44] ss:$8 sps:$4 sm:$0xff]   ;;  %v10764_v4 = vld [vmem:[#allocation25 + $0x50] ss:$8 sps:$4 sm:$0xff]  }
 0x86e   : > { %7263 = vmatmul.mubr.bf16.gmra.mrb[8].mxu1 %v6994_v17  ;;  %v6914_v8 = vadd.f32 %v6913_v10, %v14976_v34  ;;  %v6915_v30 = vpop.f32.mrb[79].mxu1  ;;  %v6970_v62 = vmax.f32 %v6910_v27, 0.0  ;;  %7610 = vmatpush1.bf16.msra.mxu0 %v10752_v45  ;;  %v10758_v17 = vld [vmem:[#allocation25 + $0x30] ss:$8 sps:$4 sm:$0xff]   ;;  %v10766_v27 = vld [vmem:[#allocation25 + $0x54] ss:$8 sps:$4 sm:$0xff]  }
 0x86f   : > { %v6916_v50 = vadd.f32 %v6915_v30, %v14979_v60  ;;  %v6971_v7 = vmax.f32 %v6912_v20, 0.0  ;;  %7611 = vmatprep.subr.bf16.mxu0 %v10757_v11  ;;  %v10769_v20 = vld [vmem:[#allocation25 + $0x64] ss:$8 sps:$4 sm:$0xff]   ;;  %v10767_v10 = vld [vmem:[#allocation25 + $0x60] ss:$8 sps:$4 sm:$0xff]   ;;  %v18092_v45 = vld [vmem:[#allocation50_spill] sm:$0xff] }
 0x870   : > { %v6972_v9 = vmax.f32 %v6914_v8, 0.0  ;;  %v10772_v8 = vld [vmem:[#allocation25 + $0x74] ss:$8 sps:$4 sm:$0xff]   ;;  %v10770_v30 = vld [vmem:[#allocation25 + $0x70] ss:$8 sps:$4 sm:$0xff]   ;;  %v3271_v11 = vmul.f32 %v15018_v53, %v18092_v45 }
 0x871   : > { %v6973_v37 = vmax.f32 %v6916_v50, 0.0  ;;  %v10775_v50 = vld [vmem:[#allocation25 + $0x84] ss:$8 sps:$4 sm:$0xff]  }
 0x872   : > { %v6996_v54 = vpack.c.bf16 %v6972_v9, %v6970_v62  ;;  %7612 = vmatpush1.bf16.msra.mxu0 %v10755_v35  ;;  %v10773_v62 = vld [vmem:[#allocation25 + $0x80] ss:$8 sps:$4 sm:$0xff]   ;;  %v10778_v9 = vld [vmem:[#allocation25 + $0x94] ss:$8 sps:$4 sm:$0xff]  }
 0x873   : > { %v6997_v47 = vpack.c.bf16 %v6973_v37, %v6971_v7  ;;  %7613 = vmatprep.subr.bf16.mxu0 %v10760_v18  ;;  %v10776_v7 = vld [vmem:[#allocation25 + $0x90] ss:$8 sps:$4 sm:$0xff]   ;;  %v10781_v37 = vld [vmem:[#allocation25 + $0xa4] ss:$8 sps:$4 sm:$0xff]  }
 0x874   : > { %v15022_v18 = vld [vmem:[#allocation7 + $0x2] ss:$0 sm:$0xff] }
 0x875   : > { %7272 = vmatprep.mubr.bf16.mxu1 %v6997_v47  ;;  %v10784_v47 = vld [vmem:[#allocation25 + $0xb4] ss:$8 sps:$4 sm:$0xff]  }
 0x876   : > { %7273 = vmatmul.mubr.bf16.gmra.mrb[12].mxu1 %v6996_v54  ;;  %7614 = vmatpush1.bf16.msra.mxu0 %v10758_v17  ;;  %v10779_v54 = vld [vmem:[#allocation25 + $0xa0] ss:$8 sps:$4 sm:$0xff]  }
 0x877   : > { %7615 = vmatprep.subr.bf16.mxu0 %v10763_v43 }
 0x87a   : > { %7616 = vmatpush1.bf16.msra.mxu0 %v10761_v39  ;;  %v15025_v39 = vld [vmem:[#allocation8] ss:$0 sm:$0xff] }
 0x87b   : > { %7617 = vmatprep.subr.bf16.mxu0 %v10766_v27 }
 0x87e   : > { %7618 = vmatpush1.bf16.msra.mxu0 %v10764_v4 }
 0x87f   : > { %7619 = vmatprep.subr.bf16.mxu0 %v10769_v20 }
 0x882   : > { %7620 = vmatpush1.bf16.msra.mxu0 %v10767_v10 }
 0x883   : > { %7621 = vmatprep.subr.bf16.mxu0 %v10772_v8 }
 0x885   : > { %v6919_v59 = vpop.f32.mrb[80].mxu1 }
 0x886   : > { %v6920_v16 = vadd.f32 %v6919_v59, %v14976_v34  ;;  %v6921_v13 = vpop.f32.mrb[81].mxu1  ;;  %7622 = vmatpush1.bf16.msra.mxu0 %v10770_v30  ;;  %v10782_v59 = vld [vmem:[#allocation25 + $0xb0] ss:$8 sps:$4 sm:$0xff]  }
 0x887   : > { %v6922_v32 = vadd.f32 %v6921_v13, %v14979_v60  ;;  %v6923_v63 = vpop.f32.mrb[82].mxu1  ;;  %7623 = vmatprep.subr.bf16.mxu0 %v10775_v50  ;;  %v10785_v13 = vld [vmem:[#allocation25 + $0xc0] ss:$8 sps:$4 sm:$0xff]   ;;  %v18094_v30 = vld [vmem:[#allocation55_spill] sm:$0xff] }
 0x888   : > { %v6924_v49 = vadd.f32 %v6923_v63, %v14976_v34  ;;  %v6925_v33 = vpop.f32.mrb[83].mxu1  ;;  %v6974_v12 = vmax.f32 %v6920_v16, 0.0  ;;  %v10787_v16 = vld [vmem:[#allocation25 + $0xc4] ss:$8 sps:$4 sm:$0xff]   ;;  %v10788_v63 = vld [vmem:[#allocation25 + $0xd0] ss:$8 sps:$4 sm:$0xff]   ;;  %v15033_v50 = vadd.f32 %v15025_v39, %v18094_v30 }
 0x889   : > { %v6926_v55 = vadd.f32 %v6925_v33, %v14979_v60  ;;  %v6975_v58 = vmax.f32 %v6922_v32, 0.0  ;;  %v10790_v32 = vld [vmem:[#allocation25 + $0xd4] ss:$8 sps:$4 sm:$0xff]   ;;  %v10791_v33 = vld [vmem:[#allocation25 + $0xe0] ss:$8 sps:$4 sm:$0xff]  }
 0x88a   : > { %v6976_v57 = vmax.f32 %v6924_v49, 0.0  ;;  %7624 = vmatpush1.bf16.msra.mxu0 %v10773_v62  ;;  %v10793_v49 = vld [vmem:[#allocation25 + $0xe4] ss:$8 sps:$4 sm:$0xff]   ;;  %18095 = vst [vmem:[#allocation53_spill] sm:$0xff] %v15033_v50 }
 0x88b   : > { %v6977_v1 = vmax.f32 %v6926_v55, 0.0  ;;  %7625 = vmatprep.subr.bf16.mxu0 %v10778_v9  ;;  %v10796_v55 = vld [vmem:[#allocation25 + $0xf4] ss:$8 sps:$4 sm:$0xff]  }
 0x88c   : > { %v6998_v19 = vpack.c.bf16 %v6976_v57, %v6974_v12  ;;  %v10794_v12 = vld [vmem:[#allocation25 + $0xf0] ss:$8 sps:$4 sm:$0xff]   ;;  %v3309_v57 = vpop.permute.xlu0 %3308 }
 0x88d   : > { %v6999_v44 = vpack.c.bf16 %v6977_v1, %v6975_v58  ;;  %v3372_v17 = vmul.f32 %v15022_v18, %v3309_v57 }
 0x88e   : > { %7626 = vmatpush1.bf16.msra.mxu0 %v10776_v7 }
 0x88f   : > { %7282 = vmatprep.mubr.bf16.mxu1 %v6999_v44  ;;  %7627 = vmatprep.subr.bf16.mxu0 %v10781_v37 }
 0x890   : > { %7283 = vmatmul.mubr.bf16.gmra.mrb[16].mxu1 %v6998_v19  ;;  %v15005_v58 = vpop.permute.xlu0 %3320 }
 0x892   : > { %7628 = vmatpush1.bf16.msra.mxu0 %v10779_v54 }
 0x893   : > { %7629 = vmatprep.subr.bf16.mxu0 %v10784_v47  ;;  %v3429_v47 = vand.u32 2139095040, %v15033_v50 }
 0x895   : > { %v3430_v57 = vshrl.u32 %v3429_v47, 23 }
 0x896   : > { %7630 = vmatpush1.bf16.msra.mxu0 %v10782_v59 }
 0x897   : > { %7631 = vmatprep.subr.bf16.mxu0 %v10787_v16 }
 0x89a   : > { %7632 = vmatpush1.bf16.msra.mxu0 %v10785_v13 }
 0x89b   : > { %7633 = vmatprep.subr.bf16.mxu0 %v10790_v32 }
 0x89e   : > { %7634 = vmatpush1.bf16.msra.mxu0 %v10788_v63 }
 0x89f   : > { %7635 = vmatprep.subr.bf16.mxu0 %v10793_v49 }
 0x8a2   : > { %7636 = vmatpush1.bf16.msra.mxu0 %v10791_v33 }
 0x8a3   : > { %7637 = vmatprep.subr.bf16.mxu0 %v10796_v55 }
 0x8a6   : > { %7638 = vmatpush1.bf16.msra.mxu0 %v10794_v12 }
 0x8b7   : > { %v6929_v2 = vpop.f32.mrb[84].mxu1 }
 0x8b8   : > { %v6930_v51 = vadd.f32 %v6929_v2, %v14976_v34  ;;  %v6931_v23 = vpop.f32.mrb[85].mxu1 }
 0x8b9   : > { %v6932_v28 = vadd.f32 %v6931_v23, %v14979_v60  ;;  %v6933_v3 = vpop.f32.mrb[86].mxu1 }
 0x8ba   : > { %v6934_v22 = vadd.f32 %v6933_v3, %v14976_v34  ;;  %v6935_v48 = vpop.f32.mrb[87].mxu1  ;;  %v6978_v61 = vmax.f32 %v6930_v51, 0.0  ;;  %v15010_v3 = vpop.permute.xlu0 %3332 }
 0x8bb   : > { %v6936_v56 = vadd.f32 %v6935_v48, %v14979_v60  ;;  %v6979_v31 = vmax.f32 %v6932_v28, 0.0 }
 0x8bc   : > { %v6980_v41 = vmax.f32 %v6934_v22, 0.0 }
 0x8bd   : > { %v6981_v36 = vmax.f32 %v6936_v56, 0.0 }
 0x8be   : > { %v7000_v42 = vpack.c.bf16 %v6980_v41, %v6978_v61 }
 0x8bf   : > { %v7001_v24 = vpack.c.bf16 %v6981_v36, %v6979_v31 }
 0x8c1   : > { %7292 = vmatprep.mubr.bf16.mxu1 %v7001_v24 }
 0x8c2   : > { %7293 = vmatmul.mubr.bf16.gmra.mrb[20].mxu1 %v7000_v42  ;;  %v15013_v42 = vpop.permute.xlu0 %3340 }
 0x8c6   : > { %v3109_v15 = vpop.permute.xlu0 %3108 }
 0x8c7   : > { %v3186_v24 = vmul.f32 %v15015_v0, %v3109_v15 }
 0x8c9   : > { %v3287_v35 = vadd.f32 %v3271_v11, %v3186_v24 }
 0x8cb   : > { %v3388_v43 = vadd.f32 %v3372_v17, %v3287_v35 }
 0x8cd   : > { %v15028_v27 = vadd.f32 %v15025_v39, %v3388_v43 }
 0x8cf   : > { %18093 = vst [vmem:[#allocation62_spill] sm:$0xff] %v15028_v27  ;;  %v3533_v4 = vand.u32 2139095040, %v15028_v27 }
 0x8d1   : > { %v3534_v20 = vshrl.u32 %v3533_v4, 23 }
 0x8d3   : > { %v9426_v10 = vadd.s32 4294967169, %v3534_v20 }
 0x8d5   : > { %v3540_v8 = vadd.s32 1, %v9426_v10 }
 0x8d7   : > { %vm3541_vm10 = vcmp.gt.s32.totalorder %v3540_v8, 0 }
 0x8d8   : > { %v3542_v13 = vsel %vm3541_vm10, %v3540_v8, 0 }
 0x8d9   : > { %v3544_v12 = vand.u32 31, %v3542_v13 }
 0x8db   : > { %v3556_v11 = vshll.u32 %v18061_v25, %v3544_v12  ;;  %v3550_v43 = vshll.u32 %v18000_v5, %v3544_v12  ;;  %v3559_v20 = vshll.u32 %v17980_v38, %v3544_v12 }
 0x8e7   : > { %v6939_v1 = vpop.f32.mrb[88].mxu1 }
 0x8e8   : > { %v6940_v19 = vadd.f32 %v6939_v1, %v14976_v34  ;;  %v6941_v44 = vpop.f32.mrb[89].mxu1 }
 0x8e9   : > { %v6942_v2 = vadd.f32 %v6941_v44, %v14979_v60  ;;  %v6943_v51 = vpop.f32.mrb[90].mxu1  ;;  %v7038_v44 = vld [vmem:[#allocation23] sm:$0x3] }
 0x8ea   : > { %v6944_v23 = vadd.f32 %v6943_v51, %v14976_v34  ;;  %v6945_v28 = vpop.f32.mrb[91].mxu1  ;;  %v6982_v48 = vmax.f32 %v6940_v19, 0.0  ;;  %v15041_v51 = vsub.s32 32, %v3544_v12 }
 0x8eb   : > { %v6946_v22 = vadd.f32 %v6945_v28, %v14979_v60  ;;  %v6983_v61 = vmax.f32 %v6942_v2, 0.0  ;;  %v17819_v2 = vand.u32 2147483647, %v15028_v27 }
 0x8ec   : > { %v6984_v56 = vmax.f32 %v6944_v23, 0.0  ;;  %v9422_v23 = vadd.s32 4294967169, %v3430_v57  ;;  %v3548_v24 = vshrl.u32 %v18000_v5, %v15041_v51  ;;  %v3551_v45 = vshrl.u32 %v17978_v46, %v15041_v51 }
 0x8ed   : > { %v6985_v41 = vmax.f32 %v6946_v22, 0.0  ;;  %v3537_v28 = vand.u32 8388607, %v17819_v2  ;;  %v3557_v22 = vshrl.u32 %v17980_v38, %v15041_v51  ;;  %v3554_v4 = vshrl.u32 %v18061_v25, %v15041_v51 }
 0x8ee   : > { %v7002_v31 = vpack.c.bf16 %v6984_v56, %v6982_v48  ;;  %v3436_v48 = vadd.s32 1, %v9422_v23 }
 0x8ef   : > { %v7003_v36 = vpack.c.bf16 %v6985_v41, %v6983_v61  ;;  %v15053_v61 = vshrl.u32 %v3542_v13, 5  ;;  %v3547_v41 = vshll.u32 %v17986_v52, %v3544_v12  ;;  %v3558_v30 = vor.u32 %v3557_v22, %v3556_v11 }
 0x8f0   : > { %vm3437_vm5 = vcmp.gt.s32.totalorder %v3436_v48, 0  ;;  %v3546_v11 = vshrl.u32 %v17986_v52, %v15041_v51 }
 0x8f1   : > { %7302 = vmatprep.mubr.bf16.mxu1 %v7003_v36  ;;  %vm3565_vm4 = vcmp.lt.s32.totalorder %v15053_v61, 4  ;;  %vm3562_vm0 = vcmp.lt.s32.totalorder %v15053_v61, 1  ;;  %vm3564_vm1 = vcmp.lt.s32.totalorder %v15053_v61, 3  ;;  %vm3563_vm2 = vcmp.lt.s32.totalorder %v15053_v61, 2 }
 0x8f2   : > { %7303 = vmatmul.mubr.bf16.gmra.mrb[24].mxu1 %v7002_v31  ;;  %v3560_v31 = vshrl.u32 %v18060_v29, %v15041_v51 }
 0x902   : > { %v6949_v62 = vpop.f32.mrb[92].mxu1 }
 0x903   : > { %v6950_v9 = vadd.f32 %v6949_v62, %v14976_v34  ;;  %v6951_v7 = vpop.f32.mrb[93].mxu1  ;;  %v15072_v62 = vadd.f32 %v15025_v39, %v14136_v6  ;;  %v3571_v6 = vsel %vm3565_vm4, %v3558_v30, 920167782 }
 0x904   : > { %v6952_v37 = vadd.f32 %v6951_v7, %v14979_v60  ;;  %v6953_v54 = vpop.f32.mrb[94].mxu1  ;;  %v3553_v7 = vshll.u32 %v17978_v46, %v3544_v12 }
 0x905   : > { %v6954_v59 = vadd.f32 %v6953_v54, %v14976_v34  ;;  %v6955_v16 = vpop.f32.mrb[95].mxu1  ;;  %v6986_v63 = vmax.f32 %v6950_v9, 0.0  ;;  %v15044_v34 = vrot.slane %v7038_v44, %v14709_v26  ;;  %18096 = vst [vmem:[#allocation58_spill] sm:$0xff] %v15072_v62  ;;  %v3741_v57 = vand.u32 2139095040, %v15072_v62 }
 0x906   : > { %v6956_v32 = vadd.f32 %v6955_v16, %v14979_v60  ;;  %v6987_v33 = vmax.f32 %v6952_v37, 0.0  ;;  %v15047_v60 = vrot.slane %v7038_v44, %v14711_v21  ;;  %v3561_v37 = vor.u32 %v3560_v31, %v3559_v20 }
 0x907   : > { %v6988_v49 = vmax.f32 %v6954_v59, 0.0  ;;  %v3549_v59 = vor.u32 %v3548_v24, %v3547_v41  ;;  %v3552_v16 = vor.u32 %v3551_v45, %v3550_v43  ;;  %v3538_v44 = vor.u32 8388608, %v3537_v28  ;;  %v15106_v45 = vpop.permute.xlu0 %3113 }
 0x908   : > { %v6989_v55 = vmax.f32 %v6956_v32, 0.0  ;;  %v3742_v31 = vshrl.u32 %v3741_v57, 23 }
 0x909   : > { %v7004_v1 = vpack.c.bf16 %v6988_v49, %v6986_v63  ;;  %v3555_v63 = vor.u32 %v3554_v4, %v3553_v7  ;;  %v3438_v49 = vsel %vm3437_vm5, %v3436_v48, 0  ;;  %v3570_v23 = vsel %vm3562_vm0, %v3549_v59, %v3552_v16 }
 0x90a   : > { %v7005_v19 = vpack.c.bf16 %v6989_v55, %v6987_v33  ;;  %v17820_v55 = vand.u32 2147483647, %v15033_v50  ;;  %v9434_v4 = vadd.s32 4294967169, %v3742_v31  ;;  %v3566_v20 = vsel %vm3562_vm0, %v3546_v11, %v3549_v59 }
 0x90b   : > { %v3572_v22 = vsel %vm3564_vm1, %v3555_v63, %v3571_v6  ;;  %v3574_v48 = vsel %vm3562_vm0, %v3552_v16, %v3555_v63  ;;  %v3567_v28 = vsel %vm3565_vm4, %v3555_v63, 2102212464  ;;  %v3124_v57 = vpop.permute.xlu0 %3123 }
 0x90c   : > { %7312 = vmatprep.mubr.bf16.mxu1 %v7005_v19  ;;  %v3440_v19 = vand.u32 31, %v3438_v49  ;;  %v15095_v41 = vand.u32 8388607, %v17820_v55  ;;  %v3748_v6 = vadd.s32 1, %v9434_v4 }
 0x90d   : > { %7313 = vmatmul.mubr.bf16.gmra.mrb[28].mxu1 %v7004_v1  ;;  %v3575_v1 = vsel %vm3565_vm4, %v3561_v37, 1326507024 }
 0x90e   : > { %v15104_v24 = vsub.s32 32, %v3440_v19  ;;  %v3434_v43 = vor.u32 8388608, %v15095_v41  ;;  %v3452_v7 = vshll.u32 %v18061_v25, %v3440_v19  ;;  %v3443_v59 = vshll.u32 %v17986_v52, %v3440_v19 }
 0x90f   : > { %v3455_v41 = vshll.u32 %v17980_v38, %v3440_v19  ;;  %vm3749_vm7 = vcmp.gt.s32.totalorder %v3748_v6, 0 }
 0x910   : > { %v7244_v56 = vpop.f32.mrb[0].mxu1  ;;  %v3453_v37 = vshrl.u32 %v17980_v38, %v15104_v24  ;;  %v3447_v63 = vshrl.u32 %v17978_v46, %v15104_v24  ;;  %v3456_v31 = vshrl.u32 %v18060_v29, %v15104_v24 }
 0x911   : > { %v7245_v36 = vadd.f32 %v7244_v56, %v15044_v34  ;;  %v7246_v15 = vpop.f32.mrb[1].mxu1  ;;  %v3576_v56 = vsel %vm3564_vm1, %v3558_v30, %v3575_v1 }
 0x912   : > { %v7247_v35 = vadd.f32 %v7246_v15, %v15047_v60  ;;  %v7248_v17 = vpop.f32.mrb[2].mxu1  ;;  %v3573_v15 = vsel %vm3563_vm2, %v3570_v23, %v3572_v22 }
 0x913   : > { %v7249_v10 = vadd.f32 %v7248_v17, %v15044_v34  ;;  %v7250_v8 = vpop.f32.mrb[3].mxu1  ;;  %v7355_v54 = vmax.f32 %v7245_v36, 0.0  ;;  %v15097_v36 = vpop.permute.xlu1 %3128  ;;  %v15112_v17 = vshll.u32 %v3538_v44, 8  ;;  %v3189_v44 = vmul.f32 %v15015_v0, %v3124_v57 }
 0x914   : > { %v7251_v9 = vadd.f32 %v7250_v8, %v15047_v60  ;;  %v7356_v13 = vmax.f32 %v7247_v35, 0.0  ;;  %v3577_v35 = vsel %vm3563_vm2, %v3574_v48, %v3576_v56  ;;  %v3454_v56 = vor.u32 %v3453_v37, %v3452_v7 }
 0x915   : > { %v7357_v47 = vmax.f32 %v7249_v10, 0.0  ;;  %v3568_v10 = vsel %vm3564_vm1, %v3552_v16, %v3567_v28  ;;  %v15120_v8 = vmul.u32.u64.low %v15112_v17, %v3573_v15  ;;  %v15121_v30 = vmul.u32.u64.high %v15112_v17, %v3573_v15, %v15120_v8 }
 0x916   : > { %v7358_v32 = vmax.f32 %v7251_v9, 0.0  ;;  %v15125_v51 = vmul.u32.u64.low %v15112_v17, %v3577_v35  ;;  %v15126_v9 = vmul.u32.u64.high %v15112_v17, %v3577_v35, %v15125_v51  ;;  %v3444_v16 = vshrl.u32 %v18000_v5, %v15104_v24 }
 0x917   : > { %v7387_v33 = vpack.c.bf16 %v7357_v47, %v7355_v54  ;;  %v3220_v54 = vpop.permute.xlu1 %3219  ;;  %v15131_v47 = vshrl.u32 %v3438_v49, 5  ;;  %v3450_v49 = vshrl.u32 %v18061_v25, %v15104_v24  ;;  %v3457_v57 = vor.u32 %v3456_v31, %v3455_v41 }
 0x918   : > { %v7388_v12 = vpack.c.bf16 %v7358_v32, %v7356_v13  ;;  %v3446_v13 = vshll.u32 %v18000_v5, %v3440_v19  ;;  %v7254_v32 = vpop.f32.mrb[4].mxu1  ;;  %v3274_v23 = vmul.f32 %v15018_v53, %v3220_v54  ;;  %v3445_v11 = vor.u32 %v3444_v16, %v3443_v59 }
 0x919   : > { %v7256_v1 = vpop.f32.mrb[5].mxu1  ;;  %vm3458_vm11 = vcmp.lt.s32.totalorder %v15131_v47, 1  ;;  %vm3461_vm6 = vcmp.lt.s32.totalorder %v15131_v47, 4  ;;  %vm3460_vm8 = vcmp.lt.s32.totalorder %v15131_v47, 3  ;;  %vm3459_vm9 = vcmp.lt.s32.totalorder %v15131_v47, 2 }
 0x91a   : > { %7639 = vmatprep.mubr.bf16.mxu0 %v7388_v12  ;;  %v7255_v12 = vadd.f32 %v7254_v32, %v15044_v34  ;;  %v7257_v22 = vadd.f32 %v7256_v1, %v15047_v60  ;;  %v7258_v48 = vpop.f32.mrb[6].mxu1  ;;  %v3448_v4 = vor.u32 %v3447_v63, %v3446_v13  ;;  %v3290_v37 = vadd.f32 %v3274_v23, %v3189_v44 }
 0x91b   : > { %7640 = vmatmul.mubr.bf16.vlgmr.msra.gmra.mrb[96].mxu0 %v7387_v33  ;;  %v3449_v33 = vshll.u32 %v17978_v46, %v3440_v19  ;;  %v7259_v28 = vadd.f32 %v7258_v48, %v15044_v34  ;;  %v7260_v15 = vpop.f32.mrb[7].mxu1  ;;  %v3467_v59 = vsel %vm3461_vm6, %v3454_v56, 920167782  ;;  %v3375_v1 = vmul.f32 %v15022_v18, %v15005_v58 }
 0x91c   : > { %v7261_v35 = vadd.f32 %v7260_v15, %v15047_v60  ;;  %v7359_v51 = vmax.f32 %v7255_v12, 0.0  ;;  %v7360_v19 = vmax.f32 %v7257_v22, 0.0  ;;  %v3750_v48 = vsel %vm3749_vm7, %v3748_v6, 0  ;;  %v15158_v15 = vpop.permute.xlu0 %3148 }
 0x91d   : > { %v7361_v54 = vmax.f32 %v7259_v28, 0.0  ;;  %v3451_v7 = vor.u32 %v3450_v49, %v3449_v33  ;;  %v15162_v33 = vsel %vm3563_vm2, %v3566_v20, %v3568_v10  ;;  %v15165_v12 = vshll.u32 %v3434_v43, 8 }
 0x91e   : > { %v7362_v32 = vmax.f32 %v7261_v35, 0.0  ;;  %v3466_v23 = vsel %vm3458_vm11, %v3445_v11, %v3448_v4  ;;  %v3391_v6 = vadd.f32 %v3375_v1, %v3290_v37  ;;  %v3588_v20 = vadd.s32 1, %v15121_v30 }
 0x91f   : > { %v7389_v16 = vpack.c.bf16 %v7361_v54, %v7359_v51  ;;  %v3468_v58 = vsel %vm3460_vm8, %v3451_v7, %v3467_v59  ;;  %v3471_v43 = vsel %vm3461_vm6, %v3457_v57, 1326507024  ;;  %v3752_v10 = vand.u32 31, %v3750_v48 }
 0x920   : > { %v7390_v13 = vpack.c.bf16 %v7362_v32, %v7360_v19  ;;  %vm3587_vm12 = vc.u32 %v15126_v9, %v15120_v8  ;;  %v3442_v28 = vshrl.u32 %v17986_v52, %v15104_v24  ;;  %v3463_v35 = vsel %vm3461_vm6, %v3451_v7, 2102212464  ;;  %v15195_v24 = vpop.permute.xlu0 %3153 }
 0x921   : > { %v15186_v54 = vsel %vm3459_vm9, %v3466_v23, %v3468_v58  ;;  %v3470_v37 = vsel %vm3458_vm11, %v3448_v4, %v3451_v7  ;;  %v3472_v57 = vsel %vm3460_vm8, %v3454_v56, %v3471_v43  ;;  %v15193_v59 = vadd.f32 %v15025_v39, %v3391_v6  ;;  %18098 = vst [vmem:[#allocation57_spill] sm:$0xff] %v15195_v24 }
 0x922   : > { %7649 = vmatprep.mubr.bf16.mxu0 %v7390_v13  ;;  %v15205_v7 = vsel %vm3587_vm12, %v3588_v20, %v15121_v30  ;;  %v15209_v56 = vsel %vm3458_vm11, %v3442_v28, %v3445_v11  ;;  %v15217_v6 = vsel %vm3459_vm9, %v3470_v37, %v3472_v57  ;;  %v15227_v43 = vshrl.u32 %v3750_v48, 5 }
 0x923   : > { %7650 = vmatmul.mubr.bf16.gmra.mrb[100].mxu0 %v7389_v16  ;;  %18097 = vst [vmem:[#allocation49_spill] sm:$0xff] %v15193_v59  ;;  %v3755_v28 = vshll.u32 %v17986_v52, %v3752_v10  ;;  %v3758_v48 = vshll.u32 %v18000_v5, %v3752_v10  ;;  %v15252_v55 = vmul.u32.u64.low %v15165_v12, %v15217_v6  ;;  %v15253_v13 = vmul.u32.u64.high %v15165_v12, %v15217_v6, %v15252_v55 }
 0x924   : > { %v15240_v57 = vpop.permute.xlu0 %3163  ;;  %vm3773_vm14 = vcmp.lt.s32.totalorder %v15227_v43, 4  ;;  %vm3770_vm15 = vcmp.lt.s32.totalorder %v15227_v43, 1  ;;  %vm3772_vm13 = vcmp.lt.s32.totalorder %v15227_v43, 3  ;;  %vm3771_vm3 = vcmp.lt.s32.totalorder %v15227_v43, 2 }
 0x925   : > { %18099 = vst [vmem:[#allocation61_spill] sm:$0xff] %v15240_v57  ;;  %v18100_v57 = vand.u32 2147483647, %v15072_v62  ;;  %v10835_v62 = vld [vmem:[#allocation26 + $0xc4] ss:$8 sps:$4 sm:$0xff]  }
 0x927   : > { %v3745_v24 = vand.u32 8388607, %v18100_v57 }
 0x941   : > { %v7264_v63 = vpop.f32.mrb[8].mxu1 }
 0x942   : > { %v7265_v49 = vadd.f32 %v7264_v63, %v15044_v34  ;;  %v7266_v44 = vpop.f32.mrb[9].mxu1  ;;  %v15199_v63 = vsub.s32 32, %v3752_v10 }
 0x943   : > { %v7267_v22 = vadd.f32 %v7266_v44, %v15047_v60  ;;  %v7268_v61 = vpop.f32.mrb[10].mxu1 }
 0x944   : > { %v7269_v41 = vadd.f32 %v7268_v61, %v15044_v34  ;;  %v7270_v31 = vpop.f32.mrb[11].mxu1  ;;  %v7363_v19 = vmax.f32 %v7265_v49, 0.0  ;;  %v15213_v49 = vsel %vm3460_vm8, %v3448_v4, %v3463_v35  ;;  %v3845_v4 = vand.u32 2139095040, %v15193_v59 }
 0x945   : > { %v7271_v51 = vadd.f32 %v7270_v31, %v15047_v60  ;;  %v7364_v16 = vmax.f32 %v7267_v22, 0.0  ;;  %v15221_v22 = vmul.u32.u64.low %v15165_v12, %v15186_v54  ;;  %v15222_v61 = vmul.u32.u64.high %v15165_v12, %v15186_v54, %v15221_v22 }
 0x946   : > { %v7365_v32 = vmax.f32 %v7269_v41, 0.0  ;;  %v3764_v35 = vshll.u32 %v18061_v25, %v3752_v10  ;;  %v3846_v55 = vshrl.u32 %v3845_v4, 23  ;;  %v3746_v4 = vor.u32 8388608, %v3745_v24 }
 0x947   : > { %v7366_v1 = vmax.f32 %v7271_v51, 0.0  ;;  %v3765_v51 = vshrl.u32 %v17980_v38, %v15199_v63  ;;  %vm3483_vm10 = vc.u32 %v15253_v13, %v15221_v22 }
 0x948   : > { %v7391_v44 = vpack.c.bf16 %v7365_v32, %v7363_v19  ;;  %v3767_v19 = vshll.u32 %v17980_v38, %v3752_v10  ;;  %v3768_v32 = vshrl.u32 %v18060_v29, %v15199_v63 }
 0x949   : > { %v7392_v23 = vpack.c.bf16 %v7366_v1, %v7364_v16  ;;  %v7274_v58 = vpop.f32.mrb[12].mxu1  ;;  %v3756_v1 = vshrl.u32 %v18000_v5, %v15199_v63 }
 0x94a   : > { %v7275_v30 = vadd.f32 %v7274_v58, %v15044_v34  ;;  %v7276_v11 = vpop.f32.mrb[13].mxu1  ;;  %v3769_v21 = vor.u32 %v3768_v32, %v3767_v19 }
 0x94b   : > { %7659 = vmatprep.mubr.bf16.mxu0 %v7392_v23  ;;  %v7277_v41 = vadd.f32 %v7276_v11, %v15047_v60  ;;  %v7278_v31 = vpop.f32.mrb[14].mxu1  ;;  %v3761_v11 = vshll.u32 %v17978_v46, %v3752_v10 }
 0x94c   : > { %7660 = vmatmul.mubr.bf16.gmra.mrb[104].mxu0 %v7391_v44  ;;  %v7279_v54 = vadd.f32 %v7278_v31, %v15044_v34  ;;  %v7280_v37 = vpop.f32.mrb[15].mxu1  ;;  %v3759_v44 = vshrl.u32 %v17978_v46, %v15199_v63  ;;  %v7367_v23 = vmax.f32 %v7275_v30, 0.0  ;;  %v3762_v31 = vshrl.u32 %v18061_v25, %v15199_v63 }
 0x94d   : > { %v7281_v16 = vadd.f32 %v7280_v37, %v15047_v60  ;;  %v7368_v40 = vmax.f32 %v7277_v41, 0.0  ;;  %v3766_v37 = vor.u32 %v3765_v51, %v3764_v35  ;;  %v3187_v41 = vmul.f32 %v15015_v0, %v15106_v45  ;;  %v3212_v35 = vpop.permute.xlu0 %3211 }
 0x94e   : > { %v7369_v58 = vmax.f32 %v7279_v54, 0.0  ;;  %v3757_v54 = vor.u32 %v3756_v1, %v3755_v28  ;;  %v3760_v26 = vor.u32 %v3759_v44, %v3758_v48  ;;  %v3763_v6 = vor.u32 %v3762_v31, %v3761_v11  ;;  %v18101_v48 = vld [vmem:[#allocation52_spill] sm:$0xff] }
 0x94f   : > { %v7370_v2 = vmax.f32 %v7281_v16, 0.0  ;;  %v3373_v32 = vmul.f32 %v15022_v18, %v18101_v48  ;;  %v3783_v57 = vsel %vm3773_vm14, %v3769_v21, 1326507024  ;;  %v9438_v31 = vadd.s32 4294967169, %v3846_v55 }
 0x950   : > { %v7393_v20 = vpack.c.bf16 %v7369_v58, %v7367_v23  ;;  %v3778_v1 = vsel %vm3770_vm15, %v3757_v54, %v3760_v26  ;;  %v3782_v58 = vsel %vm3770_vm15, %v3760_v26, %v3763_v6  ;;  %v3784_v21 = vsel %vm3772_vm13, %v3766_v37, %v3783_v57 }
 0x951   : > { %v7394_v30 = vpack.c.bf16 %v7370_v2, %v7368_v40  ;;  %v3779_v40 = vsel %vm3773_vm14, %v3766_v37, 920167782  ;;  %v3272_v2 = vmul.f32 %v15018_v53, %v3212_v35  ;;  %v18102_v35 = vmul.u32 %v15112_v17, %v15162_v33 }
 0x952   : > { %v3484_v37 = vadd.s32 1, %v15222_v61  ;;  %v3852_v17 = vadd.s32 1, %v9438_v31 }
 0x953   : > { %7669 = vmatprep.mubr.bf16.mxu0 %v7394_v30  ;;  %v3288_v30 = vadd.f32 %v3272_v2, %v3187_v41  ;;  %v3785_v41 = vsel %vm3771_vm3, %v3782_v58, %v3784_v21 }
 0x954   : > { %7670 = vmatmul.mubr.bf16.gmra.mrb[108].mxu0 %v7393_v20  ;;  %v3780_v20 = vsel %vm3772_vm13, %v3763_v6, %v3779_v40  ;;  %v3485_v48 = vsel %vm3483_vm10, %v3484_v37, %v15222_v61  ;;  %vm3853_vm5 = vcmp.gt.s32.totalorder %v3852_v17, 0 }
 0x955   : > { %v3781_v40 = vsel %vm3771_vm3, %v3778_v1, %v3780_v20  ;;  %v3389_v33 = vadd.f32 %v3373_v32, %v3288_v30  ;;  %v3854_v1 = vsel %vm3853_vm5, %v3852_v17, 0 }
 0x956   : > { %v15338_v17 = vshrl.u32 %v3854_v1, 5 }
 0x957   : > { %v15311_v32 = vadd.f32 %v15025_v39, %v3389_v33 }
 0x958   : > { %vm3877_vm1 = vcmp.lt.s32.totalorder %v15338_v17, 4  ;;  %vm3874_vm2 = vcmp.lt.s32.totalorder %v15338_v17, 1  ;;  %vm3876_vm11 = vcmp.lt.s32.totalorder %v15338_v17, 3  ;;  %vm3875_vm6 = vcmp.lt.s32.totalorder %v15338_v17, 2 }
 0x959   : > { %18103 = vst [vmem:[#allocation64_spill] sm:$0xff] %v15311_v32 }
 0x963   : > { %v7284_v10 = vpop.f32.mrb[16].mxu1 }
 0x964   : > { %v7285_v16 = vadd.f32 %v7284_v10, %v15044_v34  ;;  %v7286_v27 = vpop.f32.mrb[17].mxu1 }
 0x965   : > { %v7287_v51 = vadd.f32 %v7286_v27, %v15047_v60  ;;  %v7288_v19 = vpop.f32.mrb[18].mxu1 }
 0x966   : > { %v7289_v45 = vadd.f32 %v7288_v19, %v15044_v34  ;;  %v7290_v28 = vpop.f32.mrb[19].mxu1  ;;  %v7371_v44 = vmax.f32 %v7285_v16, 0.0  ;;  %v3590_v16 = vadd.s32 %v15205_v7, %v18102_v35  ;;  %v3786_v19 = vshll.u32 %v3746_v4, 8 }
 0x967   : > { %v7291_v27 = vadd.f32 %v7290_v28, %v15047_v60  ;;  %v7372_v11 = vmax.f32 %v7287_v51, 0.0  ;;  %v3465_v51 = vsel %vm3459_vm9, %v15209_v56, %v15213_v49  ;;  %v3754_v56 = vshrl.u32 %v17986_v52, %v15199_v63 }
 0x968   : > { %v7373_v23 = vmax.f32 %v7289_v45, 0.0  ;;  %v3591_v7 = vadd.s32 536870912, %v3590_v16  ;;  %v15297_v55 = vmul.u32.u64.low %v3786_v19, %v3781_v40  ;;  %v15298_v2 = vmul.u32.u64.high %v3786_v19, %v3781_v40, %v15297_v55 }
 0x969   : > { %v7374_v24 = vmax.f32 %v7291_v27, 0.0  ;;  %v3481_v47 = vmul.u32 %v15165_v12, %v3465_v51  ;;  %v15304_v49 = vmul.u32.u64.low %v3786_v19, %v3785_v41  ;;  %v15305_v28 = vmul.u32.u64.high %v3786_v19, %v3785_v41, %v15304_v49 }
 0x96a   : > { %v7395_v10 = vpack.c.bf16 %v7373_v23, %v7371_v44  ;;  %v3775_v4 = vsel %vm3773_vm14, %v3763_v6, 2102212464  ;;  %v15313_v57 = vshrl.u32 %v3591_v7, 30  ;;  %v3774_v12 = vsel %vm3770_vm15, %v3754_v56, %v3757_v54  ;;  %v15323_v23 = vpop.permute.xlu1 %3133 }
 0x96b   : > { %v7396_v45 = vpack.c.bf16 %v7374_v24, %v7372_v11  ;;  %v3486_v27 = vadd.s32 %v3485_v48, %v3481_v47  ;;  %v3776_v63 = vsel %vm3772_vm13, %v3760_v26, %v3775_v4  ;;  %v3637_v44 = vand.u32 2139095040, %v15311_v32 }
 0x96c   : > { %18104 = vst [vmem:[#allocation56_spill] sm:$0xff] %v15313_v57  ;;  %v3777_v61 = vsel %vm3771_vm3, %v3774_v12, %v3776_v63  ;;  %v3796_v6 = vadd.s32 1, %v15298_v2  ;;  %v3593_v20 = vshll.u32 %v15313_v57, 30  ;;  %vm3795_vm4 = vc.u32 %v15305_v28, %v15297_v55 }
 0x96d   : > { %7679 = vmatprep.mubr.bf16.mxu0 %v7396_v45  ;;  %v3487_v58 = vadd.s32 536870912, %v3486_v27  ;;  %v3856_v54 = vand.u32 31, %v3854_v1  ;;  %v3793_v11 = vmul.u32 %v3786_v19, %v3777_v61  ;;  %v3638_v24 = vshrl.u32 %v3637_v44, 23 }
 0x96e   : > { %7680 = vmatmul.mubr.bf16.gmra.mrb[112].mxu0 %v7395_v10  ;;  %v3797_v26 = vsel %vm3795_vm4, %v3796_v6, %v15298_v2  ;;  %v15329_v21 = vsub.s32 %v3590_v16, %v3593_v20  ;;  %v3139_v30 = vpop.permute.xlu1 %3138  ;;  %v17827_v51 = vand.u32 2147483647, %v15193_v59 }
 0x96f   : > { %v15331_v31 = vshrl.u32 %v3487_v58, 30  ;;  %v3857_v43 = vsub.s32 32, %v3856_v54  ;;  %v3798_v10 = vadd.s32 %v3797_v26, %v3793_v11  ;;  %v9430_v35 = vadd.s32 4294967169, %v3638_v24 }
 0x970   : > { %18105 = vst [vmem:[#allocation54_spill] sm:$0xff] %v15329_v21  ;;  %v3596_v45 = vsub.s32 0, %v15329_v21  ;;  %v3868_v16 = vshll.u32 %v18061_v25, %v3856_v54  ;;  %v3871_v56 = vshll.u32 %v17980_v38, %v3856_v54  ;;  %v3849_v12 = vand.u32 8388607, %v17827_v51 }
 0x971   : > { %18106 = vst [vmem:[#allocation59_spill] sm:$0xff] %v15331_v31  ;;  %v3489_v40 = vshll.u32 %v15331_v31, 30  ;;  %v3869_v37 = vshrl.u32 %v17980_v38, %v3857_v43  ;;  %v3872_v19 = vshrl.u32 %v18060_v29, %v3857_v43  ;;  %v3799_v41 = vadd.s32 536870912, %v3798_v10 }
 0x972   : > { %v3644_v33 = vadd.s32 1, %v9430_v35  ;;  %v3860_v7 = vshrl.u32 %v18000_v5, %v3857_v43  ;;  %v3863_v2 = vshrl.u32 %v17978_v46, %v3857_v43  ;;  %v3866_v47 = vshrl.u32 %v18061_v25, %v3857_v43  ;;  %v3232_v49 = vpop.permute.xlu1 %3231 }
 0x973   : > { %v15346_v48 = vmin.u32 %v3596_v45, %v15329_v21  ;;  %v15348_v4 = vsub.s32 %v3486_v27, %v3489_v40  ;;  %v3870_v63 = vor.u32 %v3869_v37, %v3868_v16  ;;  %v3859_v1 = vshll.u32 %v17986_v52, %v3856_v54 }
 0x974   : > { %v3862_v44 = vshll.u32 %v18000_v5, %v3856_v54  ;;  %v3865_v61 = vshll.u32 %v17978_v46, %v3856_v54  ;;  %v3873_v6 = vor.u32 %v3872_v19, %v3871_v56  ;;  %v15355_v20 = vshrl.u32 %v3799_v41, 30  ;;  %v3224_v41 = vpop.permute.xlu0 %3223 }
 0x975   : > { %18107 = vst [vmem:[#allocation60_spill] sm:$0xff] %v15348_v4  ;;  %v3192_v58 = vmul.f32 %v15015_v0, %v3139_v30  ;;  %vm3645_vm0 = vcmp.gt.s32.totalorder %v3644_v33, 0  ;;  %v3277_v11 = vmul.f32 %v15018_v53, %v3232_v49  ;;  %v3861_v27 = vor.u32 %v3860_v7, %v3859_v1 }
 0x976   : > { %18108 = vst [vmem:[#allocation63_spill] sm:$0xff] %v15355_v20  ;;  %v3864_v24 = vor.u32 %v3863_v2, %v3862_v44  ;;  %v3867_v26 = vor.u32 %v3866_v47, %v3865_v61  ;;  %v3378_v35 = vmul.f32 %v15022_v18, %v15010_v3  ;;  %v3190_v45 = vmul.f32 %v15015_v0, %v15097_v36  ;;  %v3325_v1 = vpop.permute.xlu1 %3324 }
 0x977   : > { %v3883_v54 = vsel %vm3877_vm1, %v3870_v63, 920167782  ;;  %v3850_v30 = vor.u32 8388608, %v3849_v12  ;;  %v3887_v37 = vsel %vm3877_vm1, %v3873_v6, 1326507024  ;;  %v3646_v19 = vsel %vm3645_vm0, %v3644_v33, 0 }
 0x978   : > { %v3801_v16 = vshll.u32 %v15355_v20, 30  ;;  %v3293_v3 = vadd.f32 %v3277_v11, %v3192_v58  ;;  %v3882_v7 = vsel %vm3874_vm2, %v3861_v27, %v3864_v24  ;;  %v3884_v2 = vsel %vm3876_vm11, %v3867_v26, %v3883_v54 }
 0x979   : > { %v3886_v47 = vsel %vm3874_vm2, %v3864_v24, %v3867_v26  ;;  %v3888_v56 = vsel %vm3876_vm11, %v3870_v63, %v3887_v37  ;;  %v3648_v49 = vand.u32 31, %v3646_v19  ;;  %v3275_v12 = vmul.f32 %v15018_v53, %v3224_v41 }
 0x97a   : > { %v3858_v6 = vshrl.u32 %v17986_v52, %v3857_v43  ;;  %v15385_v58 = vshll.u32 %v3850_v30, 8  ;;  %v15388_v51 = vsub.s32 %v3798_v10, %v3801_v16  ;;  %v3885_v63 = vsel %vm3875_vm6, %v3882_v7, %v3884_v2 }
 0x97b   : > { %v3394_v37 = vadd.f32 %v3378_v35, %v3293_v3  ;;  %v3889_v43 = vsel %vm3875_vm6, %v3886_v47, %v3888_v56  ;;  %v3376_v30 = vmul.f32 %v15022_v18, %v3325_v1  ;;  %v15399_v36 = vsub.s32 32, %v3648_v49  ;;  %v10797_v56 = vld [vmem:[#allocation26] ss:$8 sps:$4 sm:$0xff]   ;;  %v10799_v1 = vld [vmem:[#allocation26 + $0x4] ss:$8 sps:$4 sm:$0xff]  }
 0x97c   : > { %v3291_v10 = vadd.f32 %v3275_v12, %v3190_v45  ;;  %v15402_v35 = vmul.u32.u64.low %v15385_v58, %v3885_v63  ;;  %v15403_v3 = vmul.u32.u64.high %v15385_v58, %v3885_v63, %v15402_v35  ;;  %v3804_v45 = vsub.s32 0, %v15388_v51  ;;  %7972 = vmatprep.subr.bf16.mxu0 %v10799_v1  ;;  %v3329_v1 = vpop.permute.xlu1 %3328 }
 0x97d   : > { %v15411_v47 = vadd.f32 %v15025_v39, %v3394_v37  ;;  %v3878_v12 = vsel %vm3874_vm2, %v3858_v6, %v3861_v27  ;;  %v3660_v37 = vshll.u32 %v18061_v25, %v3648_v49  ;;  %v3663_v27 = vshll.u32 %v17980_v38, %v3648_v49  ;;  %7973 = vmatpush1.bf16.msra.mxu0 %v10797_v56  ;;  %v10800_v6 = vld [vmem:[#allocation26 + $0x10] ss:$8 sps:$4 sm:$0xff]  }
 0x97e   : > { %18109 = vst [vmem:[#allocation50_spill] sm:$0xff] %v15402_v35  ;;  %v3658_v56 = vshrl.u32 %v18061_v25, %v15399_v36  ;;  %v18114_v31 = vand.u32 2147483647, %v15311_v32  ;;  %v9435_v17 = vmin.u32 %v3804_v45, %v15388_v51  ;;  %v15487_v32 = vld [vmem:[%s12356_s30 + $0x70] sm:$0xff] }
 0x97f   : > { %18111 = vst [vmem:[#allocation52_spill] sm:$0xff] %v15411_v47 }
 0x980   : > { %v3641_v59 = vand.u32 8388607, %v18114_v31 }
 0x995   : > { %v7294_v33 = vpop.f32.mrb[20].mxu1 }
 0x996   : > { %v7295_v44 = vadd.f32 %v7294_v33, %v15044_v34  ;;  %v7296_v61 = vpop.f32.mrb[21].mxu1  ;;  %v3879_v33 = vsel %vm3877_vm1, %v3867_v26, 2102212464 }
 0x997   : > { %v7297_v11 = vadd.f32 %v7296_v61, %v15047_v60  ;;  %v7298_v54 = vpop.f32.mrb[22].mxu1 }
 0x998   : > { %v7299_v41 = vadd.f32 %v7298_v54, %v15044_v34  ;;  %v7300_v40 = vpop.f32.mrb[23].mxu1  ;;  %v7375_v16 = vmax.f32 %v7295_v44, 0.0  ;;  %v15407_v26 = vmul.u32.u64.low %v15385_v58, %v3889_v43  ;;  %v15408_v54 = vmul.u32.u64.high %v15385_v58, %v3889_v43, %v15407_v26 }
 0x999   : > { %v7301_v61 = vadd.f32 %v7300_v40, %v15047_v60  ;;  %v7376_v7 = vmax.f32 %v7297_v11, 0.0  ;;  %v3880_v44 = vsel %vm3876_vm11, %v3864_v24, %v3879_v33  ;;  %v3228_v11 = vpop.permute.xlu0 %3227  ;;  %v3191_v43 = vmul.f32 %v15015_v0, %v15323_v23 }
 0x99a   : > { %v7377_v57 = vmax.f32 %v7299_v41, 0.0  ;;  %18110 = vst [vmem:[#allocation55_spill] sm:$0xff] %v15408_v54  ;;  %v10802_v41 = vld [vmem:[#allocation26 + $0x14] ss:$8 sps:$4 sm:$0xff]   ;;  %v15424_v26 = vshrl.u32 %v3646_v19, 5  ;;  %v3664_v24 = vshrl.u32 %v18060_v29, %v15399_v36  ;;  %v3651_v0 = vshll.u32 %v17986_v52, %v3648_v49 }
 0x99b   : > { %v7378_v2 = vmax.f32 %v7301_v61, 0.0  ;;  %v3392_v61 = vadd.f32 %v3376_v30, %v3291_v10  ;;  %v3654_v23 = vshll.u32 %v18000_v5, %v3648_v49  ;;  %v4157_v33 = vand.u32 2139095040, %v15411_v47  ;;  %7974 = vmatprep.subr.bf16.mxu0 %v10802_v41  ;;  %v10805_v19 = vld [vmem:[#allocation26 + $0x24] ss:$8 sps:$4 sm:$0xff]  }
 0x99c   : > { %v7397_v40 = vpack.c.bf16 %v7377_v57, %v7375_v16  ;;  %v3661_v57 = vshrl.u32 %v17980_v38, %v15399_v36  ;;  %v3276_v30 = vmul.f32 %v15018_v53, %v3228_v11  ;;  %v3652_v10 = vshrl.u32 %v18000_v5, %v15399_v36  ;;  %v15451_v41 = vld [vmem:[%s12356_s30 + $0x68] sm:$0xff]  ;;  %7975 = vmatpush1.bf16.msra.mxu0 %v10800_v6 }
 0x99d   : > { %v7398_v63 = vpack.c.bf16 %v7378_v2, %v7376_v7  ;;  %v3655_v7 = vshrl.u32 %v17978_v46, %v15399_v36  ;;  %v3657_v2 = vshll.u32 %v17978_v46, %v3648_v49  ;;  %v3881_v53 = vsel %vm3875_vm6, %v3878_v12, %v3880_v44  ;;  %3168 = vperm.xlu1 %10437, %v15451_v41  }
 0x99e   : > { %v15448_v11 = vadd.f32 %v15025_v39, %v3392_v61  ;;  %v3900_v49 = vadd.s32 1, %v15403_v3  ;;  %v3665_v50 = vor.u32 %v3664_v24, %v3663_v27  ;;  %vm3669_vm7 = vcmp.lt.s32.totalorder %v15424_v26, 4  ;;  %7976 = vmatprep.subr.bf16.mxu0 %v10805_v19  ;;  %3255 = vperm.xlu0 %10436, %v15451_v41   ;;  %v15467_v24 = vpop.permute.xlu1 %3143  ;;  %v10806_v19 = vld [vmem:[#allocation26 + $0x30] ss:$8 sps:$4 sm:$0xff]  }
 0x99f   : > { %7689 = vmatprep.mubr.bf16.mxu0 %v7398_v63  ;;  %v18112_v63 = vsub.s32 0, %v15348_v4  ;;  %vm3899_vm8 = vc.u32 %v15408_v54, %v15402_v35  ;;  %v4158_v12 = vshrl.u32 %v4157_v33, 23  ;;  %v3292_v44 = vadd.f32 %v3276_v30, %v3191_v43 }
 0x9a0   : > { %7690 = vmatmul.mubr.bf16.gmra.mrb[116].mxu0 %v7397_v40  ;;  %v3662_v40 = vor.u32 %v3661_v57, %v3660_v37  ;;  %18113 = vst [vmem:[#allocation65_spill] sm:$0xff] %v15448_v11  ;;  %v10808_v37 = vld [vmem:[#allocation26 + $0x34] ss:$8 sps:$4 sm:$0xff]   ;;  %v15462_v57 = vor.u32 %v3652_v10, %v3651_v0  ;;  %v15464_v31 = vor.u32 %v3655_v7, %v3654_v23  ;;  %vm3666_vm9 = vcmp.lt.s32.totalorder %v15424_v26, 1 }
 0x9a1   : > { %v15443_v16 = vmin.u32 %v18112_v63, %v15348_v4  ;;  %v10803_v63 = vld [vmem:[#allocation26 + $0x20] ss:$8 sps:$4 sm:$0xff]   ;;  %v3659_v61 = vor.u32 %v3658_v56, %v3657_v2  ;;  %v3377_v27 = vmul.f32 %v15022_v18, %v3329_v1  ;;  %vm3668_vm12 = vcmp.lt.s32.totalorder %v15424_v26, 3  ;;  %v10811_v1 = vld [vmem:[#allocation26 + $0x44] ss:$8 sps:$4 sm:$0xff]  }
 0x9a2   : > { %v3675_v45 = vsel %vm3669_vm7, %v3662_v40, 920167782  ;;  %v3949_v43 = vand.u32 2139095040, %v15448_v11  ;;  %v18115_v6 = vclz %v15346_v48  ;;  %v3901_v23 = vsel %vm3899_vm8, %v3900_v49, %v15403_v3  ;;  %7977 = vmatpush1.bf16.msra.mxu0 %v10803_v63  ;;  %3259 = vperm.xlu0 %10436, %v15487_v32  }
 0x9a3   : > { %v3642_v33 = vor.u32 8388608, %v3641_v59  ;;  %v3679_v30 = vsel %vm3669_vm7, %v3665_v50, 1326507024  ;;  %v18116_v10 = vmov 1   ;;  %v3494_v7 = vclz %v15443_v16  ;;  %7978 = vmatprep.subr.bf16.mxu0 %v10808_v37 }
 0x9a4   : > { %v9428_v0 = vadd.s32 4294967294, %v18115_v6  ;;  %10438 = vset.pattern.permute.xlu1 %v18116_v10  ;;  %v3806_v2 = vclz %v9435_v17  ;;  %v3897_v48 = vmul.u32 %v15385_v58, %v3881_v53  ;;  %v9450_v56 = vadd.s32 4294967169, %v4158_v12  ;;  %v11106_v6 = vld [vmem:[%s12356_s30 + $0x60] sm:$0xff]  ;;  %v15506_v17 = vpop.permute.xlu1 %3235  ;;  %v10809_v12 = vld [vmem:[#allocation26 + $0x40] ss:$8 sps:$4 sm:$0xff]  }
 0x9a5   : > { %3251 = vperm.xlu1 %10438, %v11106_v6   ;;  %vm3667_vm14 = vcmp.lt.s32.totalorder %v15424_v26, 2  ;;  %v3674_v50 = vsel %vm3666_vm9, %v15462_v57, %v15464_v31  ;;  %v3676_v59 = vsel %vm3668_vm12, %v3659_v61, %v3675_v45  ;;  %v3393_v3 = vadd.f32 %v3377_v27, %v3292_v44  ;;  %v10814_v27 = vld [vmem:[#allocation26 + $0x54] ss:$8 sps:$4 sm:$0xff]  }
 0x9a6   : > { %v15497_v58 = vadd.s32 %v3901_v23, %v3897_v48  ;;  %v3678_v16 = vsel %vm3666_vm9, %v15464_v31, %v3659_v61  ;;  %v3680_v53 = vsel %vm3668_vm12, %v3662_v40, %v3679_v30  ;;  %v3950_v49 = vshrl.u32 %v3949_v43, 23  ;;  %7979 = vmatpush1.bf16.msra.mxu0 %v10806_v19 }
 0x9a7   : > { %v15504_v63 = vshll.u32 %v3642_v33, 8  ;;  %v9436_v44 = vadd.s32 4294967294, %v3806_v2  ;;  %v3677_v37 = vsel %vm3667_vm14, %v3674_v50, %v3676_v59  ;;  %7980 = vmatprep.subr.bf16.mxu0 %v10811_v1  ;;  %v3681_v45 = vsel %vm3667_vm14, %v3678_v16, %v3680_v53  ;;  %v3099_v2 = vld [vmem:[%s12356_s30 + $0x78] sm:$0xff]  ;;  %s1053_s30 = sand.u32 1, %s18287_s26  }
 0x9a8   : > { %v4164_v40 = vadd.s32 1, %v9450_v56  ;;  %v15514_v43 = vadd.f32 %v15025_v39, %v3393_v3  ;;  %v18117_v23 = vmov 2   ;;  %vm9429_vm15 = vcmp.lt.s32.totalorder %v9428_v0, 0  ;;  %v10812_v39 = vld [vmem:[#allocation26 + $0x50] ss:$8 sps:$4 sm:$0xff]   ;;  %v3240_v16 = vpop.permute.xlu1 %3239  ;;  %s9345_s2 = sshll.u32 %s1053_s30, 6 }
 0x9a9   : > { %10439 = vset.pattern.permute.xlu1 %v18029_v14  ;;  %10441 = vset.pattern.permute.xlu0 %v18117_v23  ;;  %v9424_v33 = vadd.s32 4294967294, %v3494_v7  ;;  %v3903_v30 = vadd.s32 536870912, %v15497_v58  ;;  %v9442_v19 = vadd.s32 4294967169, %v3950_v49  ;;  %v15522_v48 = vmul.f32 %v15022_v18, %v15013_v42  ;;  %s17599_s15 = scalar_lea.vmem [#allocation29], %s9345_s2  ;;  %s17652_s28 = scalar_lea.sflag [#allocation4], %s1053_s30 }
 0x9aa   : > { %3173 = vperm.xlu1 %10439, %v15487_v32   ;;  %3352 = vperm.xlu0 %10441, %v11106_v6   ;;  %v15525_v56 = vmul.u32.u64.low %v15504_v63, %v3677_v37  ;;  %v15526_v1 = vmul.u32.u64.high %v15504_v63, %v3677_v37, %v15525_v56  ;;  %vm9437_vm13 = vcmp.lt.s32.totalorder %v9436_v44, 0  ;;  %v3650_v7 = vshrl.u32 %v17986_v52, %v15399_v36  ;;  %v10817_v6 = vld [vmem:[#allocation26 + $0x64] ss:$8 sps:$4 sm:$0xff]   ;;  %s9069_s29 = sshll.u32 %s17599_s15, 4  ;;  %s17646_s29 = int_to_ptr.vmem [resolvable:$true] %s9069_s29 }
 0x9ab   : > { %7981 = vmatpush1.bf16.msra.mxu0 %v10809_v12  ;;  %v15532_v50 = vmul.u32.u64.low %v15504_v63, %v3681_v45  ;;  %v15533_v59 = vmul.u32.u64.high %v15504_v63, %v3681_v45, %v15532_v50  ;;  %v15535_v3 = vsel %vm9429_vm15, 0, %v9428_v0  ;;  %v3671_v42 = vsel %vm3669_vm7, %v3659_v61, 2102212464  ;;  %v15550_v61 = vld [vmem:[#allocation7] ss:$0 sm:$0xff] }
 0x9ac   : > { %18118 = vst [vmem:[#allocation66_spill] sm:$0xff] %v15525_v56  ;;  %7982 = vmatprep.subr.bf16.mxu0 %v10814_v27  ;;  %18120 = vst [vmem:[#allocation68_spill] sm:$0xff] %v15535_v3  ;;  %vm4165_vm3 = vcmp.gt.s32.totalorder %v4164_v40, 0  ;;  %v4053_v18 = vand.u32 2139095040, %v15514_v43  ;;  %vm9425_vm10 = vcmp.lt.s32.totalorder %v9424_v33, 0  ;;  %v15540_v53 = vshrl.u32 %v3903_v30, 30 }
 0x9ad   : > { %18119 = vst [vmem:[#allocation67_spill] sm:$0xff] %v15533_v59  ;;  %v17838_v36 = vand.u32 2147483647, %v15411_v47  ;;  %v3956_v49 = vadd.s32 1, %v9442_v19  ;;  %v15545_v12 = vadd.s32 %v15120_v8, %v15126_v9  ;;  %v15548_v0 = vsel %vm9437_vm13, 0, %v9436_v44 }
 0x9ae   : > { %3178 = vperm.xlu1 %10439, %v3099_v2   ;;  %18121 = vst [vmem:[#allocation69_spill] sm:$0xff] %v15540_v53  ;;  %3364 = vperm.xlu0 %10441, %v3099_v2   ;;  %v3194_v37 = vmul.f32 %v15550_v61, %v15158_v15  ;;  %v10815_v45 = vld [vmem:[#allocation26 + $0x60] ss:$8 sps:$4 sm:$0xff]   ;;  %v3670_v30 = vsel %vm3666_vm9, %v3650_v7, %v15462_v57  ;;  %v4166_v9 = vsel %vm4165_vm3, %v4164_v40, 0  ;;  %v15562_v44 = vld [vmem:[#allocation7 + $0x1] ss:$0 sm:$0xff] }
 0x9af   : > { %18122 = vst [vmem:[#allocation70_spill] sm:$0xff] %v15545_v12  ;;  %7983 = vmatpush1.bf16.msra.mxu0 %v10812_v39  ;;  %v3672_v8 = vsel %vm3668_vm12, %v15464_v31, %v3671_v42  ;;  %v3279_v19 = vmul.f32 %v15562_v44, %v3240_v16  ;;  %v10820_v15 = vld [vmem:[#allocation26 + $0x74] ss:$8 sps:$4 sm:$0xff]   ;;  %v3606_v50 = vsub.s32 4294967266, %v15535_v3  ;;  %v3482_v39 = vadd.s32 %v15221_v22, %v15253_v13 }
 0x9b0   : > { %7984 = vmatprep.subr.bf16.mxu0 %v10817_v6  ;;  %v15569_v27 = vsel %vm9425_vm10, 0, %v9424_v33  ;;  %v4054_v57 = vshrl.u32 %v4053_v18, 23  ;;  %v3814_v31 = vsub.s32 4294967266, %v15548_v0  ;;  %v3905_v40 = vshll.u32 %v15540_v53, 30 }
 0x9b1   : > { %18123 = vst [vmem:[#allocation71_spill] sm:$0xff] %v15569_v27  ;;  %v4161_v7 = vand.u32 8388607, %v17838_v36  ;;  %vm3957_vm5 = vcmp.gt.s32.totalorder %v3956_v49, 0  ;;  %v3498_v6 = vsub.s32 32, %v15569_v27  ;;  %v3673_v13 = vsel %vm3667_vm14, %v3670_v30, %v3672_v8 }
 0x9b2   : > { %10440 = vset.pattern.permute.xlu1 %v18116_v10  ;;  %10449 = vset.pattern.permute.xlu0 %v18029_v14  ;;  %v3692_v22 = vadd.s32 1, %v15526_v1  ;;  %v4168_v33 = vand.u32 31, %v4166_v9  ;;  %v10818_v10 = vld [vmem:[#allocation26 + $0x70] ss:$8 sps:$4 sm:$0xff]   ;;  %v3502_v42 = vsub.s32 4294967266, %v15569_v27  ;;  %vm3691_vm4 = vc.u32 %v15533_v59, %v15525_v56 }
 0x9b3   : > { %3263 = vperm.xlu1 %10440, %v3099_v2   ;;  %7985 = vmatpush1.bf16.msra.mxu0 %v10815_v45  ;;  %v18124_v18 = vand.u32 2147483647, %v15448_v11  ;;  %v3295_v16 = vadd.f32 %v3279_v19, %v3194_v37  ;;  %v10823_v36 = vld [vmem:[#allocation26 + $0x84] ss:$8 sps:$4 sm:$0xff]   ;;  %v15587_v26 = vadd.s32 127, %v3606_v50  ;;  %v15590_v30 = vsel %vm3957_vm5, %v3956_v49, 0 }
 0x9b4   : > { %7986 = vmatprep.subr.bf16.mxu0 %v10820_v15  ;;  %v9446_v45 = vadd.s32 4294967169, %v4054_v57  ;;  %v15592_v8 = vadd.s32 127, %v3814_v31  ;;  %v15595_v47 = vsub.s32 %v15497_v58, %v3905_v40  ;;  %v3689_v35 = vmul.u32 %v15504_v63, %v3673_v13  ;;  %v10821_v50 = vld [vmem:[#allocation26 + $0x80] ss:$8 sps:$4 sm:$0xff]  }
 0x9b5   : > { %v3953_v2 = vand.u32 8388607, %v18124_v18  ;;  %18125 = vst [vmem:[#allocation72_spill] sm:$0xff] %v15587_v26  ;;  %v4162_v11 = vor.u32 8388608, %v4161_v7  ;;  %v15601_v19 = vshrl.u32 %v3482_v39, %v3498_v6  ;;  %v3693_v49 = vsel %vm3691_vm4, %v3692_v22, %v15526_v1  ;;  %v10826_v39 = vld [vmem:[#allocation26 + $0x94] ss:$8 sps:$4 sm:$0xff]  }
 0x9b6   : > { %18126 = vst [vmem:[#allocation73_spill] sm:$0xff] %v15592_v8  ;;  %18127 = vst [vmem:[#allocation74_spill] sm:$0xff] %v15595_v47  ;;  %v4169_v15 = vsub.s32 32, %v4168_v33  ;;  %v15608_v58 = vadd.s32 127, %v3502_v42  ;;  %v3396_v57 = vadd.f32 %v15522_v48, %v3295_v16  ;;  %v15614_v31 = vadd.s32 %v15297_v55, %v15305_v28  ;;  %v10839_v26 = vld [vmem:[#allocation26 + $0xe0] ss:$8 sps:$4 sm:$0xff]  }
 0x9b7   : > { %10442 = vset.pattern.permute.xlu1 %v18117_v23  ;;  %18128 = vst [vmem:[#allocation75_spill] sm:$0xff] %v15601_v19  ;;  %7987 = vmatpush1.bf16.msra.mxu0 %v10818_v10  ;;  %v3954_v63 = vor.u32 8388608, %v3953_v2  ;;  %v3960_v23 = vand.u32 31, %v15590_v30  ;;  %v4060_v7 = vadd.s32 1, %v9446_v45  ;;  %v15621_v13 = vadd.s32 %v3693_v49, %v3689_v35  ;;  %v10824_v10 = vld [vmem:[#allocation26 + $0x90] ss:$8 sps:$4 sm:$0xff]  }
 0x9b8   : > { %3356 = vperm.xlu1 %10442, %v15451_v41   ;;  %7988 = vmatprep.subr.bf16.mxu0 %v10823_v36  ;;  %v15623_v22 = vshll.u32 %v4162_v11, 8  ;;  %v15625_v48 = vshrl.u32 %v4166_v9, 5  ;;  %v4172_v36 = vshrl.u32 %v18000_v5, %v4169_v15  ;;  %v4175_v55 = vshrl.u32 %v17978_v46, %v4169_v15  ;;  %v15636_v11 = vld [vmem:[#allocation8] ss:$0 sm:$0xff]  ;;  %v10829_v2 = vld [vmem:[#allocation26 + $0xa4] ss:$8 sps:$4 sm:$0xff]  }
 0x9b9   : > { %v4181_v28 = vshrl.u32 %v17980_v38, %v4169_v15  ;;  %v4171_v42 = vshll.u32 %v17986_v52, %v4168_v33  ;;  %v15632_v18 = vsub.s32 32, %v3960_v23  ;;  %v15634_v35 = vshll.u32 %v3954_v63, 8  ;;  %v10827_v41 = vld [vmem:[#allocation26 + $0xa0] ss:$8 sps:$4 sm:$0xff]  }
 0x9ba   : > { %v15639_v9 = vadd.f32 %v15636_v11, %v3396_v57  ;;  %v4174_v16 = vshll.u32 %v18000_v5, %v4168_v33  ;;  %v4178_v45 = vshrl.u32 %v18061_v25, %v4169_v15  ;;  %v4180_v49 = vshll.u32 %v18061_v25, %v4168_v33 }
 0x9bb   : > { %7989 = vmatpush1.bf16.msra.mxu0 %v10821_v50  ;;  %vm4061_vm0 = vcmp.gt.s32.totalorder %v4060_v7, 0  ;;  %v4177_v50 = vshll.u32 %v17978_v46, %v4168_v33  ;;  %v4183_v63 = vshll.u32 %v17980_v38, %v4168_v33  ;;  %v4184_v53 = vshrl.u32 %v18060_v29, %v4169_v15 }
 0x9bc   : > { %3360 = vperm.xlu1 %10442, %v15487_v32   ;;  %18129 = vst [vmem:[#allocation76_spill] sm:$0xff] %v15639_v9  ;;  %7990 = vmatprep.subr.bf16.mxu0 %v10826_v39  ;;  %v4170_v32 = vshrl.u32 %v17986_v52, %v4169_v15  ;;  %v3695_v57 = vadd.s32 536870912, %v15621_v13  ;;  %v4173_v37 = vor.u32 %v4172_v36, %v4171_v42  ;;  %v4062_v56 = vsel %vm4061_vm0, %v4060_v7, 0  ;;  %v10832_v15 = vld [vmem:[#allocation26 + $0xb4] ss:$8 sps:$4 sm:$0xff]  }
 0x9bd   : > { %v15649_v39 = vor.u32 %v4175_v55, %v4174_v16  ;;  %v15651_v6 = vor.u32 %v4181_v28, %v4180_v49  ;;  %v3972_v40 = vshll.u32 %v18061_v25, %v3960_v23  ;;  %v3973_v1 = vshrl.u32 %v17980_v38, %v15632_v18 }
 0x9be   : > { %v4365_v33 = vand.u32 2139095040, %v15639_v9  ;;  %v15658_v59 = vor.u32 %v4178_v45, %v4177_v50  ;;  %v15661_v36 = vshrl.u32 %v15590_v30, 5  ;;  %v3975_v55 = vshll.u32 %v17980_v38, %v3960_v23  ;;  %v10830_v45 = vld [vmem:[#allocation26 + $0xb0] ss:$8 sps:$4 sm:$0xff]  }
 0x9bf   : > { %7991 = vmatpush1.bf16.msra.mxu0 %v10824_v10  ;;  %v3963_v28 = vshll.u32 %v17986_v52, %v3960_v23  ;;  %v3964_v10 = vshrl.u32 %v18000_v5, %v15632_v18  ;;  %v3966_v7 = vshll.u32 %v18000_v5, %v3960_v23  ;;  %v3967_v42 = vshrl.u32 %v17978_v46, %v15632_v18 }
 0x9c0   : > { %10443 = vset.pattern.permute.xlu1 %v18029_v14  ;;  %7992 = vmatprep.subr.bf16.mxu0 %v10829_v2  ;;  %v3976_v14 = vshrl.u32 %v18060_v29, %v15632_v18  ;;  %vm4189_vm1 = vcmp.lt.s32.totalorder %v15625_v48, 4  ;;  %v3969_v30 = vshll.u32 %v17978_v46, %v3960_v23  ;;  %v3970_v2 = vshrl.u32 %v18061_v25, %v15632_v18 }
 0x9c1   : > { %v4064_v16 = vand.u32 31, %v4062_v56  ;;  %vm4186_vm2 = vcmp.lt.s32.totalorder %v15625_v48, 1  ;;  %v4195_v49 = vsel %vm4189_vm1, %v15651_v6, 920167782  ;;  %v3974_v50 = vor.u32 %v3973_v1, %v3972_v40 }
 0x9c2   : > { %v4366_v54 = vshrl.u32 %v4365_v33, 23  ;;  %v4185_v20 = vor.u32 %v4184_v53, %v4183_v63  ;;  %vm4187_vm11 = vcmp.lt.s32.totalorder %v15625_v48, 2  ;;  %v3977_v23 = vor.u32 %v3976_v14, %v3975_v55  ;;  %v10833_v63 = vld [vmem:[#allocation26 + $0xc0] ss:$8 sps:$4 sm:$0xff]  }
 0x9c3   : > { %7993 = vmatpush1.bf16.msra.mxu0 %v10827_v41  ;;  %vm3981_vm6 = vcmp.lt.s32.totalorder %v15661_v36, 4  ;;  %vm4188_vm7 = vcmp.lt.s32.totalorder %v15625_v48, 3  ;;  %v4194_v41 = vsel %vm4186_vm2, %v4173_v37, %v15649_v39  ;;  %v15686_v21 = vor.u32 %v3964_v10, %v3963_v28  ;;  %v10838_v28 = vld [vmem:[#allocation26 + $0xd4] ss:$8 sps:$4 sm:$0xff]  }
 0x9c4   : > { %7994 = vmatprep.subr.bf16.mxu0 %v10832_v15  ;;  %v15688_v12 = vor.u32 %v3967_v42, %v3966_v7  ;;  %v4196_v1 = vsel %vm4188_vm7, %v15658_v59, %v4195_v49  ;;  %v15693_v53 = vor.u32 %v3970_v2, %v3969_v30  ;;  %vm3978_vm8 = vcmp.lt.s32.totalorder %v15661_v36, 1  ;;  %v15720_v30 = vpop.permute.xlu1 %3158 }
 0x9c5   : > { %v15696_v40 = vsub.s32 32, %v4064_v16  ;;  %v18130_v33 = vsub.s32 32, %v15548_v0  ;;  %vm3980_vm9 = vcmp.lt.s32.totalorder %v15661_v36, 3  ;;  %v3987_v55 = vsel %vm3981_vm6, %v3974_v50, 920167782  ;;  %18131 = vst [vmem:[#allocation77_spill] sm:$0xff] %v15720_v30 }
 0x9c6   : > { %v9458_v14 = vadd.s32 4294967169, %v4366_v54  ;;  %v15706_v10 = vshrl.u32 %v3695_v57, 30  ;;  %v15710_v7 = vsel %vm4186_vm2, %v4170_v32, %v4173_v37  ;;  %v3991_v42 = vsel %vm3981_vm6, %v3977_v23, 1326507024 }
 0x9c7   : > { %7995 = vmatpush1.bf16.msra.mxu0 %v10830_v45  ;;  %v15701_v15 = vshrl.u32 %v15614_v31, %v18130_v33  ;;  %v15716_v31 = vsel %vm4186_vm2, %v15649_v39, %v15658_v59  ;;  %v4199_v54 = vsel %vm4189_vm1, %v4185_v20, 1326507024  ;;  %vm3979_vm12 = vcmp.lt.s32.totalorder %v15661_v36, 2  ;;  %v10836_v45 = vld [vmem:[#allocation26 + $0xd0] ss:$8 sps:$4 sm:$0xff]  }
 0x9c8   : > { %7996 = vmatprep.subr.bf16.mxu0 %v10835_v62  ;;  %v15724_v62 = vsel %vm4187_vm11, %v4194_v41, %v4196_v1  ;;  %v3986_v37 = vsel %vm3978_vm8, %v15686_v21, %v15688_v12  ;;  %v3988_v32 = vsel %vm3980_vm9, %v15693_v53, %v3987_v55  ;;  %v3990_v57 = vsel %vm3978_vm8, %v15688_v12, %v15693_v53  ;;  %v10841_v33 = vld [vmem:[#allocation26 + $0xe4] ss:$8 sps:$4 sm:$0xff]   ;;  %v15769_v4 = vpop.permute.xlu1 %3247 }
 0x9c9   : > { %v4076_v2 = vshll.u32 %v18061_v25, %v4064_v16  ;;  %v4077_v20 = vshrl.u32 %v17980_v38, %v15696_v40  ;;  %v3992_v49 = vsel %vm3980_vm9, %v3974_v50, %v3991_v42  ;;  %v15746_v41 = vshrl.u32 %v4062_v56, 5  ;;  %18132 = vst [vmem:[#allocation78_spill] sm:$0xff] %v15769_v4 }
 0x9ca   : > { %v4372_v1 = vadd.s32 1, %v9458_v14  ;;  %v4067_v55 = vshll.u32 %v17986_v52, %v4064_v16  ;;  %v4070_v30 = vshll.u32 %v18000_v5, %v4064_v16  ;;  %v4079_v3 = vshll.u32 %v17980_v38, %v4064_v16 }
 0x9cb   : > { %7997 = vmatpush1.bf16.msra.mxu0 %v10833_v63  ;;  %v4080_v63 = vshrl.u32 %v18060_v29, %v15696_v40  ;;  %v4068_v19 = vshrl.u32 %v18000_v5, %v15696_v40  ;;  %v4071_v50 = vshrl.u32 %v17978_v46, %v15696_v40  ;;  %v4073_v56 = vshll.u32 %v17978_v46, %v4064_v16 }
 0x9cc   : > { %7998 = vmatprep.subr.bf16.mxu0 %v10838_v28  ;;  %v4074_v14 = vshrl.u32 %v18061_v25, %v15696_v40  ;;  %v4200_v28 = vsel %vm4188_vm7, %v15651_v6, %v4199_v54  ;;  %v15765_v42 = vmul.u32.u64.low %v15623_v22, %v15724_v62  ;;  %v15766_v23 = vmul.u32.u64.high %v15623_v22, %v15724_v62, %v15765_v42  ;;  %v10844_v6 = vld [vmem:[#allocation26 + $0xf4] ss:$8 sps:$4 sm:$0xff]  }
 0x9cd   : > { %v4078_v27 = vor.u32 %v4077_v20, %v4076_v2  ;;  %v3962_v16 = vshrl.u32 %v17986_v52, %v15632_v18  ;;  %v18133_v47 = vand.u32 2147483647, %v15514_v43  ;;  %vm4085_vm14 = vcmp.lt.s32.totalorder %v15746_v41, 4 }
 0x9ce   : > { %vm4373_vm15 = vcmp.gt.s32.totalorder %v4372_v1, 0  ;;  %v3989_v62 = vsel %vm3979_vm12, %v3986_v37, %v3988_v32  ;;  %v3993_v54 = vsel %vm3979_vm12, %v3990_v57, %v3992_v49  ;;  %v4081_v2 = vor.u32 %v4080_v63, %v4079_v3  ;;  %v10842_v57 = vld [vmem:[#allocation26 + $0xf0] ss:$8 sps:$4 sm:$0xff]  }
 0x9cf   : > { %7999 = vmatpush1.bf16.msra.mxu0 %v10836_v45  ;;  %v4057_v8 = vand.u32 8388607, %v18133_v47  ;;  %v3193_v20 = vmul.f32 %v15550_v61, %v15467_v24  ;;  %v4069_v45 = vor.u32 %v4068_v19, %v4067_v55  ;;  %v4072_v18 = vor.u32 %v4071_v50, %v4070_v30 }
 0x9d0   : > { %8000 = vmatprep.subr.bf16.mxu0 %v10841_v33  ;;  %v4075_v4 = vor.u32 %v4074_v14, %v4073_v56  ;;  %vm4082_vm13 = vcmp.lt.s32.totalorder %v15746_v41, 1  ;;  %vm4084_vm3 = vcmp.lt.s32.totalorder %v15746_v41, 3  ;;  %v4091_v47 = vsel %vm4085_vm14, %v4078_v27, 920167782 }
 0x9d1   : > { %v3278_v37 = vmul.f32 %v15562_v44, %v15506_v17  ;;  %v4374_v32 = vsel %vm4373_vm15, %v4372_v1, 0  ;;  %v3983_v24 = vsel %vm3981_vm6, %v15693_v53, 2102212464  ;;  %v4058_v19 = vor.u32 8388608, %v4057_v8 }
 0x9d2   : > { %v15792_v3 = vmul.u32.u64.low %v15634_v35, %v3989_v62  ;;  %v15793_v61 = vmul.u32.u64.high %v15634_v35, %v3989_v62, %v15792_v3  ;;  %v15797_v30 = vmul.u32.u64.low %v15634_v35, %v3993_v54  ;;  %v15798_v49 = vmul.u32.u64.high %v15634_v35, %v3993_v54, %v15797_v30 }
 0x9d3   : > { %8001 = vmatpush1.bf16.msra.mxu0 %v10839_v26  ;;  %v4066_v17 = vshrl.u32 %v17986_v52, %v15696_v40  ;;  %v4095_v44 = vsel %vm4085_vm14, %v4081_v2, 1326507024  ;;  %v3337_v26 = vpop.permute.xlu1 %3336  ;;  %vm4083_vm10 = vcmp.lt.s32.totalorder %v15746_v41, 2  ;;  %v4090_v53 = vsel %vm4082_vm13, %v4069_v45, %v4072_v18 }
 0x9d4   : > { %8002 = vmatprep.subr.bf16.mxu0 %v10844_v6  ;;  %v4092_v8 = vsel %vm4084_vm3, %v4075_v4, %v4091_v47  ;;  %v4376_v1 = vand.u32 31, %v4374_v32  ;;  %v4191_v33 = vsel %vm4189_vm1, %v15658_v59, 2102212464  ;;  %v4201_v40 = vsel %vm4187_vm11, %v15716_v31, %v4200_v28  ;;  %v15823_v6 = vld [vmem:[#allocation7 + $0x2] ss:$0 sm:$0xff] }
 0x9d5   : > { %v4087_v55 = vsel %vm4085_vm14, %v4075_v4, 2102212464  ;;  %v3294_v63 = vadd.f32 %v3278_v37, %v3193_v20  ;;  %v4094_v50 = vsel %vm4082_vm13, %v4072_v18, %v4075_v4  ;;  %v4096_v56 = vsel %vm4084_vm3, %v4078_v27, %v4095_v44  ;;  %18134 = vst [vmem:[#allocation79_spill] sm:$0xff] %v15823_v6 }
 0x9d6   : > { %v15821_v14 = vshll.u32 %v4058_v19, 8  ;;  %v3379_v59 = vmul.f32 %v15823_v6, %v3337_v26  ;;  %v3982_v31 = vsel %vm3978_vm8, %v3962_v16, %v15686_v21  ;;  %v3984_v28 = vsel %vm3980_vm9, %v15688_v12, %v3983_v24  ;;  %v7304_v19 = vpop.f32.mrb[24].mxu1 }
 0x9d7   : > { %8003 = vmatpush1.bf16.msra.mxu0 %v10842_v57  ;;  %v4093_v4 = vsel %vm4083_vm10, %v4090_v53, %v4092_v8  ;;  %v17861_v62 = vand.u32 2147483647, %v15639_v9  ;;  %v4086_v54 = vsel %vm4082_vm13, %v4066_v17, %v4069_v45  ;;  %v4088_v2 = vsel %vm4084_vm3, %v4072_v18, %v4087_v55  ;;  %v7306_v53 = vpop.f32.mrb[25].mxu1 }
 0x9d8   : > { %v15840_v20 = vsub.s32 32, %v4376_v1  ;;  %v4192_v21 = vsel %vm4188_vm7, %v15649_v39, %v4191_v33  ;;  %v15846_v12 = vmul.u32.u64.low %v15623_v22, %v4201_v40  ;;  %v15847_v16 = vmul.u32.u64.high %v15623_v22, %v4201_v40, %v15846_v12  ;;  %v7308_v55 = vpop.f32.mrb[26].mxu1 }
 0x9d9   : > { %v4097_v47 = vsel %vm4083_vm10, %v4094_v50, %v4096_v56  ;;  %v15853_v37 = vsel %vm3979_vm12, %v3982_v31, %v3984_v28  ;;  %v15856_v45 = vmul.u32.u64.low %v15821_v14, %v4093_v4  ;;  %v15857_v18 = vmul.u32.u64.high %v15821_v14, %v4093_v4, %v15856_v45 }
 0x9da   : > { %v3395_v57 = vadd.f32 %v3379_v59, %v3294_v63  ;;  %vm4003_vm5 = vc.u32 %v15798_v49, %v15792_v3  ;;  %v4004_v39 = vadd.s32 1, %v15793_v61  ;;  %v15865_v24 = vsel %vm4083_vm10, %v4086_v54, %v4088_v2 }
 0x9db   : > { %v15869_v36 = vand.u32 8388607, %v17861_v62  ;;  %v15872_v30 = vmul.u32.u64.low %v15821_v14, %v4097_v47  ;;  %v15873_v17 = vmul.u32.u64.high %v15821_v14, %v4097_v47, %v15872_v30  ;;  %v4389_v44 = vshrl.u32 %v17980_v38, %v15840_v20 }
 0x9dc   : > { %v7305_v26 = vadd.f32 %v7304_v19, %v15044_v34  ;;  %v15878_v8 = vshrl.u32 %v4374_v32, 5  ;;  %v4379_v41 = vshll.u32 %v17986_v52, %v4376_v1  ;;  %v4392_v33 = vshrl.u32 %v18060_v29, %v15840_v20  ;;  %v7310_v32 = vpop.f32.mrb[27].mxu1 }
 0x9dd   : > { %v7307_v40 = vadd.f32 %v7306_v53, %v15047_v60  ;;  %v4380_v63 = vshrl.u32 %v18000_v5, %v15840_v20  ;;  %v4388_v50 = vshll.u32 %v18061_v25, %v4376_v1  ;;  %v15888_v56 = vadd.f32 %v15636_v11, %v3395_v57 }
 0x9de   : > { %v7309_v59 = vadd.f32 %v7308_v55, %v15044_v34  ;;  %v4383_v31 = vshrl.u32 %v17978_v46, %v15840_v20  ;;  %v4386_v28 = vshrl.u32 %v18061_v25, %v15840_v20  ;;  %v4391_v4 = vshll.u32 %v17980_v38, %v4376_v1 }
 0x9df   : > { %18135 = vst [vmem:[#allocation80_spill] sm:$0xff] %v15888_v56  ;;  %v7311_v54 = vadd.f32 %v7310_v32, %v15047_v60  ;;  %v4382_v2 = vshll.u32 %v18000_v5, %v4376_v1  ;;  %v4390_v12 = vor.u32 %v4389_v44, %v4388_v50  ;;  %v7379_v47 = vmax.f32 %v7305_v26, 0.0 }
 0x9e0   : > { %v7381_v19 = vmax.f32 %v7309_v59, 0.0  ;;  %v4385_v11 = vshll.u32 %v17978_v46, %v4376_v1  ;;  %v4393_v57 = vor.u32 %v4392_v33, %v4391_v4  ;;  %v7380_v30 = vmax.f32 %v7307_v40, 0.0  ;;  %v18140_v4 = vld [vmem:[#allocation74_spill] sm:$0xff] }
 0x9e1   : > { %v7382_v53 = vmax.f32 %v7311_v54, 0.0  ;;  %v4108_v55 = vadd.s32 1, %v15857_v18  ;;  %v15900_v62 = vor.u32 %v4380_v63, %v4379_v41  ;;  %v4261_v27 = vand.u32 2139095040, %v15888_v56 }
 0x9e2   : > { %v7399_v6 = vpack.c.bf16 %v7381_v19, %v7379_v47  ;;  %v15903_v9 = vor.u32 %v4383_v31, %v4382_v2  ;;  %v4387_v32 = vor.u32 %v4386_v28, %v4385_v11  ;;  %vm4397_vm4 = vcmp.lt.s32.totalorder %v15878_v8, 4  ;;  %v18142_v47 = vld [vmem:[#allocation72_spill] sm:$0xff]  ;;  %v18144_v11 = vld [vmem:[#allocation71_spill] sm:$0xff] }
 0x9e3   : > { %v7400_v44 = vpack.c.bf16 %v7382_v53, %v7380_v30  ;;  %v4193_v1 = vsel %vm4187_vm11, %v15710_v7, %v4192_v21  ;;  %v4212_v26 = vadd.s32 1, %v15766_v23  ;;  %vm4107_vm0 = vc.u32 %v15873_v17, %v15856_v45  ;;  %v18143_v19 = vld [vmem:[#allocation60_spill] sm:$0xff]  ;;  %v18146_v30 = vld [vmem:[#allocation75_spill] sm:$0xff] }
 0x9e4   : > { %v4403_v41 = vsel %vm4397_vm4, %v4390_v12, 920167782  ;;  %vm4211_vm1 = vc.u32 %v15847_v16, %v15765_v42  ;;  %v4001_v33 = vmul.u32 %v15634_v35, %v15853_v37  ;;  %v4005_v48 = vsel %vm4003_vm5, %v4004_v39, %v15793_v61 }
 0x9e5   : > { %v4407_v7 = vsel %vm4397_vm4, %v4393_v57, 1326507024  ;;  %7699 = vmatprep.mubr.bf16.mxu0 %v7400_v44  ;;  %v4105_v21 = vmul.u32 %v15821_v14, %v15865_v24  ;;  %vm4394_vm2 = vcmp.lt.s32.totalorder %v15878_v8, 1  ;;  %vm4396_vm11 = vcmp.lt.s32.totalorder %v15878_v8, 3 }
 0x9e6   : > { %v4262_v40 = vshrl.u32 %v4261_v27, 23  ;;  %7700 = vmatmul.mubr.bf16.gmra.mrb[120].mxu0 %v7399_v6  ;;  %v4109_v35 = vsel %vm4107_vm0, %v4108_v55, %v15857_v18  ;;  %v4370_v37 = vor.u32 8388608, %v15869_v36  ;;  %v4402_v61 = vsel %vm4394_vm2, %v15900_v62, %v15903_v9 }
 0x9e7   : > { %v4404_v39 = vsel %vm4396_vm11, %v4387_v32, %v4403_v41  ;;  %v3504_v14 = vshll.u32 %v15608_v58, 23  ;;  %v18136_v24 = vshll.u32 %v15706_v10, 30  ;;  %v4406_v6 = vsel %vm4394_vm2, %v15903_v9, %v4387_v32 }
 0x9e8   : > { %v4408_v27 = vsel %vm4396_vm11, %v4390_v12, %v4407_v7  ;;  %v18137_v18 = vshll.u32 %v15388_v51, %v15548_v0  ;;  %v4213_v58 = vsel %vm4211_vm1, %v4212_v26, %v15766_v23  ;;  %v15955_v50 = vadd.s32 %v4005_v48, %v4001_v33  ;;  %v18138_v51 = vld [vmem:[#allocation73_spill] sm:$0xff] }
 0x9e9   : > { %v15940_v63 = vsub.s32 %v15621_v13, %v18136_v24  ;;  %vm4395_vm6 = vcmp.lt.s32.totalorder %v15878_v8, 2  ;;  %v4209_v13 = vmul.u32 %v15623_v22, %v4193_v1  ;;  %v15959_v59 = vadd.s32 %v4109_v35, %v4105_v21  ;;  %v18147_v35 = vld [vmem:[#allocation68_spill] sm:$0xff] }
 0x9ea   : > { %v3813_v36 = vor.u32 %v15701_v15, %v18137_v18  ;;  %v4405_v31 = vsel %vm4395_vm6, %v4402_v61, %v4404_v39  ;;  %v9454_v28 = vadd.s32 4294967169, %v4262_v40  ;;  %v18139_v0 = vshll.u32 %v18138_v51, 23  ;;  %v18149_v61 = vld [vmem:[#allocation70_spill] sm:$0xff] }
 0x9eb   : > { %v18141_v54 = vsub.s32 0, %v18140_v4  ;;  %v4409_v23 = vsel %vm4395_vm6, %v4406_v6, %v4408_v27  ;;  %v15970_v12 = vshll.u32 %v4370_v37, 8  ;;  %v3608_v22 = vshll.u32 %v18142_v47, 23  ;;  %v18150_v27 = vld [vmem:[#allocation54_spill] sm:$0xff]  ;;  %v18151_v47 = vld [vmem:[#allocation63_spill] sm:$0xff] }
 0x9ec   : > { %v3817_v15 = vor.u32 4788187, %v18139_v0  ;;  %v18145_v57 = vshll.u32 %v18143_v19, %v18144_v11  ;;  %v3700_v55 = vsub.s32 0, %v15940_v63  ;;  %v4214_v44 = vadd.s32 %v4213_v58, %v4209_v13 }
 0x9ed   : > { %v9439_v2 = vmin.u32 %v18141_v54, %v18140_v4  ;;  %v3505_v1 = vor.u32 4788187, %v3504_v14  ;;  %v4007_v26 = vadd.s32 536870912, %v15955_v50  ;;  %v4111_v48 = vadd.s32 536870912, %v15959_v59 }
 0x9ee   : > { %v3501_v53 = vor.u32 %v18146_v30, %v18145_v57  ;;  %v15980_v41 = vmul.u32.u64.low %v15970_v12, %v4405_v31  ;;  %v15981_v33 = vmul.u32.u64.high %v15970_v12, %v4405_v31, %v15980_v41  ;;  %v4268_v40 = vadd.s32 1, %v9454_v28 }
 0x9ef   : > { %v15986_v7 = vmul.u32.u64.low %v15970_v12, %v4409_v23  ;;  %v15987_v21 = vmul.u32.u64.high %v15970_v12, %v4409_v23, %v15986_v7  ;;  %v18148_v37 = vsub.s32 32, %v18147_v35  ;;  %v3818_v24 = vand.u32 2147483647, %v3817_v15 }
 0x9f0   : > { %v3820_v14 = vcvt.s32.f32 %v3813_v36  ;;  %v3910_v6 = vclz %v9439_v2  ;;  %v3603_v18 = vshll.u32 %v18150_v27, %v18147_v35  ;;  %v9431_v58 = vmin.u32 %v3700_v55, %v15940_v63 }
 0x9f1   : > { %v3604_v39 = vshrl.u32 %v18149_v61, %v18148_v37  ;;  %v4215_v13 = vadd.s32 536870912, %v4214_v44  ;;  %v3609_v31 = vor.u32 4788187, %v3608_v22  ;;  %v3506_v51 = vand.u32 2147483647, %v3505_v1 }
 0x9f2   : > { %v3508_v0 = vcvt.s32.f32 %v3501_v53  ;;  %v4399_v54 = vsel %vm4397_vm4, %v4387_v32, 2102212464  ;;  %v15997_v28 = vshrl.u32 %v4007_v26, 30  ;;  %v15999_v23 = vshrl.u32 %v4111_v48, 30  ;;  %v18153_v26 = vld [vmem:[#allocation58_spill] sm:$0xff] }
 0x9f3   : > { %v4378_v36 = vshrl.u32 %v17986_v52, %v15840_v20  ;;  %vm4269_vm7 = vcmp.gt.s32.totalorder %v4268_v40, 0  ;;  %v3605_v15 = vor.u32 %v3604_v39, %v3603_v18  ;;  %v3821_v2 = vmul.f32 %v3820_v14, %v3818_v24  ;;  %v18154_v14 = vld [vmem:[#allocation53_spill] sm:$0xff] }
 0x9f4   : > { %v3824_v19 = vsub.s32 4, %v18151_v47  ;;  %v9440_v11 = vadd.s32 4294967294, %v3910_v6  ;;  %v3702_v57 = vclz %v9431_v58  ;;  %v16004_v22 = vshrl.u32 %v4215_v13, 30 }
 0x9f5   : > { %v4398_v32 = vsel %vm4394_vm2, %v4378_v36, %v15900_v62  ;;  %v4400_v30 = vsel %vm4396_vm11, %v15903_v9, %v4399_v54  ;;  %v3610_v53 = vand.u32 2147483647, %v3609_v31  ;;  %v3509_v55 = vmul.f32 %v3508_v0, %v3506_v51 }
 0x9f6   : > { %18152 = vst [vmem:[#allocation73_spill] sm:$0xff] %v16004_v22  ;;  %v4420_v20 = vadd.s32 1, %v15981_v33  ;;  %v4270_v1 = vsel %vm4269_vm7, %v4268_v40, 0  ;;  %vm3740_vm8 = vcmp.lt.s32.totalorder %v18153_v26, 0  ;;  %v4009_v48 = vshll.u32 %v15997_v28, 30 }
 0x9f7   : > { %v4113_v7 = vshll.u32 %v15999_v23, 30  ;;  %vm4419_vm9 = vc.u32 %v15987_v21, %v15980_v41  ;;  %v3612_v35 = vcvt.s32.f32 %v3605_v15  ;;  %v3822_v62 = vxor.u32 2147483648, %v3821_v2 }
 0x9f8   : > { %v3825_v9 = vsel %vm3740_vm8, %v3824_v19, %v18151_v47  ;;  %v4401_v37 = vsel %vm4395_vm6, %v4398_v32, %v4400_v30  ;;  %vm9441_vm12 = vcmp.lt.s32.totalorder %v9440_v11, 0  ;;  %v9432_v40 = vadd.s32 4294967294, %v3702_v57  ;;  %v18159_v47 = vld [vmem:[#allocation50_spill] sm:$0xff] }
 0x9f9   : > { %v4217_v61 = vshll.u32 %v16004_v22, 30  ;;  %v4272_v39 = vand.u32 31, %v4270_v1  ;;  %v16024_v24 = vmul.f32 %v3612_v35, %v3610_v53  ;;  %vm3428_vm14 = vcmp.lt.s32.totalorder %v18154_v14, 0 }
 0x9fa   : > { %v3510_v6 = vxor.u32 2147483648, %v3509_v55  ;;  %v4421_v27 = vsel %vm4419_vm9, %v4420_v20, %v15981_v33  ;;  %v18155_v18 = vand.u32 2147483647, %v18153_v26  ;;  %v16035_v8 = vsub.s32 %v15955_v50, %v4009_v48 }
 0x9fb   : > { %v16038_v13 = vsub.s32 %v15959_v59, %v4113_v7  ;;  %v4417_v31 = vmul.u32 %v15970_v12, %v4401_v37  ;;  %v3823_v51 = vsel %vm3740_vm8, %v3822_v62, %v3821_v2  ;;  %v16045_v0 = vsel %vm9441_vm12, 0, %v9440_v11  ;;  %v18158_v2 = vld [vmem:[#allocation55_spill] sm:$0xff] }
 0x9fc   : > { %vm16030_vm15 = vcmp.le.f32.partialorder %v18155_v18, 0.7853982  ;;  %vm9433_vm13 = vcmp.lt.s32.totalorder %v9432_v40, 0  ;;  %v16047_v54 = vsub.s32 %v4214_v44, %v4217_v61  ;;  %v16051_v50 = vsub.s32 32, %v4272_v39 }
 0x9fd   : > { %v3827_v33 = vsel %vm16030_vm15, 0, %v3825_v9  ;;  %v16049_v36 = vadd.s32 %v4421_v27, %v4417_v31  ;;  %v16056_v12 = vsel %vm3428_vm14, %v3510_v6, %v3509_v55  ;;  %v3898_v19 = vadd.s32 %v18159_v47, %v18158_v2 }
 0x9fe   : > { %v16058_v15 = vadd.s32 3, %v3827_v33  ;;  %v4012_v11 = vsub.s32 0, %v16035_v8  ;;  %v4116_v44 = vsub.s32 0, %v16038_v13  ;;  %v16067_v57 = vsel %vm16030_vm15, %v18153_v26, %v3823_v51 }
 0x9ff   : > { %v3914_v32 = vsub.s32 32, %v16045_v0  ;;  %v3918_v30 = vsub.s32 4294967266, %v16045_v0  ;;  %v16071_v53 = vsel %vm9433_vm13, 0, %v9432_v40  ;;  %v4220_v55 = vsub.s32 0, %v16047_v54 }
 0xa00   : > { %v4423_v20 = vadd.s32 536870912, %v16049_v36  ;;  %v4284_v48 = vshll.u32 %v18061_v25, %v4272_v39  ;;  %v4285_v7 = vshrl.u32 %v17980_v38, %v16051_v50  ;;  %v17871_v35 = vand.u32 2147483647, %v15888_v56 }
 0xa01   : > { %v16079_v62 = vshrl.u32 %v4270_v1, 5  ;;  %v4287_v9 = vshll.u32 %v17980_v38, %v4272_v39  ;;  %v4288_v37 = vshrl.u32 %v18060_v29, %v16051_v50  ;;  %v9443_v40 = vmin.u32 %v4012_v11, %v16035_v8 }
 0xa02   : > { %v9447_v61 = vmin.u32 %v4116_v44, %v16038_v13  ;;  %v4275_v6 = vshll.u32 %v17986_v52, %v4272_v39  ;;  %v4278_v27 = vshll.u32 %v18000_v5, %v4272_v39  ;;  %v4276_v18 = vshrl.u32 %v18000_v5, %v16051_v50 }
 0xa03   : > { %v4279_v1 = vshrl.u32 %v17978_v46, %v16051_v50  ;;  %v4281_v58 = vshll.u32 %v17978_v46, %v4272_v39  ;;  %v4282_v31 = vshrl.u32 %v18061_v25, %v16051_v50  ;;  %10967 = vcosq.f32 %v16067_v57 }
 0xa04   : > { %v16098_v33 = vshrl.u32 %v4423_v20, 30  ;;  %v4286_v2 = vor.u32 %v4285_v7, %v4284_v48  ;;  %v3919_v47 = vadd.s32 127, %v3918_v30  ;;  %v4265_v11 = vand.u32 8388607, %v17871_v35 }
 0xa05   : > { %v4289_v44 = vor.u32 %v4288_v37, %v4287_v9  ;;  %vm4293_vm3 = vcmp.lt.s32.totalorder %v16079_v62, 4  ;;  %v16103_v59 = vshrl.u32 %v3898_v19, %v3914_v32  ;;  %v3710_v39 = vsub.s32 4294967266, %v16071_v53  ;;  %v18164_v9 = vld [vmem:[#allocation67_spill] sm:$0xff]  ;;  %v18165_v37 = vld [vmem:[#allocation66_spill] sm:$0xff] }
 0xa06   : > { %18160 = vst [vmem:[#allocation74_spill] sm:$0xff] %v16098_v33  ;;  %v9451_v22 = vmin.u32 %v4220_v55, %v16047_v54  ;;  %v4014_v29 = vclz %v9443_v40  ;;  %v4118_v38 = vclz %v9447_v61  ;;  %v16107_v25 = vor.u32 %v4276_v18, %v4275_v6 }
 0xa07   : > { %v16109_v20 = vor.u32 %v4279_v1, %v4278_v27  ;;  %v4283_v48 = vor.u32 %v4282_v31, %v4281_v58  ;;  %v4425_v30 = vshll.u32 %v16098_v33, 30  ;;  %vm4290_vm10 = vcmp.lt.s32.totalorder %v16079_v62, 1  ;;  %v18166_v31 = vld [vmem:[#allocation62_spill] sm:$0xff] }
 0xa08   : > { %vm4292_vm5 = vcmp.lt.s32.totalorder %v16079_v62, 3  ;;  %v4299_v19 = vsel %vm4293_vm3, %v4286_v2, 920167782  ;;  %v18161_v32 = vand.u32 2147483647, %v18154_v14  ;;  %v3920_v7 = vshll.u32 %v3919_v47, 23 }
 0xa09   : > { %v3690_v40 = vadd.s32 %v18165_v37, %v18164_v9  ;;  %v4266_v61 = vor.u32 8388608, %v4265_v11  ;;  %v4303_v6 = vsel %vm4293_vm3, %v4289_v44, 1326507024  ;;  %v3706_v27 = vsub.s32 32, %v16071_v53 }
 0xa0a   : > { %vm16118_vm4 = vcmp.le.f32.partialorder %v18161_v32, 0.7853982  ;;  %v3711_v18 = vadd.s32 127, %v3710_v39  ;;  %v4222_v1 = vclz %v9451_v22  ;;  %v9444_v58 = vadd.s32 4294967294, %v4014_v29  ;;  %v7314_v32 = vpop.f32.mrb[28].mxu1 }
 0xa0b   : > { %vm3532_vm0 = vcmp.lt.s32.totalorder %v18166_v31, 0  ;;  %v9448_v35 = vadd.s32 4294967294, %v4118_v38  ;;  %vm4291_vm1 = vcmp.lt.s32.totalorder %v16079_v62, 2  ;;  %v4298_v47 = vsel %vm4290_vm10, %v16107_v25, %v16109_v20  ;;  %v7316_v39 = vpop.f32.mrb[29].mxu1 }
 0xa0c   : > { %v4300_v11 = vsel %vm4292_vm5, %v4283_v48, %v4299_v19  ;;  %v16136_v44 = vsub.s32 %v16049_v36, %v4425_v30  ;;  %v4302_v29 = vsel %vm4290_vm10, %v16109_v20, %v4283_v48  ;;  %v4304_v38 = vsel %vm4292_vm5, %v4286_v2, %v4303_v6  ;;  %v7318_v30 = vpop.f32.mrb[30].mxu1 }
 0xa0d   : > { %v7315_v22 = vadd.f32 %v7314_v32, %v15044_v34  ;;  %v16144_v9 = vor.u32 4788187, %v3920_v7  ;;  %v3707_v37 = vshll.u32 %v15940_v63, %v16071_v53  ;;  %v16148_v19 = vshll.u32 %v4266_v61, 8  ;;  %v16151_v51 = vpop.eup %10967  ;;  %v7320_v32 = vpop.f32.mrb[31].mxu1 }
 0xa0e   : > { %v7317_v36 = vadd.f32 %v7316_v39, %v15047_v60  ;;  %v3708_v33 = vshrl.u32 %v3690_v40, %v3706_v27  ;;  %v3712_v56 = vshll.u32 %v3711_v18, 23  ;;  %v4301_v2 = vsel %vm4291_vm1, %v4298_v47, %v4300_v11 }
 0xa0f   : > { %v7319_v6 = vadd.f32 %v7318_v30, %v15044_v34  ;;  %v9452_v7 = vadd.s32 4294967294, %v4222_v1  ;;  %vm9445_vm2 = vcmp.lt.s32.totalorder %v9444_v58, 0  ;;  %v4305_v63 = vsel %vm4291_vm1, %v4302_v29, %v4304_v38 }
 0xa10   : > { %v7321_v53 = vadd.f32 %v7320_v32, %v15047_v60  ;;  %vm9449_vm11 = vcmp.lt.s32.totalorder %v9448_v35, 0  ;;  %v4428_v61 = vsub.s32 0, %v16136_v44  ;;  %v7383_v39 = vmax.f32 %v7315_v22, 0.0 }
 0xa11   : > { %v7385_v46 = vmax.f32 %v7319_v6, 0.0  ;;  %v16161_v40 = vmul.u32.u64.low %v16148_v19, %v4301_v2  ;;  %v16162_v27 = vmul.u32.u64.high %v16148_v19, %v4301_v2, %v16161_v40  ;;  %v7384_v18 = vmax.f32 %v7317_v36, 0.0  ;;  %v18169_v6 = vld [vmem:[#allocation48_spill] sm:$0xff] }
 0xa12   : > { %v7386_v34 = vmax.f32 %v7321_v53, 0.0  ;;  %v4274_v1 = vshrl.u32 %v17986_v52, %v16051_v50  ;;  %v16168_v47 = vmul.u32.u64.low %v16148_v19, %v4305_v63  ;;  %v16169_v11 = vmul.u32.u64.high %v16148_v19, %v4305_v63, %v16168_v47 }
 0xa13   : > { %v7401_v60 = vpack.c.bf16 %v7385_v46, %v7383_v39  ;;  %vm9453_vm6 = vcmp.lt.s32.totalorder %v9452_v7, 0  ;;  %v16171_v29 = vsel %vm9445_vm2, 0, %v9444_v58  ;;  %v4295_v38 = vsel %vm4293_vm3, %v4283_v48, 2102212464  ;;  %v7435_v48 = vld [vmem:[%s17712_s19] sm:$0x3] }
 0xa14   : > { %v7402_v22 = vpack.c.bf16 %v7386_v34, %v7384_v18  ;;  %v18167_v30 = vxor.u32 2147483648, %v16024_v24  ;;  %v16186_v50 = vsel %vm16118_vm4, %v18154_v14, %v16056_v12  ;;  %v16189_v46 = vand.u32 3, %v16058_v15 }
 0xa15   : > { %v16191_v58 = vor.u32 %v3708_v33, %v3707_v37  ;;  %10969 = vsinq.f32 %v16067_v57  ;;  %v16204_v12 = vsel %vm9449_vm11, 0, %v9448_v35  ;;  %v9459_v15 = vmin.u32 %v4428_v61, %v16136_v44  ;;  %v18172_v61 = vld [vmem:[#allocation51_spill] sm:$0xff] }
 0xa16   : > { %v16180_v36 = vsel %vm3532_vm0, %v18167_v30, %v16024_v24  ;;  %v18168_v24 = vshll.u32 %v18140_v4, %v16045_v0  ;;  %7709 = vmatprep.mubr.bf16.mxu0 %v7402_v22  ;;  %v16207_v33 = vsel %vm9453_vm6, 0, %v9452_v7  ;;  %v4022_v37 = vsub.s32 4294967266, %v16171_v29  ;;  %v18171_v7 = vld [vmem:[#allocation64_spill] sm:$0xff] }
 0xa17   : > { %v4294_v57 = vsel %vm4290_vm10, %v4274_v1, %v16107_v25  ;;  %v4296_v4 = vsel %vm4292_vm5, %v16109_v20, %v4295_v38  ;;  %7710 = vmatmul.mubr.bf16.gmra.mrb[124].mxu0 %v7401_v60  ;;  %v3713_v35 = vor.u32 4788187, %v3712_v56  ;;  %v16219_v32 = vrot.slane %v7435_v48, %v18169_v6  ;;  %v7641_v38 = vpop.f32.mrb[96].mxu0 }
 0xa18   : > { %v16201_v2 = vor.u32 %v16103_v59, %v18168_v24  ;;  %vm3636_vm7 = vcmp.lt.s32.totalorder %v18171_v7, 0  ;;  %v3716_v63 = vcvt.s32.f32 %v16191_v58  ;;  %v3720_v53 = vsub.s32 4, %v15706_v10 }
 0xa19   : > { %18170 = vst [vmem:[#allocation72_spill] sm:$0xff] %v16219_v32  ;;  %v4126_v25 = vsub.s32 4294967266, %v16204_v12  ;;  %v16226_v39 = vrot.slane %v7435_v48, %v18172_v61  ;;  %v4230_v20 = vsub.s32 4294967266, %v16207_v33  ;;  %v4430_v18 = vclz %v9459_v15  ;;  %v7643_v48 = vpop.f32.mrb[97].mxu0 }
 0xa1a   : > { %v4297_v56 = vsel %vm4291_vm1, %v4294_v57, %v4296_v4  ;;  %v4316_v34 = vadd.s32 1, %v16162_v27  ;;  %v4002_v1 = vadd.s32 %v15792_v3, %v15798_v49  ;;  %v4018_v47 = vsub.s32 32, %v16171_v29 }
 0xa1b   : > { %v4023_v60 = vadd.s32 127, %v4022_v37  ;;  %vm4315_vm8 = vc.u32 %v16169_v11, %v16161_v40  ;;  %v3714_v22 = vand.u32 2147483647, %v3713_v35  ;;  %v4106_v30 = vadd.s32 %v15856_v45, %v15873_v17  ;;  %v7645_v37 = vpop.f32.mrb[98].mxu0 }
 0xa1c   : > { %v4122_v58 = vsub.s32 32, %v16204_v12  ;;  %v7642_v62 = vadd.f32 %v7641_v38, %v16219_v32  ;;  %vm3834_vm9 = vcmp.eq.s32.totalorder %v16189_v46, 0  ;;  %vm3837_vm12 = vcmp.eq.s32.totalorder %v16189_v46, 2 }
 0xa1d   : > { %v18173_v3 = vand.u32 2147483647, %v18171_v7  ;;  %v4226_v24 = vsub.s32 32, %v16207_v33  ;;  %v4127_v15 = vadd.s32 127, %v4126_v25  ;;  %v4313_v45 = vmul.u32 %v16148_v19, %v4297_v56 }
 0xa1e   : > { %v7644_v17 = vadd.f32 %v7643_v48, %v16226_v39  ;;  %v4231_v57 = vadd.s32 127, %v4230_v20  ;;  %v9460_v4 = vadd.s32 4294967294, %v4430_v18  ;;  %v4317_v35 = vsel %vm4315_vm8, %v4316_v34, %v16162_v27 }
 0xa1f   : > { %vm16245_vm15 = vcmp.le.f32.partialorder %v18173_v3, 0.7853982  ;;  %v7646_v38 = vadd.f32 %v7645_v37, %v16219_v32  ;;  %v7647_v3 = vpop.f32.mrb[99].mxu0  ;;  %v4019_v0 = vshll.u32 %v16035_v8, %v16171_v29  ;;  %v4020_v59 = vshrl.u32 %v4002_v1, %v4018_v47  ;;  %v10970_v56 = vpop.eup %10969 }
 0xa20   : > { %v4024_v25 = vshll.u32 %v4023_v60, 23  ;;  %v7648_v19 = vadd.f32 %v7647_v3, %v16226_v39  ;;  %v4123_v20 = vshll.u32 %v16038_v13, %v16204_v12  ;;  %v4124_v18 = vshrl.u32 %v4106_v30, %v4122_v58 }
 0xa21   : > { %v7720_v48 = vmax.f32 %v7642_v62, 0.0  ;;  %v7722_v61 = vmax.f32 %v7646_v38, 0.0  ;;  %v4128_v6 = vshll.u32 %v4127_v15, 23  ;;  %v16262_v5 = vadd.s32 %v4317_v35, %v4313_v45  ;;  %v18176_v45 = vld [vmem:[#allocation49_spill] sm:$0xff] }
 0xa22   : > { %v7721_v27 = vmax.f32 %v7644_v17, 0.0  ;;  %v7723_v34 = vmax.f32 %v7648_v19, 0.0  ;;  %v3721_v8 = vsel %vm3636_vm7, %v3720_v53, %v15706_v10  ;;  %v4210_v29 = vadd.s32 %v15765_v42, %v15847_v16 }
 0xa23   : > { %vm9461_vm13 = vcmp.lt.s32.totalorder %v9460_v4, 0  ;;  %v7752_v1 = vpack.c.bf16 %v7722_v61, %v7720_v48  ;;  %vm3830_vm3 = vweird.f32 %v18153_v26  ;;  %v4232_v13 = vshll.u32 %v4231_v57, 23  ;;  %v18180_v48 = vld [vmem:[#allocation59_spill] sm:$0xff] }
 0xa24   : > { %v4021_v12 = vor.u32 %v4020_v59, %v4019_v0  ;;  %v4025_v47 = vor.u32 4788187, %v4024_v25  ;;  %v7753_v60 = vpack.c.bf16 %v7723_v34, %v7721_v27  ;;  %v3835_v30 = vxor.u32 2147483648, %v10970_v56  ;;  %v18179_v25 = vld [vmem:[#allocation57_spill] sm:$0xff] }
 0xa25   : > { %v3924_v58 = vcvt.s32.f32 %v16201_v2  ;;  %v3717_v62 = vmul.f32 %v3716_v63, %v3714_v22  ;;  %v4228_v15 = vshrl.u32 %v4210_v29, %v4226_v24  ;;  %vm3844_vm10 = vcmp.lt.s32.totalorder %v18176_v45, 0  ;;  %v18181_v34 = vld [vmem:[#allocation61_spill] sm:$0xff] }
 0xa26   : > { %v4125_v17 = vor.u32 %v4124_v18, %v4123_v20  ;;  %v4129_v10 = vor.u32 4788187, %v4128_v6  ;;  %v16272_v53 = vsel %vm9461_vm13, 0, %v9460_v4  ;;  %v4319_v42 = vadd.s32 536870912, %v16262_v5  ;;  %8004 = vmatprep.mubr.bf16.mxu0 %v7753_v60 }
 0xa27   : > { %10971 = vcosq.f32 %v16186_v50  ;;  %vm3833_vm5 = vcmp.lt.s32.totalorder %v16189_v46, 2  ;;  %v18177_v16 = vand.u32 2147483647, %v16144_v9  ;;  %v3723_v2 = vsel %vm16245_vm15, 0, %v3721_v8  ;;  %8005 = vmatmul.mubr.bf16.vlgmr.msra.gmra.mrb[128].mxu0 %v7752_v1 }
 0xa28   : > { %v4227_v59 = vshll.u32 %v16047_v54, %v16207_v33  ;;  %v4233_v6 = vor.u32 4788187, %v4232_v13  ;;  %v4026_v63 = vand.u32 2147483647, %v4025_v47  ;;  %v4028_v61 = vcvt.s32.f32 %v4021_v12  ;;  %v16294_v33 = vld [vmem:[#allocation7] ss:$0 sm:$0xff] }
 0xa29   : > { %v3925_v0 = vmul.f32 %v3924_v58, %v18177_v16  ;;  %v3836_v22 = vsel %vm3834_vm9, %v16151_v51, %v3835_v30  ;;  %v18178_v24 = vxor.u32 2147483648, %v16151_v51  ;;  %v3718_v37 = vxor.u32 2147483648, %v3717_v62 }
 0xa2a   : > { %v4438_v57 = vsub.s32 4294967266, %v16272_v53  ;;  %v4229_v4 = vor.u32 %v4228_v15, %v4227_v59  ;;  %v4130_v35 = vand.u32 2147483647, %v4129_v10  ;;  %v4132_v38 = vcvt.s32.f32 %v4125_v17  ;;  %v7651_v10 = vpop.f32.mrb[100].mxu0 }
 0xa2b   : > { %v3839_v9 = vsel %vm3837_vm12, %v18178_v24, %v10970_v56  ;;  %v16291_v3 = vshrl.u32 %v4319_v42, 30  ;;  %10973 = vsinq.f32 %v16186_v50  ;;  %v3926_v54 = vxor.u32 2147483648, %v3925_v0  ;;  %v18182_v50 = vld [vmem:[#allocation65_spill] sm:$0xff]  ;;  %v18188_v42 = vld [vmem:[#allocation52_spill] sm:$0xff]  ;;  %v7653_v59 = vpop.f32.mrb[101].mxu0 }
 0xa2c   : > { %v16298_v19 = vmul.f32 %v16294_v33, %v18179_v25  ;;  %v3727_v51 = vadd.s32 3, %v3723_v2  ;;  %v3840_v56 = vsel %vm3833_vm5, %v3836_v22, %v3839_v9  ;;  %v4234_v20 = vand.u32 2147483647, %v4233_v6  ;;  %v7655_v24 = vpop.f32.mrb[102].mxu0 }
 0xa2d   : > { %v4029_v18 = vmul.f32 %v4028_v61, %v4026_v63  ;;  %v3512_v27 = vsub.s32 4, %v18180_v48  ;;  %v16305_v8 = vmul.f32 %v16294_v33, %v18181_v34  ;;  %v18183_v29 = vand.u32 2147483647, %v18182_v50 }
 0xa2e   : > { %vm3948_vm2 = vcmp.lt.s32.totalorder %v18182_v50, 0  ;;  %v4439_v13 = vadd.s32 127, %v4438_v57  ;;  %v3719_v46 = vsel %vm3636_vm7, %v3718_v37, %v3717_v62  ;;  %v4236_v12 = vcvt.s32.f32 %v4229_v4  ;;  %v7657_v4 = vpop.f32.mrb[103].mxu0 }
 0xa2f   : > { %vm16309_vm1 = vcmp.le.f32.partialorder %v18183_v29, 0.7853982  ;;  %v4133_v47 = vmul.f32 %v4132_v38, %v4130_v35  ;;  %v4321_v60 = vshll.u32 %v16291_v3, 30  ;;  %v16319_v30 = vsel %vm3830_vm3, nan, %v3840_v56 }
 0xa30   : > { %18186 = vst [vmem:[#allocation60_spill] sm:$0xff] %v16319_v30  ;;  %v16323_v58 = vsel %vm3844_vm10, %v3926_v54, %v3925_v0  ;;  %v16325_v15 = vand.u32 3, %v3727_v51  ;;  %v4434_v17 = vsub.s32 32, %v16272_v53  ;;  %vm4156_vm11 = vcmp.lt.s32.totalorder %v18188_v42, 0 }
 0xa31   : > { %v4237_v62 = vmul.f32 %v4236_v12, %v4234_v20  ;;  %v4030_v16 = vxor.u32 2147483648, %v4029_v18  ;;  %v7652_v2 = vadd.f32 %v7651_v10, %v16219_v32  ;;  %v3513_v26 = vsel %vm3428_vm14, %v3512_v27, %v18180_v48  ;;  %v16333_v6 = vpop.eup %10971  ;;  %v16369_v10 = vld [vmem:[#allocation7 + $0x1] ss:$0 sm:$0xff] }
 0xa32   : > { %18187 = vst [vmem:[#allocation71_spill] sm:$0xff] %v16325_v15  ;;  %v3722_v0 = vsel %vm16245_vm15, %v18171_v7, %v3719_v46  ;;  %v4418_v63 = vadd.s32 %v15980_v41, %v15987_v21  ;;  %v4440_v61 = vshll.u32 %v4439_v13, 23  ;;  %v7654_v22 = vadd.f32 %v7653_v59, %v16226_v39 }
 0xa33   : > { %vm4052_vm6 = vcmp.lt.s32.totalorder %v15514_v43, 0  ;;  %v4134_v9 = vxor.u32 2147483648, %v4133_v47  ;;  %v16343_v37 = vsub.s32 %v16262_v5, %v4321_v60  ;;  %v7656_v57 = vadd.f32 %v7655_v24, %v16219_v32 }
 0xa34   : > { %v18189_v35 = vand.u32 2147483647, %v15514_v43  ;;  %v4436_v41 = vshrl.u32 %v4418_v63, %v4434_v17  ;;  %v7658_v21 = vadd.f32 %v7657_v4, %v16226_v39  ;;  %v3515_v38 = vsel %vm16118_vm4, 0, %v3513_v26  ;;  %v7661_v17 = vpop.f32.mrb[104].mxu0 }
 0xa35   : > { %v4238_v54 = vxor.u32 2147483648, %v4237_v62  ;;  %v4031_v5 = vsel %vm3948_vm2, %v4030_v16, %v4029_v18  ;;  %v7724_v25 = vmax.f32 %v7652_v2, 0.0  ;;  %v7726_v51 = vmax.f32 %v7656_v57, 0.0  ;;  %v16357_v56 = vpop.eup %10973  ;;  %v18193_v16 = vld [vmem:[#allocation78_spill] sm:$0xff]  ;;  %v7663_v59 = vpop.f32.mrb[105].mxu0 }
 0xa36   : > { %vm16348_vm14 = vcmp.le.f32.partialorder %v18189_v35, 0.7853982  ;;  %v4435_v20 = vshll.u32 %v16136_v44, %v16272_v53  ;;  %v4441_v48 = vor.u32 4788187, %v4440_v61  ;;  %v7725_v27 = vmax.f32 %v7654_v22, 0.0  ;;  %v18192_v44 = vld [vmem:[#allocation77_spill] sm:$0xff] }
 0xa37   : > { %v7727_v34 = vmax.f32 %v7658_v21, 0.0  ;;  %v4135_v29 = vsel %vm4052_vm6, %v4134_v9, %v4133_v47  ;;  %v4324_v55 = vsub.s32 0, %v16343_v37  ;;  %v7754_v13 = vpack.c.bf16 %v7726_v51, %v7724_v25  ;;  %v7665_v22 = vpop.f32.mrb[106].mxu0 }
 0xa38   : > { %v3519_v46 = vadd.s32 3, %v3515_v38  ;;  %10975 = vcosq.f32 %v3722_v0  ;;  %v4034_v18 = vsel %vm16309_vm1, %v18182_v50, %v4031_v5  ;;  %v4437_v12 = vor.u32 %v4436_v41, %v4435_v20  ;;  %v7667_v57 = vpop.f32.mrb[107].mxu0  ;;  %v18194_v41 = vld [vmem:[#allocation56_spill] sm:$0xff] }
 0xa39   : > { %v7755_v60 = vpack.c.bf16 %v7727_v34, %v7725_v27  ;;  %10977 = vsinq.f32 %v3722_v0  ;;  %v3196_v53 = vmul.f32 %v16294_v33, %v18192_v44  ;;  %v3281_v47 = vmul.f32 %v16369_v10, %v18193_v16 }
 0xa3a   : > { %v7662_v2 = vadd.f32 %v7661_v17, %v16219_v32  ;;  %v16376_v26 = vsel %vm4156_vm11, %v4238_v54, %v4237_v62  ;;  %v4138_v63 = vsel %vm16348_vm14, %v15514_v43, %v4135_v29  ;;  %v4442_v0 = vand.u32 2147483647, %v4441_v48 }
 0xa3b   : > { %8014 = vmatprep.mubr.bf16.mxu0 %v7755_v60  ;;  %v7664_v61 = vadd.f32 %v7663_v59, %v16226_v39  ;;  %10979 = vcosq.f32 %v4034_v18  ;;  %v9455_v24 = vmin.u32 %v4324_v55, %v16343_v37  ;;  %v7666_v9 = vadd.f32 %v7665_v22, %v16219_v32  ;;  %v18195_v55 = vld [vmem:[#allocation76_spill] sm:$0xff] }
 0xa3c   : > { %8015 = vmatmul.mubr.bf16.gmra.mrb[132].mxu0 %v7754_v13  ;;  %v3520_v4 = vand.u32 3, %v3519_v46  ;;  %10981 = vsinq.f32 %v4034_v18  ;;  %v4444_v62 = vcvt.s32.f32 %v4437_v12  ;;  %v7668_v35 = vadd.f32 %v7667_v57, %v16226_v39  ;;  %v7671_v46 = vpop.f32.mrb[108].mxu0  ;;  %v3345_v57 = vpop.permute.xlu1 %3344 }
 0xa3d   : > { %v3616_v21 = vsub.s32 4, %v18194_v41  ;;  %10983 = vcosq.f32 %v4138_v63  ;;  %v16386_v38 = vadd.f32 %v3281_v47, %v3196_v53  ;;  %v7728_v54 = vmax.f32 %v7662_v2, 0.0  ;;  %v7673_v44 = vpop.f32.mrb[109].mxu0 }
 0xa3e   : > { %v7730_v5 = vmax.f32 %v7666_v9, 0.0  ;;  %v4445_v25 = vmul.f32 %v4444_v62, %v4442_v0  ;;  %v7729_v51 = vmax.f32 %v7664_v61, 0.0  ;;  %v7731_v20 = vmax.f32 %v7668_v35, 0.0  ;;  %v7675_v59 = vpop.f32.mrb[110].mxu0  ;;  %v18201_v62 = vld [vmem:[#allocation69_spill] sm:$0xff] }
 0xa3f   : > { %v3523_v48 = vxor.u32 2147483648, %v16357_v56  ;;  %v4326_v27 = vclz %v9455_v24  ;;  %vm3522_vm4 = vcmp.eq.s32.totalorder %v3520_v4, 0  ;;  %v3526_v29 = vxor.u32 2147483648, %v16333_v6  ;;  %v7677_v22 = vpop.f32.mrb[111].mxu0 }
 0xa40   : > { %v7756_v34 = vpack.c.bf16 %v7730_v5, %v7728_v54  ;;  %vm4364_vm7 = vcmp.lt.s32.totalorder %v18195_v55, 0  ;;  %v7757_v13 = vpack.c.bf16 %v7731_v20, %v7729_v51  ;;  %vm3525_vm8 = vcmp.eq.s32.totalorder %v3520_v4, 2 }
 0xa41   : > { %v18196_v18 = vand.u32 2147483647, %v18166_v31  ;;  %v3617_v60 = vsel %vm3532_vm0, %v3616_v21, %v18194_v41  ;;  %10985 = vsinq.f32 %v4138_v63  ;;  %v7672_v17 = vadd.f32 %v7671_v46, %v16219_v32 }
 0xa42   : > { %vm3518_vm12 = vweird.f32 %v18154_v14  ;;  %v16406_v16 = vpop.eup %10975  ;;  %v16410_v47 = vadd.s32 %v16161_v40, %v16169_v11  ;;  %8024 = vmatprep.mubr.bf16.mxu0 %v7757_v13  ;;  %v7674_v2 = vadd.f32 %v7673_v44, %v16226_v39  ;;  %vm3521_vm0 = vcmp.lt.s32.totalorder %v3520_v4, 2  ;;  %v3244_v13 = vpop.permute.xlu0 %3243 }
 0xa43   : > { %vm16393_vm9 = vcmp.le.f32.partialorder %v18196_v18, 0.7853982  ;;  %18199 = vst [vmem:[#allocation75_spill] sm:$0xff] %v16406_v16  ;;  %v3524_v63 = vsel %vm3522_vm4, %v16333_v6, %v3523_v48  ;;  %v16415_v0 = vpop.eup %10977  ;;  %v9456_v61 = vadd.s32 4294967294, %v4326_v27  ;;  %v3527_v24 = vsel %vm3525_vm8, %v3526_v29, %v16357_v56 }
 0xa44   : > { %v3618_v53 = vsel %vm16393_vm9, %v18166_v31, %v16180_v36  ;;  %18200 = vst [vmem:[#allocation68_spill] sm:$0xff] %v16415_v0  ;;  %8025 = vmatmul.mubr.bf16.gmra.mrb[136].mxu0 %v7756_v34  ;;  %v7676_v36 = vadd.f32 %v7675_v59, %v16219_v32  ;;  %v3619_v40 = vsel %vm16393_vm9, 0, %v3617_v60  ;;  %v4446_v11 = vxor.u32 2147483648, %v4445_v25  ;;  %v7681_v60 = vpop.f32.mrb[112].mxu0 }
 0xa45   : > { %v7678_v9 = vadd.f32 %v7677_v22, %v16226_v39  ;;  %10987 = vcosq.f32 %v3618_v53  ;;  %v3928_v6 = vsub.s32 4, %v18201_v62  ;;  %v16424_v35 = vpop.eup %10979  ;;  %v7732_v41 = vmax.f32 %v7672_v17, 0.0  ;;  %v18205_v17 = vld [vmem:[#allocation79_spill] sm:$0xff] }
 0xa46   : > { %v7734_v21 = vmax.f32 %v7676_v36, 0.0  ;;  %10989 = vsinq.f32 %v3618_v53  ;;  %v18202_v54 = vand.u32 2147483647, %v18176_v45  ;;  %v16432_v56 = vpop.eup %10981  ;;  %v7733_v51 = vmax.f32 %v7674_v2, 0.0  ;;  %v3349_v53 = vpop.permute.xlu1 %3348 }
 0xa47   : > { %v7735_v20 = vmax.f32 %v7678_v9, 0.0  ;;  %v3528_v48 = vsel %vm3521_vm0, %v3524_v63, %v3527_v24  ;;  %v3623_v27 = vadd.s32 3, %v3619_v40  ;;  %v16435_v34 = vpop.eup %10983  ;;  %vm9457_vm13 = vcmp.lt.s32.totalorder %v9456_v61, 0 }
 0xa48   : > { %vm16428_vm15 = vcmp.le.f32.partialorder %v18202_v54, 0.7853982  ;;  %v7758_v29 = vpack.c.bf16 %v7734_v21, %v7732_v41  ;;  %v4032_v18 = vsub.s32 4, %v15997_v28  ;;  %v3381_v44 = vmul.f32 %v18205_v17, %v3345_v57 }
 0xa49   : > { %v3930_v46 = vsel %vm16428_vm15, %v18176_v45, %v16323_v58  ;;  %v7759_v12 = vpack.c.bf16 %v7735_v20, %v7733_v51  ;;  %v3280_v4 = vmul.f32 %v16369_v10, %v3244_v13  ;;  %v3929_v2 = vsel %vm3844_vm10, %v3928_v6, %v18201_v62  ;;  %v7683_v58 = vpop.f32.mrb[113].mxu0 }
 0xa4a   : > { %v16449_v59 = vsel %vm4364_vm7, %v4446_v11, %v4445_v25  ;;  %v7682_v63 = vadd.f32 %v7681_v60, %v16219_v32  ;;  %v3382_v36 = vmul.f32 %v18205_v17, %v3349_v53  ;;  %v16455_v22 = vsel %vm3518_vm12, nan, %v3528_v48  ;;  %v7685_v9 = vpop.f32.mrb[114].mxu0  ;;  %v16475_v48 = vld [vmem:[#allocation8] ss:$0 sm:$0xff] }
 0xa4b   : > { %18206 = vst [vmem:[#allocation70_spill] sm:$0xff] %v16449_v59  ;;  %18207 = vst [vmem:[#allocation54_spill] sm:$0xff] %v16455_v22  ;;  %v16458_v24 = vsel %vm9457_vm13, 0, %v9456_v61  ;;  %8034 = vmatprep.mubr.bf16.mxu0 %v7759_v12  ;;  %v7684_v40 = vadd.f32 %v7683_v58, %v16226_v39  ;;  %v3296_v57 = vadd.f32 %v3280_v4, %v16298_v19  ;;  %v16462_v25 = vand.u32 3, %v3623_v27  ;;  %v16464_v11 = vpop.eup %10985  ;;  %v7687_v6 = vpop.f32.mrb[115].mxu0 }
 0xa4c   : > { %8035 = vmatmul.mubr.bf16.gmra.mrb[140].mxu0 %v7758_v29  ;;  %v7686_v62 = vadd.f32 %v7685_v9, %v16219_v32  ;;  %v3398_v14 = vadd.f32 %v3382_v36, %v16386_v38  ;;  %v3931_v61 = vsel %vm16428_vm15, 0, %v3929_v2  ;;  %10991 = vcosq.f32 %v3930_v46  ;;  %18208 = vst [vmem:[#allocation63_spill] sm:$0xff] %v16475_v48 }
 0xa4d   : > { %v7688_v41 = vadd.f32 %v7687_v6, %v16226_v39  ;;  %v3397_v21 = vadd.f32 %v3381_v44, %v3296_v57  ;;  %10993 = vsinq.f32 %v3930_v46  ;;  %v4033_v19 = vsel %vm3948_vm2, %v4032_v18, %v15997_v28 }
 0xa4e   : > { %v4334_v54 = vsub.s32 4294967266, %v16458_v24  ;;  %v7736_v51 = vmax.f32 %v7682_v63, 0.0  ;;  %v7738_v20 = vmax.f32 %v7686_v62, 0.0  ;;  %v16478_v38 = vadd.f32 %v16475_v48, %v3398_v14 }
 0xa4f   : > { %v10988_v5 = vpop.eup %10987  ;;  %v4330_v27 = vsub.s32 32, %v16458_v24  ;;  %v7737_v29 = vmax.f32 %v7684_v40, 0.0  ;;  %v7739_v13 = vmax.f32 %v7688_v41, 0.0  ;;  %v16482_v46 = vadd.f32 %v16475_v48, %v3397_v21 }
 0xa50   : > { %18209 = vst [vmem:[#allocation58_spill] sm:$0xff] %v16478_v38  ;;  %vm3629_vm3 = vcmp.eq.s32.totalorder %v16462_v25, 2  ;;  %v10990_v28 = vpop.eup %10989  ;;  %v7760_v18 = vpack.c.bf16 %v7738_v20, %v7736_v51  ;;  %v17879_v12 = vand.u32 2147483647, %v16478_v38  ;;  %v4573_v60 = vand.u32 2139095040, %v16478_v38 }
 0xa51   : > { %18210 = vst [vmem:[#allocation53_spill] sm:$0xff] %v16482_v46  ;;  %vm3626_vm10 = vcmp.eq.s32.totalorder %v16462_v25, 0  ;;  %v3935_v17 = vadd.s32 3, %v3931_v61  ;;  %v7761_v44 = vpack.c.bf16 %v7739_v13, %v7737_v29  ;;  %v17878_v53 = vand.u32 2147483647, %v16482_v46 }
 0xa52   : > { %v4469_v4 = vand.u32 2139095040, %v16482_v46  ;;  %v4035_v2 = vsel %vm16309_vm1, 0, %v4033_v19  ;;  %v4331_v63 = vshll.u32 %v16343_v37, %v16458_v24  ;;  %v4335_v58 = vadd.s32 127, %v4334_v54 }
 0xa53   : > { %v4574_v36 = vshrl.u32 %v4573_v60, 23  ;;  %v4136_v40 = vsub.s32 4, %v15999_v23  ;;  %v4332_v9 = vshrl.u32 %v16410_v47, %v4330_v27  ;;  %8044 = vmatprep.mubr.bf16.mxu0 %v7761_v44  ;;  %v4577_v57 = vand.u32 8388607, %v17879_v12 }
 0xa54   : > { %v4470_v62 = vshrl.u32 %v4469_v4, 23  ;;  %v4473_v6 = vand.u32 8388607, %v17878_v53  ;;  %8045 = vmatmul.mubr.bf16.gmra.mrb[144].mxu0 %v7760_v18  ;;  %v3630_v14 = vxor.u32 2147483648, %v10988_v5  ;;  %v4039_v61 = vadd.s32 3, %v4035_v2 }
 0xa55   : > { %v9466_v1 = vadd.s32 4294967169, %v4574_v36  ;;  %v3627_v41 = vxor.u32 2147483648, %v10990_v28  ;;  %v16501_v21 = vand.u32 3, %v3935_v17  ;;  %v4336_v54 = vshll.u32 %v4335_v58, 23 }
 0xa56   : > { %v9462_v24 = vadd.s32 4294967169, %v4470_v62  ;;  %v16504_v19 = vpop.eup %10991  ;;  %v16509_v20 = vsel %vm4052_vm6, %v4136_v40, %v15999_v23  ;;  %v16514_v13 = vor.u32 %v4332_v9, %v4331_v63  ;;  %v4578_v18 = vor.u32 8388608, %v4577_v57 }
 0xa57   : > { %v4580_v51 = vadd.s32 1, %v9466_v1  ;;  %v16512_v29 = vpop.eup %10993  ;;  %v4474_v60 = vor.u32 8388608, %v4473_v6  ;;  %v16518_v44 = vsel %vm3629_vm3, %v3630_v14, %v10990_v28  ;;  %v16520_v4 = vand.u32 3, %v4039_v61 }
 0xa58   : > { %v4476_v17 = vadd.s32 1, %v9462_v24  ;;  %v16525_v58 = vsel %vm3626_vm10, %v10988_v5, %v3627_v41  ;;  %v16530_v36 = vor.u32 4788187, %v4336_v54  ;;  %v16533_v62 = vshll.u32 %v4578_v18, 8 }
 0xa59   : > { %vm4581_vm5 = vcmp.gt.s32.totalorder %v4580_v51, 0  ;;  %v16535_v1 = vshll.u32 %v4474_v60, 8  ;;  %v18211_v61 = vmov 2475754826   ;;  %v18212_v41 = vmov 2131351028  }
 0xa5a   : > { %v4582_v23 = vsel %vm4581_vm5, %v4580_v51, 0  ;;  %vm4477_vm1 = vcmp.gt.s32.totalorder %v4476_v17, 0  ;;  %v18213_v53 = vmov 2102212464   ;;  %v18214_v12 = vmov 920167782  }
 0xa5b   : > { %v4583_v40 = vshrl.u32 %v4582_v23, 5  ;;  %v4584_v9 = vand.u32 31, %v4582_v23  ;;  %v4478_v28 = vsel %vm4477_vm1, %v4476_v17, 0  ;;  %v18215_v57 = vmov 1326507024  }
 0xa5c   : > { %v4480_v6 = vand.u32 31, %v4478_v28  ;;  %v16542_v17 = vshrl.u32 %v4478_v28, 5  ;;  %vm4042_vm9 = vcmp.eq.s32.totalorder %v16520_v4, 0  ;;  %vm3625_vm12 = vcmp.lt.s32.totalorder %v16462_v25, 2 }
 0xa5d   : > { %v4585_v14 = vsub.s32 32, %v4584_v9  ;;  %v4587_v5 = vshll.u32 %v17986_v52, %v4584_v9  ;;  %v4590_v24 = vshll.u32 %v18211_v61, %v4584_v9  ;;  %v4593_v51 = vshll.u32 %v18212_v41, %v4584_v9 }
 0xa5e   : > { %v4596_v54 = vshll.u32 %v18213_v53, %v4584_v9  ;;  %v4599_v2 = vshll.u32 %v18214_v12, %v4584_v9  ;;  %vm4602_vm2 = vcmp.lt.s32.totalorder %v4583_v40, 1  ;;  %vm4603_vm6 = vcmp.lt.s32.totalorder %v4583_v40, 2 }
 0xa5f   : > { %v4586_v18 = vshrl.u32 %v17986_v52, %v4585_v14  ;;  %v4588_v23 = vshrl.u32 %v18211_v61, %v4585_v14  ;;  %v4591_v60 = vshrl.u32 %v18212_v41, %v4585_v14  ;;  %v4594_v27 = vshrl.u32 %v18213_v53, %v4585_v14 }
 0xa60   : > { %v4597_v47 = vshrl.u32 %v18214_v12, %v4585_v14  ;;  %v4600_v37 = vshrl.u32 %v18215_v57, %v4585_v14  ;;  %vm4605_vm4 = vcmp.lt.s32.totalorder %v4583_v40, 4  ;;  %v4481_v7 = vsub.s32 32, %v4480_v6 }
 0xa61   : > { %v4589_v63 = vor.u32 %v4588_v23, %v4587_v5  ;;  %v4592_v30 = vor.u32 %v4591_v60, %v4590_v24  ;;  %v4595_v9 = vor.u32 %v4594_v27, %v4593_v51  ;;  %vm4604_vm8 = vcmp.lt.s32.totalorder %v4583_v40, 3  ;;  %v16555_v51 = vpop.permute.xlu1 %3168 }
 0xa62   : > { %v4598_v28 = vor.u32 %v4597_v47, %v4596_v54  ;;  %v4601_v16 = vor.u32 %v4600_v37, %v4599_v2  ;;  %v4483_v0 = vshll.u32 %v17986_v52, %v4480_v6  ;;  %v4486_v5 = vshll.u32 %v18211_v61, %v4480_v6 }
 0xa63   : > { %v4606_v15 = vsel %vm4602_vm2, %v4586_v18, %v4589_v63  ;;  %v4607_v38 = vsel %vm4605_vm4, %v4595_v9, 2102212464  ;;  %v4610_v46 = vsel %vm4602_vm2, %v4589_v63, %v4592_v30  ;;  %v4614_v59 = vsel %vm4602_vm2, %v4592_v30, %v4595_v9 }
 0xa64   : > { %v4608_v55 = vsel %vm4604_vm8, %v4592_v30, %v4607_v38  ;;  %v4611_v14 = vsel %vm4605_vm4, %v4598_v28, 920167782  ;;  %v4615_v48 = vsel %vm4605_vm4, %v4601_v16, 1326507024  ;;  %v4482_v37 = vshrl.u32 %v17986_v52, %v4481_v7 }
 0xa65   : > { %v4612_v24 = vsel %vm4604_vm8, %v4595_v9, %v4611_v14  ;;  %v4616_v27 = vsel %vm4604_vm8, %v4598_v28, %v4615_v48  ;;  %v4484_v47 = vshrl.u32 %v18211_v61, %v4481_v7  ;;  %v4609_v2 = vsel %vm4603_vm6, %v4606_v15, %v4608_v55 }
 0xa66   : > { %v4613_v54 = vsel %vm4603_vm6, %v4610_v46, %v4612_v24  ;;  %v4617_v63 = vsel %vm4603_vm6, %v4614_v59, %v4616_v27  ;;  %v4487_v30 = vshrl.u32 %v18212_v41, %v4481_v7  ;;  %v4489_v15 = vshll.u32 %v18212_v41, %v4480_v6 }
 0xa67   : > { %v16564_v16 = vmul.u32.u64.low %v16533_v62, %v4617_v63  ;;  %v16565_v38 = vmul.u32.u64.high %v16533_v62, %v4617_v63, %v16564_v16  ;;  %v16568_v48 = vmul.u32.u64.low %v16533_v62, %v4613_v54  ;;  %v16569_v18 = vmul.u32.u64.high %v16533_v62, %v4613_v54, %v16568_v48 }
 0xa68   : > { %v4485_v23 = vor.u32 %v4484_v47, %v4483_v0  ;;  %v4488_v60 = vor.u32 %v4487_v30, %v4486_v5  ;;  %v4490_v55 = vshrl.u32 %v18213_v53, %v4481_v7  ;;  %v4492_v59 = vshll.u32 %v18213_v53, %v4480_v6  ;;  %v16586_v5 = vpop.permute.xlu1 %3251 }
 0xa69   : > { %v4493_v46 = vshrl.u32 %v18214_v12, %v4481_v7  ;;  %v4495_v40 = vshll.u32 %v18214_v12, %v4480_v6  ;;  %v4496_v9 = vshrl.u32 %v18215_v57, %v4481_v7  ;;  %v4625_v28 = vmul.u32 %v16533_v62, %v4609_v2 }
 0xa6a   : > { %v4491_v14 = vor.u32 %v4490_v55, %v4489_v15  ;;  %vm4498_vm0 = vcmp.lt.s32.totalorder %v16542_v17, 1  ;;  %vm4499_vm15 = vcmp.lt.s32.totalorder %v16542_v17, 2  ;;  %vm4627_vm13 = vc.u32 %v16565_v38, %v16568_v48 }
 0xa6b   : > { %v4628_v0 = vadd.s32 1, %v16569_v18  ;;  %v4494_v24 = vor.u32 %v4493_v46, %v4492_v59  ;;  %vm4500_vm3 = vcmp.lt.s32.totalorder %v16542_v17, 3  ;;  %v4497_v7 = vor.u32 %v4496_v9, %v4495_v40 }
 0xa6c   : > { %vm4501_vm10 = vcmp.lt.s32.totalorder %v16542_v17, 4  ;;  %v4502_v6 = vsel %vm4498_vm0, %v4482_v37, %v4485_v23  ;;  %v4506_v62 = vsel %vm4498_vm0, %v4485_v23, %v4488_v60  ;;  %v4510_v54 = vsel %vm4498_vm0, %v4488_v60, %v4491_v14 }
 0xa6d   : > { %v4629_v27 = vsel %vm4627_vm13, %v4628_v0, %v16569_v18  ;;  %v4503_v47 = vsel %vm4501_vm10, %v4491_v14, 2102212464  ;;  %v4507_v2 = vsel %vm4501_vm10, %v4494_v24, 920167782  ;;  %v4511_v15 = vsel %vm4501_vm10, %v4497_v7, 1326507024 }
 0xa6e   : > { %v16591_v63 = vadd.s32 %v4629_v27, %v4625_v28  ;;  %v4504_v30 = vsel %vm4500_vm3, %v4488_v60, %v4503_v47  ;;  %v4508_v16 = vsel %vm4500_vm3, %v4491_v14, %v4507_v2  ;;  %v4338_v55 = vand.u32 2147483647, %v16530_v36  ;;  %v18217_v36 = vld [vmem:[#allocation80_spill] sm:$0xff]  ;;  %v16617_v14 = vpop.permute.xlu1 %3173 }
 0xa6f   : > { %v4505_v37 = vsel %vm4499_vm15, %v4502_v6, %v4504_v30  ;;  %v4509_v18 = vsel %vm4499_vm15, %v4506_v62, %v4508_v16  ;;  %v4512_v23 = vsel %vm4500_vm3, %v4494_v24, %v4511_v15  ;;  %vm4260_vm5 = vcmp.lt.s32.totalorder %v18217_v36, 0 }
 0xa70   : > { %v4631_v59 = vadd.s32 536870912, %v16591_v63  ;;  %v4513_v60 = vsel %vm4499_vm15, %v4510_v54, %v4512_v23  ;;  %v16608_v46 = vmul.u32.u64.low %v16535_v1, %v4509_v18  ;;  %v16609_v40 = vmul.u32.u64.high %v16535_v1, %v4509_v18, %v16608_v46 }
 0xa71   : > { %v16614_v9 = vmul.u32.u64.low %v16535_v1, %v4513_v60  ;;  %v16615_v28 = vmul.u32.u64.high %v16535_v1, %v4513_v60, %v16614_v9  ;;  %vm4045_vm1 = vcmp.eq.s32.totalorder %v16520_v4, 2  ;;  %v18218_v17 = vsel %vm16348_vm14, 0, %v16509_v20 }
 0xa72   : > { %18216 = vst [vmem:[#allocation55_spill] sm:$0xff] %v16608_v46  ;;  %v4143_v0 = vadd.s32 3, %v18218_v17  ;;  %v16624_v7 = vshrl.u32 %v4631_v59, 30  ;;  %v3632_v6 = vsel %vm3625_vm12, %v16525_v58, %v16518_v44  ;;  %vm3938_vm2 = vcmp.eq.s32.totalorder %v16501_v21, 0 }
 0xa73   : > { %v7691_v24 = vpop.f32.mrb[116].mxu0  ;;  %vm3941_vm6 = vcmp.eq.s32.totalorder %v16501_v21, 2  ;;  %v18219_v62 = vxor.u32 2147483648, %v16432_v56  ;;  %v18220_v20 = vand.u32 2147483647, %v18188_v42  ;;  %v18223_v25 = vcvt.s32.f32 %v16514_v13 }
 0xa74   : > { %v7692_v58 = vadd.f32 %v7691_v24, %v16219_v32  ;;  %v7693_v47 = vpop.f32.mrb[117].mxu0  ;;  %v4521_v2 = vmul.u32 %v16535_v1, %v4505_v37  ;;  %vm3622_vm4 = vweird.f32 %v18166_v31  ;;  %vm4041_vm8 = vcmp.lt.s32.totalorder %v16520_v4, 2  ;;  %v18227_v37 = vld [vmem:[#allocation73_spill] sm:$0xff] }
 0xa75   : > { %v16637_v49 = vsel %vm4042_vm9, %v16424_v35, %v18219_v62  ;;  %vm16641_vm14 = vcmp.le.f32.partialorder %v18220_v20, 0.7853982  ;;  %v4341_v44 = vmul.f32 %v18223_v25, %v4338_v55  ;;  %v18224_v30 = vand.u32 2147483647, %v18217_v36  ;;  %v7695_v15 = vpop.f32.mrb[118].mxu0  ;;  %v3256_v62 = vpop.permute.xlu0 %3255 }
 0xa76   : > { %v4242_v54 = vsel %vm16641_vm14, %v18188_v42, %v16376_v26  ;;  %v7694_v13 = vadd.f32 %v7693_v47, %v16226_v39  ;;  %v4524_v1 = vadd.s32 1, %v16609_v40  ;;  %v3942_v55 = vxor.u32 2147483648, %v16504_v19  ;;  %v7697_v59 = vpop.f32.mrb[119].mxu0  ;;  %v16675_v20 = vpop.permute.xlu1 %3178 }
 0xa77   : > { %vm16657_vm9 = vcmp.le.f32.partialorder %v18224_v30, 0.7853982  ;;  %v4240_v18 = vsub.s32 4, %v18227_v37  ;;  %v7696_v23 = vadd.f32 %v7695_v15, %v16219_v32  ;;  %vm4523_vm12 = vc.u32 %v16615_v28, %v16608_v46 }
 0xa78   : > { %vm3937_vm0 = vcmp.lt.s32.totalorder %v16501_v21, 2  ;;  %v3939_v26 = vxor.u32 2147483648, %v16512_v29  ;;  %v16670_v60 = vand.u32 3, %v4143_v0  ;;  %v7698_v9 = vadd.f32 %v7697_v59, %v16226_v39 }
 0xa79   : > { %v4633_v17 = vshll.u32 %v16624_v7, 30  ;;  %v4525_v24 = vsel %vm4523_vm12, %v4524_v1, %v16609_v40  ;;  %10995 = vcosq.f32 %v4242_v54  ;;  %v4342_v25 = vxor.u32 2147483648, %v4341_v44 }
 0xa7a   : > { %v7740_v47 = vmax.f32 %v7692_v58, 0.0  ;;  %v7742_v30 = vmax.f32 %v7696_v23, 0.0  ;;  %v16677_v15 = vadd.s32 %v4525_v24, %v4521_v2  ;;  %v7741_v32 = vmax.f32 %v7694_v13, 0.0  ;;  %v10845_v13 = vld [vmem:[%s17717_s24] sm:$0xff]   ;;  %v16697_v24 = vpop.permute.xlu1 %3263 }
 0xa7b   : > { %v7743_v46 = vmax.f32 %v7698_v9, 0.0  ;;  %v3198_v0 = vmul.f32 %v16294_v33, %v16555_v51  ;;  %vm4038_vm15 = vweird.f32 %v18182_v50  ;;  %v4241_v40 = vsel %vm4156_vm11, %v4240_v18, %v18227_v37  ;;  %v16695_v9 = vpop.permute.xlu0 %3259  ;;  %9922 = vmatprep.subr.bf16.mxu0 %v10845_v13 }
 0xa7c   : > { %v7762_v1 = vpack.c.bf16 %v7742_v30, %v7740_v47  ;;  %v3282_v59 = vmul.f32 %v16369_v10, %v16586_v5  ;;  %v4527_v58 = vadd.s32 536870912, %v16677_v15  ;;  %v3283_v2 = vmul.f32 %v16369_v10, %v3256_v62  ;;  %v10846_v5 = vld [vmem:[%s17717_s24 + $0x8] ss:$0 sps:$4 sm:$0xff]   ;;  %9923 = vmatpush3.bf16.msra.mxu0 %v10845_v13  ;;  %v16740_v62 = vld [vmem:[#allocation7 + $0x2] ss:$0 sm:$0xff] }
 0xa7d   : > { %v7763_v23 = vpack.c.bf16 %v7743_v46, %v7741_v32  ;;  %v16693_v51 = vsub.s32 %v16591_v63, %v4633_v17  ;;  %vm8455_vm11 = vcmask 1043456   ;;  %vm3934_vm13 = vweird.f32 %v18176_v45 }
 0xa7e   : > { %10997 = vsinq.f32 %v4242_v54  ;;  %v3940_v32 = vsel %vm3938_vm2, %v16504_v19, %v3939_v26  ;;  %v3943_v63 = vsel %vm3941_vm6, %v3942_v55, %v16512_v29  ;;  %v18228_v46 = vxor.u32 2147483648, %v16424_v35  ;;  %10038 = vmatprep.subr.msk.bf16.mxu0 %vm8455_vm11, %v10846_v5  ;;  %v3357_v26 = vpop.permute.xlu1 %3356 }
 0xa7f   : > { %v4344_v18 = vsub.s32 4, %v16291_v3  ;;  %v4343_v54 = vsel %vm4260_vm5, %v4342_v25, %v4341_v44  ;;  %8054 = vmatprep.mubr.bf16.mxu0 %v7763_v23  ;;  %v16719_v19 = vsel %vm3622_vm4, nan, %v3632_v6  ;;  %vm4146_vm3 = vcmp.eq.s32.totalorder %v16670_v60, 0  ;;  %v3353_v6 = vpop.permute.xlu0 %3352 }
 0xa80   : > { %v4047_v37 = vsel %vm4045_vm1, %v18228_v46, %v16432_v56  ;;  %v4243_v29 = vsel %vm16641_vm14, 0, %v4241_v40  ;;  %8055 = vmatmul.mubr.bf16.gmra.mrb[148].mxu0 %v7762_v1  ;;  %v3298_v35 = vadd.f32 %v3282_v59, %v16305_v8  ;;  %v16725_v56 = vshrl.u32 %v4527_v58, 30  ;;  %v18230_v40 = vld [vmem:[#allocation74_spill] sm:$0xff] }
 0xa81   : > { %v3299_v55 = vadd.f32 %v3283_v2, %v3198_v0  ;;  %v8457_v44 = vsel %vm8455_vm11, %v10846_v5, 0  ;;  %vm4142_vm10 = vweird.f32 %v15514_v43  ;;  %v4636_v31 = vsub.s32 0, %v16693_v51 }
 0xa82   : > { %v3944_v27 = vsel %vm3937_vm0, %v3940_v32, %v3943_v63  ;;  %v4048_v8 = vsel %vm4041_vm8, %v16637_v49, %v4047_v37  ;;  %vm4149_vm1 = vcmp.eq.s32.totalorder %v16670_v60, 2  ;;  %v4346_v17 = vsel %vm16657_vm9, %v18217_v36, %v4343_v54  ;;  %9925 = vmatpush3.bf16.msra.mxu0 %v8457_v44  ;;  %v18232_v63 = vld [vmem:[#allocation63_spill] sm:$0xff] }
 0xa83   : > { %v3383_v25 = vmul.f32 %v16740_v62, %v3353_v6  ;;  %v3384_v47 = vmul.f32 %v16740_v62, %v3357_v26  ;;  %v4345_v21 = vsel %vm4260_vm5, %v4344_v18, %v16291_v3  ;;  %v10996_v30 = vpop.eup %10995  ;;  %vm4145_vm2 = vcmp.lt.s32.totalorder %v16670_v60, 2  ;;  %v3365_v5 = vpop.permute.xlu0 %3364 }
 0xa84   : > { %v18229_v4 = vxor.u32 2147483648, %v16464_v11  ;;  %v4247_v0 = vadd.s32 3, %v4243_v29  ;;  %v4448_v1 = vsub.s32 4, %v18230_v40  ;;  %v4529_v59 = vshll.u32 %v16725_v56, 30  ;;  %v18235_v29 = vld [vmem:[#allocation76_spill] sm:$0xff] }
 0xa85   : > { %v3399_v58 = vadd.f32 %v3383_v25, %v3298_v35  ;;  %v3400_v2 = vadd.f32 %v3384_v47, %v3299_v55  ;;  %v18231_v3 = vxor.u32 2147483648, %v16435_v34  ;;  %10999 = vcosq.f32 %v4346_v17 }
 0xa86   : > { %v4148_v49 = vsel %vm4146_vm3, %v16435_v34, %v18229_v4  ;;  %v9467_v23 = vmin.u32 %v4636_v31, %v16693_v51  ;;  %v4347_v32 = vsel %vm16657_vm9, 0, %v4345_v21  ;;  %11001 = vsinq.f32 %v4346_v17 }
 0xa87   : > { %v4151_v13 = vsel %vm4149_vm1, %v18231_v3, %v16464_v11  ;;  %v16764_v46 = vadd.f32 %v18232_v63, %v3399_v58  ;;  %v16768_v37 = vsel %vm3934_vm13, nan, %v3944_v27  ;;  %v16772_v34 = vsel %vm4038_vm15, nan, %v4048_v8  ;;  %v18239_v27 = vld [vmem:[#allocation70_spill] sm:$0xff] }
 0xa88   : > { %18233 = vst [vmem:[#allocation50_spill] sm:$0xff] %v16768_v37  ;;  %18234 = vst [vmem:[#allocation67_spill] sm:$0xff] %v16772_v34  ;;  %v10998_v11 = vpop.eup %10997  ;;  %v16775_v18 = vadd.f32 %v18232_v63, %v3400_v2  ;;  %v4152_v16 = vsel %vm4145_vm2, %v4148_v49, %v4151_v13  ;;  %v4248_v54 = vand.u32 3, %v4247_v0  ;;  %v4449_v35 = vsel %vm4364_vm7, %v4448_v1, %v18230_v40  ;;  %v10847_v2 = vld [vmem:[#allocation28] ss:$8 sps:$4 sm:$0xff]  }
 0xa89   : > { %v16783_v45 = vsub.s32 %v16677_v15, %v4529_v59  ;;  %v4677_v55 = vand.u32 2139095040, %v16764_v46  ;;  %v4351_v50 = vadd.s32 3, %v4347_v32  ;;  %v18236_v44 = vand.u32 2147483647, %v18235_v29  ;;  %v10849_v32 = vld [vmem:[#allocation28 + $0x4] ss:$8 sps:$4 sm:$0xff]  }
 0xa8a   : > { %v4638_v6 = vclz %v9467_v23  ;;  %v4254_v26 = vxor.u32 2147483648, %v10996_v30  ;;  %v17896_v8 = vand.u32 2147483647, %v16764_v46  ;;  %v4251_v25 = vxor.u32 2147483648, %v10998_v11  ;;  %8305 = vmatprep.subr.bf16.mxu1 %v10849_v32  ;;  %v10858_v32 = vld [vmem:[#allocation28 + $0x34] ss:$8 sps:$4 sm:$0xff]  }
 0xa8b   : > { %vm16788_vm5 = vcmp.le.f32.partialorder %v18236_v44, 0.7853982  ;;  %v4678_v17 = vshrl.u32 %v4677_v55, 23  ;;  %v4781_v21 = vand.u32 2139095040, %v16775_v18  ;;  %v16804_v4 = vsel %vm4142_vm10, nan, %v4152_v16  ;;  %8306 = vmatpush1.bf16.msra.mxu1 %v10847_v2 }
 0xa8c   : > { %v4450_v15 = vsel %vm16788_vm5, %v18235_v29, %v18239_v27  ;;  %v4451_v47 = vsel %vm16788_vm5, 0, %v4449_v35  ;;  %18240 = vst [vmem:[#allocation66_spill] sm:$0xff] %v16804_v4  ;;  %vm4249_vm7 = vcmp.lt.s32.totalorder %v4248_v54, 2  ;;  %vm4250_vm6 = vcmp.eq.s32.totalorder %v4248_v54, 0  ;;  %v10864_v37 = vld [vmem:[#allocation28 + $0x54] ss:$8 sps:$4 sm:$0xff]  }
 0xa8d   : > { %v4532_v49 = vsub.s32 0, %v16783_v45  ;;  %v9470_v0 = vadd.s32 4294967169, %v4678_v17  ;;  %vm4253_vm14 = vcmp.eq.s32.totalorder %v4248_v54, 2  ;;  %v16807_v40 = vand.u32 3, %v4351_v50  ;;  %v10855_v17 = vld [vmem:[#allocation28 + $0x24] ss:$8 sps:$4 sm:$0xff]  }
 0xa8e   : > { %v9468_v1 = vadd.s32 4294967294, %v4638_v6  ;;  %v4255_v59 = vsel %vm4253_vm14, %v4254_v26, %v10998_v11  ;;  %11003 = vcosq.f32 %v4450_v15  ;;  %v4455_v58 = vadd.s32 3, %v4451_v47 }
 0xa8f   : > { %v4681_v3 = vand.u32 8388607, %v17896_v8  ;;  %v4684_v13 = vadd.s32 1, %v9470_v0  ;;  %v4782_v43 = vshrl.u32 %v4781_v21, 23  ;;  %v4252_v23 = vsel %vm4250_vm6, %v10996_v30, %v4251_v25  ;;  %v16811_v16 = vpop.eup %10999 }
 0xa90   : > { %v3199_v35 = vmul.f32 %v16294_v33, %v16617_v14  ;;  %v3200_v55 = vmul.f32 %v16294_v33, %v16675_v20  ;;  %v3284_v11 = vmul.f32 %v16369_v10, %v16695_v9  ;;  %v3285_v50 = vmul.f32 %v16369_v10, %v16697_v24  ;;  %v16821_v44 = vpop.eup %11001  ;;  %v10852_v14 = vld [vmem:[#allocation28 + $0x14] ss:$8 sps:$4 sm:$0xff]   ;;  %v10850_v10 = vld [vmem:[#allocation28 + $0x10] ss:$8 sps:$4 sm:$0xff]  }
 0xa91   : > { %v16824_v31 = vmin.u32 %v4532_v49, %v16783_v45  ;;  %vm4685_vm4 = vcmp.gt.s32.totalorder %v4684_v13, 0  ;;  %v17895_v30 = vand.u32 2147483647, %v16775_v18  ;;  %11005 = vsinq.f32 %v4450_v15  ;;  %8307 = vmatprep.subr.bf16.mxu1 %v10852_v14 }
 0xa92   : > { %vm9469_vm8 = vcmp.lt.s32.totalorder %v9468_v1, 0  ;;  %v4686_v6 = vsel %vm4685_vm4, %v4684_v13, 0  ;;  %v16828_v33 = vsel %vm4249_vm7, %v4252_v23, %v4255_v59  ;;  %v16830_v20 = vand.u32 3, %v4455_v58  ;;  %8308 = vmatpush1.bf16.msra.mxu1 %v10850_v10 }
 0xa93   : > { %v4682_v9 = vor.u32 8388608, %v4681_v3  ;;  %v4688_v24 = vand.u32 31, %v4686_v6  ;;  %v9474_v26 = vadd.s32 4294967169, %v4782_v43  ;;  %v16835_v15 = vadd.s32 %v16568_v48, %v16565_v38  ;;  %v10853_v3 = vld [vmem:[#allocation28 + $0x20] ss:$8 sps:$4 sm:$0xff]   ;;  %8309 = vmatprep.subr.bf16.mxu1 %v10855_v17 }
 0xa94   : > { %v16837_v25 = vadd.f32 %v3284_v11, %v3199_v35  ;;  %v16839_v54 = vadd.f32 %v3285_v50, %v3200_v55  ;;  %v16843_v21 = vsel %vm9469_vm8, 0, %v9468_v1  ;;  %v4534_v49 = vclz %v16824_v31 }
 0xa95   : > { %v4689_v0 = vsub.s32 32, %v4688_v24  ;;  %v4785_v59 = vand.u32 8388607, %v17895_v30  ;;  %v4687_v58 = vshrl.u32 %v4686_v6, 5  ;;  %v4691_v2 = vshll.u32 %v17986_v52, %v4688_v24  ;;  %v10856_v30 = vld [vmem:[#allocation28 + $0x30] ss:$8 sps:$4 sm:$0xff]  }
 0xa96   : > { %v4694_v38 = vshll.u32 %v18211_v61, %v4688_v24  ;;  %v4697_v48 = vshll.u32 %v18212_v41, %v4688_v24  ;;  %v16853_v43 = vshll.u32 %v4682_v9, 8  ;;  %v4788_v23 = vadd.s32 1, %v9474_v26  ;;  %8310 = vmatpush1.bf16.msra.mxu1 %v10853_v3 }
 0xa97   : > { %v4690_v13 = vshrl.u32 %v17986_v52, %v4689_v0  ;;  %v4692_v1 = vshrl.u32 %v18211_v61, %v4689_v0  ;;  %v4695_v55 = vshrl.u32 %v18212_v41, %v4689_v0  ;;  %v4698_v11 = vshrl.u32 %v18213_v53, %v4689_v0  ;;  %8311 = vmatprep.subr.bf16.mxu1 %v10858_v32 }
 0xa98   : > { %v16855_v35 = vpop.eup %11003  ;;  %v4700_v50 = vshll.u32 %v18213_v53, %v4688_v24  ;;  %v4701_v31 = vshrl.u32 %v18214_v12, %v4689_v0  ;;  %v4703_v6 = vshll.u32 %v18214_v12, %v4688_v24  ;;  %v4704_v10 = vshrl.u32 %v18215_v57, %v4689_v0 }
 0xa99   : > { %v4693_v14 = vor.u32 %v4692_v1, %v4691_v2  ;;  %v4786_v9 = vor.u32 8388608, %v4785_v59  ;;  %v4696_v60 = vor.u32 %v4695_v55, %v4694_v38  ;;  %v4699_v26 = vor.u32 %v4698_v11, %v4697_v48  ;;  %v10861_v2 = vld [vmem:[#allocation28 + $0x44] ss:$8 sps:$4 sm:$0xff]  }
 0xa9a   : > { %v4702_v17 = vor.u32 %v4701_v31, %v4700_v50  ;;  %vm4706_vm9 = vcmp.lt.s32.totalorder %v4687_v58, 1  ;;  %v4705_v47 = vor.u32 %v4704_v10, %v4703_v6  ;;  %vm4707_vm12 = vcmp.lt.s32.totalorder %v4687_v58, 2  ;;  %8312 = vmatpush1.bf16.msra.mxu1 %v10856_v30  ;;  %v10859_v6 = vld [vmem:[#allocation28 + $0x40] ss:$8 sps:$4 sm:$0xff]  }
 0xa9b   : > { %v16863_v8 = vpop.eup %11005  ;;  %vm4708_vm0 = vcmp.lt.s32.totalorder %v4687_v58, 3  ;;  %vm4789_vm15 = vcmp.gt.s32.totalorder %v4788_v23, 0  ;;  %vm4709_vm11 = vcmp.lt.s32.totalorder %v4687_v58, 4  ;;  %v4710_v24 = vsel %vm4706_vm9, %v4690_v13, %v4693_v14  ;;  %8313 = vmatprep.subr.bf16.mxu1 %v10861_v2  ;;  %v10862_v2 = vld [vmem:[#allocation28 + $0x50] ss:$8 sps:$4 sm:$0xff]  }
 0xa9c   : > { %v4714_v1 = vsel %vm4706_vm9, %v4693_v14, %v4696_v60  ;;  %v4718_v0 = vsel %vm4706_vm9, %v4696_v60, %v4699_v26  ;;  %v4711_v59 = vsel %vm4709_vm11, %v4699_v26, 2102212464  ;;  %v4715_v38 = vsel %vm4709_vm11, %v4702_v17, 920167782  ;;  %v3361_v14 = vpop.permute.xlu1 %3360 }
 0xa9d   : > { %v4719_v48 = vsel %vm4709_vm11, %v4705_v47, 1326507024  ;;  %v3386_v55 = vmul.f32 %v16740_v62, %v3365_v5  ;;  %v4712_v11 = vsel %vm4708_vm0, %v4696_v60, %v4711_v59  ;;  %v4716_v3 = vsel %vm4708_vm0, %v4699_v26, %v4715_v38  ;;  %v10867_v59 = vld [vmem:[#allocation28 + $0x64] ss:$8 sps:$4 sm:$0xff]  }
 0xa9e   : > { %v4720_v50 = vsel %vm4708_vm0, %v4702_v17, %v4719_v48  ;;  %v4790_v31 = vsel %vm4789_vm15, %v4788_v23, 0  ;;  %v4713_v10 = vsel %vm4707_vm12, %v4710_v24, %v4712_v11  ;;  %v4717_v32 = vsel %vm4707_vm12, %v4714_v1, %v4716_v3  ;;  %8314 = vmatpush1.bf16.msra.mxu1 %v10859_v6 }
 0xa9f   : > { %v4721_v27 = vsel %vm4707_vm12, %v4718_v0, %v4720_v50  ;;  %v16869_v13 = vshrl.u32 %v4790_v31, 5  ;;  %v16876_v60 = vmul.u32.u64.low %v16853_v43, %v4717_v32  ;;  %v16877_v23 = vmul.u32.u64.high %v16853_v43, %v4717_v32, %v16876_v60  ;;  %8315 = vmatprep.subr.bf16.mxu1 %v10864_v37 }
 0xaa0   : > { %v16872_v47 = vmul.u32.u64.low %v16853_v43, %v4721_v27  ;;  %v16873_v5 = vmul.u32.u64.high %v16853_v43, %v4721_v27, %v16872_v47  ;;  %v16880_v30 = vadd.s32 4294967294, %v4534_v49  ;;  %v4792_v26 = vand.u32 31, %v4790_v31  ;;  %v10865_v31 = vld [vmem:[#allocation28 + $0x60] ss:$8 sps:$4 sm:$0xff]  }
 0xaa1   : > { %v16882_v17 = vshll.u32 %v4786_v9, 8  ;;  %v3402_v58 = vadd.f32 %v3386_v55, %v16839_v54  ;;  %v4729_v24 = vmul.u32 %v16853_v43, %v4713_v10  ;;  %vm4810_vm13 = vcmp.lt.s32.totalorder %v16869_v13, 1  ;;  %v10870_v47 = vld [vmem:[#allocation28 + $0x74] ss:$8 sps:$4 sm:$0xff]  }
 0xaa2   : > { %vm4811_vm3 = vcmp.lt.s32.totalorder %v16869_v13, 2  ;;  %v3385_v27 = vmul.f32 %v16740_v62, %v3361_v14  ;;  %v4793_v1 = vsub.s32 32, %v4792_v26  ;;  %v4795_v0 = vshll.u32 %v17986_v52, %v4792_v26  ;;  %8316 = vmatpush1.bf16.msra.mxu1 %v10862_v2 }
 0xaa3   : > { %v4798_v49 = vshll.u32 %v18211_v61, %v4792_v26  ;;  %v4801_v9 = vshll.u32 %v18212_v41, %v4792_v26  ;;  %vm4731_vm10 = vc.u32 %v16873_v5, %v16876_v60  ;;  %v4732_v54 = vadd.s32 1, %v16877_v23  ;;  %8317 = vmatprep.subr.bf16.mxu1 %v10867_v59  ;;  %v10868_v59 = vld [vmem:[#allocation28 + $0x70] ss:$8 sps:$4 sm:$0xff]  }
 0xaa4   : > { %v4804_v43 = vshll.u32 %v18213_v53, %v4792_v26  ;;  %vm4813_vm1 = vcmp.lt.s32.totalorder %v16869_v13, 4  ;;  %v4794_v62 = vshrl.u32 %v17986_v52, %v4793_v1  ;;  %v4796_v38 = vshrl.u32 %v18211_v61, %v4793_v1 }
 0xaa5   : > { %v4799_v48 = vshrl.u32 %v18212_v41, %v4793_v1  ;;  %v4802_v55 = vshrl.u32 %v18213_v53, %v4793_v1  ;;  %vm4357_vm2 = vcmp.eq.s32.totalorder %v16807_v40, 2  ;;  %v4733_v37 = vsel %vm4731_vm10, %v4732_v54, %v16877_v23 }
 0xaa6   : > { %v4805_v11 = vshrl.u32 %v18214_v12, %v4793_v1  ;;  %v4807_v3 = vshll.u32 %v18214_v12, %v4792_v26  ;;  %v4808_v50 = vshrl.u32 %v18215_v57, %v4793_v1  ;;  %v4734_v6 = vadd.s32 %v4733_v37, %v4729_v24  ;;  %8318 = vmatpush1.bf16.msra.mxu1 %v10865_v31 }
 0xaa7   : > { %v4797_v10 = vor.u32 %v4796_v38, %v4795_v0  ;;  %v4800_v32 = vor.u32 %v4799_v48, %v4798_v49  ;;  %v4803_v14 = vor.u32 %v4802_v55, %v4801_v9  ;;  %vm4246_vm5 = vweird.f32 %v18188_v42  ;;  %8319 = vmatprep.subr.bf16.mxu1 %v10870_v47 }
 0xaa8   : > { %v4806_v34 = vor.u32 %v4805_v11, %v4804_v43  ;;  %v4809_v22 = vor.u32 %v4808_v50, %v4807_v3  ;;  %vm4812_vm7 = vcmp.lt.s32.totalorder %v16869_v13, 3  ;;  %vm4354_vm6 = vcmp.eq.s32.totalorder %v16807_v40, 0  ;;  %v10876_v13 = vld [vmem:[#allocation28 + $0x94] ss:$8 sps:$4 sm:$0xff]  }
 0xaa9   : > { %v16910_v23 = vadd.f32 %v18232_v63, %v3402_v58  ;;  %v4735_v26 = vadd.s32 536870912, %v4734_v6  ;;  %v4815_v24 = vsel %vm4813_vm1, %v4803_v14, 2102212464  ;;  %v4818_v2 = vsel %vm4810_vm13, %v4797_v10, %v4800_v32 }
 0xaaa   : > { %v3401_v1 = vadd.f32 %v3385_v27, %v16837_v25  ;;  %v4814_v0 = vsel %vm4810_vm13, %v4794_v62, %v4797_v10  ;;  %v4819_v49 = vsel %vm4813_vm1, %v4806_v34, 920167782  ;;  %v4822_v9 = vsel %vm4810_vm13, %v4800_v32, %v4803_v14  ;;  %v10873_v62 = vld [vmem:[#allocation28 + $0x84] ss:$8 sps:$4 sm:$0xff]   ;;  %8320 = vmatpush1.bf16.msra.mxu1 %v10868_v59 }
 0xaab   : > { %v4823_v58 = vsel %vm4813_vm1, %v4809_v22, 1326507024  ;;  %v16925_v54 = vshrl.u32 %v4735_v26, 30  ;;  %v4816_v43 = vsel %vm4812_vm7, %v4800_v32, %v4815_v24  ;;  %v4820_v25 = vsel %vm4812_vm7, %v4803_v14, %v4819_v49  ;;  %v10871_v32 = vld [vmem:[#allocation28 + $0x80] ss:$8 sps:$4 sm:$0xff]   ;;  %8321 = vmatprep.subr.bf16.mxu1 %v10873_v62  ;;  %v18244_v62 = vld [vmem:[#allocation55_spill] sm:$0xff] }
 0xaac   : > { %v4824_v27 = vsel %vm4812_vm7, %v4806_v34, %v4823_v58  ;;  %v4646_v38 = vsub.s32 4294967266, %v16843_v21  ;;  %vm9465_vm14 = vcmp.lt.s32.totalorder %v16880_v30, 0  ;;  %v4821_v22 = vsel %vm4811_vm3, %v4818_v2, %v4820_v25  ;;  %v10874_v58 = vld [vmem:[#allocation28 + $0x90] ss:$8 sps:$4 sm:$0xff]  }
 0xaad   : > { %v4825_v48 = vsel %vm4811_vm3, %v4822_v9, %v4824_v27  ;;  %v4737_v55 = vshll.u32 %v16925_v54, 30  ;;  %vm4353_vm4 = vcmp.lt.s32.totalorder %v16807_v40, 2  ;;  %v4989_v34 = vand.u32 2139095040, %v16910_v23 }
 0xaae   : > { %v16941_v37 = vmul.u32.u64.low %v16882_v17, %v4825_v48  ;;  %v16942_v11 = vmul.u32.u64.high %v16882_v17, %v4825_v48, %v16941_v37  ;;  %v4642_v3 = vsub.s32 32, %v16843_v21  ;;  %v4817_v50 = vsel %vm4811_vm3, %v4814_v0, %v4816_v43  ;;  %8322 = vmatpush1.bf16.msra.mxu1 %v10871_v32 }
 0xaaf   : > { %v16950_v31 = vmul.u32.u64.low %v16882_v17, %v4821_v22  ;;  %v16951_v10 = vmul.u32.u64.high %v16882_v17, %v4821_v22, %v16950_v31  ;;  %v16955_v14 = vsel %vm9465_vm14, 0, %v16880_v30  ;;  %v16957_v47 = vsub.s32 %v4734_v6, %v4737_v55  ;;  %8323 = vmatprep.subr.bf16.mxu1 %v10876_v13 }
 0xab0   : > { %vm4461_vm8 = vcmp.eq.s32.totalorder %v16830_v20, 2  ;;  %v4990_v26 = vshrl.u32 %v4989_v34, 23  ;;  %v16961_v24 = vadd.f32 %v18232_v63, %v3401_v1  ;;  %v4643_v2 = vshll.u32 %v16693_v51, %v16843_v21  ;;  %v10877_v34 = vld [vmem:[#allocation28 + $0xa0] ss:$8 sps:$4 sm:$0xff]  }
 0xab1   : > { %v4647_v0 = vadd.s32 127, %v4646_v38  ;;  %v16968_v49 = vsel %vm4246_vm5, nan, %v16828_v33  ;;  %v18242_v30 = vxor.u32 2147483648, %v16811_v16  ;;  %vm4458_vm9 = vcmp.eq.s32.totalorder %v16830_v20, 0 }
 0xab2   : > { %18241 = vst [vmem:[#allocation62_spill] sm:$0xff] %v16968_v49  ;;  %v4740_v63 = vsub.s32 0, %v16957_v47  ;;  %v4833_v1 = vmul.u32 %v16882_v17, %v4817_v50  ;;  %vm4835_vm12 = vc.u32 %v16942_v11, %v16950_v31  ;;  %v9482_v51 = vadd.s32 4294967169, %v4990_v26  ;;  %8324 = vmatpush1.bf16.msra.mxu1 %v10874_v58  ;;  %v10882_v26 = vld [vmem:[#allocation28 + $0xb4] ss:$8 sps:$4 sm:$0xff]  }
 0xab3   : > { %v4359_v6 = vsel %vm4357_vm2, %v18242_v30, %v16821_v44  ;;  %v4644_v42 = vshrl.u32 %v16835_v15, %v4642_v3  ;;  %v4542_v33 = vsub.s32 4294967266, %v16955_v14  ;;  %v4836_v21 = vadd.s32 1, %v16951_v10  ;;  %v10879_v15 = vld [vmem:[#allocation28 + $0xa4] ss:$8 sps:$4 sm:$0xff]  }
 0xab4   : > { %v17901_v9 = vand.u32 2147483647, %v16910_v23  ;;  %v18243_v59 = vxor.u32 2147483648, %v16821_v44  ;;  %v4462_v43 = vxor.u32 2147483648, %v16855_v35  ;;  %v4996_v25 = vadd.s32 1, %v9482_v51  ;;  %8325 = vmatprep.subr.bf16.mxu1 %v10879_v15 }
 0xab5   : > { %v4885_v27 = vand.u32 2139095040, %v16961_v24  ;;  %v4522_v38 = vadd.s32 %v18244_v62, %v16615_v28  ;;  %v9471_v22 = vmin.u32 %v4740_v63, %v16957_v47  ;;  %v4837_v44 = vsel %vm4835_vm12, %v4836_v21, %v16951_v10 }
 0xab6   : > { %v4356_v17 = vsel %vm4354_vm6, %v16811_v16, %v18243_v59  ;;  %v4459_v48 = vxor.u32 2147483648, %v16863_v8  ;;  %v4648_v16 = vshll.u32 %v4647_v0, 23  ;;  %v4538_v55 = vsub.s32 32, %v16955_v14  ;;  %8326 = vmatpush1.bf16.msra.mxu1 %v10877_v34 }
 0xab7   : > { %v4838_v37 = vadd.s32 %v4837_v44, %v4833_v1  ;;  %vm4997_vm0 = vcmp.gt.s32.totalorder %v4996_v25, 0  ;;  %v17000_v3 = vor.u32 %v4644_v42, %v4643_v2  ;;  %v4543_v50 = vadd.s32 127, %v4542_v33  ;;  %8327 = vmatprep.subr.bf16.mxu1 %v10882_v26 }
 0xab8   : > { %v4993_v28 = vand.u32 8388607, %v17901_v9  ;;  %v4998_v32 = vsel %vm4997_vm0, %v4996_v25, 0  ;;  %v17900_v10 = vand.u32 2147483647, %v16961_v24  ;;  %v4886_v63 = vshrl.u32 %v4885_v27, 23 }
 0xab9   : > { %v4839_v13 = vadd.s32 536870912, %v4838_v37  ;;  %v5000_v30 = vand.u32 31, %v4998_v32  ;;  %v4742_v0 = vclz %v9471_v22  ;;  %v17009_v2 = vsel %vm4353_vm4, %v4356_v17, %v4359_v6 }
 0xaba   : > { %v17014_v51 = vsel %vm4461_vm8, %v4462_v43, %v16863_v8  ;;  %v17016_v42 = vor.u32 4788187, %v4648_v16  ;;  %v17023_v21 = vsel %vm4458_vm9, %v16855_v35, %v4459_v48  ;;  %v4539_v40 = vshll.u32 %v16783_v45, %v16955_v14  ;;  %v10880_v8 = vld [vmem:[#allocation28 + $0xb0] ss:$8 sps:$4 sm:$0xff]   ;;  %v10885_v43 = vld [vmem:[#allocation28 + $0xc4] ss:$8 sps:$4 sm:$0xff]  }
 0xabb   : > { %v17018_v33 = vshrl.u32 %v4839_v13, 30  ;;  %v5001_v58 = vsub.s32 32, %v5000_v30  ;;  %v4540_v6 = vshrl.u32 %v4522_v38, %v4538_v55  ;;  %v4544_v17 = vshll.u32 %v4543_v50, 23  ;;  %8328 = vmatpush1.bf16.msra.mxu1 %v10880_v8 }
 0xabc   : > { %v4994_v27 = vor.u32 8388608, %v4993_v28  ;;  %v9478_v15 = vadd.s32 4294967169, %v4886_v63  ;;  %v17031_v62 = vand.u32 8388607, %v17900_v10  ;;  %v9472_v35 = vadd.s32 4294967294, %v4742_v0  ;;  %8329 = vmatprep.subr.bf16.mxu1 %v10885_v43 }
 0xabd   : > { %v4841_v25 = vshll.u32 %v17018_v33, 30  ;;  %v17033_v22 = vshrl.u32 %v4998_v32, 5  ;;  %v5003_v44 = vshll.u32 %v17986_v52, %v5000_v30  ;;  %v5012_v45 = vshll.u32 %v18213_v53, %v5000_v30  ;;  %v10883_v32 = vld [vmem:[#allocation28 + $0xc0] ss:$8 sps:$4 sm:$0xff]   ;;  %v10888_v0 = vld [vmem:[#allocation28 + $0xd4] ss:$8 sps:$4 sm:$0xff]  }
 0xabe   : > { %v5006_v38 = vshll.u32 %v18211_v61, %v5000_v30  ;;  %v5009_v48 = vshll.u32 %v18212_v41, %v5000_v30  ;;  %v5013_v16 = vshrl.u32 %v18214_v12, %v5001_v58  ;;  %v5004_v55 = vshrl.u32 %v18211_v61, %v5001_v58 }
 0xabf   : > { %v17037_v14 = vsub.s32 %v4838_v37, %v4841_v25  ;;  %v5007_v34 = vshrl.u32 %v18212_v41, %v5001_v58  ;;  %v5010_v50 = vshrl.u32 %v18213_v53, %v5001_v58  ;;  %v5015_v28 = vshll.u32 %v18214_v12, %v5000_v30  ;;  %8330 = vmatpush1.bf16.msra.mxu1 %v10883_v32 }
 0xac0   : > { %v17046_v26 = vor.u32 %v4540_v6, %v4539_v40  ;;  %v17048_v37 = vor.u32 4788187, %v4544_v17  ;;  %v17052_v13 = vadd.s32 %v16876_v60, %v16873_v5  ;;  %v5014_v25 = vor.u32 %v5013_v16, %v5012_v45  ;;  %v7701_v5 = vpop.f32.mrb[120].mxu0  ;;  %v10886_v45 = vld [vmem:[#allocation28 + $0xd0] ss:$8 sps:$4 sm:$0xff]   ;;  %v18245_v16 = vld [vmem:[#allocation72_spill] sm:$0xff]  ;;  %8331 = vmatprep.subr.bf16.mxu1 %v10888_v0 }
 0xac1   : > { %v4844_v63 = vsub.s32 0, %v17037_v14  ;;  %v5016_v1 = vshrl.u32 %v18215_v57, %v5001_v58  ;;  %v17056_v10 = vshll.u32 %v4994_v27, 8  ;;  %vm9473_vm15 = vcmp.lt.s32.totalorder %v9472_v35, 0  ;;  %v7703_v27 = vpop.f32.mrb[121].mxu0  ;;  %v10889_v0 = vld [vmem:[#allocation28 + $0xe0] ss:$8 sps:$4 sm:$0xff]  }
 0xac2   : > { %vm5021_vm11 = vcmp.lt.s32.totalorder %v17033_v22, 4  ;;  %v17061_v6 = vadd.s32 1, %v9478_v15  ;;  %v5005_v60 = vor.u32 %v5004_v55, %v5003_v44  ;;  %v5008_v17 = vor.u32 %v5007_v34, %v5006_v38  ;;  %v7705_v30 = vpop.f32.mrb[122].mxu0 }
 0xac3   : > { %v9475_v40 = vmin.u32 %v4844_v63, %v17037_v14  ;;  %v5011_v8 = vor.u32 %v5010_v50, %v5009_v48  ;;  %v5017_v43 = vor.u32 %v5016_v1, %v5015_v28  ;;  %v7702_v9 = vadd.f32 %v7701_v5, %v18245_v16  ;;  %v10891_v63 = vld [vmem:[#allocation28 + $0xe4] ss:$8 sps:$4 sm:$0xff]   ;;  %v7707_v55 = vpop.f32.mrb[123].mxu0  ;;  %8332 = vmatpush1.bf16.msra.mxu1 %v10886_v45 }
 0xac4   : > { %vm5018_vm13 = vcmp.lt.s32.totalorder %v17033_v22, 1  ;;  %vm5020_vm3 = vcmp.lt.s32.totalorder %v17033_v22, 3  ;;  %v7704_v15 = vadd.f32 %v7703_v27, %v16226_v39  ;;  %v17068_v44 = vsel %vm9473_vm15, 0, %v9472_v35  ;;  %8333 = vmatprep.subr.bf16.mxu1 %v10891_v63  ;;  %v10894_v27 = vld [vmem:[#allocation28 + $0xf4] ss:$8 sps:$4 sm:$0xff]  }
 0xac5   : > { %v4846_v59 = vclz %v9475_v40  ;;  %v5002_v1 = vshrl.u32 %v17986_v52, %v5001_v58  ;;  %v5027_v38 = vsel %vm5021_vm11, %v5014_v25, 920167782  ;;  %v7706_v48 = vadd.f32 %v7705_v30, %v18245_v16 }
 0xac6   : > { %vm5019_vm10 = vcmp.lt.s32.totalorder %v17033_v22, 2  ;;  %v5023_v50 = vsel %vm5021_vm11, %v5011_v8, 2102212464  ;;  %v7708_v28 = vadd.f32 %v7707_v55, %v16226_v39  ;;  %v5026_v35 = vsel %vm5018_vm13, %v5005_v60, %v5008_v17 }
 0xac7   : > { %v9476_v34 = vadd.s32 4294967294, %v4846_v59  ;;  %v5028_v58 = vsel %vm5020_vm3, %v5011_v8, %v5027_v38  ;;  %v5031_v32 = vsel %vm5021_vm11, %v5017_v43, 1326507024  ;;  %v7744_v30 = vmax.f32 %v7702_v9, 0.0  ;;  %8334 = vmatpush1.bf16.msra.mxu1 %v10889_v0 }
 0xac8   : > { %v7746_v59 = vmax.f32 %v7706_v48, 0.0  ;;  %v4750_v40 = vsub.s32 4294967266, %v17068_v44  ;;  %v5030_v5 = vsel %vm5018_vm13, %v5008_v17, %v5011_v8  ;;  %v7745_v55 = vmax.f32 %v7704_v15, 0.0  ;;  %8335 = vmatprep.subr.bf16.mxu1 %v10894_v27 }
 0xac9   : > { %v7747_v4 = vmax.f32 %v7708_v28, 0.0  ;;  %vm9477_vm1 = vcmp.lt.s32.totalorder %v9476_v34, 0  ;;  %v5032_v38 = vsel %vm5020_vm3, %v5014_v25, %v5031_v32  ;;  %v5022_v43 = vsel %vm5018_vm13, %v5002_v1, %v5005_v60  ;;  %v10892_v25 = vld [vmem:[#allocation28 + $0xf0] ss:$8 sps:$4 sm:$0xff]  }
 0xaca   : > { %v7764_v49 = vpack.c.bf16 %v7746_v59, %v7744_v30  ;;  %v5024_v9 = vsel %vm5020_vm3, %v5008_v17, %v5023_v50  ;;  %v5029_v45 = vsel %vm5019_vm10, %v5026_v35, %v5028_v58  ;;  %v4746_v8 = vsub.s32 32, %v17068_v44 }
 0xacb   : > { %v7765_v48 = vpack.c.bf16 %v7747_v4, %v7745_v55  ;;  %v5033_v63 = vsel %vm5019_vm10, %v5030_v5, %v5032_v38  ;;  %vm4893_vm2 = vcmp.gt.s32.totalorder %v17061_v6, 0  ;;  %v17099_v15 = vadd.s32 127, %v4750_v40  ;;  %8336 = vmatpush1.bf16.msra.mxu1 %v10892_v25 }
 0xacc   : > { %v17101_v28 = vsel %vm9477_vm1, 0, %v9476_v34  ;;  %v17104_v60 = vmul.u32.u64.low %v17056_v10, %v5033_v63  ;;  %v17105_v17 = vmul.u32.u64.high %v17056_v10, %v5033_v63, %v17104_v60  ;;  %v4650_v4 = vand.u32 2147483647, %v17016_v42 }
 0xacd   : > { %8064 = vmatprep.mubr.bf16.mxu0 %v7765_v48  ;;  %v5025_v1 = vsel %vm5019_vm10, %v5022_v43, %v5024_v9  ;;  %v17111_v50 = vmul.u32.u64.low %v17056_v10, %v5029_v45  ;;  %v17112_v35 = vmul.u32.u64.high %v17056_v10, %v5029_v45, %v17111_v50  ;;  %v4546_v34 = vand.u32 2147483647, %v17048_v37 }
 0xace   : > { %8065 = vmatmul.mubr.bf16.gmra.mrb[152].mxu0 %v7764_v49  ;;  %v4548_v58 = vcvt.s32.f32 %v17046_v26  ;;  %v4834_v32 = vadd.s32 %v16950_v31, %v16942_v11  ;;  %v4894_v0 = vsel %vm4893_vm2, %v17061_v6, 0  ;;  %v4747_v22 = vshll.u32 %v16957_v47, %v17068_v44 }
 0xacf   : > { %v4854_v30 = vsub.s32 4294967266, %v17101_v28  ;;  %v4896_v59 = vand.u32 31, %v4894_v0  ;;  %v18246_v40 = vor.u32 8388608, %v17031_v62  ;;  %v4748_v26 = vshrl.u32 %v17052_v13, %v4746_v8 }
 0xad0   : > { %v4752_v37 = vshll.u32 %v17099_v15, 23  ;;  %v5041_v11 = vmul.u32 %v17056_v10, %v5025_v1  ;;  %vm5043_vm5 = vc.u32 %v17105_v17, %v17111_v50  ;;  %v5044_v31 = vadd.s32 1, %v17112_v35 }
 0xad1   : > { %v17127_v49 = vshll.u32 %v18246_v40, 8  ;;  %v4895_v47 = vshrl.u32 %v4894_v0, 5  ;;  %v4897_v6 = vsub.s32 32, %v4896_v59  ;;  %v4899_v44 = vshll.u32 %v17986_v52, %v4896_v59 }
 0xad2   : > { %v4850_v62 = vsub.s32 32, %v17101_v28  ;;  %v4902_v5 = vshll.u32 %v18211_v61, %v4896_v59  ;;  %v4905_v27 = vshll.u32 %v18212_v41, %v4896_v59  ;;  %v4908_v13 = vshll.u32 %v18213_v53, %v4896_v59 }
 0xad3   : > { %v4855_v55 = vadd.s32 127, %v4854_v30  ;;  %v5045_v10 = vsel %vm5043_vm5, %v5044_v31, %v17112_v35  ;;  %v4900_v38 = vshrl.u32 %v18211_v61, %v4897_v6  ;;  %v4911_v43 = vshll.u32 %v18214_v12, %v4896_v59 }
 0xad4   : > { %v5046_v9 = vadd.s32 %v5045_v10, %v5041_v11  ;;  %v4903_v45 = vshrl.u32 %v18212_v41, %v4897_v6  ;;  %v4906_v48 = vshrl.u32 %v18213_v53, %v4897_v6  ;;  %v4909_v8 = vshrl.u32 %v18214_v12, %v4897_v6  ;;  %v18247_v12 = vld [vmem:[#allocation53_spill] sm:$0xff] }
 0xad5   : > { %v4898_v63 = vshrl.u32 %v17986_v52, %v4897_v6  ;;  %v4901_v25 = vor.u32 %v4900_v38, %v4899_v44  ;;  %v4912_v15 = vshrl.u32 %v18215_v57, %v4897_v6  ;;  %vm4914_vm7 = vcmp.lt.s32.totalorder %v4895_v47, 1 }
 0xad6   : > { %v5047_v60 = vadd.s32 536870912, %v5046_v9  ;;  %v4904_v1 = vor.u32 %v4903_v45, %v4902_v5  ;;  %v4907_v35 = vor.u32 %v4906_v48, %v4905_v27  ;;  %v4910_v0 = vor.u32 %v4909_v8, %v4908_v13  ;;  %v18248_v27 = vld [vmem:[#allocation58_spill] sm:$0xff] }
 0xad7   : > { %v4851_v61 = vshll.u32 %v17037_v14, %v17101_v28  ;;  %v4852_v30 = vshrl.u32 %v4834_v32, %v4850_v62  ;;  %v4913_v59 = vor.u32 %v4912_v15, %v4911_v43  ;;  %vm4916_vm6 = vcmp.lt.s32.totalorder %v4895_v47, 3 }
 0xad8   : > { %v17150_v41 = vshrl.u32 %v5047_v60, 30  ;;  %vm4915_vm14 = vcmp.lt.s32.totalorder %v4895_v47, 2  ;;  %vm4917_vm4 = vcmp.lt.s32.totalorder %v4895_v47, 4  ;;  %v4922_v52 = vsel %vm4914_vm7, %v4901_v25, %v4904_v1 }
 0xad9   : > { %vm4468_vm8 = vcmp.lt.s32.totalorder %v18247_v12, 0  ;;  %v4856_v53 = vshll.u32 %v4855_v55, 23  ;;  %v4918_v57 = vsel %vm4914_vm7, %v4898_v63, %v4901_v25  ;;  %v4919_v40 = vsel %vm4917_vm4, %v4907_v35, 2102212464  ;;  %v18250_v25 = vld [vmem:[#allocation71_spill] sm:$0xff] }
 0xada   : > { %v4923_v11 = vsel %vm4917_vm4, %v4910_v0, 920167782  ;;  %v5049_v31 = vshll.u32 %v17150_v41, 30  ;;  %v4920_v14 = vsel %vm4916_vm6, %v4904_v1, %v4919_v40  ;;  %v4926_v32 = vsel %vm4914_vm7, %v4904_v1, %v4907_v35 }
 0xadb   : > { %v4924_v28 = vsel %vm4916_vm6, %v4907_v35, %v4923_v11  ;;  %v4749_v6 = vor.u32 %v4748_v26, %v4747_v22  ;;  %v4753_v44 = vor.u32 4788187, %v4752_v37  ;;  %v4927_v5 = vsel %vm4917_vm4, %v4913_v59, 1326507024  ;;  %v18254_v35 = vld [vmem:[#allocation68_spill] sm:$0xff] }
 0xadc   : > { %v4925_v62 = vsel %vm4915_vm14, %v4922_v52, %v4924_v28  ;;  %vm4572_vm9 = vcmp.lt.s32.totalorder %v18248_v27, 0  ;;  %v4549_v13 = vmul.f32 %v4548_v58, %v4546_v34  ;;  %v4853_v55 = vor.u32 %v4852_v30, %v4851_v61  ;;  %v18256_v52 = vld [vmem:[#allocation64_spill] sm:$0xff] }
 0xadd   : > { %v17161_v10 = vsub.s32 %v5046_v9, %v5049_v31  ;;  %v4928_v38 = vsel %vm4916_vm6, %v4910_v0, %v4927_v5  ;;  %v4921_v43 = vsel %vm4915_vm14, %v4918_v57, %v4920_v14  ;;  %v4857_v22 = vor.u32 4788187, %v4856_v53 }
 0xade   : > { %v4929_v45 = vsel %vm4915_vm14, %v4926_v32, %v4928_v38  ;;  %v17167_v48 = vmul.u32.u64.low %v17127_v49, %v4925_v62  ;;  %v17168_v8 = vmul.u32.u64.high %v17127_v49, %v4925_v62, %v17167_v48  ;;  %v18249_v58 = vcvt.s32.f32 %v17000_v3 }
 0xadf   : > { %v5052_v26 = vsub.s32 0, %v17161_v10  ;;  %v17173_v37 = vmul.u32.u64.low %v17127_v49, %v4929_v45  ;;  %v17174_v34 = vmul.u32.u64.high %v17127_v49, %v4929_v45, %v17173_v37  ;;  %v4754_v63 = vand.u32 2147483647, %v4753_v44 }
 0xae0   : > { %v4653_v9 = vmul.f32 %v18249_v58, %v4650_v4  ;;  %v4756_v47 = vcvt.s32.f32 %v4749_v6  ;;  %vm3730_vm12 = vcmp.eq.s32.totalorder %v18250_v25, 0  ;;  %v18251_v15 = vand.u32 2147483647, %v18248_v27  ;;  %v18255_v4 = vld [vmem:[#allocation75_spill] sm:$0xff] }
 0xae1   : > { %v4550_v1 = vxor.u32 2147483648, %v4549_v13  ;;  %v3731_v0 = vxor.u32 2147483648, %v18254_v35  ;;  %vm4457_vm15 = vcmp.lt.s32.totalorder %v16830_v20, 2  ;;  %v9483_v42 = vmin.u32 %v5052_v26, %v17161_v10 }
 0xae2   : > { %vm17183_vm0 = vcmp.le.f32.partialorder %v18251_v15, 0.7853982  ;;  %v4937_v3 = vmul.u32 %v17127_v49, %v4921_v43  ;;  %vm3733_vm11 = vcmp.eq.s32.totalorder %v18250_v25, 2  ;;  %v3734_v61 = vxor.u32 2147483648, %v18255_v4 }
 0xae3   : > { %v4940_v30 = vadd.s32 1, %v17168_v8  ;;  %v4552_v59 = vsub.s32 4, %v16725_v56  ;;  %vm3726_vm13 = vweird.f32 %v18256_v52  ;;  %v4858_v53 = vand.u32 2147483647, %v4857_v22 }
 0xae4   : > { %v4860_v57 = vcvt.s32.f32 %v4853_v55  ;;  %v5054_v40 = vclz %v9483_v42  ;;  %vm4939_vm3 = vc.u32 %v17174_v34, %v17167_v48  ;;  %v4654_v11 = vxor.u32 2147483648, %v4653_v9 }
 0xae5   : > { %v4757_v31 = vmul.f32 %v4756_v47, %v4754_v63  ;;  %vm3729_vm10 = vcmp.lt.s32.totalorder %v18250_v25, 2  ;;  %v4941_v49 = vsel %vm4939_vm3, %v4940_v30, %v17168_v8  ;;  %v4551_v14 = vsel %vm4468_vm8, %v4550_v1, %v4549_v13 }
 0xae6   : > { %vm4350_vm1 = vweird.f32 %v18217_v36  ;;  %v9484_v28 = vadd.s32 4294967294, %v5054_v40  ;;  %v4942_v32 = vadd.s32 %v4941_v49, %v4937_v3  ;;  %v18257_v6 = vand.u32 2147483647, %v18247_v12 }
 0xae7   : > { %vm4676_vm5 = vcmp.lt.s32.totalorder %v16764_v46, 0  ;;  %v3732_v62 = vsel %vm3730_vm12, %v18255_v4, %v3731_v0  ;;  %v3735_v5 = vsel %vm3733_vm11, %v3734_v61, %v18254_v35  ;;  %v4553_v13 = vsel %vm4468_vm8, %v4552_v59, %v16725_v56 }
 0xae8   : > { %vm17205_vm2 = vcmp.le.f32.partialorder %v18257_v6, 0.7853982  ;;  %v4861_v55 = vmul.f32 %v4860_v57, %v4858_v53  ;;  %vm4454_vm7 = vweird.f32 %v18235_v29  ;;  %v5042_v38 = vadd.s32 %v17111_v50, %v17105_v17 }
 0xae9   : > { %vm9485_vm6 = vcmp.lt.s32.totalorder %v9484_v28, 0  ;;  %v4943_v43 = vadd.s32 536870912, %v4942_v32  ;;  %v4655_v45 = vsel %vm4572_vm9, %v4654_v11, %v4653_v9  ;;  %v4758_v8 = vxor.u32 2147483648, %v4757_v31 }
 0xaea   : > { %v5057_v22 = vsel %vm9485_vm6, 0, %v9484_v28  ;;  %v4554_v26 = vsel %vm17205_vm2, %v18247_v12, %v4551_v14  ;;  %vm4780_vm14 = vcmp.lt.s32.totalorder %v16775_v18, 0  ;;  %v3736_v17 = vsel %vm3729_vm10, %v3732_v62, %v3735_v5 }
 0xaeb   : > { %v5058_v37 = vsub.s32 32, %v5057_v22  ;;  %v5059_v56 = vshll.u32 %v17161_v10, %v5057_v22  ;;  %v5062_v58 = vsub.s32 4294967266, %v5057_v22  ;;  %v17228_v63 = vshrl.u32 %v4943_v43, 30 }
 0xaec   : > { %v4464_v50 = vsel %vm4457_vm15, %v17023_v21, %v17014_v51  ;;  %v4555_v9 = vsel %vm17205_vm2, 0, %v4553_v13  ;;  %v4862_v47 = vxor.u32 2147483648, %v4861_v55  ;;  %v4658_v35 = vsel %vm17183_vm0, %v18248_v27, %v4655_v45  ;;  %v7711_v13 = vpop.f32.mrb[124].mxu0 }
 0xaed   : > { %v5060_v15 = vshrl.u32 %v5042_v38, %v5058_v37  ;;  %v5063_v1 = vadd.s32 127, %v5062_v58  ;;  %v4945_v10 = vshll.u32 %v17228_v63, 30  ;;  %v18260_v25 = vand.u32 2147483647, %v16764_v46 }
 0xaee   : > { %v4759_v20 = vsel %vm4676_vm5, %v4758_v8, %v4757_v31  ;;  %11007 = vcosq.f32 %v4554_v26  ;;  %v4656_v3 = vsub.s32 4, %v16624_v7  ;;  %v18263_v4 = vand.u32 2147483647, %v16775_v18  ;;  %v7713_v8 = vpop.f32.mrb[125].mxu0 }
 0xaef   : > { %vm17245_vm4 = vcmp.le.f32.partialorder %v18260_v25, 0.7853982  ;;  %v5061_v51 = vor.u32 %v5060_v15, %v5059_v56  ;;  %v5064_v21 = vshll.u32 %v5063_v1, 23  ;;  %v17251_v42 = vsub.s32 %v4942_v32, %v4945_v10  ;;  %v7715_v58 = vpop.f32.mrb[126].mxu0 }
 0xaf0   : > { %vm17256_vm8 = vcmp.le.f32.partialorder %v18263_v4, 0.7853982  ;;  %v17262_v30 = vsel %vm3726_vm13, nan, %v3736_v17  ;;  %11009 = vsinq.f32 %v4554_v26  ;;  %v4559_v59 = vadd.s32 3, %v4555_v9 }
 0xaf1   : > { %v4863_v53 = vsel %vm4780_vm14, %v4862_v47, %v4861_v55  ;;  %v5065_v57 = vor.u32 4788187, %v5064_v21  ;;  %v5068_v40 = vcvt.s32.f32 %v5061_v51  ;;  %v4948_v11 = vsub.s32 0, %v17251_v42 }
 0xaf2   : > { %11011 = vcosq.f32 %v4658_v35  ;;  %v4762_v31 = vsel %vm17245_vm4, %v16764_v46, %v4759_v20  ;;  %v17273_v52 = vsel %vm4350_vm1, nan, %v17009_v2  ;;  %v17277_v49 = vsel %vm4454_vm7, nan, %v4464_v50  ;;  %v18266_v2 = vld [vmem:[#allocation60_spill] sm:$0xff]  ;;  %v7717_v50 = vpop.f32.mrb[127].mxu0 }
 0xaf3   : > { %v5066_v14 = vand.u32 2147483647, %v5065_v57  ;;  %v9479_v28 = vmin.u32 %v4948_v11, %v17251_v42  ;;  %v4657_v32 = vsel %vm4572_vm9, %v4656_v3, %v16624_v7  ;;  %v4760_v6 = vsub.s32 4, %v16925_v54 }
 0xaf4   : > { %11013 = vsinq.f32 %v4658_v35  ;;  %v4866_v36 = vsel %vm17256_vm8, %v16775_v18, %v4863_v53  ;;  %v5091_v44 = vpack.c.bf16 %v18266_v2, %v17262_v30  ;;  %v17289_v29 = vand.u32 3, %v4559_v59 }
 0xaf5   : > { %11015 = vcosq.f32 %v4762_v31  ;;  %vm4988_vm12 = vcmp.lt.s32.totalorder %v16910_v23, 0  ;;  %v5069_v62 = vmul.f32 %v5068_v40, %v5066_v14  ;;  %v4950_v5 = vclz %v9479_v28  ;;  %v7800_v28 = vld [vmem:[%s17714_s21] sm:$0x3] }
 0xaf6   : > { %11017 = vsinq.f32 %v4762_v31  ;;  %v18267_v7 = vand.u32 2147483647, %v16910_v23  ;;  %v4659_v38 = vsel %vm17183_vm0, 0, %v4657_v32  ;;  %v4864_v43 = vsub.s32 4, %v17018_v33 }
 0xaf7   : > { %v7712_v45 = vadd.f32 %v7711_v13, %v18245_v16  ;;  %vm8430_vm15 = vcmask 195584   ;;  %11019 = vcosq.f32 %v4866_v36  ;;  %v9480_v22 = vadd.s32 4294967294, %v4950_v5 }
 0xaf8   : > { %vm17294_vm9 = vcmp.le.f32.partialorder %v18267_v7, 0.7853982  ;;  %v4761_v26 = vsel %vm4676_vm5, %v4760_v6, %v16925_v54  ;;  %v11008_v37 = vpop.eup %11007  ;;  %v7714_v56 = vadd.f32 %v7713_v8, %v16226_v39  ;;  %11021 = vsinq.f32 %v4866_v36 }
 0xaf9   : > { %v5070_v17 = vxor.u32 2147483648, %v5069_v62  ;;  %vm4562_vm0 = vcmp.eq.s32.totalorder %v17289_v29, 0  ;;  %v7716_v60 = vadd.f32 %v7715_v58, %v18245_v16  ;;  %v4938_v9 = vadd.s32 %v17167_v48, %v17174_v34 }
 0xafa   : > { %vm9481_vm11 = vcmp.lt.s32.totalorder %v9480_v22, 0  ;;  %v4663_v47 = vadd.s32 3, %v4659_v38  ;;  %v11010_v15 = vpop.eup %11009  ;;  %v7718_v1 = vadd.f32 %v7717_v50, %v16226_v39  ;;  %v4763_v10 = vsel %vm17245_vm4, 0, %v4761_v26  ;;  %v18273_v26 = vld [vmem:[#allocation54_spill] sm:$0xff] }
 0xafb   : > { %v4953_v54 = vsel %vm9481_vm11, 0, %v9480_v22  ;;  %v4865_v35 = vsel %vm4780_vm14, %v4864_v43, %v17018_v33  ;;  %v7748_v25 = vmax.f32 %v7712_v45, 0.0  ;;  %v7750_v20 = vmax.f32 %v7716_v60, 0.0 }
 0xafc   : > { %v4954_v16 = vsub.s32 32, %v4953_v54  ;;  %v4955_v51 = vshll.u32 %v17251_v42, %v4953_v54  ;;  %v17317_v21 = vpop.eup %11011  ;;  %v7749_v48 = vmax.f32 %v7714_v56, 0.0  ;;  %v7751_v34 = vmax.f32 %v7718_v1, 0.0 }
 0xafd   : > { %v5071_v39 = vsel %vm4988_vm12, %v5070_v17, %v5069_v62  ;;  %v4958_v3 = vsub.s32 4294967266, %v4953_v54  ;;  %v7766_v4 = vpack.c.bf16 %v7750_v20, %v7748_v25  ;;  %v4563_v59 = vxor.u32 2147483648, %v11010_v15 }
 0xafe   : > { %v4956_v0 = vshrl.u32 %v4938_v9, %v4954_v16  ;;  %v4566_v53 = vxor.u32 2147483648, %v11008_v37  ;;  %v17321_v57 = vpop.eup %11013  ;;  %v7767_v33 = vpack.c.bf16 %v7751_v34, %v7749_v48  ;;  %vm4565_vm13 = vcmp.eq.s32.totalorder %v17289_v29, 2 }
 0xaff   : > { %v4959_v40 = vadd.s32 127, %v4958_v3  ;;  %v4767_v11 = vadd.s32 3, %v4763_v10  ;;  %v17324_v42 = vpop.eup %11015  ;;  %v5074_v31 = vsel %vm17294_vm9, %v16910_v23, %v5071_v39  ;;  %v4867_v32 = vsel %vm17256_vm8, 0, %v4865_v35  ;;  %v8006_v10 = vpop.f32.mrb[128].mxu0 }
 0xb00   : > { %v4957_v14 = vor.u32 %v4956_v0, %v4955_v51  ;;  %v5072_v6 = vsub.s32 4, %v17150_v41  ;;  %v17335_v36 = vpop.eup %11017  ;;  %8074 = vmatprep.mubr.bf16.mxu0 %v7767_v33  ;;  %v18270_v62 = vand.u32 2147483647, %v16961_v24  ;;  %vm4884_vm10 = vcmp.lt.s32.totalorder %v16961_v24, 0 }
 0xb01   : > { %v4960_v13 = vshll.u32 %v4959_v40, 23  ;;  %v17344_v7 = vand.u32 3, %v4663_v47  ;;  %v17346_v38 = vpop.eup %11019  ;;  %8075 = vmatmul.mubr.bf16.gmra.mrb[156].mxu0 %v7766_v4  ;;  %v17350_v61 = vsel %vm4562_vm0, %v11008_v37, %v4563_v59  ;;  %v17354_v43 = vsel %vm4565_vm13, %v4566_v53, %v11010_v15  ;;  %v18275_v37 = vld [vmem:[#allocation48_spill] sm:$0xff] }
 0xb02   : > { %vm17339_vm3 = vcmp.le.f32.partialorder %v18270_v62, 0.7853982  ;;  %v4667_v45 = vxor.u32 2147483648, %v17321_v57  ;;  %v4670_v8 = vxor.u32 2147483648, %v17317_v21  ;;  %v11022_v22 = vpop.eup %11021  ;;  %v18274_v56 = vpack.c.bf16 %v16719_v19, %v18273_v26  ;;  %v18276_v19 = vld [vmem:[#allocation51_spill] sm:$0xff] }
 0xb03   : > { %11023 = vcosq.f32 %v5074_v31  ;;  %v4961_v58 = vor.u32 4788187, %v4960_v13  ;;  %v4964_v17 = vcvt.s32.f32 %v4957_v14  ;;  %v4871_v60 = vadd.s32 3, %v4867_v32 }
 0xb04   : > { %9926 = vmatprep.mubr.msk.bf16.mxu0 %vm8430_vm15, %v18274_v56  ;;  %11025 = vsinq.f32 %v5074_v31  ;;  %v17363_v50 = vrot.slane %v7800_v28, %v18275_v37  ;;  %v17365_v9 = vand.u32 3, %v4767_v11  ;;  %v5073_v47 = vsel %vm4988_vm12, %v5072_v6, %v17150_v41  ;;  %v8008_v41 = vpop.f32.mrb[129].mxu0  ;;  %v18277_v11 = vld [vmem:[#allocation67_spill] sm:$0xff]  ;;  %v18278_v31 = vld [vmem:[#allocation50_spill] sm:$0xff] }
 0xb05   : > { %v4962_v15 = vand.u32 2147483647, %v4961_v58  ;;  %vm4561_vm1 = vcmp.lt.s32.totalorder %v17289_v29, 2  ;;  %vm4666_vm2 = vcmp.eq.s32.totalorder %v17344_v7, 0  ;;  %v17373_v1 = vrot.slane %v7800_v28, %v18276_v19  ;;  %v8010_v39 = vpop.f32.mrb[130].mxu0  ;;  %v18280_v58 = vld [vmem:[#allocation62_spill] sm:$0xff] }
 0xb06   : > { %v4968_v54 = vsub.s32 4, %v17228_v63  ;;  %vm4665_vm5 = vcmp.lt.s32.totalorder %v17344_v7, 2  ;;  %v4771_v35 = vxor.u32 2147483648, %v17335_v36  ;;  %v4774_v25 = vxor.u32 2147483648, %v17324_v42  ;;  %v8012_v59 = vpop.f32.mrb[131].mxu0 }
 0xb07   : > { %v4875_v20 = vxor.u32 2147483648, %v11022_v22  ;;  %v4965_v16 = vmul.f32 %v4964_v17, %v4962_v15  ;;  %vm4669_vm7 = vcmp.eq.s32.totalorder %v17344_v7, 2  ;;  %v4872_v51 = vand.u32 3, %v4871_v60  ;;  %v18281_v17 = vld [vmem:[#allocation66_spill] sm:$0xff] }
 0xb08   : > { %v5075_v48 = vsel %vm17294_vm9, 0, %v5073_v47  ;;  %v4668_v34 = vsel %vm4666_vm2, %v17317_v21, %v4667_v45  ;;  %vm4769_vm6 = vcmp.lt.s32.totalorder %v17365_v9, 2  ;;  %vm4770_vm14 = vcmp.eq.s32.totalorder %v17365_v9, 0 }
 0xb09   : > { %vm4773_vm4 = vcmp.eq.s32.totalorder %v17365_v9, 2  ;;  %v4966_v3 = vxor.u32 2147483648, %v4965_v16  ;;  %v8007_v4 = vadd.f32 %v8006_v10, %v17363_v50  ;;  %v8011_v0 = vadd.f32 %v8010_v39, %v17363_v50  ;;  %9927 = vmatmul.mubr.msk.bf16.vlgmr.msra.gmra.mrb[160].mxu0 %vm8430_vm15, %v5091_v44 }
 0xb0a   : > { %v4969_v55 = vsel %vm4884_vm10, %v4968_v54, %v17228_v63  ;;  %v8009_v21 = vadd.f32 %v8008_v41, %v17373_v1  ;;  %v4878_v53 = vxor.u32 2147483648, %v17346_v38  ;;  %v8013_v33 = vadd.f32 %v8012_v59, %v17373_v1 }
 0xb0b   : > { %v5079_v40 = vadd.s32 3, %v5075_v48  ;;  %v18279_v14 = vpack.c.bf16 %v18277_v11, %v18278_v31  ;;  %v4967_v63 = vsel %vm4884_vm10, %v4966_v3, %v4965_v16  ;;  %v8085_v28 = vpack.c.bf16 %v8011_v0, %v8007_v4 }
 0xb0c   : > { %vm4874_vm8 = vcmp.eq.s32.totalorder %v4872_v51, 0  ;;  %vm4877_vm12 = vcmp.eq.s32.totalorder %v4872_v51, 2  ;;  %v4970_v30 = vsel %vm17339_vm3, %v16961_v24, %v4967_v63  ;;  %v4671_v2 = vsel %vm4669_vm7, %v4670_v8, %v17321_v57 }
 0xb0d   : > { %9930 = vmatprep.mubr.msk.bf16.mxu0 %vm8430_vm15, %v18279_v14  ;;  %v8086_v44 = vpack.c.bf16 %v8013_v33, %v8009_v21  ;;  %v4971_v32 = vsel %vm17339_vm3, 0, %v4969_v55  ;;  %v11024_v6 = vpop.eup %11023  ;;  %11027 = vcosq.f32 %v4970_v30  ;;  %v4772_v62 = vsel %vm4770_vm14, %v17324_v42, %v4771_v35 }
 0xb0e   : > { %v4775_v13 = vsel %vm4773_vm4, %v4774_v25, %v17335_v36  ;;  %vm4873_vm9 = vcmp.lt.s32.totalorder %v4872_v51, 2  ;;  %v11026_v45 = vpop.eup %11025  ;;  %11029 = vsinq.f32 %v4970_v30  ;;  %v4876_v26 = vsel %vm4874_vm8, %v17346_v38, %v4875_v20 }
 0xb0f   : > { %v4879_v57 = vsel %vm4877_vm12, %v4878_v53, %v11022_v22  ;;  %8337 = vmatprep.mubr.bf16.mxu1 %v8086_v44  ;;  %v5080_v8 = vand.u32 3, %v5079_v40  ;;  %v5094_v5 = vpack.c.bf16 %v17277_v49, %v17273_v52  ;;  %vm4558_vm0 = vweird.f32 %v18247_v12  ;;  %v8016_v25 = vpop.f32.mrb[132].mxu0 }
 0xb10   : > { %vm4662_vm11 = vweird.f32 %v18248_v27  ;;  %8338 = vmatmul.mubr.bf16.vlgmr.msra.gmra.mrb[96].mxu1 %v8085_v28  ;;  %v4975_v42 = vadd.s32 3, %v4971_v32  ;;  %v4568_v36 = vsel %vm4561_vm1, %v17350_v61, %v17354_v43  ;;  %v4672_v38 = vsel %vm4665_vm5, %v4668_v34, %v4671_v2  ;;  %v8018_v20 = vpop.f32.mrb[133].mxu0 }
 0xb11   : > { %vm4766_vm13 = vweird.f32 %v16764_v46  ;;  %vm4870_vm3 = vweird.f32 %v16775_v18  ;;  %v4776_v52 = vsel %vm4769_vm6, %v4772_v62, %v4775_v13  ;;  %v4880_v49 = vsel %vm4873_vm9, %v4876_v26, %v4879_v57  ;;  %v8020_v41 = vpop.f32.mrb[134].mxu0 }
 0xb12   : > { %v5083_v22 = vxor.u32 2147483648, %v11026_v45  ;;  %v5086_v56 = vxor.u32 2147483648, %v11024_v6  ;;  %v18282_v60 = vpack.c.bf16 %v18280_v58, %v18281_v17  ;;  %vm5082_vm10 = vcmp.eq.s32.totalorder %v5080_v8, 0 }
 0xb13   : > { %vm5085_vm1 = vcmp.eq.s32.totalorder %v5080_v8, 2  ;;  %v4569_v46 = vsel %vm4558_vm0, nan, %v4568_v36  ;;  %v4673_v18 = vsel %vm4662_vm11, nan, %v4672_v38  ;;  %v4976_v29 = vand.u32 3, %v4975_v42 }
 0xb14   : > { %9931 = vmatmul.mubr.msk.bf16.gmra.mrb[164].mxu0 %vm8430_vm15, %v18282_v60  ;;  %v4777_v7 = vsel %vm4766_vm13, nan, %v4776_v52  ;;  %v4881_v61 = vsel %vm4870_vm3, nan, %v4880_v49  ;;  %vm5081_vm2 = vcmp.lt.s32.totalorder %v5080_v8, 2  ;;  %v5084_v43 = vsel %vm5082_vm10, %v11024_v6, %v5083_v22 }
 0xb15   : > { %9934 = vmatprep.mubr.msk.bf16.mxu0 %vm8430_vm15, %v5094_v5  ;;  %v5087_v9 = vsel %vm5085_vm1, %v5086_v56, %v11026_v45  ;;  %v5095_v47 = vpack.c.bf16 %v4673_v18, %v4569_v46  ;;  %v5096_v54 = vpack.c.bf16 %v4881_v61, %v4777_v7  ;;  %vm4981_vm5 = vcmp.eq.s32.totalorder %v4976_v29, 2 }
 0xb16   : > { %vm4978_vm7 = vcmp.eq.s32.totalorder %v4976_v29, 0  ;;  %vm5078_vm6 = vweird.f32 %v16910_v23  ;;  %v5088_v12 = vsel %vm5081_vm2, %v5084_v43, %v5087_v9  ;;  %vm4977_vm14 = vcmp.lt.s32.totalorder %v4976_v29, 2  ;;  %v8022_v23 = vpop.f32.mrb[135].mxu0 }
 0xb17   : > { %v11028_v15 = vpop.eup %11027  ;;  %vm4974_vm4 = vweird.f32 %v16961_v24  ;;  %v5089_v48 = vsel %vm5078_vm6, nan, %v5088_v12  ;;  %v8017_v34 = vadd.f32 %v8016_v25, %v17363_v50  ;;  %v8021_v39 = vadd.f32 %v8020_v41, %v17363_v50  ;;  %v8026_v53 = vpop.f32.mrb[136].mxu0  ;;  %v10897_v12 = vld [vmem:[%s18284_s13 + $0x10] sm:$0xff]   ;;  %v10898_v25 = vld [vmem:[%s18284_s13 + $0x18] sm:$0xff]  }
 0xb18   : > { %v11030_v10 = vpop.eup %11029  ;;  %v4982_v35 = vxor.u32 2147483648, %v11028_v15  ;;  %v8019_v4 = vadd.f32 %v8018_v20, %v17373_v1  ;;  %v8023_v0 = vadd.f32 %v8022_v23, %v17373_v1  ;;  %v8028_v33 = vpop.f32.mrb[137].mxu0  ;;  %v8027_v11 = vadd.f32 %v8026_v53, %v17363_v50  ;;  %v10900_v20 = vld [vmem:[%s18284_s13 + $0x28] sm:$0xff]   ;;  %v10902_v41 = vld [vmem:[%s18284_s13 + $0x38] sm:$0xff]  }
 0xb19   : > { %v4979_v27 = vxor.u32 2147483648, %v11030_v10  ;;  %v8087_v55 = vpack.c.bf16 %v8021_v39, %v8017_v34  ;;  %v8030_v40 = vpop.f32.mrb[138].mxu0  ;;  %v8029_v63 = vadd.f32 %v8028_v33, %v17373_v1 }
 0xb1a   : > { %v4983_v16 = vsel %vm4981_vm5, %v4982_v35, %v11030_v10  ;;  %v8088_v24 = vpack.c.bf16 %v8023_v0, %v8019_v4  ;;  %v8031_v31 = vadd.f32 %v8030_v40, %v17363_v50  ;;  %v8032_v14 = vpop.f32.mrb[139].mxu0  ;;  %v10895_v10 = vld [vmem:[%s18283_s4] sm:$0xff]   ;;  %v10896_v35 = vld [vmem:[%s18284_s13 + $0x8] sm:$0xff]   ;;  %s11591_s4 = scalar_lea.vmem %s17646_s29, 1024 }
 0xb1b   : > { %v4980_v51 = vsel %vm4978_vm7, %v11028_v15, %v4979_v27  ;;  %v8033_v28 = vadd.f32 %v8032_v14, %v17373_v1  ;;  %9942 = vmatprep.subr.bf16.mxu1 %v10895_v10  ;;  %v10899_v27 = vld [vmem:[%s18284_s13 + $0x20] sm:$0xff]   ;;  %p11592_p12 = scmp.ne.s32.totalorder %s17646_s29, %s11591_s4 }
 0xb1c   : > { %9935 = vmatmul.mubr.msk.bf16.gmra.mrb[168].mxu0 %vm8430_vm15, %v5095_v47  ;;  %v4984_v3 = vsel %vm4977_vm14, %v4980_v51, %v4983_v16  ;;  %8347 = vmatprep.mubr.bf16.mxu1 %v8088_v24  ;;  %v8089_v30 = vpack.c.bf16 %v8031_v31, %v8027_v11  ;;  %v10901_v16 = vld [vmem:[%s18284_s13 + $0x30] sm:$0xff]  }
 0xb1d   : > { %9938 = vmatprep.mubr.msk.bf16.mxu0 %vm8430_vm15, %v5096_v54  ;;  %v4985_v59 = vsel %vm4974_vm4, nan, %v4984_v3  ;;  %8348 = vmatmul.mubr.bf16.gmra.mrb[100].mxu1 %v8087_v55  ;;  %v8090_v2 = vpack.c.bf16 %v8033_v28, %v8029_v63  ;;  %p11593_p2 = pnand %p11592_p12, %p18291_p10 }
 0xb1e   : > { %v5097_v21 = vpack.c.bf16 %v5089_v48, %v4985_v59  ;;  %9943 = vmatpush3.bf16.msra.mxu1 %v10895_v10 }
 0xb1f   : > { %8357 = vmatprep.mubr.bf16.mxu1 %v8090_v2  ;;  %v8036_v44 = vpop.f32.mrb[140].mxu0  ;;  %9944 = vmatprep.subr.bf16.mxu1 %v10896_v35  ;;  %p11594_p3 = pneg %p11593_p2 }
 0xb20   : > { %v8038_v32 = vpop.f32.mrb[141].mxu0  ;;  %v8037_v62 = vadd.f32 %v8036_v44, %v17363_v50 }
 0xb21   : > { %v8040_v6 = vpop.f32.mrb[142].mxu0  ;;  %v8039_v26 = vadd.f32 %v8038_v32, %v17373_v1 }
 0xb22   : > { %v8041_v13 = vadd.f32 %v8040_v6, %v17363_v50  ;;  %v8042_v45 = vpop.f32.mrb[143].mxu0  ;;  %9945 = vmatpush3.bf16.msra.mxu1 %v10896_v35 }
 0xb23   : > { %v8043_v57 = vadd.f32 %v8042_v45, %v17373_v1  ;;  %9946 = vmatprep.subr.bf16.mxu1 %v10897_v12 }
 0xb24   : > { %9939 = vmatmul.mubr.msk.bf16.gmra.mrb[172].mxu0 %vm8430_vm15, %v5097_v21  ;;  %v8091_v8 = vpack.c.bf16 %v8041_v13, %v8037_v62 }
 0xb25   : > { %8358 = vmatmul.mubr.bf16.gmra.mrb[104].mxu1 %v8089_v30  ;;  %v8092_v5 = vpack.c.bf16 %v8043_v57, %v8039_v26  ;;  %v8133_v30 = vld [vmem:[%s18285_s11] sm:$0x3]  ;;  %s11721_s11 = smov [#allocation29]  }
 0xb26   : > { %9947 = vmatpush3.bf16.msra.mxu1 %v10897_v12  ;;  %v17504_v6 = vrot.slane %v8133_v30, %v18275_v37  ;;  %v17507_v62 = vrot.slane %v8133_v30, %v18276_v19  ;;  %s11595_s10 = sshll.u32 %s11721_s11, 4  ;;  %s11596_s10 = int_to_ptr.vmem [resolvable:$false] %s11595_s10 }
 0xb27   : > { %8367 = vmatprep.mubr.bf16.mxu1 %v8092_v5  ;;  %v8046_v42 = vpop.f32.mrb[144].mxu0  ;;  %9948 = vmatprep.subr.bf16.mxu1 %v10898_v25  ;;  %s11597_s5 = scalar_lea.vmem %s11596_s10, 2048  ;;  %p11598_p4 = scmp.lt.s32.totalorder %s17646_s29, %s11596_s10 }
 0xb28   : > { %v8048_v36 = vpop.f32.mrb[145].mxu0  ;;  %v8047_v52 = vadd.f32 %v8046_v42, %v17363_v50  ;;  %p11599_p7 = scmp.lt.s32.totalorder %s11597_s5, %s11591_s4 }
 0xb29   : > { %v8050_v38 = vpop.f32.mrb[146].mxu0  ;;  %v8049_v56 = vadd.f32 %v8048_v36, %v17373_v1 }
 0xb2a   : > { %v8051_v49 = vadd.f32 %v8050_v38, %v17363_v50  ;;  %v8052_v22 = vpop.f32.mrb[147].mxu0  ;;  %9949 = vmatpush3.bf16.msra.mxu1 %v10898_v25  ;;  %p11600_p8 = por %p11599_p7, %p11598_p4 }
 0xb2b   : > { %v8053_v58 = vadd.f32 %v8052_v22, %v17373_v1  ;;  %9950 = vmatprep.subr.bf16.mxu1 %v10899_v27 }
 0xb2c   : > { %v8093_v17 = vpack.c.bf16 %v8051_v49, %v8047_v52  ;;  %p11601_p11 = pnand %p11600_p8, %p11594_p3 }
 0xb2d   : > { %8368 = vmatmul.mubr.bf16.gmra.mrb[108].mxu1 %v8091_v8  ;;  %v8094_v60 = vpack.c.bf16 %v8053_v58, %v8049_v56 }
 0xb2e   : > { %9951 = vmatpush3.bf16.msra.mxu1 %v10899_v27 }
 0xb2f   : > { %8377 = vmatprep.mubr.bf16.mxu1 %v8094_v60  ;;  %9952 = vmatprep.subr.bf16.mxu1 %v10900_v20 }
 0xb32   : > { %9953 = vmatpush3.bf16.msra.mxu1 %v10900_v20 }
 0xb33   : > { %9954 = vmatprep.subr.bf16.mxu1 %v10901_v16 }
 0xb35   : > { %8378 = vmatmul.mubr.bf16.gmra.mrb[112].mxu1 %v8093_v17 }
 0xb36   : > { %9955 = vmatpush3.bf16.msra.mxu1 %v10901_v16 }
 0xb37   : > { %9956 = vmatprep.subr.bf16.mxu1 %v10902_v41 }
 0xb3a   : > { %9957 = vmatpush3.bf16.msra.mxu1 %v10902_v41 }
 0xb53   : > { %v8056_v46 = vpop.f32.mrb[148].mxu0 }
 0xb54   : > { %v8058_v18 = vpop.f32.mrb[149].mxu0  ;;  %v8057_v7 = vadd.f32 %v8056_v46, %v17363_v50 }
 0xb55   : > { %v8060_v29 = vpop.f32.mrb[150].mxu0  ;;  %v8059_v9 = vadd.f32 %v8058_v18, %v17373_v1 }
 0xb56   : > { %v8061_v61 = vadd.f32 %v8060_v29, %v17363_v50  ;;  %v8062_v43 = vpop.f32.mrb[151].mxu0 }
 0xb57   : > { %v8063_v47 = vadd.f32 %v8062_v43, %v17373_v1 }
 0xb58   : > { %v8095_v15 = vpack.c.bf16 %v8061_v61, %v8057_v7 }
 0xb59   : > { %v8096_v54 = vpack.c.bf16 %v8063_v47, %v8059_v9 }
 0xb5b   : > { %8387 = vmatprep.mubr.bf16.mxu1 %v8096_v54 }
 0xb5c   : > { %8388 = vmatmul.mubr.bf16.gmra.mrb[116].mxu1 %v8095_v15 }
 0xba1   : > { %v8066_v51 = vpop.f32.mrb[152].mxu0 }
 0xba2   : > { %v8068_v48 = vpop.f32.mrb[153].mxu0  ;;  %v8067_v39 = vadd.f32 %v8066_v51, %v17363_v50 }
 0xba3   : > { %v8070_v34 = vpop.f32.mrb[154].mxu0  ;;  %v8069_v4 = vadd.f32 %v8068_v48, %v17373_v1 }
 0xba4   : > { %v8071_v23 = vadd.f32 %v8070_v34, %v17363_v50  ;;  %v8072_v3 = vpop.f32.mrb[155].mxu0 }
 0xba5   : > { %v8073_v0 = vadd.f32 %v8072_v3, %v17373_v1 }
 0xba6   : > { %v8097_v59 = vpack.c.bf16 %v8071_v23, %v8067_v39 }
 0xba7   : > { %v8098_v55 = vpack.c.bf16 %v8073_v0, %v8069_v4 }
 0xba9   : > { %8397 = vmatprep.mubr.bf16.mxu1 %v8098_v55 }
 0xbaa   : > { %8398 = vmatmul.mubr.bf16.gmra.mrb[120].mxu1 %v8097_v59 }
 0xbd4   : > { %v8076_v21 = vpop.f32.mrb[156].mxu0 }
 0xbd5   : > { %v8078_v24 = vpop.f32.mrb[157].mxu0  ;;  %v8077_v33 = vadd.f32 %v8076_v21, %v17363_v50 }
 0xbd6   : > { %v8080_v53 = vpop.f32.mrb[158].mxu0  ;;  %v8079_v31 = vadd.f32 %v8078_v24, %v17373_v1 }
 0xbd7   : > { %v8081_v40 = vadd.f32 %v8080_v53, %v17363_v50  ;;  %v8082_v11 = vpop.f32.mrb[159].mxu0 }
 0xbd8   : > { %v8083_v14 = vadd.f32 %v8082_v11, %v17373_v1 }
 0xbd9   : > { %v8099_v63 = vpack.c.bf16 %v8081_v40, %v8077_v33 }
 0xbda   : > { %v8100_v28 = vpack.c.bf16 %v8083_v14, %v8079_v31 }
 0xbdc   : > { %8407 = vmatprep.mubr.bf16.mxu1 %v8100_v28  ;;  %v9928_v2 = vpop.f32.mrb[160].mxu0 }
 0xbdd   : > { %8408 = vmatmul.mubr.bf16.gmra.mrb[124].mxu1 %v8099_v63  ;;  %v8493_v44 = vpop.f32.mrb[161].mxu0 }
 0xbde   : > { %v9929_v32 = vpop.f32.mrb[162].mxu0 }
 0xbdf   : > { %v8496_v50 = vpop.f32.mrb[163].mxu0 }
 0xbe3   : > { %v8339_v13 = vpop.f32.mrb[96].mxu1 }
 0xbe4   : > { %v8340_v1 = vadd.f32 %v8339_v13, %v17504_v6  ;;  %v8341_v45 = vpop.f32.mrb[97].mxu1 }
 0xbe5   : > { %v8342_v26 = vadd.f32 %v8341_v45, %v17507_v62  ;;  %v8343_v57 = vpop.f32.mrb[98].mxu1 }
 0xbe6   : > { %v8556_v5 = vadd.f32 %v8493_v44, %v8340_v1  ;;  %v8344_v42 = vadd.f32 %v8343_v57, %v17504_v6  ;;  %v8345_v36 = vpop.f32.mrb[99].mxu1 }
 0xbe7   : > { %v17511_v8 = vpop.f32.mrb[164].mxu0  ;;  %v8346_v37 = vadd.f32 %v8345_v36, %v17507_v62  ;;  %v8863_v22 = vmax.f32 %v8342_v26, 0.0 }
 0xbe8   : > { %v8509_v38 = vpop.f32.mrb[165].mxu0  ;;  %v8557_v19 = vadd.f32 %v8496_v50, %v8344_v42  ;;  %v8572_v58 = vmax.f32 %v8556_v5, 0.0 }
 0xbe9   : > { %v17515_v52 = vpop.f32.mrb[166].mxu0  ;;  %v8864_v56 = vmax.f32 %v8346_v37, 0.0 }
 0xbea   : > { %v8512_v49 = vpop.f32.mrb[167].mxu0  ;;  %v8573_v17 = vmax.f32 %v8557_v19, 0.0 }
 0xbeb   : > { %v10444_v60 = vpack.i.bf16 %v8864_v56, %v8863_v22 }
 0xbec   : > { %v8588_v46 = vpack.c.bf16 %v8573_v17, %v8572_v58 }
 0xbed   : > { %10445 = vperm.xlu1 %10443, %v10444_v60  }
 0xbee   : > { %9958 = vmatprep.mubr.bf16.mxu1 %v8588_v46 }
 0xbef   : > { %v17517_v18 = vpop.f32.mrb[168].mxu0 }
 0xbf0   : > { %v17519_v29 = vpop.f32.mrb[169].mxu0  ;;  %v8349_v43 = vpop.f32.mrb[100].mxu1 }
 0xbf1   : > { %v17521_v7 = vpop.f32.mrb[170].mxu0  ;;  %v8350_v47 = vadd.f32 %v8349_v43, %v17504_v6  ;;  %v8351_v15 = vpop.f32.mrb[101].mxu1 }
 0xbf2   : > { %v17523_v61 = vpop.f32.mrb[171].mxu0  ;;  %v8352_v10 = vadd.f32 %v8351_v15, %v17507_v62  ;;  %v8353_v35 = vpop.f32.mrb[102].mxu1 }
 0xbf3   : > { %v8558_v25 = vadd.f32 %v9928_v2, %v8350_v47  ;;  %v8354_v27 = vadd.f32 %v8353_v35, %v17504_v6  ;;  %v8355_v20 = vpop.f32.mrb[103].mxu1 }
 0xbf4   : > { %v8356_v41 = vadd.f32 %v8355_v20, %v17507_v62  ;;  %v8865_v48 = vmax.f32 %v8352_v10, 0.0 }
 0xbf5   : > { %v8559_v51 = vadd.f32 %v9929_v32, %v8354_v27  ;;  %v8574_v39 = vmax.f32 %v8558_v25, 0.0 }
 0xbf6   : > { %v8866_v34 = vmax.f32 %v8356_v41, 0.0 }
 0xbf7   : > { %v17525_v9 = vpop.f32.mrb[172].mxu0  ;;  %v8575_v23 = vmax.f32 %v8559_v51, 0.0 }
 0xbf8   : > { %v17528_v54 = vpop.f32.mrb[173].mxu0  ;;  %v10450_v3 = vpack.i.bf16 %v8866_v34, %v8865_v48  ;;  %v8359_v4 = vpop.f32.mrb[104].mxu1 }
 0xbf9   : > { %v17531_v12 = vpop.f32.mrb[174].mxu0  ;;  %v8589_v0 = vpack.c.bf16 %v8575_v23, %v8574_v39  ;;  %v8360_v59 = vadd.f32 %v8359_v4, %v17504_v6  ;;  %v8361_v55 = vpop.f32.mrb[105].mxu1 }
 0xbfa   : > { %v17534_v16 = vpop.f32.mrb[175].mxu0  ;;  %10451 = vperm.xlu0 %10449, %v10450_v3   ;;  %v8362_v21 = vadd.f32 %v8361_v55, %v17507_v62  ;;  %v8363_v24 = vpop.f32.mrb[106].mxu1 }
 0xbfb   : > { %9959 = vmatmul.mubr.bf16.vlgmr.msra.gmra.mrb[128].mxu1 %v8589_v0  ;;  %v8560_v53 = vadd.f32 %v8509_v38, %v8360_v59  ;;  %v8364_v33 = vadd.f32 %v8363_v24, %v17504_v6  ;;  %v8365_v40 = vpop.f32.mrb[107].mxu1 }
 0xbfc   : > { %v8366_v11 = vadd.f32 %v8365_v40, %v17507_v62  ;;  %v8867_v14 = vmax.f32 %v8362_v21, 0.0 }
 0xbfd   : > { %v8561_v31 = vadd.f32 %v8512_v49, %v8364_v33  ;;  %v8576_v28 = vmax.f32 %v8560_v53, 0.0 }
 0xbfe   : > { %v8868_v63 = vmax.f32 %v8366_v11, 0.0 }
 0xbff   : > { %v8577_v30 = vmax.f32 %v8561_v31, 0.0 }
 0xc00   : > { %v10455_v2 = vpack.i.bf16 %v8868_v63, %v8867_v14  ;;  %v8369_v44 = vpop.f32.mrb[108].mxu1 }
 0xc01   : > { %v8590_v32 = vpack.c.bf16 %v8577_v30, %v8576_v28  ;;  %v8370_v50 = vadd.f32 %v8369_v44, %v17504_v6  ;;  %v8371_v13 = vpop.f32.mrb[109].mxu1 }
 0xc02   : > { %10456 = vperm.xlu1 %10443, %v10455_v2   ;;  %v8372_v1 = vadd.f32 %v8371_v13, %v17507_v62  ;;  %v8373_v45 = vpop.f32.mrb[110].mxu1 }
 0xc03   : > { %9962 = vmatprep.mubr.bf16.mxu1 %v8590_v32  ;;  %v8562_v26 = vadd.f32 %v17511_v8, %v8370_v50  ;;  %v8374_v57 = vadd.f32 %v8373_v45, %v17504_v6  ;;  %v8375_v5 = vpop.f32.mrb[111].mxu1 }
 0xc04   : > { %v8376_v42 = vadd.f32 %v8375_v5, %v17507_v62  ;;  %v8869_v38 = vmax.f32 %v8372_v1, 0.0 }
 0xc05   : > { %v8563_v36 = vadd.f32 %v17515_v52, %v8374_v57  ;;  %v8578_v19 = vmax.f32 %v8562_v26, 0.0 }
 0xc06   : > { %v8870_v37 = vmax.f32 %v8376_v42, 0.0 }
 0xc07   : > { %v8579_v49 = vmax.f32 %v8563_v36, 0.0 }
 0xc08   : > { %v10460_v22 = vpack.i.bf16 %v8870_v37, %v8869_v38  ;;  %v8379_v56 = vpop.f32.mrb[112].mxu1 }
 0xc09   : > { %v8591_v58 = vpack.c.bf16 %v8579_v49, %v8578_v19  ;;  %v8380_v17 = vadd.f32 %v8379_v56, %v17504_v6  ;;  %v8381_v60 = vpop.f32.mrb[113].mxu1 }
 0xc0a   : > { %10461 = vperm.xlu1 %10443, %v10460_v22   ;;  %v8382_v8 = vadd.f32 %v8381_v60, %v17507_v62  ;;  %v8383_v46 = vpop.f32.mrb[114].mxu1 }
 0xc0b   : > { %9963 = vmatmul.mubr.bf16.gmra.mrb[132].mxu1 %v8591_v58  ;;  %v8564_v43 = vadd.f32 %v17519_v29, %v8380_v17  ;;  %v8384_v47 = vadd.f32 %v8383_v46, %v17504_v6  ;;  %v8385_v52 = vpop.f32.mrb[115].mxu1  ;;  %v17574_v46 = vld [vmem:[%s18286_s7] ss:$0 sm:$0xff] }
 0xc0c   : > { %v8386_v15 = vadd.f32 %v8385_v52, %v17507_v62  ;;  %v8871_v35 = vmax.f32 %v8382_v8, 0.0 }
 0xc0d   : > { %v8565_v10 = vadd.f32 %v17523_v61, %v8384_v47  ;;  %v8580_v27 = vmax.f32 %v8564_v43, 0.0 }
 0xc0e   : > { %v8872_v25 = vmax.f32 %v8386_v15, 0.0 }
 0xc0f   : > { %v8581_v20 = vmax.f32 %v8565_v10, 0.0 }
 0xc10   : > { %v10465_v41 = vpack.i.bf16 %v8872_v25, %v8871_v35 }
 0xc11   : > { %v8592_v51 = vpack.c.bf16 %v8581_v20, %v8580_v27 }
 0xc12   : > { %10466 = vperm.xlu0 %10449, %v10465_v41  }
 0xc13   : > { %9966 = vmatprep.mubr.bf16.mxu1 %v8592_v51 }
 0xc2f   : > { %v8389_v48 = vpop.f32.mrb[116].mxu1 }
 0xc30   : > { %v8390_v34 = vadd.f32 %v8389_v48, %v17504_v6  ;;  %v8391_v39 = vpop.f32.mrb[117].mxu1 }
 0xc31   : > { %v8392_v29 = vadd.f32 %v8391_v39, %v17507_v62  ;;  %v8393_v23 = vpop.f32.mrb[118].mxu1 }
 0xc32   : > { %v8566_v3 = vadd.f32 %v17517_v18, %v8390_v34  ;;  %v8394_v4 = vadd.f32 %v8393_v23, %v17504_v6  ;;  %v8395_v61 = vpop.f32.mrb[119].mxu1 }
 0xc33   : > { %v8396_v0 = vadd.f32 %v8395_v61, %v17507_v62  ;;  %v8873_v55 = vmax.f32 %v8392_v29, 0.0 }
 0xc34   : > { %v8567_v59 = vadd.f32 %v17521_v7, %v8394_v4  ;;  %v8582_v24 = vmax.f32 %v8566_v3, 0.0 }
 0xc35   : > { %v8874_v21 = vmax.f32 %v8396_v0, 0.0 }
 0xc36   : > { %v8583_v53 = vmax.f32 %v8567_v59, 0.0 }
 0xc37   : > { %v10470_v33 = vpack.i.bf16 %v8874_v21, %v8873_v55 }
 0xc38   : > { %v8593_v40 = vpack.c.bf16 %v8583_v53, %v8582_v24 }
 0xc39   : > { %10471 = vperm.xlu1 %10443, %v10470_v33  }
 0xc3a   : > { %9967 = vmatmul.mubr.bf16.gmra.mrb[136].mxu1 %v8593_v40 }
 0xc7d   : > { %v8399_v11 = vpop.f32.mrb[120].mxu1 }
 0xc7e   : > { %v8400_v31 = vadd.f32 %v8399_v11, %v17504_v6  ;;  %v8401_v14 = vpop.f32.mrb[121].mxu1 }
 0xc7f   : > { %v8402_v18 = vadd.f32 %v8401_v14, %v17507_v62  ;;  %v8403_v63 = vpop.f32.mrb[122].mxu1 }
 0xc80   : > { %v8568_v28 = vadd.f32 %v17528_v54, %v8400_v31  ;;  %v8404_v30 = vadd.f32 %v8403_v63, %v17504_v6  ;;  %v8405_v7 = vpop.f32.mrb[123].mxu1  ;;  %v18288_v31 = vlaneseq  ;;  %v10446_v63 = vpop.permute.xlu1 %10445 }
 0xc81   : > { %v8406_v2 = vadd.f32 %v8405_v7, %v17507_v62  ;;  %v8875_v32 = vmax.f32 %v8402_v18, 0.0  ;;  %v10452_v18 = vpop.permute.xlu0 %10451 }
 0xc82   : > { %v8569_v44 = vadd.f32 %v17534_v16, %v8404_v30  ;;  %v8584_v13 = vmax.f32 %v8568_v28, 0.0  ;;  %v17585_v14 = vand.u32 127, %v18288_v31  ;;  %v10454_v7 = vunpack.i.h.bf16 %v10452_v18 }
 0xc83   : > { %v8876_v50 = vmax.f32 %v8406_v2, 0.0  ;;  %v10453_v2 = vunpack.i.l.bf16 %v10452_v18 }
 0xc84   : > { %v8585_v1 = vmax.f32 %v8569_v44, 0.0  ;;  %vm8862_vm15 = vcmp.eq.s32.totalorder %v17585_v14, 3 }
 0xc85   : > { %v10475_v45 = vpack.i.bf16 %v8876_v50, %v8875_v32  ;;  %v10448_v32 = vunpack.i.h.bf16 %v10446_v63  ;;  %v10447_v50 = vunpack.i.l.bf16 %v10446_v63 }
 0xc86   : > { %v8594_v26 = vpack.c.bf16 %v8585_v1, %v8584_v13 }
 0xc87   : > { %10476 = vperm.xlu0 %10449, %v10475_v45  }
 0xc88   : > { %9970 = vmatprep.mubr.bf16.mxu1 %v8594_v26 }
 0xc91   : > { %v10467_v31 = vpop.permute.xlu0 %10466 }
 0xcb0   : > { %v8409_v57 = vpop.f32.mrb[124].mxu1 }
 0xcb1   : > { %v8410_v5 = vadd.f32 %v8409_v57, %v17504_v6  ;;  %v8411_v42 = vpop.f32.mrb[125].mxu1 }
 0xcb2   : > { %v8412_v54 = vadd.f32 %v8411_v42, %v17507_v62  ;;  %v8413_v36 = vpop.f32.mrb[126].mxu1 }
 0xcb3   : > { %v8570_v38 = vadd.f32 %v17525_v9, %v8410_v5  ;;  %v8414_v37 = vadd.f32 %v8413_v36, %v17504_v6  ;;  %v8415_v16 = vpop.f32.mrb[127].mxu1 }
 0xcb4   : > { %v8416_v19 = vadd.f32 %v8415_v16, %v17507_v62  ;;  %v8877_v22 = vmax.f32 %v8412_v54, 0.0 }
 0xcb5   : > { %v8571_v49 = vadd.f32 %v17531_v12, %v8414_v37  ;;  %v8586_v58 = vmax.f32 %v8570_v38, 0.0 }
 0xcb6   : > { %v8878_v56 = vmax.f32 %v8416_v19, 0.0 }
 0xcb7   : > { %v8587_v17 = vmax.f32 %v8571_v49, 0.0 }
 0xcb8   : > { %v10480_v60 = vpack.i.bf16 %v8878_v56, %v8877_v22  ;;  %v10457_v56 = vpop.permute.xlu1 %10456 }
 0xcb9   : > { %v8595_v8 = vpack.c.bf16 %v8587_v17, %v8586_v58 }
 0xcba   : > { %10481 = vperm.xlu1 %10443, %v10480_v60  }
 0xcbb   : > { %9971 = vmatmul.mubr.bf16.gmra.mrb[140].mxu1 %v8595_v8 }
 0xcbc   : > { %v10462_v58 = vpop.permute.xlu1 %10461 }
 0xcbd   : > { %v10464_v8 = vunpack.i.h.bf16 %v10462_v58 }
 0xcce   : > { %v9960_v9 = vpop.f32.mrb[128].mxu1 }
 0xccf   : > { %v8710_v6 = vadd.f32 %v9960_v9, %v17574_v46  ;;  %v8701_v43 = vpop.f32.mrb[129].mxu1  ;;  %v10463_v9 = vunpack.i.l.bf16 %v10462_v58 }
 0xcd0   : > { %v8702_v62 = vadd.f32 %v17574_v46, %v8701_v43  ;;  %v9961_v12 = vpop.f32.mrb[130].mxu1  ;;  %v10459_v43 = vunpack.i.h.bf16 %v10457_v56 }
 0xcd1   : > { %v9797_v47 = vmul.f32 -1.442695, %v8710_v6  ;;  %v8713_v52 = vadd.f32 %v9961_v12, %v17574_v46  ;;  %v8704_v15 = vpop.f32.mrb[131].mxu1 }
 0xcd2   : > { %v9795_v10 = vmul.f32 -1.442695, %v8702_v62  ;;  %v8705_v35 = vadd.f32 %v17574_v46, %v8704_v15  ;;  %v10458_v62 = vunpack.i.l.bf16 %v10457_v56 }
 0xcd3   : > { %11031 = vpow2.f32 %v9797_v47  ;;  %v9798_v25 = vmul.f32 -1.442695, %v8713_v52 }
 0xcd4   : > { %11033 = vpow2.f32 %v9795_v10  ;;  %v9796_v27 = vmul.f32 -1.442695, %v8705_v35 }
 0xcd5   : > { %11035 = vpow2.f32 %v9798_v25 }
 0xcd6   : > { %11037 = vpow2.f32 %v9796_v27 }
 0xcdd   : > { %v11032_v20 = vpop.eup %11031 }
 0xcde   : > { %v11034_v41 = vpop.eup %11033  ;;  %v8814_v51 = vadd.f32 1.0, %v11032_v20  ;;  %v9964_v48 = vpop.f32.mrb[132].mxu1 }
 0xcdf   : > { %v11036_v34 = vpop.eup %11035  ;;  %v8812_v39 = vadd.f32 1.0, %v11034_v41  ;;  %v8726_v29 = vadd.f32 %v9964_v48, %v17574_v46  ;;  %v8717_v23 = vpop.f32.mrb[133].mxu1 }
 0xce0   : > { %v11038_v3 = vpop.eup %11037  ;;  %11039 = vrcp.f32 %v8814_v51  ;;  %v8815_v4 = vadd.f32 1.0, %v11036_v34  ;;  %v8718_v61 = vadd.f32 %v17574_v46, %v8717_v23  ;;  %v9965_v0 = vpop.f32.mrb[134].mxu1 }
 0xce1   : > { %11041 = vrcp.f32 %v8812_v39  ;;  %v8813_v59 = vadd.f32 1.0, %v11038_v3  ;;  %v9801_v55 = vmul.f32 -1.442695, %v8726_v29  ;;  %v8729_v21 = vadd.f32 %v9965_v0, %v17574_v46  ;;  %v8720_v24 = vpop.f32.mrb[135].mxu1 }
 0xce2   : > { %11043 = vrcp.f32 %v8815_v4  ;;  %v9799_v53 = vmul.f32 -1.442695, %v8718_v61  ;;  %v8721_v33 = vadd.f32 %v17574_v46, %v8720_v24 }
 0xce3   : > { %11045 = vrcp.f32 %v8813_v59  ;;  %v9802_v40 = vmul.f32 -1.442695, %v8729_v21 }
 0xce4   : > { %11047 = vpow2.f32 %v9801_v55  ;;  %v9800_v11 = vmul.f32 -1.442695, %v8721_v33 }
 0xce5   : > { %11049 = vpow2.f32 %v9799_v53 }
 0xce6   : > { %11051 = vpow2.f32 %v9802_v40 }
 0xce7   : > { %11053 = vpow2.f32 %v9800_v11  ;;  %v10472_v11 = vpop.permute.xlu1 %10471 }
 0xcea   : > { %v11040_v28 = vpop.eup %11039 }
 0xceb   : > { %v11042_v30 = vpop.eup %11041  ;;  %v8961_v1 = vsel %vm8862_vm15, %v10453_v2, %v11040_v28  ;;  %v10474_v28 = vunpack.i.h.bf16 %v10472_v11  ;;  %v10469_v2 = vunpack.i.h.bf16 %v10467_v31 }
 0xcec   : > { %v11044_v44 = vpop.eup %11043  ;;  %v8959_v57 = vsel %vm8862_vm15, %v10447_v50, %v11042_v30  ;;  %v10473_v30 = vunpack.i.l.bf16 %v10472_v11 }
 0xced   : > { %v11046_v13 = vpop.eup %11045  ;;  %v8962_v45 = vsel %vm8862_vm15, %v10454_v7, %v11044_v44  ;;  %v10468_v44 = vunpack.i.l.bf16 %v10467_v31 }
 0xcee   : > { %v11048_v26 = vpop.eup %11047  ;;  %v9857_v5 = vpack.c.bf16 %v8962_v45, %v8961_v1  ;;  %v8960_v42 = vsel %vm8862_vm15, %v10448_v32, %v11046_v13 }
 0xcef   : > { %v11050_v54 = vpop.eup %11049  ;;  %v9852_v36 = vpack.c.bf16 %v8960_v42, %v8959_v57  ;;  %v8818_v38 = vadd.f32 1.0, %v11048_v26 }
 0xcf0   : > { %v11052_v37 = vpop.eup %11051  ;;  %9889 = vst [vmem:[%s17599_s15 + $0x8] sm:$0xff] %v9857_v5   ;;  %v8816_v16 = vadd.f32 1.0, %v11050_v54 }
 0xcf1   : > { %v11054_v19 = vpop.eup %11053  ;;  %9853 = vst [vmem:[%s17599_s15] sm:$0xff] %v9852_v36   ;;  %11055 = vrcp.f32 %v8818_v38  ;;  %v8819_v49 = vadd.f32 1.0, %v11052_v37 }
 0xcf2   : > { %11057 = vrcp.f32 %v8816_v16  ;;  %v8817_v22 = vadd.f32 1.0, %v11054_v19 }
 0xcf3   : > { %11059 = vrcp.f32 %v8819_v49 }
 0xcf4   : > { %11061 = vrcp.f32 %v8817_v22 }
 0xcfb   : > { %v11056_v17 = vpop.eup %11055 }
 0xcfc   : > { %v11058_v60 = vpop.eup %11057  ;;  %v8965_v47 = vsel %vm8862_vm15, %v10463_v9, %v11056_v17 }
 0xcfd   : > { %v11060_v6 = vpop.eup %11059  ;;  %v8963_v15 = vsel %vm8862_vm15, %v10458_v62, %v11058_v60 }
 0xcfe   : > { %v11062_v12 = vpop.eup %11061  ;;  %v8966_v52 = vsel %vm8862_vm15, %v10464_v8, %v11060_v6 }
 0xcff   : > { %v9867_v10 = vpack.c.bf16 %v8966_v52, %v8965_v47  ;;  %v8964_v35 = vsel %vm8862_vm15, %v10459_v43, %v11062_v12 }
 0xd00   : > { %v9862_v25 = vpack.c.bf16 %v8964_v35, %v8963_v15 }
 0xd01   : > { %9891 = vst [vmem:[%s17599_s15 + $0x18] sm:$0xff] %v9867_v10  }
 0xd02   : > { %9890 = vst [vmem:[%s17599_s15 + $0x10] sm:$0xff] %v9862_v25  }
 0xd06   : > { %v10477_v47 = vpop.permute.xlu0 %10476 }
 0xd0d   : > { %v9968_v27 = vpop.f32.mrb[136].mxu1 }
 0xd0e   : > { %v8742_v20 = vadd.f32 %v9968_v27, %v17574_v46  ;;  %v8733_v41 = vpop.f32.mrb[137].mxu1  ;;  %v10479_v27 = vunpack.i.h.bf16 %v10477_v47 }
 0xd0f   : > { %v8734_v51 = vadd.f32 %v17574_v46, %v8733_v41  ;;  %v9969_v48 = vpop.f32.mrb[138].mxu1 }
 0xd10   : > { %v9805_v34 = vmul.f32 -1.442695, %v8742_v20  ;;  %v8745_v39 = vadd.f32 %v9969_v48, %v17574_v46  ;;  %v8736_v29 = vpop.f32.mrb[139].mxu1  ;;  %v10478_v20 = vunpack.i.l.bf16 %v10477_v47 }
 0xd11   : > { %v9803_v23 = vmul.f32 -1.442695, %v8734_v51  ;;  %v8737_v3 = vadd.f32 %v17574_v46, %v8736_v29 }
 0xd12   : > { %11063 = vpow2.f32 %v9805_v34  ;;  %v9806_v4 = vmul.f32 -1.442695, %v8745_v39 }
 0xd13   : > { %11065 = vpow2.f32 %v9803_v23  ;;  %v9804_v61 = vmul.f32 -1.442695, %v8737_v3 }
 0xd14   : > { %11067 = vpow2.f32 %v9806_v4 }
 0xd15   : > { %11069 = vpow2.f32 %v9804_v61 }
 0xd1c   : > { %v11064_v0 = vpop.eup %11063 }
 0xd1d   : > { %v11066_v59 = vpop.eup %11065  ;;  %v8822_v55 = vadd.f32 1.0, %v11064_v0 }
 0xd1e   : > { %v11068_v21 = vpop.eup %11067  ;;  %v8820_v24 = vadd.f32 1.0, %v11066_v59 }
 0xd1f   : > { %v11070_v53 = vpop.eup %11069  ;;  %11071 = vrcp.f32 %v8822_v55  ;;  %v8823_v33 = vadd.f32 1.0, %v11068_v21 }
 0xd20   : > { %11073 = vrcp.f32 %v8820_v24  ;;  %v8821_v40 = vadd.f32 1.0, %v11070_v53 }
 0xd21   : > { %11075 = vrcp.f32 %v8823_v33 }
 0xd22   : > { %11077 = vrcp.f32 %v8821_v40 }
 0xd29   : > { %v11072_v18 = vpop.eup %11071 }
 0xd2a   : > { %v11074_v63 = vpop.eup %11073  ;;  %v8969_v50 = vsel %vm8862_vm15, %v10473_v30, %v11072_v18 }
 0xd2b   : > { %v11076_v7 = vpop.eup %11075  ;;  %v8967_v1 = vsel %vm8862_vm15, %v10468_v44, %v11074_v63 }
 0xd2c   : > { %v11078_v32 = vpop.eup %11077  ;;  %v8970_v13 = vsel %vm8862_vm15, %v10474_v28, %v11076_v7 }
 0xd2d   : > { %v9877_v45 = vpack.c.bf16 %v8970_v13, %v8969_v50  ;;  %v8968_v26 = vsel %vm8862_vm15, %v10469_v2, %v11078_v32 }
 0xd2e   : > { %v9872_v57 = vpack.c.bf16 %v8968_v26, %v8967_v1 }
 0xd2f   : > { %9893 = vst [vmem:[%s17599_s15 + $0x28] sm:$0xff] %v9877_v45  }
 0xd30   : > { %9892 = vst [vmem:[%s17599_s15 + $0x20] sm:$0xff] %v9872_v57  }
 0xd8e   : > { %v9972_v5 = vpop.f32.mrb[140].mxu1 }
 0xd8f   : > { %v8758_v42 = vadd.f32 %v9972_v5, %v17574_v46  ;;  %v8749_v54 = vpop.f32.mrb[141].mxu1 }
 0xd90   : > { %v8750_v36 = vadd.f32 %v17574_v46, %v8749_v54  ;;  %v9973_v38 = vpop.f32.mrb[142].mxu1 }
 0xd91   : > { %v9809_v37 = vmul.f32 -1.442695, %v8758_v42  ;;  %v8761_v16 = vadd.f32 %v9973_v38, %v17574_v46  ;;  %v8752_v19 = vpop.f32.mrb[143].mxu1 }
 0xd92   : > { %v9807_v49 = vmul.f32 -1.442695, %v8750_v36  ;;  %v8753_v22 = vadd.f32 %v17574_v46, %v8752_v19  ;;  %v10482_v46 = vpop.permute.xlu1 %10481 }
 0xd93   : > { %11079 = vpow2.f32 %v9809_v37  ;;  %v9810_v56 = vmul.f32 -1.442695, %v8761_v16  ;;  %v10484_v10 = vunpack.i.h.bf16 %v10482_v46  ;;  %v10483_v35 = vunpack.i.l.bf16 %v10482_v46 }
 0xd94   : > { %11081 = vpow2.f32 %v9807_v49  ;;  %v9808_v58 = vmul.f32 -1.442695, %v8753_v22 }
 0xd95   : > { %11083 = vpow2.f32 %v9810_v56 }
 0xd96   : > { %11085 = vpow2.f32 %v9808_v58 }
 0xd9d   : > { %v11080_v17 = vpop.eup %11079 }
 0xd9e   : > { %v11082_v60 = vpop.eup %11081  ;;  %v8826_v8 = vadd.f32 1.0, %v11080_v17 }
 0xd9f   : > { %v11084_v9 = vpop.eup %11083  ;;  %v8824_v6 = vadd.f32 1.0, %v11082_v60 }
 0xda0   : > { %v11086_v43 = vpop.eup %11085  ;;  %11087 = vrcp.f32 %v8826_v8  ;;  %v8827_v62 = vadd.f32 1.0, %v11084_v9 }
 0xda1   : > { %11089 = vrcp.f32 %v8824_v6  ;;  %v8825_v12 = vadd.f32 1.0, %v11086_v43 }
 0xda2   : > { %11091 = vrcp.f32 %v8827_v62 }
 0xda3   : > { %11093 = vrcp.f32 %v8825_v12 }
 0xdaa   : > { %v11088_v52 = vpop.eup %11087 }
 0xdab   : > { %v11090_v15 = vpop.eup %11089  ;;  %v8973_v51 = vsel %vm8862_vm15, %v10483_v35, %v11088_v52 }
 0xdac   : > { %v11092_v25 = vpop.eup %11091  ;;  %v8971_v34 = vsel %vm8862_vm15, %v10478_v20, %v11090_v15 }
 0xdad   : > { %v11094_v41 = vpop.eup %11093  ;;  %v8974_v48 = vsel %vm8862_vm15, %v10484_v10, %v11092_v25 }
 0xdae   : > { %v9887_v39 = vpack.c.bf16 %v8974_v48, %v8973_v51  ;;  %v8972_v29 = vsel %vm8862_vm15, %v10479_v27, %v11094_v41 }
 0xdaf   : > { %v9882_v23 = vpack.c.bf16 %v8972_v29, %v8971_v34 }
 0xdb0   : > { %9895 = vst [vmem:[%s17599_s15 + $0x38] sm:$0xff] %v9887_v39  }
 0xdb1   : > { %9894 = vst [vmem:[%s17599_s15 + $0x30] sm:$0xff] %v9882_v23  }
 0xdb2   : > { %11604 = shalt.err (!%p11601_p11)
}
 0xdb3   : > { %s11605_s7 = scalar_lea.hbm %s17644_s3, 1024  ;;  %s11609_s2 = scalar_lea.hbm %s18290_s6, 2048 }
 0xdb4   : > { %p11606_p13 = scmp.ne.s32.totalorder %s17644_s3, %s11605_s7  ;;  %p11610_p6 = scmp.lt.u32.totalorder %s17644_s3, %s18290_s6 }
 0xdb5   : > { %p11611_p5 = scmp.lt.u32.totalorder %s11609_s2, %s11605_s7  ;;  %p11613_p12 = scmp.lt.u32.totalorder %s11605_s7, %s17644_s3 }
 0xdb6   : > { %p11607_p0 = pnand %p11606_p13, %p18291_p10 }
 0xdb7   : > { %p11612_p9 = por %p11611_p5, %p11610_p6 }
 0xdb8   : > { %p11608_p1 = pneg %p11607_p0 }
 0xdb9   : > { %p11614_p2 = por %p11613_p12, %p11612_p9 }
 0xdbb   : > { %p11615_p3 = pnand %p11614_p2, %p11608_p1 }
 0xdbd   : > { %11618 = shalt.err (!%p11615_p3)
}
 0xdbe   : > { %s11722_s9 = smov 64   ;;  %s11723_s27 = smov 4  }
 0xdbf   : > { %10235 = dma.vmem_to_hbm [thread:$0]  (%p18291_p10), %s17646_s29, 1024, %s17644_s3, %s17652_s28, %s11722_s9, %s11722_s9, %s11723_s27  }
 0xdc0 PF: > { %s18292_s4 = sld [smem:[#allocation43_spill]]  ;;  %s18293_s11 = sld [smem:[#allocation40_spill]] }
 0xdc1   : > { %s18294_s10 = sld [smem:[#allocation47_spill]] }
 0xdc6   : > { %p10327_p4 = scmp.ge.s32.totalorder %s18292_s4, 2  ;;  %s9084_s5 = sand.u32 1, %s18293_s11  }
 0xdc7   : > { %p18295_p7 = scmp.ne.s32.totalorder %s18294_s10, 0  ;;  %s9085_s7 = scalar_lea.sflag [#allocation4], %s9084_s5 }
 0xdc9   : > { %p10290_p8 = pnand %p10327_p4, %p18295_p7 }
 0xdcb   : > { %11672 = dma.done.wait (!%p10290_p8), %s9085_s7, 1024  }
 0xdcc   : > { %11674 = vsyncadd (!%p10290_p8), %s9085_s7, 4294966272  ;;  %s18296_s30 = sld [smem:[#allocation44_spill]]  ;;  %s18297_s7 = sld [smem:[#allocation41_spill]] }
 0xdcd   : > { %s18298_s4 = sld [smem:[#allocation42_spill]]  ;;  %s18299_s26 = sld [smem:[#allocation45_spill]] }
 0xdd2   : > { %p46_p11 = scmp.ge.s32.totalorder %s18296_s30, 4  }
 0xdd3   : > { %18300 = sst [smem:[#allocation40_spill]] %s18299_s26 }
 0xdd4   :  { %48 = sbr.rel (!%p46_p11) target bundleno = 33 (0x21), region = 235 }
 0xddb   :  { %9090 = vsyncpa [#allocation3], 1 }
 0xddc   :  { %9092 = vsyncpa [#allocation3 + $0x1], 1 }
 0xddd   :  { %9093 = vsyncpa [#allocation6], 1 }
 0xdde   :  { %9094 = vsyncpa [#allocation9], 1 }
 0xddf   :  { %9095 = vsyncpa [#allocation12], 1 }
 0xde0   :  { %9096 = vsyncpa [#allocation15], 1 }
 0xde1   :  { %9097 = vsyncpa [#allocation18], 1 }
 0xde2   :  { %9098 = vsyncpa [#allocation21], 1 }
 0xde3   :  { %9099 = vsyncpa [#allocation24], 1 }
 0xde4   :  { %9100 = vsyncpa [#allocation27], 1 }
 0xde5   :  { %9101 = vsyncpa [#allocation4], 1 }
 0xde6   :  { %9103 = vsyncpa [#allocation4 + $0x1], 1 }

</bundles_post_ra>
